<compile_context>
chip_gen: v5e
topology: v5e:2x2
jax: 0.10.0
libtpu: 0.0.40
codegen_flags: <defaults>
</compile_context>

<pallas_src>
import functools
import math

import jax
import jax.numpy as jnp
from jax import lax
from jax.experimental import pallas as pl
from jax.experimental.pallas import tpu as pltpu


def _pick_vmem_limit():
    # Derive the scoped-VMEM limit from the chip (v5e/v6e: 64 MiB, v7x: 32 MiB)
    try:
        cap = int(pltpu.get_tpu_info().vmem_capacity_bytes)
        if cap > 0:
            return int(max(32 * 1024 * 1024, min(cap // 2, 64 * 1024 * 1024)))
    except Exception:
        pass
    return 32 * 1024 * 1024


_VMEM_LIMIT = _pick_vmem_limit()


def _cparams(*sems):
    return pltpu.CompilerParams(dimension_semantics=sems,
                                vmem_limit_bytes=_VMEM_LIMIT)


# --------------------------------------------------------------------------
# Fused conv 3x3 + BatchNorm(eval) + ReLU + MaxPool, one sample per grid step
# --------------------------------------------------------------------------
def _conv_bn_relu_pool_kernel(x_ref, w_ref, scale_ref, shift_ref, o_ref,
                              patch_scr, *, T, M, Cin, Cout, pt, pf):
    # Build the im2col operand (T*M, 9*Cin) in VMEM -> single MXU contraction
    for k in range(9):
        dy, dx = divmod(k, 3)
        patch_scr[:, k * Cin:(k + 1) * Cin] = (
            x_ref[0, dy:dy + T, dx:dx + M, :].reshape(T * M, Cin))
    acc = jnp.dot(patch_scr[...], w_ref[...], preferred_element_type=jnp.float32)

    # conv bias + BatchNorm (eval) folded into scale/shift, then ReLU
    y = jnp.maximum(acc * scale_ref[...] + shift_ref[...], 0.0)

    # fused (pt, pf) max-pool entirely in VMEM
    To, Mo = T // pt, M // pf
    y = y.reshape(T * Mo, pf, Cout)
    yp = y[:, 0, :]
    for j in range(1, pf):
        yp = jnp.maximum(yp, y[:, j, :])
    yp = yp.reshape(To, pt, Mo, Cout)
    out = yp[:, 0]
    for i in range(1, pt):
        out = jnp.maximum(out, yp[:, i])            # (To, Mo, Cout) f32
    out = out.astype(o_ref.dtype)

    # lane-dense (To, Mo*Cout) write-back (per-bin static-slice stores avoid a
    # minor-dim value reshape; the HBM block itself is a full-lane slab)
    for m in range(Mo):
        o_ref[0, :, m * Cout:(m + 1) * Cout] = out[:, m, :]


def pallas_conv_block(x, blk):
    """x: (B, T, M, Cin) channels-last bf16.  Returns (B, T//pt, M//pf, Cout) bf16."""
    B, T, M, Cin = x.shape
    Cout = blk['w9'].shape[1]
    pt, pf = blk['pt'], blk['pf']
    assert T % pt == 0 and M % pf == 0, "pool size must divide the feature map"
    To, Mo = T // pt, M // pf
    xp = jnp.pad(x, ((0, 0), (1, 1), (1, 1), (0, 0)))
    kernel = functools.partial(_conv_bn_relu_pool_kernel,
                               T=T, M=M, Cin=Cin, Cout=Cout, pt=pt, pf=pf)
    out = pl.pallas_call(
        kernel,
        out_shape=jax.ShapeDtypeStruct((B, To, Mo * Cout), jnp.bfloat16),
        grid=(B,),
        in_specs=[
            pl.BlockSpec((1, T + 2, M + 2, Cin), lambda b: (b, 0, 0, 0)),
            pl.BlockSpec((9 * Cin, Cout), lambda b: (0, 0)),
            pl.BlockSpec((1, Cout), lambda b: (0, 0)),
            pl.BlockSpec((1, Cout), lambda b: (0, 0)),
        ],
        out_specs=pl.BlockSpec((1, To, Mo * Cout), lambda b: (b, 0, 0)),
        scratch_shapes=[pltpu.VMEM((T * M, 9 * Cin), jnp.bfloat16)],
        compiler_params=_cparams("parallel"),
    )(xp, blk['w9'], blk['scale'], blk['shift'])
    # TODO(synk): for production-length T, add a T-tile grid axis with a 1-row
    # halo so the working set stays under v7x's 64 MiB VMEM.
    return out.reshape(B, To, Mo, Cout)     # free metadata reshape
    # Dropout2d: identity at inference


# --------------------------------------------------------------------------
# Row-tiled linear (+ optional activation), bf16 operands, f32 accumulate
# --------------------------------------------------------------------------
def _linear_kernel(x_ref, w_ref, b_ref, o_ref, *, act):
    y = jnp.dot(x_ref[...].astype(jnp.bfloat16), w_ref[...],
                preferred_element_type=jnp.float32) + b_ref[...]
    if act == 'relu':
        y = jnp.maximum(y, 0.0)
    elif act == 'tanh':
        y = jnp.tanh(y)
    o_ref[...] = y.astype(o_ref.dtype)


def pallas_linear(x2d, w_t, b2, act=None, block_rows=512):
    """x2d: (N, Din). w_t: (Din, Dout) bf16 (pre-transposed). b2: (1, Dout) f32."""
    N, Din = x2d.shape
    Dout = w_t.shape[1]
    bm = N if N <= block_rows else block_rows
    return pl.pallas_call(
        functools.partial(_linear_kernel, act=act),
        out_shape=jax.ShapeDtypeStruct((N, Dout), jnp.float32),
        grid=(pl.cdiv(N, bm),),
        in_specs=[pl.BlockSpec((bm, Din), lambda i: (i, 0)),
                  pl.BlockSpec((Din, Dout), lambda i: (0, 0)),
                  pl.BlockSpec((1, Dout), lambda i: (0, 0))],
        out_specs=pl.BlockSpec((bm, Dout), lambda i: (i, 0)),
        compiler_params=_cparams("parallel"),
    )(x2d, w_t, b2)


# --------------------------------------------------------------------------
# GRU input projection for BOTH directions: grid = (direction, row block).
# Accepts 1 input part (conv features) or 2 parts (fwd / bwd of prev layer).
# --------------------------------------------------------------------------
def _dual_proj_kernel(*refs, n_parts):
    xs = refs[:n_parts]
    ws = refs[n_parts:2 * n_parts]
    b_ref = refs[2 * n_parts]
    o_ref = refs[2 * n_parts + 1]
    y = jnp.dot(xs[0][...].astype(jnp.bfloat16), ws[0][0],
                preferred_element_type=jnp.float32)
    for i in range(1, n_parts):
        y = y + jnp.dot(xs[i][...].astype(jnp.bfloat16), ws[i][0],
                        preferred_element_type=jnp.float32)
    o_ref[0] = (y + b_ref[0]).astype(o_ref.dtype)


def pallas_gi_proj(x_parts, w_stacks, b_stack, *, H, block_rows=512):
    """x_parts: list of (N, Din_i).  w_stacks: list of (2, Din_i, 3H) bf16.
    b_stack: (2, 1, 3H) f32.  Returns (2, N, 3H) bf16."""
    N = x_parts[0].shape[0]
    bm = N if N <= block_rows else block_rows
    in_specs = []
    for xpart in x_parts:
        din = xpart.shape[1]
        in_specs.append(pl.BlockSpec((bm, din), lambda d, r: (r, 0)))
    for ws in w_stacks:
        din = ws.shape[1]
        in_specs.append(pl.BlockSpec((1, din, 3 * H), lambda d, r: (d, 0, 0)))
    in_specs.append(pl.BlockSpec((1, 1, 3 * H), lambda d, r: (d, 0, 0)))
    return pl.pallas_call(
        functools.partial(_dual_proj_kernel, n_parts=len(x_parts)),
        out_shape=jax.ShapeDtypeStruct((2, N, 3 * H), jnp.bfloat16),
        grid=(2, pl.cdiv(N, bm)),
        in_specs=in_specs,
        out_specs=pl.BlockSpec((1, bm, 3 * H), lambda d, r: (d, r, 0)),
        compiler_params=_cparams("parallel", "parallel"),
    )(*x_parts, *w_stacks, b_stack)


# --------------------------------------------------------------------------
# Bidirectional GRU recurrence: grid = (direction,), whole time loop in-kernel
# --------------------------------------------------------------------------
def _bigru_rec_kernel(gi_ref, whh_ref, bhh_ref, o_ref, *, T, H, B):
    d = pl.program_id(0)             # 0 = forward, 1 = backward
    whh = whh_ref[0]                 # (H, 3H) bf16, resident
    bhh = bhh_ref[0]                 # (1, 3H) f32

    def step(t, h):
        tt = t + d * (T - 1 - 2 * t)                 # fwd: t ; bwd: T-1-t
        gi = gi_ref[0, tt].astype(jnp.float32)       # (B, 3H) precomputed x@W_ih+b
        gh = jnp.dot(h.astype(jnp.bfloat16), whh,
                     preferred_element_type=jnp.float32) + bhh
        r = jax.nn.sigmoid(gi[:, :H] + gh[:, :H])
        z = jax.nn.sigmoid(gi[:, H:2 * H] + gh[:, H:2 * H])
        n = jnp.tanh(gi[:, 2 * H:] + r * gh[:, 2 * H:])
        h_new = (1.0 - z) * n + z * h
        o_ref[0, tt] = h_new.astype(o_ref.dtype)     # resident slab, flushed once
        return h_new

    lax.fori_loop(0, T, step, jnp.zeros((B, H), jnp.float32))


def pallas_bigru_rec(gi4, w_hh_stack, b_hh_stack, *, B, T, H):
    """gi4: (2, T, B, 3H) bf16.  Returns (2, T, B, H) bf16 (fwd / bwd slabs)."""
    return pl.pallas_call(
        functools.partial(_bigru_rec_kernel, T=T, H=H, B=B),
        out_shape=jax.ShapeDtypeStruct((2, T, B, H), jnp.bfloat16),
        grid=(2,),
        in_specs=[pl.BlockSpec((1, T, B, 3 * H), lambda d: (d, 0, 0, 0)),
                  pl.BlockSpec((1, H, 3 * H), lambda d: (d, 0, 0)),
                  pl.BlockSpec((1, 1, 3 * H), lambda d: (d, 0, 0))],
        out_specs=pl.BlockSpec((1, T, B, H), lambda d: (d, 0, 0, 0)),
        compiler_params=_cparams("parallel"),
    )(gi4, w_hh_stack, b_hh_stack)


# --------------------------------------------------------------------------
# Fused tanh-GLU + first linear of each output head (doa / activity)
# --------------------------------------------------------------------------
def _glu_heads_kernel(*refs, n_heads, acts):
    f_ref, b_ref = refs[0], refs[1]
    wb = refs[2:2 + 2 * n_heads]
    outs = refs[2 + 2 * n_heads:]
    g = (jnp.tanh(b_ref[...].astype(jnp.float32)) *
         jnp.tanh(f_ref[...].astype(jnp.float32))).astype(jnp.bfloat16)
    for i in range(n_heads):
        y = jnp.dot(g, wb[2 * i][...],
                    preferred_element_type=jnp.float32) + wb[2 * i + 1][...]
        if acts[i] == 'relu':
            y = jnp.maximum(y, 0.0)
        elif acts[i] == 'tanh':
            y = jnp.tanh(y)
        outs[i][...] = y.astype(outs[i].dtype)


def pallas_glu_heads(fwd2d, bwd2d, heads, *, H, block_rows=512):
    """fwd2d / bwd2d: (N, H) GRU direction outputs.  heads: list of (w_t, b2, act)."""
    N = fwd2d.shape[0]
    bm = N if N <= block_rows else block_rows
    in_specs = [pl.BlockSpec((bm, H), lambda i: (i, 0)),
                pl.BlockSpec((bm, H), lambda i: (i, 0))]
    args = [fwd2d, bwd2d]
    out_shape, out_specs = [], []
    for (w, b, _a) in heads:
        dout = w.shape[1]
        in_specs.append(pl.BlockSpec((H, dout), lambda i: (0, 0)))
        in_specs.append(pl.BlockSpec((1, dout), lambda i: (0, 0)))
        args.extend([w, b])
        out_shape.append(jax.ShapeDtypeStruct((N, dout), jnp.float32))
        out_specs.append(pl.BlockSpec((bm, dout), lambda i: (i, 0)))
    res = pl.pallas_call(
        functools.partial(_glu_heads_kernel, n_heads=len(heads),
                          acts=tuple(a for *_, a in heads)),
        out_shape=tuple(out_shape),
        grid=(pl.cdiv(N, bm),),
        in_specs=in_specs,
        out_specs=tuple(out_specs),
        compiler_params=_cparams("parallel"),
    )(*args)
    if not isinstance(res, (tuple, list)):
        res = (res,)
    return tuple(res)


# --------------------------------------------------------------------------
# Parameter init (deterministic, synthetic) directly in kernel-friendly layout
# --------------------------------------------------------------------------
def _normal(key, shape, scale=0.1):
    return scale * jax.random.normal(key, shape, dtype=jnp.float32)


def init_doanet_params(key, in_feat_shape, out_dim, hp):
    keys = iter(jax.random.split(key, 256))
    p = {}
    nf = hp['nb_cnn2d_filt']
    cin = in_feat_shape[1]
    conv_blocks = []
    for i in range(len(hp['f_pool_size'])):
        w = _normal(next(keys), (nf, cin, 3, 3))        # PyTorch (Cout, Cin, kh, kw)
        b = _normal(next(keys), (nf,))
        gamma = 1.0 + _normal(next(keys), (nf,))
        beta = _normal(next(keys), (nf,))
        run_mean = jnp.zeros((nf,), jnp.float32)
        run_var = jnp.ones((nf,), jnp.float32)
        eps = 1e-5
        scale = gamma / jnp.sqrt(run_var + eps)
        shift = scale * (b - run_mean) + beta           # conv bias + BN(eval) folded
        conv_blocks.append(dict(
            w9=jnp.transpose(w, (2, 3, 1, 0)).reshape(9 * cin, nf).astype(jnp.bfloat16),
            scale=scale.reshape(1, nf),
            shift=shift.reshape(1, nf),
            pt=hp['t_pool_size'][i], pf=hp['f_pool_size'][i]))
        cin = nf
    p['conv_blocks'] = conv_blocks

    H = hp['rnn_size']
    mo_final = int(in_feat_shape[-1] // math.prod(hp['f_pool_size']))
    in_gru = int(nf * (in_feat_shape[-1] / math.prod(hp['f_pool_size'])))
    gru_layers = []
    inp = in_gru
    for layer in range(hp['nb_rnn_layers']):
        w_ih_f = _normal(next(keys), (3 * H, inp)); w_hh_f = _normal(next(keys), (3 * H, H))
        b_ih_f = _normal(next(keys), (3 * H,));     b_hh_f = _normal(next(keys), (3 * H,))
        w_ih_b = _normal(next(keys), (3 * H, inp)); w_hh_b = _normal(next(keys), (3 * H, H))
        b_ih_b = _normal(next(keys), (3 * H,));     b_hh_b = _normal(next(keys), (3 * H,))
        if layer == 0:
            # Fold the PyTorch channel-major feature flatten (c*Mo + m) into W_ih so
            # the conv kernel's spatial-major output (m*C + c) feeds the GRU directly.
            def spatial_major(wm):
                return wm.reshape(3 * H, nf, mo_final).transpose(0, 2, 1).reshape(3 * H, inp)
            w_ih_stacks = [jnp.stack([spatial_major(w_ih_f).T,
                                      spatial_major(w_ih_b).T], 0).astype(jnp.bfloat16)]
        else:
            # split-input projection: previous layer is kept as separate fwd/bwd slabs
            w_ih_stacks = [
                jnp.stack([w_ih_f[:, :H].T, w_ih_b[:, :H].T], 0).astype(jnp.bfloat16),
                jnp.stack([w_ih_f[:, H:].T, w_ih_b[:, H:].T], 0).astype(jnp.bfloat16)]
        gru_layers.append(dict(
            w_ih_stacks=w_ih_stacks,
            b_ih_stack=jnp.stack([b_ih_f, b_ih_b], 0).reshape(2, 1, 3 * H),
            w_hh_stack=jnp.stack([w_hh_f.T, w_hh_b.T], 0).astype(jnp.bfloat16),
            b_hh_stack=jnp.stack([b_hh_f, b_hh_b], 0).reshape(2, 1, 3 * H)))
        inp = 2 * H
    p['gru_layers'] = gru_layers

    def make_linear(din, dout):
        w = _normal(next(keys), (dout, din))
        b = _normal(next(keys), (dout,))
        return (w.T.astype(jnp.bfloat16), b.reshape(1, dout))

    fnn, din = [], H
    for _ in range(hp['nb_fnn_layers']):
        fnn.append(make_linear(din, hp['fnn_doa_size'])); din = hp['fnn_doa_size']
    fnn.append(make_linear(din, out_dim))
    p['fnn'] = fnn

    n_src = out_dim // 3
    if hp['use_activity_output']:
        fnn_act, din = [], H
        for _ in range(hp['nb_fnn_act_layers']):
            fnn_act.append(make_linear(din, hp['fnn_act_size'])); din = hp['fnn_act_size']
        fnn_act.append(make_linear(din, n_src))
        p['fnn_act'] = fnn_act
    p['H'] = H
    p['n_src'] = n_src
    return p


# --------------------------------------------------------------------------
# Full forward
# --------------------------------------------------------------------------
def doanet_forward(inputs, p):
    x = inputs['signal'][..., 0]                          # (B, Cin, T, M) NCHW
    x = jnp.transpose(x, (0, 2, 3, 1)).astype(jnp.bfloat16)   # channels-last bf16
    for blk in p['conv_blocks']:
        x = pallas_conv_block(x, blk)                     # fused conv+BN+ReLU+pool
    B, Tp, Mp, C = x.shape
    F = Mp * C
    # single remaining XLA layout pass: batch-major -> time-major for the GRU
    xt = jnp.transpose(x.reshape(B, Tp, F), (1, 0, 2))    # (T', B, F) bf16

    H = p['H']
    parts = [xt.reshape(Tp * B, F)]
    for lp in p['gru_layers']:
        gi = pallas_gi_proj(parts, lp['w_ih_stacks'], lp['b_ih_stack'], H=H)
        gi4 = gi.reshape(2, Tp, B, 3 * H)                 # free reshape (time-major rows)
        out = pallas_bigru_rec(gi4, lp['w_hh_stack'], lp['b_hh_stack'], B=B, T=Tp, H=H)
        parts = [out[0].reshape(Tp * B, H), out[1].reshape(Tp * B, H)]
        # inter-layer GRU dropout: identity at inference

    fwd2d, bwd2d = parts
    fnn = p['fnn']
    fnn_act = p.get('fnn_act')
    heads = [(fnn[0][0], fnn[0][1], 'relu' if len(fnn) > 1 else 'tanh')]
    if fnn_act is not None:
        heads.append((fnn_act[0][0], fnn_act[0][1],
                      'relu' if len(fnn_act) > 1 else None))
    houts = pallas_glu_heads(fwd2d, bwd2d, heads, H=H)    # GLU fused with first linears

    h = houts[0]
    for i in range(1, len(fnn)):
        w, b = fnn[i]
        h = pallas_linear(h, w, b, act='relu' if i < len(fnn) - 1 else 'tanh')
    n_src = p['n_src']
    doa = jnp.transpose(h.reshape(Tp, B, 3, n_src), (1, 0, 3, 2))   # (B, T', n_src, 3)
    out_d = {'doa_cart': doa}

    if fnn_act is not None:
        h = houts[1]
        for i in range(1, len(fnn_act)):
            w, b = fnn_act[i]
            h = pallas_linear(h, w, b, act='relu' if i < len(fnn_act) - 1 else None)
        out_d['activity'] = jnp.transpose(h.reshape(Tp, B, n_src), (1, 0, 2))
    return out_d


if __name__ == "__main__":
    hp = {
        'use_activity_output': True,
        'nb_cnn2d_filt': 8,
        'f_pool_size': [2, 2],
        't_pool_size': [2, 2],
        'dropout_rate': 0.0,        # eval mode: dropout layers are identity
        'rnn_size': 16,
        'nb_rnn_layers': 1,
        'nb_fnn_layers': 1,
        'fnn_doa_size': 16,
        'nb_fnn_act_layers': 1,
        'fnn_act_size': 16,
    }
    B, Cin, T, M = 2, 4, 16, 16
    in_feat_shape = (B, Cin, T, M)
    out_label_dim = 6                               # 2 sources * xyz

    key = jax.random.PRNGKey(0)
    k_sig, k_par = jax.random.split(key)
    signal = jax.random.normal(k_sig, (B, Cin, T, M, 1), dtype=jnp.float32)
    params = init_doanet_params(k_par, in_feat_shape, out_label_dim, hp)

    fwd = jax.jit(lambda sig: doanet_forward({'signal': sig}, params))
    out = fwd(signal)
    jax.block_until_ready(out['doa_cart'])
    jax.block_until_ready(out['activity'])

    assert out['doa_cart'].shape == (B, T // 4, 2, 3)
    assert out['activity'].shape == (B, T // 4, 2)
    assert bool(jnp.all(jnp.isfinite(out['doa_cart'])))
    assert bool(jnp.all(jnp.isfinite(out['activity'])))
    print("KERNEL_OK")
</pallas_src>

<mosaic_0001>
module attributes {stable_mosaic.version = 11 : i64} {
  func.func @_conv_bn_relu_pool_kernel(%arg0: i32, %arg1: memref<1x18x18x4xbf16, #tpu.memory_space<vmem>>, %arg2: memref<36x8xbf16, #tpu.memory_space<vmem>>, %arg3: memref<1x8xf32, #tpu.memory_space<vmem>>, %arg4: memref<1x8xf32, #tpu.memory_space<vmem>>, %arg5: memref<1x8x64xbf16, #tpu.memory_space<vmem>>, %arg6: memref<256x36xbf16, #tpu.memory_space<vmem>>) attributes {dimension_semantics = [#tpu.dimension_semantics<parallel>], iteration_bounds = array<i64: 2>, scalar_prefetch = 0 : i64, scratch_operands = 1 : i64, tpu.core_type = #tpu.core_type<tc>, window_params = [{transform_indices = @transform_0, window_bounds = array<i64: 1, 18, 18, 4>}, {pipeline_mode = #tpu.pipeline_mode<synchronous>, transform_indices = @transform_1, window_bounds = array<i64: 36, 8>}, {pipeline_mode = #tpu.pipeline_mode<synchronous>, transform_indices = @transform_2, window_bounds = array<i64: 1, 8>}, {pipeline_mode = #tpu.pipeline_mode<synchronous>, transform_indices = @transform_3, window_bounds = array<i64: 1, 8>}, {transform_indices = @transform_4, window_bounds = array<i64: 1, 8, 64>}]} {
    %c0 = arith.constant 0 : index
    %c0_0 = arith.constant 0 : index
    %c0_1 = arith.constant 0 : index
    %c0_2 = arith.constant 0 : index
    %0 = vector.load %arg1[%c0, %c0_0, %c0_1, %c0_2] : memref<1x18x18x4xbf16, #tpu.memory_space<vmem>>, vector<1x16x16x4xbf16>
    %1 = vector.shape_cast %0 : vector<1x16x16x4xbf16> to vector<16x16x4xbf16>
    %2 = vector.shape_cast %1 : vector<16x16x4xbf16> to vector<256x4xbf16>
    %c0_3 = arith.constant 0 : index
    %c0_4 = arith.constant 0 : index
    %3 = vector.load %arg6[%c0_3, %c0_4] : memref<256x36xbf16, #tpu.memory_space<vmem>>, vector<256x4xbf16>
    tpu.vector_store %arg6[%c0_3, %c0_4], %2 {strides = array<i32>} : memref<256x36xbf16, #tpu.memory_space<vmem>>, vector<256x4xbf16>,
    %c0_5 = arith.constant 0 : index
    %c0_6 = arith.constant 0 : index
    %c1 = arith.constant 1 : index
    %c0_7 = arith.constant 0 : index
    %4 = vector.load %arg1[%c0_5, %c0_6, %c1, %c0_7] : memref<1x18x18x4xbf16, #tpu.memory_space<vmem>>, vector<1x16x16x4xbf16>
    %5 = vector.shape_cast %4 : vector<1x16x16x4xbf16> to vector<16x16x4xbf16>
    %6 = vector.shape_cast %5 : vector<16x16x4xbf16> to vector<256x4xbf16>
    %c0_8 = arith.constant 0 : index
    %c4 = arith.constant 4 : index
    %7 = vector.load %arg6[%c0_8, %c4] : memref<256x36xbf16, #tpu.memory_space<vmem>>, vector<256x4xbf16>
    tpu.vector_store %arg6[%c0_8, %c4], %6 {strides = array<i32>} : memref<256x36xbf16, #tpu.memory_space<vmem>>, vector<256x4xbf16>,
    %c0_9 = arith.constant 0 : index
    %c0_10 = arith.constant 0 : index
    %c2 = arith.constant 2 : index
    %c0_11 = arith.constant 0 : index
    %8 = vector.load %arg1[%c0_9, %c0_10, %c2, %c0_11] : memref<1x18x18x4xbf16, #tpu.memory_space<vmem>>, vector<1x16x16x4xbf16>
    %9 = vector.shape_cast %8 : vector<1x16x16x4xbf16> to vector<16x16x4xbf16>
    %10 = vector.shape_cast %9 : vector<16x16x4xbf16> to vector<256x4xbf16>
    %c0_12 = arith.constant 0 : index
    %c8 = arith.constant 8 : index
    %11 = vector.load %arg6[%c0_12, %c8] : memref<256x36xbf16, #tpu.memory_space<vmem>>, vector<256x4xbf16>
    tpu.vector_store %arg6[%c0_12, %c8], %10 {strides = array<i32>} : memref<256x36xbf16, #tpu.memory_space<vmem>>, vector<256x4xbf16>,
    %c0_13 = arith.constant 0 : index
    %c1_14 = arith.constant 1 : index
    %c0_15 = arith.constant 0 : index
    %c0_16 = arith.constant 0 : index
    %12 = vector.load %arg1[%c0_13, %c1_14, %c0_15, %c0_16] : memref<1x18x18x4xbf16, #tpu.memory_space<vmem>>, vector<1x16x16x4xbf16>
    %13 = vector.shape_cast %12 : vector<1x16x16x4xbf16> to vector<16x16x4xbf16>
    %14 = vector.shape_cast %13 : vector<16x16x4xbf16> to vector<256x4xbf16>
    %c0_17 = arith.constant 0 : index
    %c12 = arith.constant 12 : index
    %15 = vector.load %arg6[%c0_17, %c12] : memref<256x36xbf16, #tpu.memory_space<vmem>>, vector<256x4xbf16>
    tpu.vector_store %arg6[%c0_17, %c12], %14 {strides = array<i32>} : memref<256x36xbf16, #tpu.memory_space<vmem>>, vector<256x4xbf16>,
    %c0_18 = arith.constant 0 : index
    %c1_19 = arith.constant 1 : index
    %c1_20 = arith.constant 1 : index
    %c0_21 = arith.constant 0 : index
    %16 = vector.load %arg1[%c0_18, %c1_19, %c1_20, %c0_21] : memref<1x18x18x4xbf16, #tpu.memory_space<vmem>>, vector<1x16x16x4xbf16>
    %17 = vector.shape_cast %16 : vector<1x16x16x4xbf16> to vector<16x16x4xbf16>
    %18 = vector.shape_cast %17 : vector<16x16x4xbf16> to vector<256x4xbf16>
    %c0_22 = arith.constant 0 : index
    %c16 = arith.constant 16 : index
    %19 = vector.load %arg6[%c0_22, %c16] : memref<256x36xbf16, #tpu.memory_space<vmem>>, vector<256x4xbf16>
    tpu.vector_store %arg6[%c0_22, %c16], %18 {strides = array<i32>} : memref<256x36xbf16, #tpu.memory_space<vmem>>, vector<256x4xbf16>,
    %c0_23 = arith.constant 0 : index
    %c1_24 = arith.constant 1 : index
    %c2_25 = arith.constant 2 : index
    %c0_26 = arith.constant 0 : index
    %20 = vector.load %arg1[%c0_23, %c1_24, %c2_25, %c0_26] : memref<1x18x18x4xbf16, #tpu.memory_space<vmem>>, vector<1x16x16x4xbf16>
    %21 = vector.shape_cast %20 : vector<1x16x16x4xbf16> to vector<16x16x4xbf16>
    %22 = vector.shape_cast %21 : vector<16x16x4xbf16> to vector<256x4xbf16>
    %c0_27 = arith.constant 0 : index
    %c20 = arith.constant 20 : index
    %23 = vector.load %arg6[%c0_27, %c20] : memref<256x36xbf16, #tpu.memory_space<vmem>>, vector<256x4xbf16>
    tpu.vector_store %arg6[%c0_27, %c20], %22 {strides = array<i32>} : memref<256x36xbf16, #tpu.memory_space<vmem>>, vector<256x4xbf16>,
    %c0_28 = arith.constant 0 : index
    %c2_29 = arith.constant 2 : index
    %c0_30 = arith.constant 0 : index
    %c0_31 = arith.constant 0 : index
    %24 = vector.load %arg1[%c0_28, %c2_29, %c0_30, %c0_31] : memref<1x18x18x4xbf16, #tpu.memory_space<vmem>>, vector<1x16x16x4xbf16>
    %25 = vector.shape_cast %24 : vector<1x16x16x4xbf16> to vector<16x16x4xbf16>
    %26 = vector.shape_cast %25 : vector<16x16x4xbf16> to vector<256x4xbf16>
    %c0_32 = arith.constant 0 : index
    %c24 = arith.constant 24 : index
    %27 = vector.load %arg6[%c0_32, %c24] : memref<256x36xbf16, #tpu.memory_space<vmem>>, vector<256x4xbf16>
    tpu.vector_store %arg6[%c0_32, %c24], %26 {strides = array<i32>} : memref<256x36xbf16, #tpu.memory_space<vmem>>, vector<256x4xbf16>,
    %c0_33 = arith.constant 0 : index
    %c2_34 = arith.constant 2 : index
    %c1_35 = arith.constant 1 : index
    %c0_36 = arith.constant 0 : index
    %28 = vector.load %arg1[%c0_33, %c2_34, %c1_35, %c0_36] : memref<1x18x18x4xbf16, #tpu.memory_space<vmem>>, vector<1x16x16x4xbf16>
    %29 = vector.shape_cast %28 : vector<1x16x16x4xbf16> to vector<16x16x4xbf16>
    %30 = vector.shape_cast %29 : vector<16x16x4xbf16> to vector<256x4xbf16>
    %c0_37 = arith.constant 0 : index
    %c28 = arith.constant 28 : index
    %31 = vector.load %arg6[%c0_37, %c28] : memref<256x36xbf16, #tpu.memory_space<vmem>>, vector<256x4xbf16>
    tpu.vector_store %arg6[%c0_37, %c28], %30 {strides = array<i32>} : memref<256x36xbf16, #tpu.memory_space<vmem>>, vector<256x4xbf16>,
    %c0_38 = arith.constant 0 : index
    %c2_39 = arith.constant 2 : index
    %c2_40 = arith.constant 2 : index
    %c0_41 = arith.constant 0 : index
    %32 = vector.load %arg1[%c0_38, %c2_39, %c2_40, %c0_41] : memref<1x18x18x4xbf16, #tpu.memory_space<vmem>>, vector<1x16x16x4xbf16>
    %33 = vector.shape_cast %32 : vector<1x16x16x4xbf16> to vector<16x16x4xbf16>
    %34 = vector.shape_cast %33 : vector<16x16x4xbf16> to vector<256x4xbf16>
    %c0_42 = arith.constant 0 : index
    %c32 = arith.constant 32 : index
    %35 = vector.load %arg6[%c0_42, %c32] : memref<256x36xbf16, #tpu.memory_space<vmem>>, vector<256x4xbf16>
    tpu.vector_store %arg6[%c0_42, %c32], %34 {strides = array<i32>} : memref<256x36xbf16, #tpu.memory_space<vmem>>, vector<256x4xbf16>,
    %c0_43 = arith.constant 0 : index
    %c0_44 = arith.constant 0 : index
    %36 = vector.load %arg6[%c0_43, %c0_44] : memref<256x36xbf16, #tpu.memory_space<vmem>>, vector<256x36xbf16>
    %c0_45 = arith.constant 0 : index
    %c0_46 = arith.constant 0 : index
    %37 = vector.load %arg2[%c0_45, %c0_46] : memref<36x8xbf16, #tpu.memory_space<vmem>>, vector<36x8xbf16>
    %cst = arith.constant dense<0.000000e+00> : vector<256x8xf32>
    %38 = tpu.matmul %36, %37, %cst {dimension_numbers = #tpu.dot_dimension_numbers<[1], [0], [0], [1], [0, 0, 1, 1], [], []>} : vector<256x36xbf16>, vector<36x8xbf16>, vector<256x8xf32> -> vector<256x8xf32>
    %c0_47 = arith.constant 0 : index
    %c0_48 = arith.constant 0 : index
    %39 = vector.load %arg3[%c0_47, %c0_48] : memref<1x8xf32, #tpu.memory_space<vmem>>, vector<1x8xf32>
    %40 = vector.broadcast %39 : vector<1x8xf32> to vector<256x8xf32>
    %41 = arith.mulf %38, %40 : vector<256x8xf32>
    %c0_49 = arith.constant 0 : index
    %c0_50 = arith.constant 0 : index
    %42 = vector.load %arg4[%c0_49, %c0_50] : memref<1x8xf32, #tpu.memory_space<vmem>>, vector<1x8xf32>
    %43 = vector.broadcast %42 : vector<1x8xf32> to vector<256x8xf32>
    %44 = arith.addf %41, %43 : vector<256x8xf32>
    %cst_51 = arith.constant 0.000000e+00 : f32
    %45 = vector.broadcast %cst_51 : f32 to vector<256x8xf32>
    %46 = arith.maximumf %44, %45 : vector<256x8xf32>
    %47 = vector.shape_cast %46 : vector<256x8xf32> to vector<128x2x8xf32>
    %48 = vector.extract_strided_slice %47 {offsets = [0, 0, 0], sizes = [128, 1, 8], strides = [1, 1, 1]} : vector<128x2x8xf32> to vector<128x1x8xf32>
    %49 = vector.shape_cast %48 : vector<128x1x8xf32> to vector<128x8xf32>
    %50 = vector.extract_strided_slice %47 {offsets = [0, 1, 0], sizes = [128, 1, 8], strides = [1, 1, 1]} : vector<128x2x8xf32> to vector<128x1x8xf32>
    %51 = vector.shape_cast %50 : vector<128x1x8xf32> to vector<128x8xf32>
    %52 = arith.maximumf %49, %51 : vector<128x8xf32>
    %53 = vector.shape_cast %52 : vector<128x8xf32> to vector<8x2x8x8xf32>
    %54 = vector.extract_strided_slice %53 {offsets = [0, 0, 0, 0], sizes = [8, 1, 8, 8], strides = [1, 1, 1, 1]} : vector<8x2x8x8xf32> to vector<8x1x8x8xf32>
    %55 = vector.shape_cast %54 : vector<8x1x8x8xf32> to vector<8x8x8xf32>
    %56 = vector.extract_strided_slice %53 {offsets = [0, 1, 0, 0], sizes = [8, 1, 8, 8], strides = [1, 1, 1, 1]} : vector<8x2x8x8xf32> to vector<8x1x8x8xf32>
    %57 = vector.shape_cast %56 : vector<8x1x8x8xf32> to vector<8x8x8xf32>
    %58 = arith.maximumf %55, %57 : vector<8x8x8xf32>
    %59 = arith.truncf %58 : vector<8x8x8xf32> to vector<8x8x8xbf16>
    %60 = vector.extract_strided_slice %59 {offsets = [0, 0, 0], sizes = [8, 1, 8], strides = [1, 1, 1]} : vector<8x8x8xbf16> to vector<8x1x8xbf16>
    %61 = vector.shape_cast %60 : vector<8x1x8xbf16> to vector<8x8xbf16>
    %c0_52 = arith.constant 0 : index
    %c0_53 = arith.constant 0 : index
    %c0_54 = arith.constant 0 : index
    %62 = vector.load %arg5[%c0_52, %c0_53, %c0_54] : memref<1x8x64xbf16, #tpu.memory_space<vmem>>, vector<1x8x8xbf16>
    %63 = vector.shape_cast %62 : vector<1x8x8xbf16> to vector<8x8xbf16>
    %64 = vector.shape_cast %61 : vector<8x8xbf16> to vector<1x8x8xbf16>
    tpu.vector_store %arg5[%c0_52, %c0_53, %c0_54], %64 {strides = array<i32>} : memref<1x8x64xbf16, #tpu.memory_space<vmem>>, vector<1x8x8xbf16>,
    %65 = vector.extract_strided_slice %59 {offsets = [0, 1, 0], sizes = [8, 1, 8], strides = [1, 1, 1]} : vector<8x8x8xbf16> to vector<8x1x8xbf16>
    %66 = vector.shape_cast %65 : vector<8x1x8xbf16> to vector<8x8xbf16>
    %c0_55 = arith.constant 0 : index
    %c0_56 = arith.constant 0 : index
    %c8_57 = arith.constant 8 : index
    %67 = vector.load %arg5[%c0_55, %c0_56, %c8_57] : memref<1x8x64xbf16, #tpu.memory_space<vmem>>, vector<1x8x8xbf16>
    %68 = vector.shape_cast %67 : vector<1x8x8xbf16> to vector<8x8xbf16>
    %69 = vector.shape_cast %66 : vector<8x8xbf16> to vector<1x8x8xbf16>
    tpu.vector_store %arg5[%c0_55, %c0_56, %c8_57], %69 {strides = array<i32>} : memref<1x8x64xbf16, #tpu.memory_space<vmem>>, vector<1x8x8xbf16>,
    %70 = vector.extract_strided_slice %59 {offsets = [0, 2, 0], sizes = [8, 1, 8], strides = [1, 1, 1]} : vector<8x8x8xbf16> to vector<8x1x8xbf16>
    %71 = vector.shape_cast %70 : vector<8x1x8xbf16> to vector<8x8xbf16>
    %c0_58 = arith.constant 0 : index
    %c0_59 = arith.constant 0 : index
    %c16_60 = arith.constant 16 : index
    %72 = vector.load %arg5[%c0_58, %c0_59, %c16_60] : memref<1x8x64xbf16, #tpu.memory_space<vmem>>, vector<1x8x8xbf16>
    %73 = vector.shape_cast %72 : vector<1x8x8xbf16> to vector<8x8xbf16>
    %74 = vector.shape_cast %71 : vector<8x8xbf16> to vector<1x8x8xbf16>
    tpu.vector_store %arg5[%c0_58, %c0_59, %c16_60], %74 {strides = array<i32>} : memref<1x8x64xbf16, #tpu.memory_space<vmem>>, vector<1x8x8xbf16>,
    %75 = vector.extract_strided_slice %59 {offsets = [0, 3, 0], sizes = [8, 1, 8], strides = [1, 1, 1]} : vector<8x8x8xbf16> to vector<8x1x8xbf16>
    %76 = vector.shape_cast %75 : vector<8x1x8xbf16> to vector<8x8xbf16>
    %c0_61 = arith.constant 0 : index
    %c0_62 = arith.constant 0 : index
    %c24_63 = arith.constant 24 : index
    %77 = vector.load %arg5[%c0_61, %c0_62, %c24_63] : memref<1x8x64xbf16, #tpu.memory_space<vmem>>, vector<1x8x8xbf16>
    %78 = vector.shape_cast %77 : vector<1x8x8xbf16> to vector<8x8xbf16>
    %79 = vector.shape_cast %76 : vector<8x8xbf16> to vector<1x8x8xbf16>
    tpu.vector_store %arg5[%c0_61, %c0_62, %c24_63], %79 {strides = array<i32>} : memref<1x8x64xbf16, #tpu.memory_space<vmem>>, vector<1x8x8xbf16>,
    %80 = vector.extract_strided_slice %59 {offsets = [0, 4, 0], sizes = [8, 1, 8], strides = [1, 1, 1]} : vector<8x8x8xbf16> to vector<8x1x8xbf16>
    %81 = vector.shape_cast %80 : vector<8x1x8xbf16> to vector<8x8xbf16>
    %c0_64 = arith.constant 0 : index
    %c0_65 = arith.constant 0 : index
    %c32_66 = arith.constant 32 : index
    %82 = vector.load %arg5[%c0_64, %c0_65, %c32_66] : memref<1x8x64xbf16, #tpu.memory_space<vmem>>, vector<1x8x8xbf16>
    %83 = vector.shape_cast %82 : vector<1x8x8xbf16> to vector<8x8xbf16>
    %84 = vector.shape_cast %81 : vector<8x8xbf16> to vector<1x8x8xbf16>
    tpu.vector_store %arg5[%c0_64, %c0_65, %c32_66], %84 {strides = array<i32>} : memref<1x8x64xbf16, #tpu.memory_space<vmem>>, vector<1x8x8xbf16>,
    %85 = vector.extract_strided_slice %59 {offsets = [0, 5, 0], sizes = [8, 1, 8], strides = [1, 1, 1]} : vector<8x8x8xbf16> to vector<8x1x8xbf16>
    %86 = vector.shape_cast %85 : vector<8x1x8xbf16> to vector<8x8xbf16>
    %c0_67 = arith.constant 0 : index
    %c0_68 = arith.constant 0 : index
    %c40 = arith.constant 40 : index
    %87 = vector.load %arg5[%c0_67, %c0_68, %c40] : memref<1x8x64xbf16, #tpu.memory_space<vmem>>, vector<1x8x8xbf16>
    %88 = vector.shape_cast %87 : vector<1x8x8xbf16> to vector<8x8xbf16>
    %89 = vector.shape_cast %86 : vector<8x8xbf16> to vector<1x8x8xbf16>
    tpu.vector_store %arg5[%c0_67, %c0_68, %c40], %89 {strides = array<i32>} : memref<1x8x64xbf16, #tpu.memory_space<vmem>>, vector<1x8x8xbf16>,
    %90 = vector.extract_strided_slice %59 {offsets = [0, 6, 0], sizes = [8, 1, 8], strides = [1, 1, 1]} : vector<8x8x8xbf16> to vector<8x1x8xbf16>
    %91 = vector.shape_cast %90 : vector<8x1x8xbf16> to vector<8x8xbf16>
    %c0_69 = arith.constant 0 : index
    %c0_70 = arith.constant 0 : index
    %c48 = arith.constant 48 : index
    %92 = vector.load %arg5[%c0_69, %c0_70, %c48] : memref<1x8x64xbf16, #tpu.memory_space<vmem>>, vector<1x8x8xbf16>
    %93 = vector.shape_cast %92 : vector<1x8x8xbf16> to vector<8x8xbf16>
    %94 = vector.shape_cast %91 : vector<8x8xbf16> to vector<1x8x8xbf16>
    tpu.vector_store %arg5[%c0_69, %c0_70, %c48], %94 {strides = array<i32>} : memref<1x8x64xbf16, #tpu.memory_space<vmem>>, vector<1x8x8xbf16>,
    %95 = vector.extract_strided_slice %59 {offsets = [0, 7, 0], sizes = [8, 1, 8], strides = [1, 1, 1]} : vector<8x8x8xbf16> to vector<8x1x8xbf16>
    %96 = vector.shape_cast %95 : vector<8x1x8xbf16> to vector<8x8xbf16>
    %c0_71 = arith.constant 0 : index
    %c0_72 = arith.constant 0 : index
    %c56 = arith.constant 56 : index
    %97 = vector.load %arg5[%c0_71, %c0_72, %c56] : memref<1x8x64xbf16, #tpu.memory_space<vmem>>, vector<1x8x8xbf16>
    %98 = vector.shape_cast %97 : vector<1x8x8xbf16> to vector<8x8xbf16>
    %99 = vector.shape_cast %96 : vector<8x8xbf16> to vector<1x8x8xbf16>
    tpu.vector_store %arg5[%c0_71, %c0_72, %c56], %99 {strides = array<i32>} : memref<1x8x64xbf16, #tpu.memory_space<vmem>>, vector<1x8x8xbf16>,
    return
  }
  func.func @transform_0(%arg0: i32) -> (i32, i32, i32, i32) {
    %c0_i32 = arith.constant 0 : i32
    %c0_i32_0 = arith.constant 0 : i32
    %c0_i32_1 = arith.constant 0 : i32
    %c0_i32_2 = arith.constant 0 : i32
    return %arg0, %c0_i32, %c0_i32_0, %c0_i32_1 : i32, i32, i32, i32
  }
  func.func @transform_1(%arg0: i32) -> (i32, i32) {
    %c0_i32 = arith.constant 0 : i32
    %c0_i32_0 = arith.constant 0 : i32
    %c0_i32_1 = arith.constant 0 : i32
    return %c0_i32, %c0_i32_0 : i32, i32
  }
  func.func @transform_2(%arg0: i32) -> (i32, i32) {
    %c0_i32 = arith.constant 0 : i32
    %c0_i32_0 = arith.constant 0 : i32
    %c0_i32_1 = arith.constant 0 : i32
    return %c0_i32, %c0_i32_0 : i32, i32
  }
  func.func @transform_3(%arg0: i32) -> (i32, i32) {
    %c0_i32 = arith.constant 0 : i32
    %c0_i32_0 = arith.constant 0 : i32
    %c0_i32_1 = arith.constant 0 : i32
    return %c0_i32, %c0_i32_0 : i32, i32
  }
  func.func @transform_4(%arg0: i32) -> (i32, i32, i32) {
    %c0_i32 = arith.constant 0 : i32
    %c0_i32_0 = arith.constant 0 : i32
    %c0_i32_1 = arith.constant 0 : i32
    return %arg0, %c0_i32, %c0_i32_0 : i32, i32, i32
  }
}

module attributes {stable_mosaic.version = 11 : i64} {
  func.func @_conv_bn_relu_pool_kernel(%arg0: i32, %arg1: memref<1x10x10x8xbf16, #tpu.memory_space<vmem>>, %arg2: memref<72x8xbf16, #tpu.memory_space<vmem>>, %arg3: memref<1x8xf32, #tpu.memory_space<vmem>>, %arg4: memref<1x8xf32, #tpu.memory_space<vmem>>, %arg5: memref<1x4x32xbf16, #tpu.memory_space<vmem>>, %arg6: memref<64x72xbf16, #tpu.memory_space<vmem>>) attributes {dimension_semantics = [#tpu.dimension_semantics<parallel>], iteration_bounds = array<i64: 2>, scalar_prefetch = 0 : i64, scratch_operands = 1 : i64, tpu.core_type = #tpu.core_type<tc>, window_params = [{transform_indices = @transform_0, window_bounds = array<i64: 1, 10, 10, 8>}, {pipeline_mode = #tpu.pipeline_mode<synchronous>, transform_indices = @transform_1, window_bounds = array<i64: 72, 8>}, {pipeline_mode = #tpu.pipeline_mode<synchronous>, transform_indices = @transform_2, window_bounds = array<i64: 1, 8>}, {pipeline_mode = #tpu.pipeline_mode<synchronous>, transform_indices = @transform_3, window_bounds = array<i64: 1, 8>}, {transform_indices = @transform_4, window_bounds = array<i64: 1, 4, 32>}]} {
    %c0 = arith.constant 0 : index
    %c0_0 = arith.constant 0 : index
    %c0_1 = arith.constant 0 : index
    %c0_2 = arith.constant 0 : index
    %0 = vector.load %arg1[%c0, %c0_0, %c0_1, %c0_2] : memref<1x10x10x8xbf16, #tpu.memory_space<vmem>>, vector<1x8x8x8xbf16>
    %1 = vector.shape_cast %0 : vector<1x8x8x8xbf16> to vector<8x8x8xbf16>
    %2 = vector.shape_cast %1 : vector<8x8x8xbf16> to vector<64x8xbf16>
    %c0_3 = arith.constant 0 : index
    %c0_4 = arith.constant 0 : index
    %3 = vector.load %arg6[%c0_3, %c0_4] : memref<64x72xbf16, #tpu.memory_space<vmem>>, vector<64x8xbf16>
    tpu.vector_store %arg6[%c0_3, %c0_4], %2 {strides = array<i32>} : memref<64x72xbf16, #tpu.memory_space<vmem>>, vector<64x8xbf16>,
    %c0_5 = arith.constant 0 : index
    %c0_6 = arith.constant 0 : index
    %c1 = arith.constant 1 : index
    %c0_7 = arith.constant 0 : index
    %4 = vector.load %arg1[%c0_5, %c0_6, %c1, %c0_7] : memref<1x10x10x8xbf16, #tpu.memory_space<vmem>>, vector<1x8x8x8xbf16>
    %5 = vector.shape_cast %4 : vector<1x8x8x8xbf16> to vector<8x8x8xbf16>
    %6 = vector.shape_cast %5 : vector<8x8x8xbf16> to vector<64x8xbf16>
    %c0_8 = arith.constant 0 : index
    %c8 = arith.constant 8 : index
    %7 = vector.load %arg6[%c0_8, %c8] : memref<64x72xbf16, #tpu.memory_space<vmem>>, vector<64x8xbf16>
    tpu.vector_store %arg6[%c0_8, %c8], %6 {strides = array<i32>} : memref<64x72xbf16, #tpu.memory_space<vmem>>, vector<64x8xbf16>,
    %c0_9 = arith.constant 0 : index
    %c0_10 = arith.constant 0 : index
    %c2 = arith.constant 2 : index
    %c0_11 = arith.constant 0 : index
    %8 = vector.load %arg1[%c0_9, %c0_10, %c2, %c0_11] : memref<1x10x10x8xbf16, #tpu.memory_space<vmem>>, vector<1x8x8x8xbf16>
    %9 = vector.shape_cast %8 : vector<1x8x8x8xbf16> to vector<8x8x8xbf16>
    %10 = vector.shape_cast %9 : vector<8x8x8xbf16> to vector<64x8xbf16>
    %c0_12 = arith.constant 0 : index
    %c16 = arith.constant 16 : index
    %11 = vector.load %arg6[%c0_12, %c16] : memref<64x72xbf16, #tpu.memory_space<vmem>>, vector<64x8xbf16>
    tpu.vector_store %arg6[%c0_12, %c16], %10 {strides = array<i32>} : memref<64x72xbf16, #tpu.memory_space<vmem>>, vector<64x8xbf16>,
    %c0_13 = arith.constant 0 : index
    %c1_14 = arith.constant 1 : index
    %c0_15 = arith.constant 0 : index
    %c0_16 = arith.constant 0 : index
    %12 = vector.load %arg1[%c0_13, %c1_14, %c0_15, %c0_16] : memref<1x10x10x8xbf16, #tpu.memory_space<vmem>>, vector<1x8x8x8xbf16>
    %13 = vector.shape_cast %12 : vector<1x8x8x8xbf16> to vector<8x8x8xbf16>
    %14 = vector.shape_cast %13 : vector<8x8x8xbf16> to vector<64x8xbf16>
    %c0_17 = arith.constant 0 : index
    %c24 = arith.constant 24 : index
    %15 = vector.load %arg6[%c0_17, %c24] : memref<64x72xbf16, #tpu.memory_space<vmem>>, vector<64x8xbf16>
    tpu.vector_store %arg6[%c0_17, %c24], %14 {strides = array<i32>} : memref<64x72xbf16, #tpu.memory_space<vmem>>, vector<64x8xbf16>,
    %c0_18 = arith.constant 0 : index
    %c1_19 = arith.constant 1 : index
    %c1_20 = arith.constant 1 : index
    %c0_21 = arith.constant 0 : index
    %16 = vector.load %arg1[%c0_18, %c1_19, %c1_20, %c0_21] : memref<1x10x10x8xbf16, #tpu.memory_space<vmem>>, vector<1x8x8x8xbf16>
    %17 = vector.shape_cast %16 : vector<1x8x8x8xbf16> to vector<8x8x8xbf16>
    %18 = vector.shape_cast %17 : vector<8x8x8xbf16> to vector<64x8xbf16>
    %c0_22 = arith.constant 0 : index
    %c32 = arith.constant 32 : index
    %19 = vector.load %arg6[%c0_22, %c32] : memref<64x72xbf16, #tpu.memory_space<vmem>>, vector<64x8xbf16>
    tpu.vector_store %arg6[%c0_22, %c32], %18 {strides = array<i32>} : memref<64x72xbf16, #tpu.memory_space<vmem>>, vector<64x8xbf16>,
    %c0_23 = arith.constant 0 : index
    %c1_24 = arith.constant 1 : index
    %c2_25 = arith.constant 2 : index
    %c0_26 = arith.constant 0 : index
    %20 = vector.load %arg1[%c0_23, %c1_24, %c2_25, %c0_26] : memref<1x10x10x8xbf16, #tpu.memory_space<vmem>>, vector<1x8x8x8xbf16>
    %21 = vector.shape_cast %20 : vector<1x8x8x8xbf16> to vector<8x8x8xbf16>
    %22 = vector.shape_cast %21 : vector<8x8x8xbf16> to vector<64x8xbf16>
    %c0_27 = arith.constant 0 : index
    %c40 = arith.constant 40 : index
    %23 = vector.load %arg6[%c0_27, %c40] : memref<64x72xbf16, #tpu.memory_space<vmem>>, vector<64x8xbf16>
    tpu.vector_store %arg6[%c0_27, %c40], %22 {strides = array<i32>} : memref<64x72xbf16, #tpu.memory_space<vmem>>, vector<64x8xbf16>,
    %c0_28 = arith.constant 0 : index
    %c2_29 = arith.constant 2 : index
    %c0_30 = arith.constant 0 : index
    %c0_31 = arith.constant 0 : index
    %24 = vector.load %arg1[%c0_28, %c2_29, %c0_30, %c0_31] : memref<1x10x10x8xbf16, #tpu.memory_space<vmem>>, vector<1x8x8x8xbf16>
    %25 = vector.shape_cast %24 : vector<1x8x8x8xbf16> to vector<8x8x8xbf16>
    %26 = vector.shape_cast %25 : vector<8x8x8xbf16> to vector<64x8xbf16>
    %c0_32 = arith.constant 0 : index
    %c48 = arith.constant 48 : index
    %27 = vector.load %arg6[%c0_32, %c48] : memref<64x72xbf16, #tpu.memory_space<vmem>>, vector<64x8xbf16>
    tpu.vector_store %arg6[%c0_32, %c48], %26 {strides = array<i32>} : memref<64x72xbf16, #tpu.memory_space<vmem>>, vector<64x8xbf16>,
    %c0_33 = arith.constant 0 : index
    %c2_34 = arith.constant 2 : index
    %c1_35 = arith.constant 1 : index
    %c0_36 = arith.constant 0 : index
    %28 = vector.load %arg1[%c0_33, %c2_34, %c1_35, %c0_36] : memref<1x10x10x8xbf16, #tpu.memory_space<vmem>>, vector<1x8x8x8xbf16>
    %29 = vector.shape_cast %28 : vector<1x8x8x8xbf16> to vector<8x8x8xbf16>
    %30 = vector.shape_cast %29 : vector<8x8x8xbf16> to vector<64x8xbf16>
    %c0_37 = arith.constant 0 : index
    %c56 = arith.constant 56 : index
    %31 = vector.load %arg6[%c0_37, %c56] : memref<64x72xbf16, #tpu.memory_space<vmem>>, vector<64x8xbf16>
    tpu.vector_store %arg6[%c0_37, %c56], %30 {strides = array<i32>} : memref<64x72xbf16, #tpu.memory_space<vmem>>, vector<64x8xbf16>,
    %c0_38 = arith.constant 0 : index
    %c2_39 = arith.constant 2 : index
    %c2_40 = arith.constant 2 : index
    %c0_41 = arith.constant 0 : index
    %32 = vector.load %arg1[%c0_38, %c2_39, %c2_40, %c0_41] : memref<1x10x10x8xbf16, #tpu.memory_space<vmem>>, vector<1x8x8x8xbf16>
    %33 = vector.shape_cast %32 : vector<1x8x8x8xbf16> to vector<8x8x8xbf16>
    %34 = vector.shape_cast %33 : vector<8x8x8xbf16> to vector<64x8xbf16>
    %c0_42 = arith.constant 0 : index
    %c64 = arith.constant 64 : index
    %35 = vector.load %arg6[%c0_42, %c64] : memref<64x72xbf16, #tpu.memory_space<vmem>>, vector<64x8xbf16>
    tpu.vector_store %arg6[%c0_42, %c64], %34 {strides = array<i32>} : memref<64x72xbf16, #tpu.memory_space<vmem>>, vector<64x8xbf16>,
    %c0_43 = arith.constant 0 : index
    %c0_44 = arith.constant 0 : index
    %36 = vector.load %arg6[%c0_43, %c0_44] : memref<64x72xbf16, #tpu.memory_space<vmem>>, vector<64x72xbf16>
    %c0_45 = arith.constant 0 : index
    %c0_46 = arith.constant 0 : index
    %37 = vector.load %arg2[%c0_45, %c0_46] : memref<72x8xbf16, #tpu.memory_space<vmem>>, vector<72x8xbf16>
    %cst = arith.constant dense<0.000000e+00> : vector<64x8xf32>
    %38 = tpu.matmul %36, %37, %cst {dimension_numbers = #tpu.dot_dimension_numbers<[1], [0], [0], [1], [0, 0, 1, 1], [], []>} : vector<64x72xbf16>, vector<72x8xbf16>, vector<64x8xf32> -> vector<64x8xf32>
    %c0_47 = arith.constant 0 : index
    %c0_48 = arith.constant 0 : index
    %39 = vector.load %arg3[%c0_47, %c0_48] : memref<1x8xf32, #tpu.memory_space<vmem>>, vector<1x8xf32>
    %40 = vector.broadcast %39 : vector<1x8xf32> to vector<64x8xf32>
    %41 = arith.mulf %38, %40 : vector<64x8xf32>
    %c0_49 = arith.constant 0 : index
    %c0_50 = arith.constant 0 : index
    %42 = vector.load %arg4[%c0_49, %c0_50] : memref<1x8xf32, #tpu.memory_space<vmem>>, vector<1x8xf32>
    %43 = vector.broadcast %42 : vector<1x8xf32> to vector<64x8xf32>
    %44 = arith.addf %41, %43 : vector<64x8xf32>
    %cst_51 = arith.constant 0.000000e+00 : f32
    %45 = vector.broadcast %cst_51 : f32 to vector<64x8xf32>
    %46 = arith.maximumf %44, %45 : vector<64x8xf32>
    %47 = vector.shape_cast %46 : vector<64x8xf32> to vector<32x2x8xf32>
    %48 = vector.extract_strided_slice %47 {offsets = [0, 0, 0], sizes = [32, 1, 8], strides = [1, 1, 1]} : vector<32x2x8xf32> to vector<32x1x8xf32>
    %49 = vector.shape_cast %48 : vector<32x1x8xf32> to vector<32x8xf32>
    %50 = vector.extract_strided_slice %47 {offsets = [0, 1, 0], sizes = [32, 1, 8], strides = [1, 1, 1]} : vector<32x2x8xf32> to vector<32x1x8xf32>
    %51 = vector.shape_cast %50 : vector<32x1x8xf32> to vector<32x8xf32>
    %52 = arith.maximumf %49, %51 : vector<32x8xf32>
    %53 = vector.shape_cast %52 : vector<32x8xf32> to vector<4x2x4x8xf32>
    %54 = vector.extract_strided_slice %53 {offsets = [0, 0, 0, 0], sizes = [4, 1, 4, 8], strides = [1, 1, 1, 1]} : vector<4x2x4x8xf32> to vector<4x1x4x8xf32>
    %55 = vector.shape_cast %54 : vector<4x1x4x8xf32> to vector<4x4x8xf32>
    %56 = vector.extract_strided_slice %53 {offsets = [0, 1, 0, 0], sizes = [4, 1, 4, 8], strides = [1, 1, 1, 1]} : vector<4x2x4x8xf32> to vector<4x1x4x8xf32>
    %57 = vector.shape_cast %56 : vector<4x1x4x8xf32> to vector<4x4x8xf32>
    %58 = arith.maximumf %55, %57 : vector<4x4x8xf32>
    %59 = arith.truncf %58 : vector<4x4x8xf32> to vector<4x4x8xbf16>
    %60 = vector.extract_strided_slice %59 {offsets = [0, 0, 0], sizes = [4, 1, 8], strides = [1, 1, 1]} : vector<4x4x8xbf16> to vector<4x1x8xbf16>
    %61 = vector.shape_cast %60 : vector<4x1x8xbf16> to vector<4x8xbf16>
    %c0_52 = arith.constant 0 : index
    %c0_53 = arith.constant 0 : index
    %c0_54 = arith.constant 0 : index
    %62 = vector.load %arg5[%c0_52, %c0_53, %c0_54] : memref<1x4x32xbf16, #tpu.memory_space<vmem>>, vector<1x4x8xbf16>
    %63 = vector.shape_cast %62 : vector<1x4x8xbf16> to vector<4x8xbf16>
    %64 = vector.shape_cast %61 : vector<4x8xbf16> to vector<1x4x8xbf16>
    tpu.vector_store %arg5[%c0_52, %c0_53, %c0_54], %64 {strides = array<i32>} : memref<1x4x32xbf16, #tpu.memory_space<vmem>>, vector<1x4x8xbf16>,
    %65 = vector.extract_strided_slice %59 {offsets = [0, 1, 0], sizes = [4, 1, 8], strides = [1, 1, 1]} : vector<4x4x8xbf16> to vector<4x1x8xbf16>
    %66 = vector.shape_cast %65 : vector<4x1x8xbf16> to vector<4x8xbf16>
    %c0_55 = arith.constant 0 : index
    %c0_56 = arith.constant 0 : index
    %c8_57 = arith.constant 8 : index
    %67 = vector.load %arg5[%c0_55, %c0_56, %c8_57] : memref<1x4x32xbf16, #tpu.memory_space<vmem>>, vector<1x4x8xbf16>
    %68 = vector.shape_cast %67 : vector<1x4x8xbf16> to vector<4x8xbf16>
    %69 = vector.shape_cast %66 : vector<4x8xbf16> to vector<1x4x8xbf16>
    tpu.vector_store %arg5[%c0_55, %c0_56, %c8_57], %69 {strides = array<i32>} : memref<1x4x32xbf16, #tpu.memory_space<vmem>>, vector<1x4x8xbf16>,
    %70 = vector.extract_strided_slice %59 {offsets = [0, 2, 0], sizes = [4, 1, 8], strides = [1, 1, 1]} : vector<4x4x8xbf16> to vector<4x1x8xbf16>
    %71 = vector.shape_cast %70 : vector<4x1x8xbf16> to vector<4x8xbf16>
    %c0_58 = arith.constant 0 : index
    %c0_59 = arith.constant 0 : index
    %c16_60 = arith.constant 16 : index
    %72 = vector.load %arg5[%c0_58, %c0_59, %c16_60] : memref<1x4x32xbf16, #tpu.memory_space<vmem>>, vector<1x4x8xbf16>
    %73 = vector.shape_cast %72 : vector<1x4x8xbf16> to vector<4x8xbf16>
    %74 = vector.shape_cast %71 : vector<4x8xbf16> to vector<1x4x8xbf16>
    tpu.vector_store %arg5[%c0_58, %c0_59, %c16_60], %74 {strides = array<i32>} : memref<1x4x32xbf16, #tpu.memory_space<vmem>>, vector<1x4x8xbf16>,
    %75 = vector.extract_strided_slice %59 {offsets = [0, 3, 0], sizes = [4, 1, 8], strides = [1, 1, 1]} : vector<4x4x8xbf16> to vector<4x1x8xbf16>
    %76 = vector.shape_cast %75 : vector<4x1x8xbf16> to vector<4x8xbf16>
    %c0_61 = arith.constant 0 : index
    %c0_62 = arith.constant 0 : index
    %c24_63 = arith.constant 24 : index
    %77 = vector.load %arg5[%c0_61, %c0_62, %c24_63] : memref<1x4x32xbf16, #tpu.memory_space<vmem>>, vector<1x4x8xbf16>
    %78 = vector.shape_cast %77 : vector<1x4x8xbf16> to vector<4x8xbf16>
    %79 = vector.shape_cast %76 : vector<4x8xbf16> to vector<1x4x8xbf16>
    tpu.vector_store %arg5[%c0_61, %c0_62, %c24_63], %79 {strides = array<i32>} : memref<1x4x32xbf16, #tpu.memory_space<vmem>>, vector<1x4x8xbf16>,
    return
  }
  func.func @transform_0(%arg0: i32) -> (i32, i32, i32, i32) {
    %c0_i32 = arith.constant 0 : i32
    %c0_i32_0 = arith.constant 0 : i32
    %c0_i32_1 = arith.constant 0 : i32
    %c0_i32_2 = arith.constant 0 : i32
    return %arg0, %c0_i32, %c0_i32_0, %c0_i32_1 : i32, i32, i32, i32
  }
  func.func @transform_1(%arg0: i32) -> (i32, i32) {
    %c0_i32 = arith.constant 0 : i32
    %c0_i32_0 = arith.constant 0 : i32
    %c0_i32_1 = arith.constant 0 : i32
    return %c0_i32, %c0_i32_0 : i32, i32
  }
  func.func @transform_2(%arg0: i32) -> (i32, i32) {
    %c0_i32 = arith.constant 0 : i32
    %c0_i32_0 = arith.constant 0 : i32
    %c0_i32_1 = arith.constant 0 : i32
    return %c0_i32, %c0_i32_0 : i32, i32
  }
  func.func @transform_3(%arg0: i32) -> (i32, i32) {
    %c0_i32 = arith.constant 0 : i32
    %c0_i32_0 = arith.constant 0 : i32
    %c0_i32_1 = arith.constant 0 : i32
    return %c0_i32, %c0_i32_0 : i32, i32
  }
  func.func @transform_4(%arg0: i32) -> (i32, i32, i32) {
    %c0_i32 = arith.constant 0 : i32
    %c0_i32_0 = arith.constant 0 : i32
    %c0_i32_1 = arith.constant 0 : i32
    return %arg0, %c0_i32, %c0_i32_0 : i32, i32, i32
  }
}

module attributes {stable_mosaic.version = 11 : i64} {
  func.func @_dual_proj_kernel(%arg0: i32, %arg1: i32, %arg2: memref<8x32xbf16, #tpu.memory_space<vmem>>, %arg3: memref<1x32x48xbf16, #tpu.memory_space<vmem>>, %arg4: memref<1x1x48xf32, #tpu.memory_space<vmem>>, %arg5: memref<1x8x48xbf16, #tpu.memory_space<vmem>>) attributes {dimension_semantics = [#tpu.dimension_semantics<parallel>, #tpu.dimension_semantics<parallel>], iteration_bounds = array<i64: 2, 1>, scalar_prefetch = 0 : i64, scratch_operands = 0 : i64, tpu.core_type = #tpu.core_type<tc>, window_params = [{transform_indices = @transform_0, window_bounds = array<i64: 8, 32>}, {transform_indices = @transform_1, window_bounds = array<i64: 1, 32, 48>}, {transform_indices = @transform_2, window_bounds = array<i64: 1, 1, 48>}, {transform_indices = @transform_3, window_bounds = array<i64: 1, 8, 48>}]} {
    %c0 = arith.constant 0 : index
    %c0_0 = arith.constant 0 : index
    %0 = vector.load %arg2[%c0, %c0_0] : memref<8x32xbf16, #tpu.memory_space<vmem>>, vector<8x32xbf16>
    %c0_1 = arith.constant 0 : index
    %c0_2 = arith.constant 0 : index
    %c0_3 = arith.constant 0 : index
    %1 = vector.load %arg3[%c0_1, %c0_2, %c0_3] : memref<1x32x48xbf16, #tpu.memory_space<vmem>>, vector<1x32x48xbf16>
    %2 = vector.shape_cast %1 : vector<1x32x48xbf16> to vector<32x48xbf16>
    %cst = arith.constant dense<0.000000e+00> : vector<8x48xf32>
    %3 = tpu.matmul %0, %2, %cst {dimension_numbers = #tpu.dot_dimension_numbers<[1], [0], [0], [1], [0, 0, 1, 1], [], []>} : vector<8x32xbf16>, vector<32x48xbf16>, vector<8x48xf32> -> vector<8x48xf32>
    %c0_4 = arith.constant 0 : index
    %c0_5 = arith.constant 0 : index
    %c0_6 = arith.constant 0 : index
    %4 = vector.load %arg4[%c0_4, %c0_5, %c0_6] : memref<1x1x48xf32, #tpu.memory_space<vmem>>, vector<1x1x48xf32>
    %5 = vector.shape_cast %4 : vector<1x1x48xf32> to vector<1x48xf32>
    %6 = vector.broadcast %5 : vector<1x48xf32> to vector<8x48xf32>
    %7 = arith.addf %3, %6 : vector<8x48xf32>
    %8 = arith.truncf %7 : vector<8x48xf32> to vector<8x48xbf16>
    %c0_7 = arith.constant 0 : index
    %c0_8 = arith.constant 0 : index
    %c0_9 = arith.constant 0 : index
    %9 = vector.load %arg5[%c0_7, %c0_8, %c0_9] : memref<1x8x48xbf16, #tpu.memory_space<vmem>>, vector<1x8x48xbf16>
    %10 = vector.shape_cast %9 : vector<1x8x48xbf16> to vector<8x48xbf16>
    %11 = vector.shape_cast %8 : vector<8x48xbf16> to vector<1x8x48xbf16>
    tpu.vector_store %arg5[%c0_7, %c0_8, %c0_9], %11 {strides = array<i32>} : memref<1x8x48xbf16, #tpu.memory_space<vmem>>, vector<1x8x48xbf16>,
    return
  }
  func.func @transform_0(%arg0: i32, %arg1: i32) -> (i32, i32) {
    %c0_i32 = arith.constant 0 : i32
    %c0_i32_0 = arith.constant 0 : i32
    return %arg1, %c0_i32 : i32, i32
  }
  func.func @transform_1(%arg0: i32, %arg1: i32) -> (i32, i32, i32) {
    %c0_i32 = arith.constant 0 : i32
    %c0_i32_0 = arith.constant 0 : i32
    %c0_i32_1 = arith.constant 0 : i32
    return %arg0, %c0_i32, %c0_i32_0 : i32, i32, i32
  }
  func.func @transform_2(%arg0: i32, %arg1: i32) -> (i32, i32, i32) {
    %c0_i32 = arith.constant 0 : i32
    %c0_i32_0 = arith.constant 0 : i32
    %c0_i32_1 = arith.constant 0 : i32
    return %arg0, %c0_i32, %c0_i32_0 : i32, i32, i32
  }
  func.func @transform_3(%arg0: i32, %arg1: i32) -> (i32, i32, i32) {
    %c0_i32 = arith.constant 0 : i32
    %c0_i32_0 = arith.constant 0 : i32
    return %arg0, %arg1, %c0_i32 : i32, i32, i32
  }
}

module attributes {stable_mosaic.version = 11 : i64} {
  func.func @_bigru_rec_kernel(%arg0: i32, %arg1: memref<1x4x2x48xbf16, #tpu.memory_space<vmem>>, %arg2: memref<1x16x48xbf16, #tpu.memory_space<vmem>>, %arg3: memref<1x1x48xf32, #tpu.memory_space<vmem>>, %arg4: memref<1x4x2x16xbf16, #tpu.memory_space<vmem>>) attributes {dimension_semantics = [#tpu.dimension_semantics<parallel>], iteration_bounds = array<i64: 2>, scalar_prefetch = 0 : i64, scratch_operands = 0 : i64, tpu.core_type = #tpu.core_type<tc>, window_params = [{transform_indices = @transform_0, window_bounds = array<i64: 1, 4, 2, 48>}, {transform_indices = @transform_1, window_bounds = array<i64: 1, 16, 48>}, {transform_indices = @transform_2, window_bounds = array<i64: 1, 1, 48>}, {transform_indices = @transform_3, window_bounds = array<i64: 1, 4, 2, 16>}]} {
    %c0 = arith.constant 0 : index
    %c0_0 = arith.constant 0 : index
    %c0_1 = arith.constant 0 : index
    %0 = vector.load %arg2[%c0, %c0_0, %c0_1] : memref<1x16x48xbf16, #tpu.memory_space<vmem>>, vector<1x16x48xbf16>
    %1 = vector.shape_cast %0 : vector<1x16x48xbf16> to vector<16x48xbf16>
    %c0_2 = arith.constant 0 : index
    %c0_3 = arith.constant 0 : index
    %c0_4 = arith.constant 0 : index
    %2 = vector.load %arg3[%c0_2, %c0_3, %c0_4] : memref<1x1x48xf32, #tpu.memory_space<vmem>>, vector<1x1x48xf32>
    %3 = vector.shape_cast %2 : vector<1x1x48xf32> to vector<1x48xf32>
    %cst = arith.constant 0.000000e+00 : f32
    %4 = vector.broadcast %cst : f32 to vector<2x16xf32>
    %c0_i32 = arith.constant 0 : i32
    %c4_i32 = arith.constant 4 : i32
    %5 = arith.addi %c0_i32, %c4_i32 : i32
    %c1_i32 = arith.constant 1 : i32
    %6 = scf.for %arg5 = %c0_i32 to %5 step %c1_i32 iter_args(%arg6 = %4) -> (vector<2x16xf32>)  : i32 {
      %c2_i32 = arith.constant 2 : i32
      %7 = arith.muli %c2_i32, %arg5 : i32
      %c3_i32 = arith.constant 3 : i32
      %8 = arith.subi %c3_i32, %7 : i32
      %9 = arith.muli %arg0, %8 : i32
      %10 = arith.addi %arg5, %9 : i32
      %c0_6 = arith.constant 0 : index
      %11 = arith.index_cast %10 : i32 to index
      %c0_7 = arith.constant 0 : index
      %c0_8 = arith.constant 0 : index
      %12 = vector.load %arg1[%c0_6, %11, %c0_7, %c0_8] : memref<1x4x2x48xbf16, #tpu.memory_space<vmem>>, vector<1x1x2x48xbf16>
      %13 = vector.shape_cast %12 : vector<1x1x2x48xbf16> to vector<2x48xbf16>
      %14 = arith.extf %13 : vector<2x48xbf16> to vector<2x48xf32>
      %15 = arith.truncf %arg6 : vector<2x16xf32> to vector<2x16xbf16>
      %cst_9 = arith.constant dense<0.000000e+00> : vector<2x48xf32>
      %16 = tpu.matmul %15, %1, %cst_9 {dimension_numbers = #tpu.dot_dimension_numbers<[1], [0], [0], [1], [0, 0, 1, 1], [], []>} : vector<2x16xbf16>, vector<16x48xbf16>, vector<2x48xf32> -> vector<2x48xf32>
      %17 = vector.broadcast %3 : vector<1x48xf32> to vector<2x48xf32>
      %18 = arith.addf %16, %17 : vector<2x48xf32>
      %19 = vector.extract_strided_slice %14 {offsets = [0, 0], sizes = [2, 16], strides = [1, 1]} : vector<2x48xf32> to vector<2x16xf32>
      %20 = vector.extract_strided_slice %18 {offsets = [0, 0], sizes = [2, 16], strides = [1, 1]} : vector<2x48xf32> to vector<2x16xf32>
      %21 = arith.addf %19, %20 : vector<2x16xf32>
      %22 = arith.negf %21 : vector<2x16xf32>
      %23 = math.exp %22 : vector<2x16xf32>
      %cst_10 = arith.constant 1.000000e+00 : f32
      %24 = vector.broadcast %cst_10 : f32 to vector<2x16xf32>
      %25 = arith.addf %24, %23 : vector<2x16xf32>
      %26 = arith.divf %24, %25 : vector<2x16xf32>
      %27 = vector.extract_strided_slice %14 {offsets = [0, 16], sizes = [2, 16], strides = [1, 1]} : vector<2x48xf32> to vector<2x16xf32>
      %28 = vector.extract_strided_slice %18 {offsets = [0, 16], sizes = [2, 16], strides = [1, 1]} : vector<2x48xf32> to vector<2x16xf32>
      %29 = arith.addf %27, %28 : vector<2x16xf32>
      %30 = arith.negf %29 : vector<2x16xf32>
      %31 = math.exp %30 : vector<2x16xf32>
      %cst_11 = arith.constant 1.000000e+00 : f32
      %32 = vector.broadcast %cst_11 : f32 to vector<2x16xf32>
      %33 = arith.addf %32, %31 : vector<2x16xf32>
      %34 = arith.divf %32, %33 : vector<2x16xf32>
      %35 = vector.extract_strided_slice %14 {offsets = [0, 32], sizes = [2, 16], strides = [1, 1]} : vector<2x48xf32> to vector<2x16xf32>
      %36 = vector.extract_strided_slice %18 {offsets = [0, 32], sizes = [2, 16], strides = [1, 1]} : vector<2x48xf32> to vector<2x16xf32>
      %37 = arith.mulf %26, %36 : vector<2x16xf32>
      %38 = arith.addf %35, %37 : vector<2x16xf32>
      %39 = math.tanh %38 : vector<2x16xf32>
      %cst_12 = arith.constant 1.000000e+00 : f32
      %40 = vector.broadcast %cst_12 : f32 to vector<2x16xf32>
      %41 = arith.subf %40, %34 : vector<2x16xf32>
      %42 = arith.mulf %41, %39 : vector<2x16xf32>
      %43 = arith.mulf %34, %arg6 : vector<2x16xf32>
      %44 = arith.addf %42, %43 : vector<2x16xf32>
      %45 = arith.truncf %44 : vector<2x16xf32> to vector<2x16xbf16>
      %c0_13 = arith.constant 0 : index
      %46 = arith.index_cast %10 : i32 to index
      %c0_14 = arith.constant 0 : index
      %c0_15 = arith.constant 0 : index
      %47 = vector.load %arg4[%c0_13, %46, %c0_14, %c0_15] : memref<1x4x2x16xbf16, #tpu.memory_space<vmem>>, vector<1x1x2x16xbf16>
      %48 = vector.shape_cast %47 : vector<1x1x2x16xbf16> to vector<2x16xbf16>
      %49 = vector.shape_cast %45 : vector<2x16xbf16> to vector<1x1x2x16xbf16>
      tpu.vector_store %arg4[%c0_13, %46, %c0_14, %c0_15], %49 {strides = array<i32>} : memref<1x4x2x16xbf16, #tpu.memory_space<vmem>>, vector<1x1x2x16xbf16>,
      scf.yield %44 : vector<2x16xf32>
    }
    %c4_i32_5 = arith.constant 4 : i32
    return
  }
  func.func @transform_0(%arg0: i32) -> (i32, i32, i32, i32) {
    %c0_i32 = arith.constant 0 : i32
    %c0_i32_0 = arith.constant 0 : i32
    %c0_i32_1 = arith.constant 0 : i32
    %c0_i32_2 = arith.constant 0 : i32
    return %arg0, %c0_i32, %c0_i32_0, %c0_i32_1 : i32, i32, i32, i32
  }
  func.func @transform_1(%arg0: i32) -> (i32, i32, i32) {
    %c0_i32 = arith.constant 0 : i32
    %c0_i32_0 = arith.constant 0 : i32
    %c0_i32_1 = arith.constant 0 : i32
    return %arg0, %c0_i32, %c0_i32_0 : i32, i32, i32
  }
  func.func @transform_2(%arg0: i32) -> (i32, i32, i32) {
    %c0_i32 = arith.constant 0 : i32
    %c0_i32_0 = arith.constant 0 : i32
    %c0_i32_1 = arith.constant 0 : i32
    return %arg0, %c0_i32, %c0_i32_0 : i32, i32, i32
  }
  func.func @transform_3(%arg0: i32) -> (i32, i32, i32, i32) {
    %c0_i32 = arith.constant 0 : i32
    %c0_i32_0 = arith.constant 0 : i32
    %c0_i32_1 = arith.constant 0 : i32
    %c0_i32_2 = arith.constant 0 : i32
    return %arg0, %c0_i32, %c0_i32_0, %c0_i32_1 : i32, i32, i32, i32
  }
}

module attributes {stable_mosaic.version = 11 : i64} {
  func.func @_glu_heads_kernel(%arg0: i32, %arg1: memref<8x16xbf16, #tpu.memory_space<vmem>>, %arg2: memref<8x16xbf16, #tpu.memory_space<vmem>>, %arg3: memref<16x16xbf16, #tpu.memory_space<vmem>>, %arg4: memref<1x16xf32, #tpu.memory_space<vmem>>, %arg5: memref<16x16xbf16, #tpu.memory_space<vmem>>, %arg6: memref<1x16xf32, #tpu.memory_space<vmem>>, %arg7: memref<8x16xf32, #tpu.memory_space<vmem>>, %arg8: memref<8x16xf32, #tpu.memory_space<vmem>>) attributes {dimension_semantics = [#tpu.dimension_semantics<parallel>], iteration_bounds = array<i64: 1>, scalar_prefetch = 0 : i64, scratch_operands = 0 : i64, tpu.core_type = #tpu.core_type<tc>, window_params = [{transform_indices = @transform_0, window_bounds = array<i64: 8, 16>}, {transform_indices = @transform_1, window_bounds = array<i64: 8, 16>}, {pipeline_mode = #tpu.pipeline_mode<synchronous>, transform_indices = @transform_2, window_bounds = array<i64: 16, 16>}, {pipeline_mode = #tpu.pipeline_mode<synchronous>, transform_indices = @transform_3, window_bounds = array<i64: 1, 16>}, {pipeline_mode = #tpu.pipeline_mode<synchronous>, transform_indices = @transform_4, window_bounds = array<i64: 16, 16>}, {pipeline_mode = #tpu.pipeline_mode<synchronous>, transform_indices = @transform_5, window_bounds = array<i64: 1, 16>}, {transform_indices = @transform_6, window_bounds = array<i64: 8, 16>}, {transform_indices = @transform_7, window_bounds = array<i64: 8, 16>}]} {
    %c0 = arith.constant 0 : index
    %c0_0 = arith.constant 0 : index
    %0 = vector.load %arg2[%c0, %c0_0] : memref<8x16xbf16, #tpu.memory_space<vmem>>, vector<8x16xbf16>
    %1 = arith.extf %0 : vector<8x16xbf16> to vector<8x16xf32>
    %2 = math.tanh %1 : vector<8x16xf32>
    %c0_1 = arith.constant 0 : index
    %c0_2 = arith.constant 0 : index
    %3 = vector.load %arg1[%c0_1, %c0_2] : memref<8x16xbf16, #tpu.memory_space<vmem>>, vector<8x16xbf16>
    %4 = arith.extf %3 : vector<8x16xbf16> to vector<8x16xf32>
    %5 = math.tanh %4 : vector<8x16xf32>
    %6 = arith.mulf %2, %5 : vector<8x16xf32>
    %7 = arith.truncf %6 : vector<8x16xf32> to vector<8x16xbf16>
    %c0_3 = arith.constant 0 : index
    %c0_4 = arith.constant 0 : index
    %8 = vector.load %arg3[%c0_3, %c0_4] : memref<16x16xbf16, #tpu.memory_space<vmem>>, vector<16x16xbf16>
    %cst = arith.constant dense<0.000000e+00> : vector<8x16xf32>
    %9 = tpu.matmul %7, %8, %cst {dimension_numbers = #tpu.dot_dimension_numbers<[1], [0], [0], [1], [0, 0, 1, 1], [], []>} : vector<8x16xbf16>, vector<16x16xbf16>, vector<8x16xf32> -> vector<8x16xf32>
    %c0_5 = arith.constant 0 : index
    %c0_6 = arith.constant 0 : index
    %10 = vector.load %arg4[%c0_5, %c0_6] : memref<1x16xf32, #tpu.memory_space<vmem>>, vector<1x16xf32>
    %11 = vector.broadcast %10 : vector<1x16xf32> to vector<8x16xf32>
    %12 = arith.addf %9, %11 : vector<8x16xf32>
    %cst_7 = arith.constant 0.000000e+00 : f32
    %13 = vector.broadcast %cst_7 : f32 to vector<8x16xf32>
    %14 = arith.maximumf %12, %13 : vector<8x16xf32>
    %c0_8 = arith.constant 0 : index
    %c0_9 = arith.constant 0 : index
    %15 = vector.load %arg7[%c0_8, %c0_9] : memref<8x16xf32, #tpu.memory_space<vmem>>, vector<8x16xf32>
    tpu.vector_store %arg7[%c0_8, %c0_9], %14 {strides = array<i32>} : memref<8x16xf32, #tpu.memory_space<vmem>>, vector<8x16xf32>,
    %c0_10 = arith.constant 0 : index
    %c0_11 = arith.constant 0 : index
    %16 = vector.load %arg5[%c0_10, %c0_11] : memref<16x16xbf16, #tpu.memory_space<vmem>>, vector<16x16xbf16>
    %cst_12 = arith.constant dense<0.000000e+00> : vector<8x16xf32>
    %17 = tpu.matmul %7, %16, %cst_12 {dimension_numbers = #tpu.dot_dimension_numbers<[1], [0], [0], [1], [0, 0, 1, 1], [], []>} : vector<8x16xbf16>, vector<16x16xbf16>, vector<8x16xf32> -> vector<8x16xf32>
    %c0_13 = arith.constant 0 : index
    %c0_14 = arith.constant 0 : index
    %18 = vector.load %arg6[%c0_13, %c0_14] : memref<1x16xf32, #tpu.memory_space<vmem>>, vector<1x16xf32>
    %19 = vector.broadcast %18 : vector<1x16xf32> to vector<8x16xf32>
    %20 = arith.addf %17, %19 : vector<8x16xf32>
    %cst_15 = arith.constant 0.000000e+00 : f32
    %21 = vector.broadcast %cst_15 : f32 to vector<8x16xf32>
    %22 = arith.maximumf %20, %21 : vector<8x16xf32>
    %c0_16 = arith.constant 0 : index
    %c0_17 = arith.constant 0 : index
    %23 = vector.load %arg8[%c0_16, %c0_17] : memref<8x16xf32, #tpu.memory_space<vmem>>, vector<8x16xf32>
    tpu.vector_store %arg8[%c0_16, %c0_17], %22 {strides = array<i32>} : memref<8x16xf32, #tpu.memory_space<vmem>>, vector<8x16xf32>,
    return
  }
  func.func @transform_0(%arg0: i32) -> (i32, i32) {
    %c0_i32 = arith.constant 0 : i32
    %c0_i32_0 = arith.constant 0 : i32
    return %arg0, %c0_i32 : i32, i32
  }
  func.func @transform_1(%arg0: i32) -> (i32, i32) {
    %c0_i32 = arith.constant 0 : i32
    %c0_i32_0 = arith.constant 0 : i32
    return %arg0, %c0_i32 : i32, i32
  }
  func.func @transform_2(%arg0: i32) -> (i32, i32) {
    %c0_i32 = arith.constant 0 : i32
    %c0_i32_0 = arith.constant 0 : i32
    %c0_i32_1 = arith.constant 0 : i32
    return %c0_i32, %c0_i32_0 : i32, i32
  }
  func.func @transform_3(%arg0: i32) -> (i32, i32) {
    %c0_i32 = arith.constant 0 : i32
    %c0_i32_0 = arith.constant 0 : i32
    %c0_i32_1 = arith.constant 0 : i32
    return %c0_i32, %c0_i32_0 : i32, i32
  }
  func.func @transform_4(%arg0: i32) -> (i32, i32) {
    %c0_i32 = arith.constant 0 : i32
    %c0_i32_0 = arith.constant 0 : i32
    %c0_i32_1 = arith.constant 0 : i32
    return %c0_i32, %c0_i32_0 : i32, i32
  }
  func.func @transform_5(%arg0: i32) -> (i32, i32) {
    %c0_i32 = arith.constant 0 : i32
    %c0_i32_0 = arith.constant 0 : i32
    %c0_i32_1 = arith.constant 0 : i32
    return %c0_i32, %c0_i32_0 : i32, i32
  }
  func.func @transform_6(%arg0: i32) -> (i32, i32) {
    %c0_i32 = arith.constant 0 : i32
    %c0_i32_0 = arith.constant 0 : i32
    return %arg0, %c0_i32 : i32, i32
  }
  func.func @transform_7(%arg0: i32) -> (i32, i32) {
    %c0_i32 = arith.constant 0 : i32
    %c0_i32_0 = arith.constant 0 : i32
    return %arg0, %c0_i32 : i32, i32
  }
}

module attributes {stable_mosaic.version = 11 : i64} {
  func.func @_linear_kernel(%arg0: i32, %arg1: memref<8x16xf32, #tpu.memory_space<vmem>>, %arg2: memref<16x2xbf16, #tpu.memory_space<vmem>>, %arg3: memref<1x2xf32, #tpu.memory_space<vmem>>, %arg4: memref<8x2xf32, #tpu.memory_space<vmem>>) attributes {dimension_semantics = [#tpu.dimension_semantics<parallel>], iteration_bounds = array<i64: 1>, scalar_prefetch = 0 : i64, scratch_operands = 0 : i64, tpu.core_type = #tpu.core_type<tc>, window_params = [{transform_indices = @transform_0, window_bounds = array<i64: 8, 16>}, {pipeline_mode = #tpu.pipeline_mode<synchronous>, transform_indices = @transform_1, window_bounds = array<i64: 16, 2>}, {pipeline_mode = #tpu.pipeline_mode<synchronous>, transform_indices = @transform_2, window_bounds = array<i64: 1, 2>}, {transform_indices = @transform_3, window_bounds = array<i64: 8, 2>}]} {
    %c0 = arith.constant 0 : index
    %c0_0 = arith.constant 0 : index
    %0 = vector.load %arg1[%c0, %c0_0] : memref<8x16xf32, #tpu.memory_space<vmem>>, vector<8x16xf32>
    %1 = arith.truncf %0 : vector<8x16xf32> to vector<8x16xbf16>
    %c0_1 = arith.constant 0 : index
    %c0_2 = arith.constant 0 : index
    %2 = vector.load %arg2[%c0_1, %c0_2] : memref<16x2xbf16, #tpu.memory_space<vmem>>, vector<16x2xbf16>
    %cst = arith.constant dense<0.000000e+00> : vector<8x2xf32>
    %3 = tpu.matmul %1, %2, %cst {dimension_numbers = #tpu.dot_dimension_numbers<[1], [0], [0], [1], [0, 0, 1, 1], [], []>} : vector<8x16xbf16>, vector<16x2xbf16>, vector<8x2xf32> -> vector<8x2xf32>
    %c0_3 = arith.constant 0 : index
    %c0_4 = arith.constant 0 : index
    %4 = vector.load %arg3[%c0_3, %c0_4] : memref<1x2xf32, #tpu.memory_space<vmem>>, vector<1x2xf32>
    %5 = vector.broadcast %4 : vector<1x2xf32> to vector<8x2xf32>
    %6 = arith.addf %3, %5 : vector<8x2xf32>
    %c0_5 = arith.constant 0 : index
    %c0_6 = arith.constant 0 : index
    %7 = vector.load %arg4[%c0_5, %c0_6] : memref<8x2xf32, #tpu.memory_space<vmem>>, vector<8x2xf32>
    tpu.vector_store %arg4[%c0_5, %c0_6], %6 {strides = array<i32>} : memref<8x2xf32, #tpu.memory_space<vmem>>, vector<8x2xf32>,
    return
  }
  func.func @transform_0(%arg0: i32) -> (i32, i32) {
    %c0_i32 = arith.constant 0 : i32
    %c0_i32_0 = arith.constant 0 : i32
    return %arg0, %c0_i32 : i32, i32
  }
  func.func @transform_1(%arg0: i32) -> (i32, i32) {
    %c0_i32 = arith.constant 0 : i32
    %c0_i32_0 = arith.constant 0 : i32
    %c0_i32_1 = arith.constant 0 : i32
    return %c0_i32, %c0_i32_0 : i32, i32
  }
  func.func @transform_2(%arg0: i32) -> (i32, i32) {
    %c0_i32 = arith.constant 0 : i32
    %c0_i32_0 = arith.constant 0 : i32
    %c0_i32_1 = arith.constant 0 : i32
    return %c0_i32, %c0_i32_0 : i32, i32
  }
  func.func @transform_3(%arg0: i32) -> (i32, i32) {
    %c0_i32 = arith.constant 0 : i32
    %c0_i32_0 = arith.constant 0 : i32
    return %arg0, %c0_i32 : i32, i32
  }
}

module attributes {stable_mosaic.version = 11 : i64} {
  func.func @_linear_kernel(%arg0: i32, %arg1: memref<8x16xf32, #tpu.memory_space<vmem>>, %arg2: memref<16x6xbf16, #tpu.memory_space<vmem>>, %arg3: memref<1x6xf32, #tpu.memory_space<vmem>>, %arg4: memref<8x6xf32, #tpu.memory_space<vmem>>) attributes {dimension_semantics = [#tpu.dimension_semantics<parallel>], iteration_bounds = array<i64: 1>, scalar_prefetch = 0 : i64, scratch_operands = 0 : i64, tpu.core_type = #tpu.core_type<tc>, window_params = [{transform_indices = @transform_0, window_bounds = array<i64: 8, 16>}, {pipeline_mode = #tpu.pipeline_mode<synchronous>, transform_indices = @transform_1, window_bounds = array<i64: 16, 6>}, {pipeline_mode = #tpu.pipeline_mode<synchronous>, transform_indices = @transform_2, window_bounds = array<i64: 1, 6>}, {transform_indices = @transform_3, window_bounds = array<i64: 8, 6>}]} {
    %c0 = arith.constant 0 : index
    %c0_0 = arith.constant 0 : index
    %0 = vector.load %arg1[%c0, %c0_0] : memref<8x16xf32, #tpu.memory_space<vmem>>, vector<8x16xf32>
    %1 = arith.truncf %0 : vector<8x16xf32> to vector<8x16xbf16>
    %c0_1 = arith.constant 0 : index
    %c0_2 = arith.constant 0 : index
    %2 = vector.load %arg2[%c0_1, %c0_2] : memref<16x6xbf16, #tpu.memory_space<vmem>>, vector<16x6xbf16>
    %cst = arith.constant dense<0.000000e+00> : vector<8x6xf32>
    %3 = tpu.matmul %1, %2, %cst {dimension_numbers = #tpu.dot_dimension_numbers<[1], [0], [0], [1], [0, 0, 1, 1], [], []>} : vector<8x16xbf16>, vector<16x6xbf16>, vector<8x6xf32> -> vector<8x6xf32>
    %c0_3 = arith.constant 0 : index
    %c0_4 = arith.constant 0 : index
    %4 = vector.load %arg3[%c0_3, %c0_4] : memref<1x6xf32, #tpu.memory_space<vmem>>, vector<1x6xf32>
    %5 = vector.broadcast %4 : vector<1x6xf32> to vector<8x6xf32>
    %6 = arith.addf %3, %5 : vector<8x6xf32>
    %7 = math.tanh %6 : vector<8x6xf32>
    %c0_5 = arith.constant 0 : index
    %c0_6 = arith.constant 0 : index
    %8 = vector.load %arg4[%c0_5, %c0_6] : memref<8x6xf32, #tpu.memory_space<vmem>>, vector<8x6xf32>
    tpu.vector_store %arg4[%c0_5, %c0_6], %7 {strides = array<i32>} : memref<8x6xf32, #tpu.memory_space<vmem>>, vector<8x6xf32>,
    return
  }
  func.func @transform_0(%arg0: i32) -> (i32, i32) {
    %c0_i32 = arith.constant 0 : i32
    %c0_i32_0 = arith.constant 0 : i32
    return %arg0, %c0_i32 : i32, i32
  }
  func.func @transform_1(%arg0: i32) -> (i32, i32) {
    %c0_i32 = arith.constant 0 : i32
    %c0_i32_0 = arith.constant 0 : i32
    %c0_i32_1 = arith.constant 0 : i32
    return %c0_i32, %c0_i32_0 : i32, i32
  }
  func.func @transform_2(%arg0: i32) -> (i32, i32) {
    %c0_i32 = arith.constant 0 : i32
    %c0_i32_0 = arith.constant 0 : i32
    %c0_i32_1 = arith.constant 0 : i32
    return %c0_i32, %c0_i32_0 : i32, i32
  }
  func.func @transform_3(%arg0: i32) -> (i32, i32) {
    %c0_i32 = arith.constant 0 : i32
    %c0_i32_0 = arith.constant 0 : i32
    return %arg0, %c0_i32 : i32, i32
  }
}

</mosaic_0001>

<bundles_post_ra>
// kernel: _lambda_.9
= control target key start
LH: loop header
LB: loop body
LE: loop exit
PB: predicated region body
PF: predicated region fallthrough
CT: control target
= control target key end

     0   :  { %s450_s12 = smov 0   ;;  %s452_s13 = smov 0   ;;  %s486_s0 = inlined_call_operand.vmem [shape: bf16[8,32], index: 0, kind: input, shape index: {}]   ;;  %s487_s1 = inlined_call_operand.vmem [shape: bf16[2,32,48], index: 1, kind: input, shape index: {}]   ;;  %s488_s2 = inlined_call_operand.vmem [shape: f32[2,1,48], index: 2, kind: input, shape index: {}]   ;;  %s489_s3 = inlined_call_operand.vmem [shape: bf16[2,8,48], index: 3, kind: output, shape index: {}]  }
   0x1   :  { %s454_s14 = smov 0  }
   0x2 LB: > { %s25_s15 = sadd.s32 1, %s424_s13  ;;  %p363_p0 = scmp.ge.s32.totalorder %s428_s14, 1  ;;  %s428_s14 = sphi %s454_s14, %s13_s14   ;;  %s424_s13 = sphi %s452_s13, %s491_s13   ;;  %s420_s12 = sphi %s450_s12, %s490_s12  }
   0x3   : > { %p27_p1 = scmp.ge.s32.totalorder %s25_s15, 2  ;;  %p168_p2 = scmp.lt.s32.totalorder %s428_s14, 3 }
   0x5   : > { %s493_s15 = smov (%p27_p1, %s25_s15), 0  ;;  %p169_p3 = pnand %p363_p0, %p168_p2 }
   0x6   : > { %p205_p4 = scmp.lt.s32.totalorder (!%p169_p3), %s420_s12, 1 }
   0x7   : > { %172 = sbr.rel (%p169_p3) target bundleno = 157 (0x9d), region = 32 }
   0xc   : > { %s495_s12 = smov (!%p205_p4, %s420_s12), 1  ;;  %v221_v2 = vld [vmem:[%s486_s0] sm:$0xf]  ;;  %vm242_vm0 = vcmask 261120   ;;  %vm260_vm1 = vcmask 388096  }
   0xd   : > { %s378_s16 = sshll.u32 %s495_s12, 4  ;;  %s212_s19 = scalar_lea.vmem %s488_s2, %s495_s12 }
   0xe   : > { %s209_s22 = scalar_lea.vmem %s487_s1, %s378_s16  ;;  %v405_v3 = vld [vmem:[%s212_s19] ss:$0 sm:$0xff]  ;;  %s366_s25 = sshll.u32 %s495_s12, 2 }
   0xf   : > { %v380_v0 = vld [vmem:[%s209_s22 + $0x8] sm:$0xff]  ;;  %v379_v1 = vld [vmem:[%s209_s22] sm:$0xff]  ;;  %s219_s28 = scalar_lea.vmem %s489_s3, %s366_s25 }
  0x10   : > { %252 = vmatpush.bf16.msra.mxu0 %v380_v0 }
  0x14   : > { %253 = vmatpush.bf16.msra.mxu0 %v379_v1 }
  0x17   : > { %375 = vmatmul.msk.bf16.vlgmr.msra.gmra.mxu0 %vm242_vm0, %v221_v2 }
  0x94   : > { %v255_v4 = vpop.f32.mrf.mxu0 }
  0x95   : > { %v256_v5 = vadd.f32 %v405_v3, %v255_v4 }
  0x97   : > { %v259_v6 = vpack.c.bf16 %v256_v5, %v256_v5 }
  0x99   : > { %261 = vst.msk [vmem:[%s219_s28] sm:$0xf] %vm260_vm1, %v259_v6 }
  0x9c   : > { %v257_v7 = vpop.f32.mrf.mxu0 }
  0x9d PF: > { %s13_s14 = sadd.s32 1, %s428_s14   ;;  %s490_s12 = smov %s424_s13 }
  0x9e   : > { %p10_p5 = scmp.ge.s32.totalorder %s13_s14, 4   ;;  %s491_s13 = smov %s493_s15 }
  0xa0   :  { %12 = sbr.rel (!%p10_p5) target bundleno = 2 (0x2), region = 68 }

// kernel: _lambda_.10
= control target key start
LH: loop header
LB: loop body
LE: loop exit
PB: predicated region body
PF: predicated region fallthrough
CT: control target
= control target key end

     0   :  { %s487_s12 = smov 0   ;;  %s552_s0 = inlined_call_operand.vmem [shape: bf16[2,4,2,48], index: 0, kind: input, shape index: {}]   ;;  %s553_s1 = inlined_call_operand.vmem [shape: bf16[2,16,48], index: 1, kind: input, shape index: {}]   ;;  %s554_s2 = inlined_call_operand.vmem [shape: f32[2,1,48], index: 2, kind: input, shape index: {}]   ;;  %s555_s3 = inlined_call_operand.vmem [shape: bf16[2,4,2,16], index: 3, kind: output, shape index: {}]  }
   0x1 LB: > { %s493_s13 = sadd.s32 4294967295, %s454_s12   ;;  %p391_p0 = scmp.ge.s32.totalorder %s454_s12, 1  ;;  %s454_s12 = sphi %s487_s12, %s13_s12  }
   0x2   : > { %p154_p1 = scmp.lt.s32.totalorder %s454_s12, 3 }
   0x4   : > { %p155_p2 = pnand %p391_p0, %p154_p1 }
   0x5   : > { %p184_p3 = scmp.lt.s32.totalorder (!%p155_p2), %s493_s13, 1  ;;  %s523_s29 = smov (!%p155_p2), 0  }
   0x6   : > { %158 = sbr.rel (%p155_p2) target bundleno = 719 (0x2cf), region = 32 }
   0xb   : > { %s185_s14 = scalar_select %p184_p3, %s493_s13, 1  ;;  %v521_v3 = vmov 0.0  }
   0xd   : > { %s392_s15 = sshll.u32 %s185_s14, 2  ;;  %s405_s16 = sshll.u32 %s185_s14, 3 }
   0xe   : > { %s502_s19 = scalar_lea.vmem %s552_s0, %s392_s15  ;;  %s192_s22 = scalar_lea.vmem %s553_s1, %s405_s16 }
   0xf   : > { %s195_s25 = scalar_lea.vmem %s554_s2, %s185_s14  ;;  %s513_s28 = scalar_lea.vmem %s555_s3, %s392_s15  ;;  %v515_v0 = vld [vmem:[%s192_s22] sm:$0xf]  ;;  %v517_v1 = vld [vmem:[%s192_s22] sm:$0xf0] }
  0x10   : > { %v519_v2 = vld [vmem:[%s195_s25] sm:$0x1] }
  0x11 LB: >> { %v400_v4 = vor.u32 %v517_v1, %v515_v0  ;;  %v218_v5 = vpack.c.bf16 %v458_v3, %v458_v3  ;;  %s464_s30 = smov 112   ;;  %vm231_vm0 = vcmask 130048   ;;  %v220_v7 = vperm.slane %v519_v2, 0  ;;  %s465_s4 = smov 96   ;;  %s462_s29 = sphi %s523_s29, %s209_s29   ;;  %v458_v3 = vphi %v521_v3, %v286_v3  }
  0x12   : >> { %s396_s5 = sshll.u32 %s462_s29, 1  ;;  %s466_s10 = smov 32   ;;  %vm290_vm5 = vcmask 1040384   ;;  %vm299_vm6 = vcmask 122880  }
  0x13   : >> { %242 = vmatpush.bf16.msra.mxu0 %v400_v4  ;;  %223 = vrot.lane.b32.xlu0 %v218_v5, %s464_s30  ;;  %s212_s6 = ssub.s32 3, %s396_s5 }
  0x14   : >> { %s213_s7 = smul.u32 %s493_s13, %s212_s6 }
  0x16   : >> { %s536_s8 = sadd.s32 %s462_s29, %s213_s7  ;;  %s209_s29 = sadd.s32 1, %s462_s29  }
  0x17   : >> { %s215_s9 = scalar_lea.vmem %s502_s19, %s536_s8  ;;  %s298_s11 = scalar_lea.vmem %s513_s28, %s536_s8 }
  0x18   : >> { %v216_v11 = vld [vmem:[%s215_s9] sm:$0x1]  ;;  %p206_p4 = scmp.ge.s32.totalorder %s209_s29, 4  }
  0x19   : >> { %v217_v12 = vunpack.c.l.bf16 %v216_v11 }
  0x85   : >> { %v224_v6 = vpop.permute.xlu0 %223 }
  0x86   : >> { %401 = vmatmul.msk.bf16.vlgmr.msra.gmra.mxu0 %vm231_vm0, %v224_v6 }
 0x103   : >> { %v244_v8 = vpop.f32.mrf.mxu0 }
 0x104   : >> { %v245_v9 = vadd.f32 %v244_v8, %v220_v7 }
 0x106   : >> { %269 = vrot.lane.b32.xlu0 %v245_v9, %s465_s4  ;;  %v248_v13 = vadd.f32 %v245_v9, %v217_v12 }
 0x108   : >> { %v402_v14 = vmul.f32 -1.442695, %v248_v13 }
 0x10a   : >> { %434 = vpow2.f32 %v402_v14 }
 0x10b   : >> { %v246_v10 = vpop.f32.mrf.mxu0 }
 0x110   : >> { %v435_v15 = vpop.eup %434 }
 0x111   : >> { %v252_v16 = vadd.f32 1.0, %v435_v15 }
 0x113   : >> { %436 = vrcp.f32 %v252_v16  ;;  %v264_v22 = vand.u32 2147483648, %v252_v16  ;;  %vm258_vm2 = vweird.f32 %v252_v16  ;;  %v262_v23 = vand.u32 2147483647, %v252_v16 }
 0x115   : >> { %v265_v25 = vor.u32 1.1754944e-38, %v264_v22  ;;  %vm263_vm4 = vcmp.eq.f32.partialorder %v262_v23, 8.507059e+37 }
 0x119   : >> { %v437_v17 = vpop.eup %436 }
 0x11a   : >> { %v254_v18 = vmul.f32 %v437_v17, %v252_v16  ;;  %vm259_vm1 = vweird.f32 %v437_v17 }
 0x11b   : >> { %vm260_vm3 = vmor %vm258_vm2, %vm259_vm1 }
 0x11c   : >> { %v255_v19 = vsub.f32 1.0, %v254_v18 }
 0x11e   : >> { %v256_v20 = vmul.f32 %v437_v17, %v255_v19 }
 0x120   : >> { %v257_v21 = vadd.f32 %v437_v17, %v256_v20 }
 0x122   : >> { %v261_v24 = vsel %vm260_vm3, %v437_v17, %v257_v21 }
 0x123   : >> { %v266_v27 = vsel %vm263_vm4, %v265_v25, %v261_v24 }
 0x124   : >> { %v279_v32 = vsub.f32 1.0, %v266_v27  ;;  %v285_v34 = vmul.f32 %v458_v3, %v266_v27 }
 0x178   : >> { %v270_v26 = vpop.permute.xlu0 %269 }
 0x179   : >> { %v272_v28 = vmul.f32 %v270_v26, %v266_v27 }
 0x17b   : >> { %274 = vrot.lane.b32.xlu1 %v272_v28, %s466_s10 }
 0x1ed   : >> { %v275_v29 = vpop.permute.xlu1 %274 }
 0x1ee   : >> { %v277_v30 = vadd.f32 %v275_v29, %v217_v12 }
 0x1f0   : >> { %438 = vtanh.f32 %v277_v30 }
 0x1f6   : >> { %v439_v31 = vpop.eup %438 }
 0x1f7   : >> { %281 = vrot.lane.b32.xlu1 %v439_v31, %s464_s30 }
 0x269   : >> { %v282_v33 = vpop.permute.xlu1 %281 }
 0x26a   : >> { %v284_v35 = vmul.f32 %v282_v33, %v279_v32 }
 0x26c   : >> { %v286_v3 = vadd.f32 %v285_v34, %v284_v35  }
 0x26e   : >> { %v287_v36 = vpack.c.bf16 %v286_v3, %v286_v3 }
 0x270   : >> { %v289_v37 = vrot.slane %v287_v36, 3 }
 0x272   : >> { %v293_v38 = vsel %vm290_vm5, %v287_v36, %v289_v37 }
 0x273   : >> { %295 = vrot.lane.b32.xlu2 %v293_v38, %s464_s30 }
 0x2ca   : > { %208 = sbr.rel (!%p206_p4) target bundleno = 17 (0x11), region = 77 }
 0x2cd   : >> { %v296_v39 = vpop.permute.xlu2 %295 }
 0x2ce   : >> { %300 = vst.msk [vmem:[%s298_s11] sm:$0x1] %vm299_vm6, %v296_v39 }
 0x2cf PF: > { %s13_s12 = sadd.s32 1, %s454_s12  }
 0x2d0   : > { %p10_p5 = scmp.ge.s32.totalorder %s13_s12, 4  }
 0x2d2   :  { %12 = sbr.rel (!%p10_p5) target bundleno = 1 (0x1), region = 88 }

// kernel: _lambda_.8
= control target key start
LH: loop header
LB: loop body
LE: loop exit
PB: predicated region body
PF: predicated region fallthrough
CT: control target
= control target key end

     0   :  { %s1994_s15 = smov 0   ;;  %s2503_s0 = inlined_call_operand.vmem [shape: bf16[2,10,10,8], index: 0, kind: input, shape index: {}]   ;;  %s2504_s1 = inlined_call_operand.vmem [shape: bf16[72,8], index: 1, kind: input, shape index: {}]   ;;  %s2505_s2 = inlined_call_operand.vmem [shape: f32[1,8], index: 2, kind: input, shape index: {}]   ;;  %s2506_s3 = inlined_call_operand.vmem [shape: f32[1,8], index: 3, kind: input, shape index: {}]   ;;  %s2507_s4 = inlined_call_operand.vmem [shape: bf16[2,4,32], index: 4, kind: output, shape index: {}]  }
   0x1 LB: > { %s1730_s16 = sadd.s32 4294967295, %s1959_s15   ;;  %p1734_p0 = scmp.ge.s32.totalorder %s1959_s15, 1  ;;  %s1959_s15 = sphi %s1994_s15, %s14_s15  }
   0x2   : > { %p162_p1 = scmp.lt.s32.totalorder %s1959_s15, 3 }
   0x4   : > { %p163_p2 = pnand %p1734_p0, %p162_p1 }
   0x5   : > { %p187_p3 = scmp.lt.s32.totalorder (!%p163_p2), %s1730_s16, 1  ;;  %s1961_s21 = smov (!%p163_p2), 16  }
   0x6   : > { %166 = sbr.rel (%p163_p2) target bundleno = 620 (0x26c), region = 36  ;;  %s1962_s22 = smov (!%p163_p2), 8  }
   0x7   : > { %s1963_s23 = smov (!%p163_p2), 24   ;;  %s1964_s24 = smov (!%p163_p2), 32  }
   0x8   : > { %s1965_s25 = smov (!%p163_p2), 40   ;;  %s1966_s26 = smov (!%p163_p2), 48  }
   0x9   : > { %s1967_s27 = smov (!%p163_p2), 56   ;;  %s1968_s28 = smov (!%p163_p2), 64  }
   0xb   : > { %s2513_s16 = smov (!%p187_p3, %s1730_s16), 1  ;;  %vm410_vm0 = vcmask 1042432   ;;  %vm411_vm1 = vcmask 1046532   ;;  %vm230_vm3 = vsmask.f32 3328  ;;  %vm205_vm6 = vcmask 60416  }
   0xc   : > { %s1934_s17 = smul.u32 80, %s2513_s16  ;;  %vm2010_vm2 = vmor %vm410_vm0, %vm411_vm1  ;;  %vm231_vm4 = vsmask.f32 7440  ;;  %vm369_vm7 = vcmask 126016   ;;  %vm469_vm8 = vcmask 191616   ;;  %vm519_vm9 = vcmask 257216  }
   0xd   : > { %vm2034_vm5 = vmor %vm230_vm3, %vm231_vm4  ;;  %vm680_vm10 = vcmask 322816   ;;  %vm777_vm11 = vcmask 388416   ;;  %vm827_vm12 = vcmask 454016   ;;  %vm1171_vm13 = vcmask 1043456   ;;  %s1736_s19 = sshll.u32 %s2513_s16, 1 }
   0xe   : > { %s2008_s20 = scalar_lea.vmem %s2503_s0, %s1934_s17  ;;  %vm988_vm14 = vcmask 519616   ;;  %vm1085_vm15 = vcmask 585216   ;;  %vm1158_vm0 = vcmask 588800   ;;  %vm1460_vm1 = vcmask 1041408  }
   0xf   : > { %v392_v1 = vld [vmem:[%s2008_s20 + $0x38] sm:$0xe]  ;;  %v393_v2 = vld [vmem:[%s2008_s20 + $0x3c] sm:$0x1]  ;;  %v390_v3 = vld [vmem:[%s2008_s20 + $0x30] sm:$0xe] }
  0x10   : > { %v1744_v4 = vrot.slane %v392_v1, 9  ;;  %v443_v5 = vrot.slane %v393_v2, 5  ;;  %v391_v6 = vld [vmem:[%s2008_s20 + $0x34] sm:$0x1]  ;;  %v1743_v7 = vrot.slane %v390_v3, 9  ;;  %vm1496_vm3 = vcmask 1042434  }
  0x11   : > { %v439_v8 = vrot.slane %v391_v6, 5  ;;  %v226_v9 = vld [vmem:[%s2008_s20 + $0x30] sm:$0xf]  ;;  %v227_v10 = vld [vmem:[%s2008_s20 + $0x34] sm:$0x1]  ;;  %vm1499_vm4 = vcmask 1043459  }
  0x12   : > { %v444_v11 = vsel %vm2010_vm2, %v1744_v4, %v443_v5  ;;  %v318_v12 = vshrl.u32 %v226_v9, 16  ;;  %v321_v13 = vshll.u32 %v226_v9, 16  ;;  %v327_v14 = vshll.u32 %v227_v10, 16  ;;  %v222_v15 = vld [vmem:[%s2008_s20 + $0x20] sm:$0xf] }
  0x13   : > { %459 = vrot.lane.b32.xlu1 %v444_v11, %s1961_s21  ;;  %v440_v16 = vsel %vm2010_vm2, %v1743_v7, %v439_v8  ;;  %v223_v17 = vld [vmem:[%s2008_s20 + $0x24] sm:$0x1]  ;;  %v290_v18 = vshrl.u32 %v222_v15, 16  ;;  %v293_v19 = vshll.u32 %v222_v15, 16  ;;  %v228_v20 = vld [vmem:[%s2008_s20 + $0x38] sm:$0xf] }
  0x14   : > { %457 = vrot.lane.b32.xlu0 %v440_v16, %s1961_s21  ;;  %v320_v21 = vrot.slane %v318_v12, 4  ;;  %v323_v22 = vrot.slane %v321_v13, 5  ;;  %v299_v23 = vshll.u32 %v223_v17, 16  ;;  %v229_v24 = vld [vmem:[%s2008_s20 + $0x3c] sm:$0x1]  ;;  %v332_v27 = vshrl.u32 %v228_v20, 16 }
  0x15   : > { %v292_v25 = vrot.slane %v290_v18, 4  ;;  %v295_v26 = vrot.slane %v293_v19, 5  ;;  %v335_v28 = vshll.u32 %v228_v20, 16  ;;  %v224_v29 = vld [vmem:[%s2008_s20 + $0x28] sm:$0xf]  ;;  %v329_v31 = vrot.slane %v327_v14, 5 }
  0x16   : > { %v324_v30 = vor.u32 %v323_v22, %v320_v21  ;;  %v301_v32 = vrot.slane %v299_v23, 5  ;;  %v225_v33 = vld [vmem:[%s2008_s20 + $0x2c] sm:$0x1]  ;;  %v304_v34 = vshrl.u32 %v224_v29, 16  ;;  %v334_v37 = vrot.slane %v332_v27, 4 }
  0x17   : > { %v296_v36 = vor.u32 %v295_v26, %v292_v25  ;;  %v337_v38 = vrot.slane %v335_v28, 5  ;;  %v307_v39 = vshll.u32 %v224_v29, 16  ;;  %v386_v40 = vld [vmem:[%s2008_s20 + $0x20] sm:$0xe]  ;;  %v341_v42 = vshll.u32 %v229_v24, 16 }
  0x18   : > { %v325_v41 = vrot.slane %v324_v30, 4  ;;  %v306_v43 = vrot.slane %v304_v34, 4  ;;  %v313_v44 = vshll.u32 %v225_v33, 16  ;;  %v387_v45 = vld [vmem:[%s2008_s20 + $0x24] sm:$0x1]  ;;  %v1741_v49 = vrot.slane %v386_v40, 9 }
  0x19   : > { %v297_v46 = vrot.slane %v296_v36, 4  ;;  %v338_v47 = vor.u32 %v337_v38, %v334_v37  ;;  %v309_v48 = vrot.slane %v307_v39, 5  ;;  %v431_v51 = vrot.slane %v387_v45, 5  ;;  %v388_v54 = vld [vmem:[%s2008_s20 + $0x28] sm:$0xe] }
  0x1a   : > { %v330_v50 = vsel %vm2034_vm5, %v325_v41, %v329_v31  ;;  %v389_v55 = vld [vmem:[%s2008_s20 + $0x2c] sm:$0x1]  ;;  %v343_v57 = vrot.slane %v341_v42, 5  ;;  %v315_v60 = vrot.slane %v313_v44, 5  ;;  %v1763_v61 = vld [vmem:[%s2008_s20 + $0x30] sm:$0xf] }
  0x1b   : > { %357 = vrot.lane.b32.xlu1 %v330_v50, %s1962_s22  ;;  %v302_v52 = vsel %vm2034_vm5, %v297_v46, %v301_v32  ;;  %v310_v53 = vor.u32 %v309_v48, %v306_v43  ;;  %v339_v56 = vrot.slane %v338_v47, 4  ;;  %v432_v58 = vsel %vm2010_vm2, %v1741_v49, %v431_v51  ;;  %v1761_v1 = vld [vmem:[%s2008_s20 + $0x28] sm:$0xf]  ;;  %v1764_v11 = vld [vmem:[%s2008_s20 + $0x34] sm:$0x1] }
  0x1c   : > { %353 = vrot.lane.b32.xlu0 %v302_v52, %s1962_s22  ;;  %453 = vrot.lane.b32.xlu2 %v432_v58, %s1961_s21  ;;  %v1742_v62 = vrot.slane %v388_v54, 9  ;;  %v435_v63 = vrot.slane %v389_v55, 5  ;;  %v615_v3 = vshrl.u32 %v1763_v61, 16  ;;  %v618_v4 = vshll.u32 %v1763_v61, 16  ;;  %v1762_v14 = vld [vmem:[%s2008_s20 + $0x2c] sm:$0x1] }
  0x1d   : > { %v311_v59 = vrot.slane %v310_v53, 4  ;;  %v344_v2 = vsel %vm2034_vm5, %v339_v56, %v343_v57  ;;  %v601_v6 = vshrl.u32 %v1761_v1, 16  ;;  %v604_v7 = vshll.u32 %v1761_v1, 16  ;;  %v1767_v15 = vld [vmem:[%s2008_s20 + $0x40] sm:$0xf] }
  0x1e   : > { %v436_v8 = vsel %vm2010_vm2, %v1742_v62, %v435_v63  ;;  %v617_v9 = vrot.slane %v615_v3, 4  ;;  %v620_v10 = vrot.slane %v618_v4, 5  ;;  %v1765_v16 = vld [vmem:[%s2008_s20 + $0x38] sm:$0xf]  ;;  %v624_v19 = vshll.u32 %v1764_v11, 16 }
  0x1f   : > { %v316_v5 = vsel %vm2034_vm5, %v311_v59, %v315_v60  ;;  %v603_v12 = vrot.slane %v601_v6, 4  ;;  %v606_v13 = vrot.slane %v604_v7, 5  ;;  %v1751_v17 = vld [vmem:[%s2008_s20 + $0x38] sm:$0xf]  ;;  %v1750_v20 = vld [vmem:[%s2008_s20 + $0x30] sm:$0xf] }
  0x20   : > { %v621_v18 = vor.u32 %v620_v10, %v617_v9  ;;  %v610_v22 = vshll.u32 %v1762_v14, 16  ;;  %v643_v23 = vshrl.u32 %v1767_v15, 16  ;;  %v646_v24 = vshll.u32 %v1767_v15, 16  ;;  %v1749_v25 = vld [vmem:[%s2008_s20 + $0x28] sm:$0xf] }
  0x21   : > { %v607_v21 = vor.u32 %v606_v13, %v603_v12  ;;  %v629_v26 = vshrl.u32 %v1765_v16, 16  ;;  %v632_v27 = vshll.u32 %v1765_v16, 16  ;;  %v626_v29 = vrot.slane %v624_v19, 5  ;;  %v1768_v30 = vld [vmem:[%s2008_s20 + $0x44] sm:$0x1] }
  0x22   : > { %v622_v28 = vrot.slane %v621_v18, 4  ;;  %v612_v32 = vrot.slane %v610_v22, 5  ;;  %v645_v33 = vrot.slane %v643_v23, 4  ;;  %v648_v34 = vrot.slane %v646_v24, 5  ;;  %v220_v36 = vld [vmem:[%s2008_s20 + $0x18] sm:$0xf] }
  0x23   : > { %359 = vrot.lane.b32.xlu1 %v344_v2, %s1962_s22  ;;  %v608_v31 = vrot.slane %v607_v21, 4  ;;  %v218_v37 = vld [vmem:[%s2008_s20 + $0x10] sm:$0xf]  ;;  %v631_v38 = vrot.slane %v629_v26, 4  ;;  %v634_v39 = vrot.slane %v632_v27, 5  ;;  %v652_v42 = vshll.u32 %v1768_v30, 16 }
  0x24   : > { %355 = vrot.lane.b32.xlu0 %v316_v5, %s1962_s22  ;;  %455 = vrot.lane.b32.xlu2 %v436_v8, %s1961_s21  ;;  %v1766_v40 = vld [vmem:[%s2008_s20 + $0x3c] sm:$0x1]  ;;  %v627_v41 = vsel %vm2034_vm5, %v622_v28, %v626_v29  ;;  %v276_v43 = vshrl.u32 %v220_v36, 16  ;;  %v279_v44 = vshll.u32 %v220_v36, 16  ;;  %v1777_v46 = vld [vmem:[%s2008_s20 + $0x28] sm:$0xe]  ;;  %v649_v48 = vor.u32 %v648_v34, %v645_v33 }
  0x25   : > { %v613_v45 = vsel %vm2034_vm5, %v608_v31, %v612_v32  ;;  %v1778_v47 = vld [vmem:[%s2008_s20 + $0x2c] sm:$0x1]  ;;  %v262_v49 = vshrl.u32 %v218_v37, 16  ;;  %v265_v50 = vshll.u32 %v218_v37, 16  ;;  %v1752_v51 = vld [vmem:[%s2008_s20 + $0x40] sm:$0xf]  ;;  %v635_v52 = vor.u32 %v634_v39, %v631_v38 }
  0x26   : > { %v638_v53 = vshll.u32 %v1766_v40, 16  ;;  %v1789_v54 = vrot.slane %v1777_v46, 9  ;;  %v739_v55 = vrot.slane %v1778_v47, 5  ;;  %v278_v56 = vrot.slane %v276_v43, 4  ;;  %v221_v60 = vld [vmem:[%s2008_s20 + $0x1c] sm:$0x1] }
  0x27   : > { %v281_v57 = vrot.slane %v279_v44, 5  ;;  %v650_v58 = vrot.slane %v649_v48, 4  ;;  %v654_v59 = vrot.slane %v652_v42, 5  ;;  %v264_v61 = vrot.slane %v262_v49, 4  ;;  %v219_v63 = vld [vmem:[%s2008_s20 + $0x14] sm:$0x1] }
  0x28   : > { %v267_v62 = vrot.slane %v265_v50, 5  ;;  %v636_v1 = vrot.slane %v635_v52, 4  ;;  %v640_v2 = vrot.slane %v638_v53, 5  ;;  %v740_v3 = vsel %vm2010_vm2, %v1789_v54, %v739_v55  ;;  %v1779_v10 = vld [vmem:[%s2008_s20 + $0x30] sm:$0xe] }
  0x29   : > { %v282_v4 = vor.u32 %v281_v57, %v278_v56  ;;  %v285_v5 = vshll.u32 %v221_v60, 16  ;;  %v655_v6 = vsel %vm2034_vm5, %v650_v58, %v654_v59  ;;  %v271_v8 = vshll.u32 %v219_v63, 16  ;;  %v1780_v11 = vld [vmem:[%s2008_s20 + $0x34] sm:$0x1]  ;;  %v1784_v21 = vld [vmem:[%s2008_s20 + $0x44] sm:$0x1] }
  0x2a   : > { %v268_v7 = vor.u32 %v267_v62, %v264_v61  ;;  %v641_v9 = vsel %vm2034_vm5, %v636_v1, %v640_v2  ;;  %v1790_v16 = vrot.slane %v1779_v10, 9  ;;  %v1781_v23 = vld [vmem:[%s2008_s20 + $0x38] sm:$0xe]  ;;  %v1782_v24 = vld [vmem:[%s2008_s20 + $0x3c] sm:$0x1]  ;;  %v751_v27 = vrot.slane %v1784_v21, 5 }
  0x2b   : > { %507 = vrot.lane.b32.xlu1 %v1751_v17, %s1963_s23  ;;  %v283_v12 = vrot.slane %v282_v4, 4  ;;  %v287_v13 = vrot.slane %v285_v5, 5  ;;  %v273_v15 = vrot.slane %v271_v8, 5  ;;  %v743_v17 = vrot.slane %v1780_v11, 5  ;;  %v1797_v32 = vld [vmem:[%s2008_s20 + $0x30] sm:$0xf] }
  0x2c   : > { %505 = vrot.lane.b32.xlu0 %v1750_v20, %s1963_s23  ;;  %503 = vrot.lane.b32.xlu2 %v1749_v25, %s1963_s23  ;;  %v269_v14 = vrot.slane %v268_v7, 4  ;;  %v1783_v20 = vld [vmem:[%s2008_s20 + $0x40] sm:$0xe]  ;;  %v1809_v25 = vld [vmem:[%s2008_s20 + $0x30] sm:$0xf]  ;;  %v1791_v28 = vrot.slane %v1781_v23, 9 }
  0x2d   : > { %v288_v18 = vsel %vm2034_vm5, %v283_v12, %v287_v13  ;;  %v744_v22 = vsel %vm2010_vm2, %v1790_v16, %v743_v17  ;;  %v1792_v26 = vrot.slane %v1783_v20, 9  ;;  %v747_v29 = vrot.slane %v1782_v24, 5  ;;  %v384_v34 = vld [vmem:[%s2008_s20 + $0x18] sm:$0xe]  ;;  %v385_v36 = vld [vmem:[%s2008_s20 + $0x1c] sm:$0x1] }
  0x2e   : > { %v274_v19 = vsel %vm2034_vm5, %v269_v14, %v273_v15  ;;  %v909_v30 = vshrl.u32 %v1809_v25, 16  ;;  %v912_v31 = vshll.u32 %v1809_v25, 16  ;;  %v382_v37 = vld [vmem:[%s2008_s20 + $0x10] sm:$0xe]  ;;  %v383_v38 = vld [vmem:[%s2008_s20 + $0x14] sm:$0x1] }
  0x2f   : > { %v752_v33 = vsel %vm2010_vm2, %v1792_v26, %v751_v27  ;;  %v748_v39 = vsel %vm2010_vm2, %v1791_v28, %v747_v29  ;;  %v1740_v42 = vrot.slane %v384_v34, 9  ;;  %v427_v43 = vrot.slane %v385_v36, 5  ;;  %v1810_v44 = vld [vmem:[%s2008_s20 + $0x34] sm:$0x1]  ;;  %v216_v47 = vld [vmem:[%s2008_s20 + $0x8] sm:$0xf] }
  0x30   : > { %v911_v40 = vrot.slane %v909_v30, 4  ;;  %v423_v46 = vrot.slane %v383_v38, 5  ;;  %v214_v48 = vld [vmem:[%s2008_s20] sm:$0xf]  ;;  %v918_v50 = vshll.u32 %v1810_v44, 16  ;;  %v248_v53 = vshrl.u32 %v216_v47, 16 }
  0x31   : > { %v428_v52 = vsel %vm2010_vm2, %v1740_v42, %v427_v43  ;;  %v251_v54 = vshll.u32 %v216_v47, 16  ;;  %v234_v56 = vshrl.u32 %v214_v48, 16  ;;  %v237_v57 = vshll.u32 %v214_v48, 16  ;;  %v1798_v58 = vld [vmem:[%s2008_s20 + $0x38] sm:$0xf] }
  0x32   : > { %v920_v62 = vrot.slane %v918_v50, 5  ;;  %v250_v63 = vrot.slane %v248_v53, 4  ;;  %v217_v2 = vld [vmem:[%s2008_s20 + $0xc] sm:$0x1]  ;;  %v1813_v5 = vld [vmem:[%s2008_s20 + $0x40] sm:$0xf] }
  0x33   : > { %666 = vrot.lane.b32.xlu1 %v627_v41, %s1964_s24  ;;  %v914_v41 = vrot.slane %v912_v31, 5  ;;  %v253_v1 = vrot.slane %v251_v54, 5  ;;  %v239_v4 = vrot.slane %v237_v57, 5  ;;  %v1812_v10 = vld [vmem:[%s2008_s20 + $0x3c] sm:$0x1]  ;;  %v257_v12 = vshll.u32 %v217_v2, 16 }
  0x34   : > { %664 = vrot.lane.b32.xlu0 %v613_v45, %s1964_s24  ;;  %509 = vrot.lane.b32.xlu2 %v1752_v51, %s1963_s23  ;;  %v1739_v45 = vrot.slane %v382_v37, 9  ;;  %v1811_v51 = vld [vmem:[%s2008_s20 + $0x38] sm:$0xf]  ;;  %v937_v13 = vshrl.u32 %v1813_v5, 16  ;;  %v940_v14 = vshll.u32 %v1813_v5, 16  ;;  %v932_v20 = vshll.u32 %v1812_v10, 16 }
  0x35   : > { %v915_v49 = vor.u32 %v914_v41, %v911_v40  ;;  %v923_v59 = vshrl.u32 %v1811_v51, 16  ;;  %v926_v60 = vshll.u32 %v1811_v51, 16  ;;  %v254_v11 = vor.u32 %v253_v1, %v250_v63  ;;  %v1800_v15 = vld [vmem:[%s2008_s20 + $0x48] sm:$0xf]  ;;  %v1814_v27 = vld [vmem:[%s2008_s20 + $0x44] sm:$0x1] }
  0x36   : > { %v424_v55 = vsel %vm2010_vm2, %v1739_v45, %v423_v46  ;;  %v939_v23 = vrot.slane %v937_v13, 4  ;;  %v942_v24 = vrot.slane %v940_v14, 5  ;;  %v934_v29 = vrot.slane %v932_v20, 5  ;;  %v1815_v30 = vld [vmem:[%s2008_s20 + $0x48] sm:$0xf] }
  0x37   : > { %v916_v61 = vrot.slane %v915_v49, 4  ;;  %v925_v7 = vrot.slane %v923_v59, 4  ;;  %v928_v8 = vrot.slane %v926_v60, 5  ;;  %v255_v21 = vrot.slane %v254_v11, 4  ;;  %v1757_v41 = vld [vmem:[%s2008_s20 + $0x18] sm:$0xf] }
  0x38   : > { %v951_v37 = vshrl.u32 %v1815_v30, 16  ;;  %v954_v38 = vshll.u32 %v1815_v30, 16  ;;  %v1827_v44 = vld [vmem:[%s2008_s20 + $0x38] sm:$0xe]  ;;  %v1816_v45 = vld [vmem:[%s2008_s20 + $0x4c] sm:$0x1] }
  0x39   : > { %v1828_v47 = vld [vmem:[%s2008_s20 + $0x3c] sm:$0x1]  ;;  %v1825_v48 = vld [vmem:[%s2008_s20 + $0x30] sm:$0xe]  ;;  %v573_v49 = vshrl.u32 %v1757_v41, 16  ;;  %v576_v50 = vshll.u32 %v1757_v41, 16 }
  0x3a   : > { %v953_v42 = vrot.slane %v951_v37, 4  ;;  %v956_v43 = vrot.slane %v954_v38, 5  ;;  %v1748_v51 = vld [vmem:[%s2008_s20 + $0x20] sm:$0xf]  ;;  %v1747_v53 = vld [vmem:[%s2008_s20 + $0x18] sm:$0xf] }
  0x3b   : > { %761 = vrot.lane.b32.xlu1 %v740_v3, %s1965_s25  ;;  %v236_v3 = vrot.slane %v234_v56, 4  ;;  %v1838_v56 = vrot.slane %v1827_v44, 9  ;;  %v1051_v57 = vrot.slane %v1828_v47, 5  ;;  %v575_v60 = vrot.slane %v573_v49, 4  ;;  %v203_v63 = vld [vmem:[%s2008_s20 + $0x30] sm:$0xf] }
  0x3c   : > { %670 = vrot.lane.b32.xlu0 %v655_v6, %s1964_s24  ;;  %668 = vrot.lane.b32.xlu2 %v641_v9, %s1964_s24  ;;  %v215_v6 = vld [vmem:[%s2008_s20 + $0x4] sm:$0x1]  ;;  %v921_v9 = vsel %vm2034_vm5, %v916_v61, %v920_v62  ;;  %v957_v54 = vor.u32 %v956_v43, %v953_v42  ;;  %v578_v61 = vrot.slane %v576_v50, 5  ;;  %v1758_v62 = vld [vmem:[%s2008_s20 + $0x1c] sm:$0x1] }
  0x3d   : > { %v240_v16 = vor.u32 %v239_v4, %v236_v3  ;;  %v243_v17 = vshll.u32 %v215_v6, 16  ;;  %v201_v1 = vld [vmem:[%s2008_s20 + $0x20] sm:$0xf]  ;;  %212 = vst.msk [vmem:[#allocation2 + $0x18] sm:$0xf] %vm205_vm6, %v203_v63  ;;  %v1052_v5 = vsel %vm2010_vm2, %v1838_v56, %v1051_v57 }
  0x3e   : > { %v958_v2 = vrot.slane %v957_v54, 4  ;;  %210 = vst.msk [vmem:[#allocation2 + $0x10] sm:$0xf] %vm205_vm6, %v201_v1  ;;  %v1759_v4 = vld [vmem:[%s2008_s20 + $0x20] sm:$0xf]  ;;  %v579_v6 = vor.u32 %v578_v61, %v575_v60 }
  0x3f   : > { %v241_v25 = vrot.slane %v240_v16, 4  ;;  %v245_v26 = vrot.slane %v243_v17, 5  ;;  %v381_v10 = vld [vmem:[%s2008_s20 + $0xc] sm:$0x1]  ;;  %v590_v13 = vshll.u32 %v1759_v4, 16 }
  0x40   : > { %v378_v14 = vld [vmem:[%s2008_s20] sm:$0xe]  ;;  %v580_v16 = vrot.slane %v579_v6, 4  ;;  %v204_v20 = vld [vmem:[%s2008_s20 + $0x38] sm:$0xf] }
  0x41   : > { %v246_v34 = vsel %vm2034_vm5, %v241_v25, %v245_v26  ;;  %213 = vst.msk [vmem:[#allocation2 + $0x1c] sm:$0xf] %vm205_vm6, %v204_v20  ;;  %v1760_v26 = vld [vmem:[%s2008_s20 + $0x24] sm:$0x1]  ;;  %v1831_v30 = vld [vmem:[%s2008_s20 + $0x48] sm:$0xe] }
  0x42   : > { %v596_v37 = vshll.u32 %v1760_v26, 16  ;;  %v1840_v38 = vrot.slane %v1831_v30, 9  ;;  %v1755_v42 = vld [vmem:[%s2008_s20 + $0x10] sm:$0xf]  ;;  %v1756_v61 = vld [vmem:[%s2008_s20 + $0x14] sm:$0x1] }
  0x43   : > { %351 = vrot.lane.b32.xlu1 %v288_v18, %s1962_s22  ;;  %v1799_v18 = vld [vmem:[%s2008_s20 + $0x40] sm:$0xf]  ;;  %v562_v49 = vshll.u32 %v1755_v42, 16  ;;  %v568_v6 = vshll.u32 %v1756_v61, 16  ;;  %v1769_v26 = vld [vmem:[%s2008_s20 + $0x8] sm:$0xe] }
  0x44   : > { %349 = vrot.lane.b32.xlu0 %v274_v19, %s1962_s22  ;;  %763 = vrot.lane.b32.xlu2 %v744_v22, %s1965_s25  ;;  %v929_v19 = vor.u32 %v928_v8, %v925_v7  ;;  %v259_v22 = vrot.slane %v257_v12, 5  ;;  %v582_v7 = vshll.u32 %v1758_v62, 16  ;;  %v587_v12 = vshrl.u32 %v1759_v4, 16  ;;  %v1770_v30 = vld [vmem:[%s2008_s20 + $0xc] sm:$0x1] }
  0x45   : > { %v598_v44 = vrot.slane %v596_v37, 5  ;;  %v1803_v61 = vld [vmem:[%s2008_s20 + $0x18] sm:$0xf] }
  0x46   : > { %v930_v28 = vrot.slane %v929_v19, 4  ;;  %v260_v31 = vsel %vm2034_vm5, %v255_v21, %v259_v22  ;;  %v584_v17 = vrot.slane %v582_v7, 5  ;;  %v419_v19 = vrot.slane %v381_v10, 5  ;;  %v1746_v7 = vld [vmem:[%s2008_s20 + $0x10] sm:$0xf] }
  0x47   : > { %v1737_v21 = vrot.slane %v378_v14, 9  ;;  %v1745_v10 = vld [vmem:[%s2008_s20 + $0x8] sm:$0xf]  ;;  %v570_v14 = vrot.slane %v568_v6, 5  ;;  %v870_v6 = vshll.u32 %v1803_v61, 16 }
  0x48   : > { %v935_v36 = vsel %vm2034_vm5, %v930_v28, %v934_v29  ;;  %v585_v28 = vsel %vm2034_vm5, %v580_v16, %v584_v17 }
  0x4b   : > { %811 = vrot.lane.b32.xlu1 %v1797_v32, %s1966_s26  ;;  %v943_v32 = vor.u32 %v942_v24, %v939_v23  ;;  %v589_v23 = vrot.slane %v587_v12, 4  ;;  %v592_v24 = vrot.slane %v590_v13, 5  ;;  %v1776_v12 = vld [vmem:[%s2008_s20 + $0x24] sm:$0x1] }
  0x4c   : > { %767 = vrot.lane.b32.xlu0 %v752_v33, %s1965_s25  ;;  %765 = vrot.lane.b32.xlu2 %v748_v39, %s1965_s25  ;;  %v946_v33 = vshll.u32 %v1814_v27, 16  ;;  %v202_v27 = vld [vmem:[%s2008_s20 + $0x28] sm:$0xf] }
  0x4d   : > { %v944_v39 = vrot.slane %v943_v32, 4  ;;  %211 = vst.msk [vmem:[#allocation2 + $0x14] sm:$0xf] %vm205_vm6, %v202_v27  ;;  %v1829_v32 = vld [vmem:[%s2008_s20 + $0x40] sm:$0xe] }
  0x4e   : > { %v948_v40 = vrot.slane %v946_v33, 5  ;;  %v1830_v33 = vld [vmem:[%s2008_s20 + $0x44] sm:$0x1] }
  0x4f   : > { %v1055_v41 = vrot.slane %v1830_v33, 5 }
  0x50   : > { %v949_v46 = vsel %vm2034_vm5, %v944_v39, %v948_v40  ;;  %v1839_v40 = vrot.slane %v1829_v32, 9 }
  0x52   : > { %v1056_v50 = vsel %vm2010_vm2, %v1839_v40, %v1055_v41 }
  0x53   : > { %451 = vrot.lane.b32.xlu1 %v428_v52, %s1961_s21  ;;  %v1826_v52 = vld [vmem:[%s2008_s20 + $0x34] sm:$0x1] }
  0x54   : > { %449 = vrot.lane.b32.xlu0 %v424_v55, %s1961_s21  ;;  %813 = vrot.lane.b32.xlu2 %v1798_v58, %s1966_s26  ;;  %v960_v55 = vshll.u32 %v1816_v45, 16  ;;  %v1837_v58 = vrot.slane %v1825_v48, 9  ;;  %v1047_v59 = vrot.slane %v1826_v52, 5  ;;  %v1753_v45 = vld [vmem:[%s2008_s20 + $0x8] sm:$0xf]  ;;  %v559_v48 = vshrl.u32 %v1755_v42, 16 }
  0x55   : > { %v1774_v52 = vld [vmem:[%s2008_s20 + $0x1c] sm:$0x1]  ;;  %v548_v54 = vshll.u32 %v1753_v45, 16 }
  0x56   : > { %v962_v3 = vrot.slane %v960_v55, 5  ;;  %v1048_v8 = vsel %vm2010_vm2, %v1837_v58, %v1047_v59  ;;  %v731_v57 = vrot.slane %v1774_v52, 5  ;;  %v561_v58 = vrot.slane %v559_v48, 4 }
  0x57   : > { %v564_v59 = vrot.slane %v562_v49, 5  ;;  %v550_v63 = vrot.slane %v548_v54, 5  ;;  %v1795_v54 = vld [vmem:[%s2008_s20 + $0x20] sm:$0xf] }
  0x58   : > { %v963_v11 = vsel %vm2034_vm5, %v958_v2, %v962_v3  ;;  %v1754_v2 = vld [vmem:[%s2008_s20 + $0xc] sm:$0x1] }
  0x5b   : > { %972 = vrot.lane.b32.xlu1 %v921_v9, %s1967_s27  ;;  %v380_v9 = vld [vmem:[%s2008_s20 + $0x8] sm:$0xe] }
  0x5c   : > { %817 = vrot.lane.b32.xlu0 %v1800_v15, %s1966_s26  ;;  %815 = vrot.lane.b32.xlu2 %v1799_v18, %s1966_s26  ;;  %v379_v15 = vld [vmem:[%s2008_s20 + $0x4] sm:$0x1]  ;;  %v1738_v18 = vrot.slane %v380_v9, 9  ;;  %v554_v9 = vshll.u32 %v1754_v2, 16  ;;  %v1801_v2 = vld [vmem:[%s2008_s20 + $0x10] sm:$0xf] }
  0x5d   : > { %v415_v22 = vrot.slane %v379_v15, 5 }
  0x5e   : > { %v420_v29 = vsel %vm2010_vm2, %v1738_v18, %v419_v19  ;;  %v556_v17 = vrot.slane %v554_v9, 5  ;;  %v1807_v18 = vld [vmem:[%s2008_s20 + $0x28] sm:$0xf]  ;;  %v1822_v9 = vld [vmem:[%s2008_s20 + $0x24] sm:$0x1] }
  0x5f   : > { %v895_v27 = vshrl.u32 %v1807_v18, 16 }
  0x63   : > { %347 = vrot.lane.b32.xlu1 %v260_v31, %s1962_s22  ;;  %v1832_v31 = vld [vmem:[%s2008_s20 + $0x4c] sm:$0x1] }
  0x64   : > { %345 = vrot.lane.b32.xlu0 %v246_v34, %s1962_s22  ;;  %974 = vrot.lane.b32.xlu2 %v935_v36, %s1967_s27  ;;  %v416_v34 = vsel %vm2010_vm2, %v1737_v21, %v415_v22  ;;  %v593_v36 = vor.u32 %v592_v24, %v589_v23  ;;  %v1059_v39 = vrot.slane %v1832_v31, 5  ;;  %v735_v21 = vrot.slane %v1776_v12, 5  ;;  %v1805_v22 = vld [vmem:[%s2008_s20 + $0x20] sm:$0xf] }
  0x65   : > { %v881_v31 = vshrl.u32 %v1805_v22, 16  ;;  %v884_v32 = vshll.u32 %v1805_v22, 16  ;;  %v1802_v22 = vld [vmem:[%s2008_s20 + $0x14] sm:$0x1] }
  0x66   : > { %v594_v43 = vrot.slane %v593_v36, 4  ;;  %v1060_v47 = vsel %vm2010_vm2, %v1840_v38, %v1059_v39  ;;  %v897_v36 = vrot.slane %v895_v27, 4  ;;  %v1808_v39 = vld [vmem:[%s2008_s20 + $0x2c] sm:$0x1] }
  0x67   : > { %v883_v40 = vrot.slane %v881_v31, 4  ;;  %v886_v41 = vrot.slane %v884_v32, 5  ;;  %v904_v49 = vshll.u32 %v1808_v39, 16  ;;  %v1793_v31 = vld [vmem:[%s2008_s20 + $0x10] sm:$0xf] }
  0x68   : > { %v599_v55 = vsel %vm2034_vm5, %v594_v43, %v598_v44  ;;  %v1806_v43 = vld [vmem:[%s2008_s20 + $0x24] sm:$0x1]  ;;  %v1796_v44 = vld [vmem:[%s2008_s20 + $0x28] sm:$0xf] }
  0x69   : > { %v890_v52 = vshll.u32 %v1806_v43, 16  ;;  %v1823_v32 = vld [vmem:[%s2008_s20 + $0x28] sm:$0xe] }
  0x6b   : > { %976 = vrot.lane.b32.xlu1 %v949_v46, %s1967_s27 }
  0x6c   : > { %501 = vrot.lane.b32.xlu0 %v1748_v51, %s1963_s23  ;;  %499 = vrot.lane.b32.xlu2 %v1747_v53, %s1963_s23  ;;  %v1773_v51 = vld [vmem:[%s2008_s20 + $0x18] sm:$0xe]  ;;  %v545_v53 = vshrl.u32 %v1753_v45, 16 }
  0x6d   : > { %v1787_v56 = vrot.slane %v1773_v51, 9  ;;  %v887_v51 = vor.u32 %v886_v41, %v883_v40  ;;  %v1836_v40 = vrot.slane %v1823_v32, 9 }
  0x6e   : > { %v547_v62 = vrot.slane %v545_v53, 4  ;;  %v199_v53 = vld [vmem:[%s2008_s20 + $0x10] sm:$0xf] }
  0x6f   : > { %v732_v4 = vsel %vm2010_vm2, %v1787_v56, %v731_v57  ;;  %v1772_v56 = vld [vmem:[%s2008_s20 + $0x14] sm:$0x1]  ;;  %208 = vst.msk [vmem:[#allocation2 + $0x8] sm:$0xf] %vm205_vm6, %v199_v53 }
  0x73   : > { %1071 = vrot.lane.b32.xlu1 %v1052_v5, %s1968_s28  ;;  %v565_v5 = vor.u32 %v564_v59, %v561_v58  ;;  %v906_v58 = vrot.slane %v904_v49, 5  ;;  %v888_v59 = vrot.slane %v887_v51, 4  ;;  %v1817_v49 = vld [vmem:[%s2008_s20 + $0x10] sm:$0xe] }
  0x74   : > { %1069 = vrot.lane.b32.xlu0 %v1048_v8, %s1968_s28  ;;  %978 = vrot.lane.b32.xlu2 %v963_v11, %s1967_s27  ;;  %v551_v8 = vor.u32 %v550_v63, %v547_v62  ;;  %v1775_v11 = vld [vmem:[%s2008_s20 + $0x20] sm:$0xe] }
  0x75   : > { %v566_v13 = vrot.slane %v565_v5, 4  ;;  %v1788_v20 = vrot.slane %v1775_v11, 9  ;;  %v867_v5 = vshrl.u32 %v1803_v61, 16  ;;  %v856_v11 = vshll.u32 %v1801_v2, 16 }
  0x76   : > { %v2193_v25 = vpop.permute.xlu2 %453  ;;  %v552_v16 = vrot.slane %v551_v8, 4  ;;  %v1821_v8 = vld [vmem:[%s2008_s20 + $0x20] sm:$0xe] }
  0x77   : > { %v571_v24 = vsel %vm2034_vm5, %v566_v13, %v570_v14  ;;  %v736_v33 = vsel %vm2010_vm2, %v1788_v20, %v735_v21  ;;  %v1835_v13 = vrot.slane %v1821_v8, 9  ;;  %v1039_v14 = vrot.slane %v1822_v9, 5  ;;  %v1804_v20 = vld [vmem:[%s2008_s20 + $0x1c] sm:$0x1]  ;;  %v1916_v8 = vld [vmem:[%s2504_s1 + $0x8] sm:$0xff]  ;;  %v1915_v9 = vld [vmem:[%s2504_s1] sm:$0xff] }
  0x78   : > { %v876_v27 = vshll.u32 %v1804_v20, 16 }
  0x7b   : > { %660 = vrot.lane.b32.xlu1 %v585_v28, %s1964_s24  ;;  %v898_v28 = vshll.u32 %v1807_v18, 16 }
  0x7c   : > { %447 = vrot.lane.b32.xlu0 %v420_v29, %s1961_s21  ;;  %445 = vrot.lane.b32.xlu2 %v416_v34, %s1961_s21  ;;  %v557_v29 = vsel %vm2034_vm5, %v552_v16, %v556_v17  ;;  %v723_v34 = vrot.slane %v1770_v30, 5  ;;  %v872_v16 = vrot.slane %v870_v6, 5  ;;  %v862_v30 = vshll.u32 %v1802_v22, 16 }
  0x7d   : > { %v900_v37 = vrot.slane %v898_v28, 5  ;;  %v1794_v28 = vld [vmem:[%s2008_s20 + $0x18] sm:$0xf] }
  0x7e   : > { %v2213_v46 = vpop.permute.xlu2 %455 }
  0x7f   : > { %v901_v48 = vor.u32 %v900_v37, %v897_v36 }
  0x81   : > { %v902_v57 = vrot.slane %v901_v48, 4 }
  0x83   : > { %1075 = vrot.lane.b32.xlu1 %v1060_v47, %s1968_s28 }
  0x84   : > { %1073 = vrot.lane.b32.xlu0 %v1056_v50, %s1968_s28  ;;  %662 = vrot.lane.b32.xlu2 %v599_v55, %s1964_s24  ;;  %v200_v50 = vld [vmem:[%s2008_s20 + $0x18] sm:$0xf]  ;;  %v1771_v55 = vld [vmem:[%s2008_s20 + $0x10] sm:$0xe] }
  0x85   : > { %v460_v60 = vpop.permute.xlu1 %459  ;;  %209 = vst.msk [vmem:[#allocation2 + $0xc] sm:$0xf] %vm205_vm6, %v200_v50  ;;  %v1786_v63 = vrot.slane %v1771_v55, 9  ;;  %v1818_v50 = vld [vmem:[%s2008_s20 + $0x14] sm:$0x1] }
  0x86   : > { %v458_v1 = vpop.permute.xlu0 %457  ;;  %v504_v3 = vpop.permute.xlu2 %503  ;;  %v1031_v55 = vrot.slane %v1818_v50, 5 }
  0x8b   : > { %757 = vrot.lane.b32.xlu1 %v732_v4, %s1965_s25  ;;  %v907_v4 = vsel %vm2034_vm5, %v902_v57, %v906_v58  ;;  %v197_v58 = vld [vmem:[%s2008_s20] sm:$0xf] }
  0x8c   : > { %497 = vrot.lane.b32.xlu0 %v1746_v7, %s1963_s23  ;;  %495 = vrot.lane.b32.xlu2 %v1745_v10, %s1963_s23  ;;  %v853_v10 = vshrl.u32 %v1801_v2, 16  ;;  %206 = vst.msk [vmem:[#allocation2] sm:$0xf] %vm205_vm6, %v197_v58 }
  0x8d   : > { %v358_v15 = vpop.permute.xlu1 %357 }
  0x8e   : > { %376 = vst.msk [vmem:[#allocation2 + $0x18] sm:$0xf] %vm369_vm7, %v358_v15  ;;  %v354_v19 = vpop.permute.xlu0 %353  ;;  %v510_v23 = vpop.permute.xlu2 %509  ;;  %v869_v15 = vrot.slane %v867_v5, 4  ;;  %v855_v18 = vrot.slane %v853_v10, 4 }
  0x8f   : > { %374 = vst.msk [vmem:[#allocation2 + $0x10] sm:$0xf] %vm369_vm7, %v354_v19  ;;  %v858_v19 = vrot.slane %v856_v11, 5 }
  0x90   : > { %474 = vst.msk [vmem:[#allocation2 + $0x10] sm:$0xf] %vm469_vm8, %v2193_v25  ;;  %v1785_v25 = vrot.slane %v1769_v26, 9  ;;  %v873_v26 = vor.u32 %v872_v16, %v869_v15 }
  0x91   : > { %524 = vst.msk [vmem:[#allocation2 + $0x10] sm:$0xf] %vm519_vm9, %v504_v3 }
  0x92   : > { %476 = vst.msk [vmem:[#allocation2 + $0x18] sm:$0xf] %vm469_vm8, %v458_v1  ;;  %v724_v47 = vsel %vm2010_vm2, %v1785_v25, %v723_v34  ;;  %v727_v1 = vrot.slane %v1772_v56, 5  ;;  %v874_v25 = vrot.slane %v873_v26, 4  ;;  %v878_v34 = vrot.slane %v876_v27, 5 }
  0x93   : > { %658 = vrot.lane.b32.xlu1 %v571_v24, %s1964_s24  ;;  %v1040_v24 = vsel %vm2010_vm2, %v1835_v13, %v1039_v14  ;;  %v198_v56 = vld [vmem:[%s2008_s20 + $0x8] sm:$0xf] }
  0x94   : > { %656 = vrot.lane.b32.xlu0 %v557_v29, %s1964_s24  ;;  %759 = vrot.lane.b32.xlu2 %v736_v33, %s1965_s25  ;;  %v728_v12 = vsel %vm2010_vm2, %v1786_v63, %v727_v1  ;;  %v859_v29 = vor.u32 %v858_v19, %v855_v18  ;;  %v1824_v33 = vld [vmem:[%s2008_s20 + $0x2c] sm:$0x1]  ;;  %v879_v43 = vsel %vm2034_vm5, %v874_v25, %v878_v34 }
  0x95   : > { %v360_v38 = vpop.permute.xlu1 %359  ;;  %v1043_v41 = vrot.slane %v1824_v33, 5  ;;  %207 = vst.msk [vmem:[#allocation2 + $0x4] sm:$0xf] %vm205_vm6, %v198_v56  ;;  %vm1563_vm6 = vcmask 123968  }
  0x96   : > { %377 = vst.msk [vmem:[#allocation2 + $0x1c] sm:$0xf] %vm369_vm7, %v360_v38  ;;  %v356_v42 = vpop.permute.xlu0 %355  ;;  %v669_v45 = vpop.permute.xlu2 %668  ;;  %v860_v37 = vrot.slane %v859_v29, 4  ;;  %v864_v38 = vrot.slane %v862_v30, 5 }
  0x97   : > { %477 = vst.msk [vmem:[#allocation2 + $0x1c] sm:$0xf] %vm469_vm8, %v460_v60  ;;  %v892_v60 = vrot.slane %v890_v52, 5  ;;  %v1044_v48 = vsel %vm2010_vm2, %v1836_v40, %v1043_v41 }
  0x98   : > { %375 = vst.msk [vmem:[#allocation2 + $0x14] sm:$0xf] %vm369_vm7, %v356_v42 }
  0x99   : > { %475 = vst.msk [vmem:[#allocation2 + $0x14] sm:$0xf] %vm469_vm8, %v2213_v46  ;;  %v893_v7 = vsel %vm2034_vm5, %v888_v59, %v892_v60 }
  0x9a   : > { %527 = vst.msk [vmem:[#allocation2 + $0x1c] sm:$0xf] %vm519_vm9, %v510_v23 }
  0x9b   : > { %753 = vrot.lane.b32.xlu1 %v724_v47, %s1965_s25  ;;  %v1820_v47 = vld [vmem:[%s2008_s20 + $0x1c] sm:$0x1] }
  0x9c   : > { %809 = vrot.lane.b32.xlu0 %v1796_v44, %s1966_s26  ;;  %807 = vrot.lane.b32.xlu2 %v1795_v54, %s1966_s26  ;;  %v865_v44 = vsel %vm2034_vm5, %v860_v37, %v864_v38  ;;  %v1035_v53 = vrot.slane %v1820_v47, 5  ;;  %v1833_v54 = vrot.slane %v1817_v49, 9  ;;  %vm1507_vm5 = vcmask 58368  }
  0x9d   : > { %v508_v46 = vpop.permute.xlu1 %507 }
  0x9e   : > { %526 = vst.msk [vmem:[#allocation2 + $0x18] sm:$0xf] %vm519_vm9, %v508_v46  ;;  %v506_v62 = vpop.permute.xlu0 %505  ;;  %v764_v3 = vpop.permute.xlu2 %763  ;;  %v1110_v46 = vld [vmem:[%s2504_s1 + $0x20] sm:$0xf]  ;;  %v1032_v61 = vsel %vm2010_vm2, %v1833_v54, %v1031_v55 }
  0x9f   : > { %525 = vst.msk [vmem:[#allocation2 + $0x14] sm:$0xf] %vm519_vm9, %v506_v62  ;;  %v1148_v59 = vunpack.c.l.b16 %v1110_v46 }
  0xa0   : > { %687 = vst.msk [vmem:[#allocation2 + $0x18] sm:$0xf] %vm680_vm10, %v669_v45  ;;  %v1819_v45 = vld [vmem:[%s2008_s20 + $0x18] sm:$0xe] }
  0xa1   : > { %v1834_v52 = vrot.slane %v1819_v45, 9  ;;  %v1153_v62 = vpack.c.b16 %v1148_v59, %v1148_v59 }
  0xa3   : > { %970 = vrot.lane.b32.xlu1 %v907_v4, %s1967_s27  ;;  %v1036_v60 = vsel %vm2010_vm2, %v1834_v52, %v1035_v53  ;;  %v1173_v63 = vsel %vm1171_vm13, %v1153_v62, 0  ;;  %v1917_v4 = vld [vmem:[%s2504_s1 + $0x10] sm:$0xff]  ;;  %v2405_v53 = vld [vmem:[%s2506_s3] ss:$0 sm:$0xff]  ;;  %vm1493_vm2 = vcmask 1041409  }
  0xa4   : > { %968 = vrot.lane.b32.xlu0 %v893_v7, %s1967_s27  ;;  %755 = vrot.lane.b32.xlu2 %v728_v12, %s1965_s25  ;;  %s2475_s25 = scalar_lea.vmem %s2507_s4, %s1736_s19 }
  0xa5   : > { %v667_v17 = vpop.permute.xlu1 %666  ;;  %1920 = vmatpush.bf16.msra.mxu2 %v1173_v63  ;;  %1921 = vmatpush.bf16.msra.mxu3 %v1173_v63 }
  0xa6   : > { %686 = vst.msk [vmem:[#allocation2 + $0x14] sm:$0xf] %vm680_vm10, %v667_v17  ;;  %v665_v21 = vpop.permute.xlu0 %664  ;;  %v766_v23 = vpop.permute.xlu2 %765  ;;  %1919 = vmatpush.bf16.msra.mxu1 %v1173_v63  ;;  %1178 = vmatpush.bf16.msra.mxu0 %v1173_v63 }
  0xa7   : > { %685 = vst.msk [vmem:[#allocation2 + $0x10] sm:$0xf] %vm680_vm10, %v665_v21 }
  0xa8   : > { %783 = vst.msk [vmem:[#allocation2 + $0x14] sm:$0xf] %vm777_vm11, %v764_v3  ;;  %v1918_v3 = vld [vmem:[%s2504_s1 + $0x18] sm:$0xff] }
  0xa9   : > { %784 = vst.msk [vmem:[#allocation2 + $0x18] sm:$0xf] %vm777_vm11, %v766_v23  ;;  %1923 = vmatpush.bf16.msra.mxu2 %v1918_v3  ;;  %1924 = vmatpush.bf16.msra.mxu3 %v1918_v3 }
  0xaa   : > { %1922 = vmatpush.bf16.msra.mxu1 %v1918_v3  ;;  %1179 = vmatpush.bf16.msra.mxu0 %v1918_v3 }
  0xab   : > { %1065 = vrot.lane.b32.xlu1 %v1040_v24, %s1968_s28 }
  0xac   : > { %805 = vrot.lane.b32.xlu0 %v1794_v28, %s1966_s26  ;;  %803 = vrot.lane.b32.xlu2 %v1793_v31, %s1966_s26 }
  0xad   : > { %v762_v36 = vpop.permute.xlu1 %761  ;;  %1926 = vmatpush.bf16.msra.mxu2 %v1917_v4  ;;  %1927 = vmatpush.bf16.msra.mxu3 %v1917_v4 }
  0xae   : > { %782 = vst.msk [vmem:[#allocation2 + $0x10] sm:$0xf] %vm777_vm11, %v762_v36  ;;  %v671_v39 = vpop.permute.xlu0 %670  ;;  %v814_v42 = vpop.permute.xlu2 %813  ;;  %1925 = vmatpush.bf16.msra.mxu1 %v1917_v4  ;;  %1180 = vmatpush.bf16.msra.mxu0 %v1917_v4 }
  0xaf   : > { %688 = vst.msk [vmem:[#allocation2 + $0x1c] sm:$0xf] %vm680_vm10, %v671_v39 }
  0xb0   : > { %833 = vst.msk [vmem:[#allocation2 + $0x14] sm:$0xf] %vm827_vm12, %v814_v42 }
  0xb1   : > { %1929 = vmatpush.bf16.msra.mxu2 %v1916_v8  ;;  %1930 = vmatpush.bf16.msra.mxu3 %v1916_v8 }
  0xb2   : > { %1928 = vmatpush.bf16.msra.mxu1 %v1916_v8  ;;  %1181 = vmatpush.bf16.msra.mxu0 %v1916_v8 }
  0xb3   : > { %966 = vrot.lane.b32.xlu1 %v879_v43, %s1967_s27 }
  0xb4   : > { %964 = vrot.lane.b32.xlu0 %v865_v44, %s1967_s27  ;;  %1067 = vrot.lane.b32.xlu2 %v1044_v48, %s1968_s28 }
  0xb5   : > { %v352_v51 = vpop.permute.xlu1 %351  ;;  %1932 = vmatpush.bf16.msra.mxu2 %v1915_v9  ;;  %1933 = vmatpush.bf16.msra.mxu3 %v1915_v9 }
  0xb6   : > { %373 = vst.msk [vmem:[#allocation2 + $0xc] sm:$0xf] %vm369_vm7, %v352_v51  ;;  %v350_v35 = vpop.permute.xlu0 %349  ;;  %v816_v57 = vpop.permute.xlu2 %815  ;;  %1931 = vmatpush.bf16.msra.mxu1 %v1915_v9  ;;  %1182 = vmatpush.bf16.msra.mxu0 %v1915_v9  ;;  %v2400_v51 = vld [vmem:[%s2505_s2] ss:$0 sm:$0xff] }
  0xb7   : > { %372 = vst.msk [vmem:[#allocation2 + $0x8] sm:$0xf] %vm369_vm7, %v350_v35 }
  0xb8   : > { %834 = vst.msk [vmem:[#allocation2 + $0x18] sm:$0xf] %vm827_vm12, %v816_v57 }
  0xbc   : > { %1063 = vrot.lane.b32.xlu0 %v1036_v60, %s1968_s28  ;;  %1061 = vrot.lane.b32.xlu2 %v1032_v61, %s1968_s28 }
  0xbd   : > { %v812_v1 = vpop.permute.xlu1 %811 }
  0xbe   : > { %832 = vst.msk [vmem:[#allocation2 + $0x10] sm:$0xf] %vm827_vm12, %v812_v1  ;;  %v768_v2 = vpop.permute.xlu0 %767  ;;  %v975_v0 = vpop.permute.xlu2 %974 }
  0xbf   : > { %785 = vst.msk [vmem:[#allocation2 + $0x1c] sm:$0xf] %vm777_vm11, %v768_v2 }
  0xc0   : > { %994 = vst.msk [vmem:[#allocation2 + $0x14] sm:$0xf] %vm988_vm14, %v975_v0 }
  0xc5   : > { %v452_v5 = vpop.permute.xlu1 %451 }
  0xc6   : > { %473 = vst.msk [vmem:[#allocation2 + $0xc] sm:$0xf] %vm469_vm8, %v452_v5  ;;  %v450_v6 = vpop.permute.xlu0 %449  ;;  %v500_v7 = vpop.permute.xlu2 %499 }
  0xc7   : > { %472 = vst.msk [vmem:[#allocation2 + $0x8] sm:$0xf] %vm469_vm8, %v450_v6 }
  0xc8   : > { %522 = vst.msk [vmem:[#allocation2 + $0x8] sm:$0xf] %vm519_vm9, %v500_v7 }
  0xcd   : > { %v973_v10 = vpop.permute.xlu1 %972 }
  0xce   : > { %993 = vst.msk [vmem:[#allocation2 + $0x10] sm:$0xf] %vm988_vm14, %v973_v10  ;;  %v818_v11 = vpop.permute.xlu0 %817  ;;  %v979_v12 = vpop.permute.xlu2 %978 }
  0xcf   : > { %835 = vst.msk [vmem:[#allocation2 + $0x1c] sm:$0xf] %vm827_vm12, %v818_v11 }
  0xd0   : > { %996 = vst.msk [vmem:[#allocation2 + $0x1c] sm:$0xf] %vm988_vm14, %v979_v12 }
  0xd5   : > { %v348_v13 = vpop.permute.xlu1 %347 }
  0xd6   : > { %371 = vst.msk [vmem:[#allocation2 + $0x4] sm:$0xf] %vm369_vm7, %v348_v13  ;;  %v346_v14 = vpop.permute.xlu0 %345  ;;  %v446_v15 = vpop.permute.xlu2 %445 }
  0xd7   : > { %370 = vst.msk [vmem:[#allocation2] sm:$0xf] %vm369_vm7, %v346_v14  ;;  %vm1619_vm7 = vcmask 189568  }
  0xd8   : > { %470 = vst.msk [vmem:[#allocation2] sm:$0xf] %vm469_vm8, %v446_v15 }
  0xdd   : > { %v977_v16 = vpop.permute.xlu1 %976 }
  0xde   : > { %995 = vst.msk [vmem:[#allocation2 + $0x18] sm:$0xf] %vm988_vm14, %v977_v16  ;;  %v502_v17 = vpop.permute.xlu0 %501  ;;  %v663_v18 = vpop.permute.xlu2 %662 }
  0xdf   : > { %523 = vst.msk [vmem:[#allocation2 + $0xc] sm:$0xf] %vm519_vm9, %v502_v17 }
  0xe0   : > { %684 = vst.msk [vmem:[#allocation2 + $0xc] sm:$0xf] %vm680_vm10, %v663_v18 }
  0xe5   : > { %v1072_v19 = vpop.permute.xlu1 %1071 }
  0xe6   : > { %1091 = vst.msk [vmem:[#allocation2 + $0x14] sm:$0xf] %vm1085_vm15, %v1072_v19  ;;  %v1070_v20 = vpop.permute.xlu0 %1069  ;;  %v496_v21 = vpop.permute.xlu2 %495 }
  0xe7   : > { %1090 = vst.msk [vmem:[#allocation2 + $0x10] sm:$0xf] %vm1085_vm15, %v1070_v20 }
  0xe8   : > { %520 = vst.msk [vmem:[#allocation2] sm:$0xf] %vm519_vm9, %v496_v21 }
  0xed   : > { %v661_v22 = vpop.permute.xlu1 %660 }
  0xee   : > { %683 = vst.msk [vmem:[#allocation2 + $0x8] sm:$0xf] %vm680_vm10, %v661_v22  ;;  %v448_v23 = vpop.permute.xlu0 %447  ;;  %v1913_v24 = vld [vmem:[#allocation2 + $0x10] sm:$0xff]  ;;  %v760_v26 = vpop.permute.xlu2 %759 }
  0xef   : > { %471 = vst.msk [vmem:[#allocation2 + $0x4] sm:$0xf] %vm469_vm8, %v448_v23  ;;  %1875 = vmatmul.msk.bf16.vlgmr.msra.gmra.mxu2 %vm1158_vm0, %v1913_v24  ;;  %vm1675_vm8 = vcmask 255168  }
  0xf0   : > { %781 = vst.msk [vmem:[#allocation2 + $0xc] sm:$0xf] %vm777_vm11, %v760_v26 }
  0xf5   : > { %v1076_v27 = vpop.permute.xlu1 %1075 }
  0xf6   : > { %1093 = vst.msk [vmem:[#allocation2 + $0x1c] sm:$0xf] %vm1085_vm15, %v1076_v27  ;;  %v1074_v28 = vpop.permute.xlu0 %1073  ;;  %v808_v29 = vpop.permute.xlu2 %807 }
  0xf7   : > { %1092 = vst.msk [vmem:[#allocation2 + $0x18] sm:$0xf] %vm1085_vm15, %v1074_v28 }
  0xfd   : > { %v758_v30 = vpop.permute.xlu1 %757 }
  0xfe   : > { %780 = vst.msk [vmem:[#allocation2 + $0x8] sm:$0xf] %vm777_vm11, %v758_v30  ;;  %v498_v31 = vpop.permute.xlu0 %497  ;;  %v1914_v32 = vld [vmem:[#allocation2 + $0x18] sm:$0xff]  ;;  %v756_v33 = vpop.permute.xlu2 %755 }
  0xff   : > { %521 = vst.msk [vmem:[#allocation2 + $0x4] sm:$0xf] %vm519_vm9, %v498_v31  ;;  %1876 = vmatmul.msk.bf16.vlgmr.msra.gmra.mxu3 %vm1158_vm0, %v1914_v32 }
 0x100   : > { %830 = vst.msk [vmem:[#allocation2 + $0x8] sm:$0xf] %vm827_vm12, %v808_v29 }
 0x105   : > { %v659_v25 = vpop.permute.xlu1 %658 }
 0x106   : > { %682 = vst.msk [vmem:[#allocation2 + $0x4] sm:$0xf] %vm680_vm10, %v659_v25  ;;  %v657_v34 = vpop.permute.xlu0 %656  ;;  %v804_v36 = vpop.permute.xlu2 %803 }
 0x107   : > { %681 = vst.msk [vmem:[#allocation2] sm:$0xf] %vm680_vm10, %v657_v34 }
 0x108   : > { %779 = vst.msk [vmem:[#allocation2 + $0x4] sm:$0xf] %vm777_vm11, %v756_v33 }
 0x10d   : > { %v754_v37 = vpop.permute.xlu1 %753 }
 0x10e   : > { %778 = vst.msk [vmem:[#allocation2] sm:$0xf] %vm777_vm11, %v754_v37  ;;  %v810_v38 = vpop.permute.xlu0 %809  ;;  %v1068_v40 = vpop.permute.xlu2 %1067 }
 0x10f   : > { %831 = vst.msk [vmem:[#allocation2 + $0xc] sm:$0xf] %vm827_vm12, %v810_v38 }
 0x110   : > { %828 = vst.msk [vmem:[#allocation2] sm:$0xf] %vm827_vm12, %v804_v36 }
 0x115   : > { %v971_v39 = vpop.permute.xlu1 %970 }
 0x116   : > { %992 = vst.msk [vmem:[#allocation2 + $0xc] sm:$0xf] %vm988_vm14, %v971_v39  ;;  %v969_v41 = vpop.permute.xlu0 %968  ;;  %v1062_v47 = vpop.permute.xlu2 %1061 }
 0x117   : > { %991 = vst.msk [vmem:[#allocation2 + $0x8] sm:$0xf] %vm988_vm14, %v969_v41 }
 0x118   : > { %1089 = vst.msk [vmem:[#allocation2 + $0xc] sm:$0xf] %vm1085_vm15, %v1068_v40 }
 0x11d   : > { %v1066_v42 = vpop.permute.xlu1 %1065 }
 0x11e   : > { %1088 = vst.msk [vmem:[#allocation2 + $0x8] sm:$0xf] %vm1085_vm15, %v1066_v42  ;;  %v806_v43 = vpop.permute.xlu0 %805 }
 0x11f   : > { %829 = vst.msk [vmem:[#allocation2 + $0x4] sm:$0xf] %vm827_vm12, %v806_v43 }
 0x125   : > { %v1912_v44 = vld [vmem:[#allocation2 + $0x8] sm:$0xff]  ;;  %v967_v45 = vpop.permute.xlu1 %966 }
 0x126   : > { %v965_v48 = vpop.permute.xlu0 %964  ;;  %990 = vst.msk [vmem:[#allocation2 + $0x4] sm:$0xf] %vm988_vm14, %v967_v45  ;;  %1874 = vmatmul.msk.bf16.vlgmr.msra.gmra.mxu1 %vm1158_vm0, %v1912_v44 }
 0x127   : > { %989 = vst.msk [vmem:[#allocation2] sm:$0xf] %vm988_vm14, %v965_v48 }
 0x128   : > { %1086 = vst.msk [vmem:[#allocation2] sm:$0xf] %vm1085_vm15, %v1062_v47 }
 0x12e   : > { %v1064_v49 = vpop.permute.xlu0 %1063 }
 0x12f   : > { %1087 = vst.msk [vmem:[#allocation2 + $0x4] sm:$0xf] %vm1085_vm15, %v1064_v49 }
 0x136   : > { %v1911_v50 = vld [vmem:[#allocation2] sm:$0xff] }
 0x137   : > { %1873 = vmatmul.msk.bf16.vlgmr.msra.gmra.mxu0 %vm1158_vm0, %v1911_v50 }
 0x172   : > { %v1194_v52 = vpop.f32.mrf.mxu2 }
 0x173   : > { %v1212_v35 = vmul.f32 %v2400_v51, %v1194_v52 }
 0x175   : > { %v1224_v54 = vadd.f32 %v2405_v53, %v1212_v35 }
 0x177   : > { %v1232_v55 = vmax.f32 %v1224_v54, 0.0 }
 0x179   : > { %v1256_v58 = vrot.slane %v1232_v55, 2  ;;  %v1893_v59 = vrot.slane %v1232_v55, 9  ;;  %v1257_v6 = vrot.slane %v1232_v55, 4  ;;  %v1258_v23 = vrot.slane %v1232_v55, 6 }
 0x17a   : > { %v1196_v56 = vpop.f32.mrf.mxu2 }
 0x17b   : > { %v1213_v57 = vmul.f32 %v2400_v51, %v1196_v56  ;;  %v1894_v61 = vrot.slane %v1256_v58, 9  ;;  %v1404_v0 = vmax.f32 %v1232_v55, %v1893_v59  ;;  %v1895_v14 = vrot.slane %v1257_v6, 9 }
 0x17c   : > { %v1896_v33 = vrot.slane %v1258_v23, 9 }
 0x17d   : > { %v1225_v46 = vadd.f32 %v2405_v53, %v1213_v57  ;;  %v1405_v7 = vmax.f32 %v1256_v58, %v1894_v61  ;;  %v1406_v24 = vmax.f32 %v1257_v6, %v1895_v14 }
 0x17e   : > { %v1407_v45 = vmax.f32 %v1258_v23, %v1896_v33 }
 0x17f   : > { %v1233_v60 = vmax.f32 %v1225_v46, 0.0 }
 0x181   : > { %v1259_v62 = vrot.slane %v1233_v60, 2  ;;  %v1897_v63 = vrot.slane %v1233_v60, 9  ;;  %v1260_v3 = vrot.slane %v1233_v60, 4  ;;  %v1261_v18 = vrot.slane %v1233_v60, 6 }
 0x182   : > { %v1199_v1 = vpop.f32.mrf.mxu3 }
 0x183   : > { %v1214_v2 = vmul.f32 %v2400_v51, %v1199_v1  ;;  %v1898_v4 = vrot.slane %v1259_v62, 9  ;;  %v1408_v5 = vmax.f32 %v1233_v60, %v1897_v63  ;;  %v1899_v11 = vrot.slane %v1260_v3, 9 }
 0x184   : > { %v1900_v28 = vrot.slane %v1261_v18, 9 }
 0x185   : > { %v1409_v8 = vmax.f32 %v1259_v62, %v1898_v4  ;;  %v1428_v9 = vmax.f32 %v1404_v0, %v1408_v5  ;;  %v1226_v10 = vadd.f32 %v2405_v53, %v1214_v2  ;;  %v1410_v19 = vmax.f32 %v1260_v3, %v1899_v11 }
 0x186   : > { %v1411_v37 = vmax.f32 %v1261_v18, %v1900_v28 }
 0x187   : > { %v1429_v12 = vmax.f32 %v1405_v7, %v1409_v8  ;;  %v1444_v13 = vpack.c.bf16 %v1428_v9, %v1428_v9  ;;  %v2413_v17 = vmax.f32 %v1226_v10, 0.0  ;;  %v1430_v29 = vmax.f32 %v1406_v24, %v1410_v19 }
 0x188   : > { %v1431_v52 = vmax.f32 %v1407_v45, %v1411_v37 }
 0x189   : > { %v1458_v15 = vrot.slane %v1444_v13, 2  ;;  %v1445_v20 = vpack.c.bf16 %v1429_v12, %v1429_v12  ;;  %v1262_v26 = vrot.slane %v2413_v17, 2  ;;  %v1901_v31 = vrot.slane %v2413_v17, 9 }
 0x18a   : > { %v1201_v16 = vpop.f32.mrf.mxu3  ;;  %v1446_v38 = vpack.c.bf16 %v1430_v29, %v1430_v29  ;;  %v1263_v47 = vrot.slane %v2413_v17, 4  ;;  %v1447_v46 = vpack.c.bf16 %v1431_v52, %v1431_v52  ;;  %v1264_v2 = vrot.slane %v2413_v17, 6 }
 0x18b   : > { %v1469_v21 = vsel %vm1460_vm1, %v1444_v13, %v1458_v15  ;;  %v1215_v22 = vmul.f32 %v2400_v51, %v1201_v16  ;;  %v1515_v30 = vrot.slane %v1445_v20, 2  ;;  %v1902_v25 = vrot.slane %v1262_v26, 9 }
 0x18c   : > { %1481 = vst [vmem:[#allocation1 + $0x20] ss:$2 sm:$0xff] %v1469_v21  ;;  %v1412_v41 = vmax.f32 %v2413_v17, %v1901_v31  ;;  %v1571_v35 = vrot.slane %v1446_v38, 2  ;;  %v1903_v57 = vrot.slane %v1263_v47, 9  ;;  %v1627_v3 = vrot.slane %v1447_v46, 2 }
 0x18d   : > { %v1227_v27 = vadd.f32 %v2405_v53, %v1215_v22  ;;  %v1525_v39 = vsel %vm1460_vm1, %v1445_v20, %v1515_v30  ;;  %v1413_v48 = vmax.f32 %v1262_v26, %v1902_v25  ;;  %v1904_v7 = vrot.slane %v1264_v2, 9 }
 0x18e   : > { %v1581_v61 = vsel %vm1460_vm1, %v1446_v38, %v1571_v35  ;;  %v1414_v0 = vmax.f32 %v1263_v47, %v1903_v57  ;;  %v1637_v9 = vsel %vm1460_vm1, %v1447_v46, %v1627_v3 }
 0x18f   : > { %v1235_v32 = vmax.f32 %v1227_v27, 0.0  ;;  %v1415_v16 = vmax.f32 %v1264_v2, %v1904_v7 }
 0x191   : > { %v1265_v34 = vrot.slane %v1235_v32, 2  ;;  %v1905_v36 = vrot.slane %v1235_v32, 9  ;;  %v1266_v42 = vrot.slane %v1235_v32, 4  ;;  %v1267_v59 = vrot.slane %v1235_v32, 6 }
 0x193   : > { %v2421_v40 = vld.sshfl [vmem:[#allocation1 + $0x20] sm:$0xff pattern:$0x75643120]  ;;  %v1906_v43 = vrot.slane %v1265_v34, 9  ;;  %v1416_v44 = vmax.f32 %v1235_v32, %v1905_v36  ;;  %v1907_v54 = vrot.slane %v1266_v42, 9  ;;  %v1908_v4 = vrot.slane %v1267_v59, 9 }
 0x194   : > { %1537 = vst [vmem:[#allocation1 + $0x20] ss:$2 sm:$0xff] %v1525_v39 }
 0x195   : > { %v1417_v49 = vmax.f32 %v1265_v34, %v1906_v43  ;;  %v1432_v50 = vmax.f32 %v1412_v41, %v1416_v44  ;;  %v1418_v62 = vmax.f32 %v1266_v42, %v1907_v54  ;;  %v1419_v10 = vmax.f32 %v1267_v59, %v1908_v4 }
 0x197   : > { %v1433_v55 = vmax.f32 %v1413_v48, %v1417_v49  ;;  %v1448_v56 = vpack.c.bf16 %v1432_v50, %v1432_v50  ;;  %v1434_v5 = vmax.f32 %v1414_v0, %v1418_v62  ;;  %v1435_v18 = vmax.f32 %v1415_v16, %v1419_v10 }
 0x199   : > { %v1459_v58 = vrot.slane %v1448_v56, 2  ;;  %v1449_v63 = vpack.c.bf16 %v1433_v55, %v1433_v55  ;;  %v1450_v13 = vpack.c.bf16 %v1434_v5, %v1434_v5  ;;  %v1451_v22 = vpack.c.bf16 %v1435_v18, %v1435_v18 }
 0x19b   : > { %v2425_v60 = vld.sshfl [vmem:[#allocation1 + $0x20] sm:$0xff pattern:$0x75643120]  ;;  %v1472_v1 = vsel %vm1460_vm1, %v1448_v56, %v1459_v58  ;;  %v1516_v6 = vrot.slane %v1449_v63, 2  ;;  %v1572_v19 = vrot.slane %v1450_v13, 2  ;;  %v1628_v29 = vrot.slane %v1451_v22, 2 }
 0x19c   : > { %1593 = vst [vmem:[#allocation1 + $0x20] ss:$2 sm:$0xff] %v1581_v61 }
 0x19d   : > { %1485 = vst [vmem:[#allocation1 + $0x30] ss:$2 sm:$0xff] %v1472_v1  ;;  %v1528_v15 = vsel %vm1460_vm1, %v1449_v63, %v1516_v6  ;;  %v1584_v26 = vsel %vm1460_vm1, %v1450_v13, %v1572_v19  ;;  %v1640_v34 = vsel %vm1460_vm1, %v1451_v22, %v1628_v29 }
 0x1a3   : > { %v1189_v8 = vpop.f32.mrf.mxu1  ;;  %v2432_v12 = vld.sshfl [vmem:[#allocation1 + $0x20] sm:$0xff pattern:$0x75643120] }
 0x1a4   : > { %v1210_v11 = vmul.f32 %v2400_v51, %v1189_v8  ;;  %v2434_v14 = vld.sshfl [vmem:[#allocation1 + $0x30] sm:$0xff pattern:$0x75643120]  ;;  %1649 = vst [vmem:[#allocation1 + $0x20] ss:$2 sm:$0xff] %v1637_v9 }
 0x1a5   : > { %1541 = vst [vmem:[#allocation1 + $0x30] ss:$2 sm:$0xff] %v1528_v15 }
 0x1a6   : > { %v1222_v17 = vadd.f32 %v2405_v53, %v1210_v11 }
 0x1a8   : > { %v1230_v20 = vmax.f32 %v1222_v17, 0.0 }
 0x1aa   : > { %v1250_v27 = vrot.slane %v1230_v20, 2  ;;  %v1885_v30 = vrot.slane %v1230_v20, 9  ;;  %v1251_v44 = vrot.slane %v1230_v20, 4  ;;  %v1252_v62 = vrot.slane %v1230_v20, 6 }
 0x1ab   : > { %v1191_v21 = vpop.f32.mrf.mxu1 }
 0x1ac   : > { %v1211_v23 = vmul.f32 %v2400_v51, %v1191_v21  ;;  %v2439_v24 = vld.sshfl [vmem:[#allocation1 + $0x30] sm:$0xff pattern:$0x75643120]  ;;  %v1886_v32 = vrot.slane %v1250_v27, 9  ;;  %v1396_v37 = vmax.f32 %v1230_v20, %v1885_v30  ;;  %v1887_v54 = vrot.slane %v1251_v44, 9 }
 0x1ad   : > { %1597 = vst [vmem:[#allocation1 + $0x30] ss:$2 sm:$0xff] %v1584_v26  ;;  %v1888_v6 = vrot.slane %v1252_v62, 9 }
 0x1ae   : > { %v1223_v28 = vadd.f32 %v2405_v53, %v1211_v23  ;;  %v1397_v45 = vmax.f32 %v1250_v27, %v1886_v32  ;;  %v1398_v63 = vmax.f32 %v1251_v44, %v1887_v54 }
 0x1af   : > { %v1399_v17 = vmax.f32 %v1252_v62, %v1888_v6  ;;  %v1546_v6 = vunpack.c.l.b16 %v2425_v60 }
 0x1b0   : > { %v1231_v31 = vmax.f32 %v1223_v28, 0.0 }
 0x1b2   : > { %v1253_v33 = vrot.slane %v1231_v31, 2  ;;  %v1889_v25 = vrot.slane %v1231_v31, 9  ;;  %v1254_v38 = vrot.slane %v1231_v31, 4  ;;  %v1255_v57 = vrot.slane %v1231_v31, 6 }
 0x1b4   : > { %v1184_v36 = vpop.f32.mrf.mxu0  ;;  %v1890_v39 = vrot.slane %v1253_v33, 9  ;;  %v1400_v41 = vmax.f32 %v1231_v31, %v1889_v25  ;;  %v2444_v42 = vld.sshfl [vmem:[#allocation1 + $0x30] sm:$0xff pattern:$0x75643120]  ;;  %v1891_v49 = vrot.slane %v1254_v38, 9  ;;  %v1892_v2 = vrot.slane %v1255_v57, 9 }
 0x1b5   : > { %v1208_v43 = vmul.f32 %v2400_v51, %v1184_v36  ;;  %1653 = vst [vmem:[#allocation1 + $0x30] ss:$2 sm:$0xff] %v1640_v34 }
 0x1b6   : > { %v1401_v47 = vmax.f32 %v1253_v33, %v1890_v39  ;;  %v1424_v48 = vmax.f32 %v1396_v37, %v1400_v41  ;;  %v1402_v58 = vmax.f32 %v1254_v38, %v1891_v49  ;;  %v1403_v9 = vmax.f32 %v1255_v57, %v1892_v2 }
 0x1b7   : > { %v1220_v35 = vadd.f32 %v2405_v53, %v1208_v43 }
 0x1b8   : > { %v1425_v50 = vmax.f32 %v1397_v45, %v1401_v47  ;;  %v1440_v52 = vpack.c.bf16 %v1424_v48, %v1424_v48  ;;  %v1426_v0 = vmax.f32 %v1398_v63, %v1402_v58  ;;  %v1427_v21 = vmax.f32 %v1399_v17, %v1403_v9 }
 0x1b9   : > { %v2449_v61 = vmax.f32 %v1220_v35, 0.0 }
 0x1ba   : > { %v1457_v55 = vrot.slane %v1440_v52, 2  ;;  %v1441_v46 = vpack.c.bf16 %v1425_v50, %v1425_v50  ;;  %v1442_v10 = vpack.c.bf16 %v1426_v0, %v1426_v0  ;;  %v1443_v32 = vpack.c.bf16 %v1427_v21, %v1427_v21 }
 0x1bb   : > { %v1244_v5 = vrot.slane %v2449_v61, 2  ;;  %v1877_v8 = vrot.slane %v2449_v61, 9  ;;  %v1245_v26 = vrot.slane %v2449_v61, 4  ;;  %v1246_v44 = vrot.slane %v2449_v61, 6 }
 0x1bc   : > { %v1186_v56 = vpop.f32.mrf.mxu0  ;;  %v1466_v59 = vsel %vm1460_vm1, %v1440_v52, %v1457_v55  ;;  %v1514_v3 = vrot.slane %v1441_v46, 2  ;;  %v1570_v22 = vrot.slane %v1442_v10, 2  ;;  %v1626_v43 = vrot.slane %v1443_v32, 2 }
 0x1bd   : > { %1477 = vst [vmem:[#allocation1 + $0x10] ss:$2 sm:$0xff] %v1466_v59  ;;  %v1209_v1 = vmul.f32 %v2400_v51, %v1186_v56  ;;  %v1878_v16 = vrot.slane %v1244_v5, 9  ;;  %v1388_v19 = vmax.f32 %v2449_v61, %v1877_v8  ;;  %v1879_v34 = vrot.slane %v1245_v26, 9 }
 0x1be   : > { %v1522_v13 = vsel %vm1460_vm1, %v1441_v46, %v1514_v3  ;;  %v1578_v33 = vsel %vm1460_vm1, %v1442_v10, %v1570_v22  ;;  %v1634_v50 = vsel %vm1460_vm1, %v1443_v32, %v1626_v43  ;;  %v1880_v54 = vrot.slane %v1246_v44, 9 }
 0x1bf   : > { %v1221_v4 = vadd.f32 %v2405_v53, %v1209_v1  ;;  %v1389_v27 = vmax.f32 %v1244_v5, %v1878_v16  ;;  %v1390_v45 = vmax.f32 %v1245_v26, %v1879_v34  ;;  %v1490_v55 = vunpack.c.l.b16 %v2421_v40 }
 0x1c0   : > { %v1491_v56 = vunpack.c.l.b16 %v2434_v14  ;;  %v1391_v63 = vmax.f32 %v1246_v44, %v1880_v54  ;;  %v1547_v8 = vunpack.c.l.b16 %v2439_v24  ;;  %v1602_v22 = vunpack.c.l.b16 %v2432_v12 }
 0x1c1   : > { %v1229_v7 = vmax.f32 %v1221_v4, 0.0  ;;  %v1495_v1 = vrot.slane %v1490_v55, 6 }
 0x1c2   : > { %v1498_v0 = vrot.slane %v1491_v56, 5  ;;  %v1552_v17 = vrot.slane %v1547_v8, 5  ;;  %v1606_v32 = vrot.slane %v1602_v22, 6 }
 0x1c3   : > { %v1247_v15 = vrot.slane %v1229_v7, 2  ;;  %v1881_v51 = vrot.slane %v1229_v7, 9  ;;  %v1248_v53 = vrot.slane %v1229_v7, 4  ;;  %v1249_v37 = vrot.slane %v1229_v7, 6 }
 0x1c4   : > { %v1478_v11 = vld.sshfl [vmem:[#allocation1 + $0x10] sm:$0xff pattern:$0x75643120] }
 0x1c5   : > { %1533 = vst [vmem:[#allocation1 + $0x10] ss:$2 sm:$0xff] %v1522_v13  ;;  %v1882_v18 = vrot.slane %v1247_v15, 9  ;;  %v1392_v20 = vmax.f32 %v1229_v7, %v1881_v51  ;;  %v1883_v29 = vrot.slane %v1248_v53, 9  ;;  %v1884_v47 = vrot.slane %v1249_v37, 9 }
 0x1c6   : > { %v1489_v35 = vunpack.c.l.b16 %v1478_v11  ;;  %v1550_v51 = vrot.slane %v1546_v6, 6 }
 0x1c7   : > { %v1393_v23 = vmax.f32 %v1247_v15, %v1882_v18  ;;  %v1420_v28 = vmax.f32 %v1388_v19, %v1392_v20  ;;  %v1394_v38 = vmax.f32 %v1248_v53, %v1883_v29  ;;  %v1395_v57 = vmax.f32 %v1249_v37, %v1884_v47 }
 0x1c8   : > { %v1492_v62 = vrot.slane %v1489_v35, 7 }
 0x1c9   : > { %v1421_v30 = vmax.f32 %v1389_v27, %v1393_v23  ;;  %v1436_v31 = vpack.c.bf16 %v1420_v28, %v1420_v28  ;;  %v1422_v48 = vmax.f32 %v1390_v45, %v1394_v38  ;;  %v1423_v40 = vmax.f32 %v1391_v63, %v1395_v57 }
 0x1ca   : > { %v1603_v23 = vunpack.c.l.b16 %v2444_v42  ;;  %v1654_v42 = vld.sshfl [vmem:[#allocation1 + $0x30] sm:$0xff pattern:$0x75643120] }
 0x1cb   : > { %v1456_v36 = vrot.slane %v1436_v31, 2  ;;  %v1437_v39 = vpack.c.bf16 %v1421_v30, %v1421_v30  ;;  %v1438_v58 = vpack.c.bf16 %v1422_v48, %v1422_v48  ;;  %v1439_v9 = vpack.c.bf16 %v1423_v40, %v1423_v40 }
 0x1cc   : > { %v1534_v25 = vld.sshfl [vmem:[#allocation1 + $0x10] sm:$0xff pattern:$0x75643120]  ;;  %v1608_v34 = vrot.slane %v1603_v23, 5  ;;  %v1659_v43 = vunpack.c.l.b16 %v1654_v42 }
 0x1cd   : > { %1589 = vst [vmem:[#allocation1 + $0x10] ss:$2 sm:$0xff] %v1578_v33  ;;  %v1463_v41 = vsel %vm1460_vm1, %v1436_v31, %v1456_v36  ;;  %v1513_v49 = vrot.slane %v1437_v39, 2  ;;  %v1569_v3 = vrot.slane %v1438_v58, 2  ;;  %v1545_v4 = vunpack.c.l.b16 %v1534_v25 }
 0x1ce   : > { %1473 = vst [vmem:[#allocation1] ss:$2 sm:$0xff] %v1463_v41  ;;  %v1625_v18 = vrot.slane %v1439_v9, 2  ;;  %v1650_v36 = vld.sshfl [vmem:[#allocation1 + $0x20] sm:$0xff pattern:$0x75643120] }
 0x1cf   : > { %v1519_v59 = vsel %vm1460_vm1, %v1437_v39, %v1513_v49  ;;  %v1575_v10 = vsel %vm1460_vm1, %v1438_v58, %v1569_v3  ;;  %v1548_v16 = vrot.slane %v1545_v4, 7  ;;  %v1658_v41 = vunpack.c.l.b16 %v1650_v36 }
 0x1d0   : > { %v1631_v26 = vsel %vm1460_vm1, %v1439_v9, %v1625_v18  ;;  %v1664_v35 = vrot.slane %v1659_v43, 5 }
 0x1d4   : > { %v1590_v52 = vld.sshfl [vmem:[#allocation1 + $0x10] sm:$0xff pattern:$0x75643120] }
 0x1d5   : > { %1645 = vst [vmem:[#allocation1 + $0x10] ss:$2 sm:$0xff] %v1634_v50  ;;  %v1474_v46 = vld.sshfl [vmem:[#allocation1] sm:$0xff pattern:$0x75643120]  ;;  %v1601_v20 = vunpack.c.l.b16 %v1590_v52  ;;  %v1662_v50 = vrot.slane %v1658_v41, 6 }
 0x1d6   : > { %1529 = vst [vmem:[#allocation1] ss:$2 sm:$0xff] %v1519_v59  ;;  %v1488_v61 = vunpack.c.l.b16 %v1474_v46 }
 0x1d7   : > { %v1604_v30 = vrot.slane %v1601_v20, 7 }
 0x1d8   : > { %v1494_v2 = vsel %vm1493_vm2, %v1492_v62, %v1488_v61 }
 0x1d9   : > { %v1497_v14 = vsel %vm1496_vm3, %v1495_v1, %v1494_v2 }
 0x1da   : > { %v1500_v5 = vsel %vm1499_vm4, %v1498_v0, %v1497_v14 }
 0x1db   : > { %v1501_v7 = vpack.c.b16 %v1500_v5, %v1500_v5 }
 0x1dc   : > { %v1646_v33 = vld.sshfl [vmem:[#allocation1 + $0x10] sm:$0xff pattern:$0x75643120] }
 0x1dd   : > { %v1530_v11 = vld.sshfl [vmem:[#allocation1] sm:$0xff pattern:$0x75643120]  ;;  %v1502_v13 = vrot.slane %v1501_v7, 2  ;;  %v1657_v38 = vunpack.c.l.b16 %v1646_v33 }
 0x1de   : > { %v1544_v15 = vunpack.c.l.b16 %v1530_v11  ;;  %1585 = vst [vmem:[#allocation1] ss:$2 sm:$0xff] %v1575_v10 }
 0x1df   : > { %v1505_v60 = vsel %vm1460_vm1, %v1501_v7, %v1502_v13  ;;  %v1660_v48 = vrot.slane %v1657_v38, 7 }
 0x1e0   : > { %v1549_v24 = vsel %vm1493_vm2, %v1548_v16, %v1544_v15  ;;  %1508 = vst.msk [vmem:[%s2475_s25] sm:$0x3] %vm1507_vm5, %v1505_v60 }
 0x1e1   : > { %v1551_v19 = vsel %vm1496_vm3, %v1550_v51, %v1549_v24 }
 0x1e2   : > { %v1553_v53 = vsel %vm1499_vm4, %v1552_v17, %v1551_v19 }
 0x1e3   : > { %v1554_v21 = vpack.c.b16 %v1553_v53, %v1553_v53 }
 0x1e5   : > { %v1555_v27 = vrot.slane %v1554_v21, 2  ;;  %v1586_v28 = vld.sshfl [vmem:[#allocation1] sm:$0xff pattern:$0x75643120] }
 0x1e6   : > { %v1600_v29 = vunpack.c.l.b16 %v1586_v28  ;;  %1641 = vst [vmem:[#allocation1] ss:$2 sm:$0xff] %v1631_v26 }
 0x1e7   : > { %v1558_v31 = vsel %vm1460_vm1, %v1554_v21, %v1555_v27 }
 0x1e8   : > { %1560 = vrot.lane.b32.xlu1 %v1558_v31, %s1962_s22  ;;  %v1605_v25 = vsel %vm1493_vm2, %v1604_v30, %v1600_v29 }
 0x1e9   : > { %v1607_v12 = vsel %vm1496_vm3, %v1606_v32, %v1605_v25 }
 0x1ea   : > { %v1609_v37 = vsel %vm1499_vm4, %v1608_v34, %v1607_v12 }
 0x1eb   : > { %v1610_v39 = vpack.c.b16 %v1609_v37, %v1609_v37 }
 0x1ed   : > { %v1611_v44 = vrot.slane %v1610_v39, 2  ;;  %v1642_v45 = vld.sshfl [vmem:[#allocation1] sm:$0xff pattern:$0x75643120] }
 0x1ee   : > { %v1656_v47 = vunpack.c.l.b16 %v1642_v45 }
 0x1ef   : > { %v1614_v49 = vsel %vm1460_vm1, %v1610_v39, %v1611_v44 }
 0x1f0   : > { %1616 = vrot.lane.b32.xlu2 %v1614_v49, %s1961_s21  ;;  %v1661_v52 = vsel %vm1493_vm2, %v1660_v48, %v1656_v47 }
 0x1f1   : > { %v1663_v54 = vsel %vm1496_vm3, %v1662_v50, %v1661_v52 }
 0x1f2   : > { %v1665_v55 = vsel %vm1499_vm4, %v1664_v35, %v1663_v54 }
 0x1f3   : > { %v1666_v56 = vpack.c.b16 %v1665_v55, %v1665_v55 }
 0x1f5   : > { %v1667_v57 = vrot.slane %v1666_v56, 2 }
 0x1f7   : > { %v1670_v58 = vsel %vm1460_vm1, %v1666_v56, %v1667_v57 }
 0x1f8   : > { %1672 = vrot.lane.b32.xlu0 %v1670_v58, %s1963_s23 }
 0x24a   : > { %v1617_v59 = vpop.permute.xlu2 %1616 }
 0x25a   : > { %v1561_v46 = vpop.permute.xlu1 %1560 }
 0x25b   : > { %1564 = vst.msk [vmem:[%s2475_s25] sm:$0x3] %vm1563_vm6, %v1561_v46 }
 0x25c   : > { %1620 = vst.msk [vmem:[%s2475_s25] sm:$0x3] %vm1619_vm7, %v1617_v59 }
 0x26a   : > { %v1673_v61 = vpop.permute.xlu0 %1672 }
 0x26b   : > { %1676 = vst.msk [vmem:[%s2475_s25] sm:$0x3] %vm1675_vm8, %v1673_v61 }
 0x26c PF: > { %s14_s15 = sadd.s32 1, %s1959_s15  }
 0x26d   : > { %p11_p4 = scmp.ge.s32.totalorder %s14_s15, 4  }
 0x26f   :  { %13 = sbr.rel (!%p11_p4) target bundleno = 1 (0x1), region = 80 }

// kernel: _lambda_.11
= control target key start
LH: loop header
LB: loop body
LE: loop exit
PB: predicated region body
PF: predicated region fallthrough
CT: control target
= control target key end

     0   :  { %vm46_vm0 = vcmask 130048   ;;  %s182_s2 = inlined_call_operand.vmem [shape: bf16[16,16], index: 2, kind: input, shape index: {}]   ;;  %s183_s4 = inlined_call_operand.vmem [shape: bf16[16,16], index: 4, kind: input, shape index: {}]   ;;  %s184_s0 = inlined_call_operand.vmem [shape: bf16[8,16], index: 0, kind: input, shape index: {}]   ;;  %s185_s1 = inlined_call_operand.vmem [shape: bf16[8,16], index: 1, kind: input, shape index: {}]   ;;  %s186_s3 = inlined_call_operand.vmem [shape: f32[1,16], index: 3, kind: input, shape index: {}]   ;;  %s187_s5 = inlined_call_operand.vmem [shape: f32[1,16], index: 5, kind: input, shape index: {}]   ;;  %s188_s6 = inlined_call_operand.vmem [shape: f32[8,16], index: 6, kind: output, shape index: {0}]   ;;  %s189_s7 = inlined_call_operand.vmem [shape: f32[8,16], index: 7, kind: output, shape index: {1}]  }
   0x1   :  { %v110_v0 = vld [vmem:[%s182_s2] sm:$0xff] }
   0x2   :  { %v111_v1 = vld [vmem:[%s183_s4] sm:$0xff]  ;;  %57 = vmatpush.bf16.msra.mxu0 %v110_v0 }
   0x3   :  { %v26_v2 = vld [vmem:[%s185_s1] sm:$0xf]  ;;  %84 = vmatpush.bf16.msra.mxu1 %v111_v1 }
   0x4   :  { %v27_v3 = vunpack.c.l.bf16 %v26_v2  ;;  %v29_v4 = vld [vmem:[%s184_s0] sm:$0xf] }
   0x5   :  { %v30_v5 = vunpack.c.l.bf16 %v29_v4  ;;  %v112_v10 = vld [vmem:[%s186_s3] ss:$0 sm:$0xff] }
   0x6   :  { %114 = vtanh.f32 %v27_v3  ;;  %v113_v11 = vld [vmem:[%s187_s5] ss:$0 sm:$0xff] }
   0x7   :  { %116 = vtanh.f32 %v30_v5 }
   0xc   :  { %v115_v6 = vpop.eup %114 }
   0xd   :  { %v117_v7 = vpop.eup %116 }
   0xe   :  { %v32_v8 = vmul.f32 %v117_v7, %v115_v6 }
  0x10   :  { %v33_v9 = vpack.c.bf16 %v32_v8, %v32_v8 }
  0x12   :  { %104 = vmatmul.msk.bf16.vlgmr.msra.gmra.mxu0 %vm46_vm0, %v33_v9  ;;  %109 = vmatmul.msk.bf16.vlgmr.msra.gmra.mxu1 %vm46_vm0, %v33_v9 }
  0x8f   :  { %v59_v12 = vpop.f32.mrf.mxu0  ;;  %v86_v13 = vpop.f32.mrf.mxu1 }
  0x90   :  { %v60_v14 = vadd.f32 %v112_v10, %v59_v12  ;;  %v87_v15 = vadd.f32 %v113_v11, %v86_v13 }
  0x92   :  { %v63_v16 = vmax.f32 %v60_v14, 0.0  ;;  %v90_v17 = vmax.f32 %v87_v15, 0.0 }
  0x94   :  { %64 = vst.msk [vmem:[%s188_s6] sm:$0xff] %vm46_vm0, %v63_v16 }
  0x95   :  { %91 = vst.msk [vmem:[%s189_s7] sm:$0xff] %vm46_vm0, %v90_v17 }
  0x97   :  { %v61_v18 = vpop.f32.mrf.mxu0  ;;  %v88_v19 = vpop.f32.mrf.mxu1 }

// kernel: _lambda_.13
= control target key start
LH: loop header
LB: loop body
LE: loop exit
PB: predicated region body
PF: predicated region fallthrough
CT: control target
= control target key end

     0   :  { %vm29_vm0 = vcmask 130048   ;;  %vm46_vm1 = vcmask 15360   ;;  %s91_s1 = inlined_call_operand.vmem [shape: bf16[16,2], index: 1, kind: input, shape index: {}]   ;;  %s92_s0 = inlined_call_operand.vmem [shape: f32[8,16], index: 0, kind: input, shape index: {}]   ;;  %s93_s2 = inlined_call_operand.vmem [shape: f32[1,2], index: 2, kind: input, shape index: {}]   ;;  %s94_s3 = inlined_call_operand.vmem [shape: f32[8,2], index: 3, kind: output, shape index: {}]  }
   0x1   :  { %v57_v0 = vld [vmem:[%s91_s1] sm:$0xff] }
   0x2   :  { %v15_v1 = vld [vmem:[%s92_s0] sm:$0xff]  ;;  %40 = vmatpush.bf16.msra.mxu0 %v57_v0 }
   0x3   :  { %v16_v2 = vpack.c.bf16 %v15_v1, %v15_v1  ;;  %v58_v3 = vld [vmem:[%s93_s2] ss:$0 sm:$0xff] }
   0x5   :  { %56 = vmatmul.msk.bf16.vlgmr.msra.gmra.mxu0 %vm29_vm0, %v16_v2 }
  0x82   :  { %v42_v4 = vpop.f32.mrf.mxu0 }
  0x83   :  { %v43_v5 = vadd.f32 %v58_v3, %v42_v4 }
  0x85   :  { %47 = vst.msk [vmem:[%s94_s3] sm:$0xff] %vm46_vm1, %v43_v5 }
  0x8a   :  { %v44_v6 = vpop.f32.mrf.mxu0 }

// kernel: _lambda_.12
= control target key start
LH: loop header
LB: loop body
LE: loop exit
PB: predicated region body
PF: predicated region fallthrough
CT: control target
= control target key end

     0   :  { %vm29_vm0 = vcmask 130048   ;;  %vm47_vm1 = vcmask 48128   ;;  %s94_s1 = inlined_call_operand.vmem [shape: bf16[16,6], index: 1, kind: input, shape index: {}]   ;;  %s95_s0 = inlined_call_operand.vmem [shape: f32[8,16], index: 0, kind: input, shape index: {}]   ;;  %s96_s2 = inlined_call_operand.vmem [shape: f32[1,6], index: 2, kind: input, shape index: {}]   ;;  %s97_s3 = inlined_call_operand.vmem [shape: f32[8,6], index: 3, kind: output, shape index: {}]  }
   0x1   :  { %v58_v0 = vld [vmem:[%s94_s1] sm:$0xff] }
   0x2   :  { %v15_v1 = vld [vmem:[%s95_s0] sm:$0xff]  ;;  %40 = vmatpush.bf16.msra.mxu0 %v58_v0 }
   0x3   :  { %v16_v2 = vpack.c.bf16 %v15_v1, %v15_v1  ;;  %v59_v3 = vld [vmem:[%s96_s2] ss:$0 sm:$0xff] }
   0x5   :  { %57 = vmatmul.msk.bf16.vlgmr.msra.gmra.mxu0 %vm29_vm0, %v16_v2 }
  0x82   :  { %v42_v4 = vpop.f32.mrf.mxu0 }
  0x83   :  { %v43_v5 = vadd.f32 %v59_v3, %v42_v4 }
  0x85   :  { %60 = vtanh.f32 %v43_v5 }
  0x8a   :  { %v44_v6 = vpop.f32.mrf.mxu0 }
  0x8b   :  { %v61_v7 = vpop.eup %60 }
  0x8c   :  { %48 = vst.msk [vmem:[%s97_s3] sm:$0xff] %vm47_vm1, %v61_v7 }

// kernel: _lambda_.7
= control target key start
LH: loop header
LB: loop body
LE: loop exit
PB: predicated region body
PF: predicated region fallthrough
CT: control target
= control target key end

     0   :  { %s5562_s15 = smov 0   ;;  %s7684_s0 = inlined_call_operand.vmem [shape: bf16[2,18,18,4], index: 0, kind: input, shape index: {}]   ;;  %s7685_s1 = inlined_call_operand.vmem [shape: bf16[36,8], index: 1, kind: input, shape index: {}]   ;;  %s7686_s2 = inlined_call_operand.vmem [shape: f32[1,8], index: 2, kind: input, shape index: {}]   ;;  %s7687_s3 = inlined_call_operand.vmem [shape: f32[1,8], index: 3, kind: input, shape index: {}]   ;;  %s7688_s4 = inlined_call_operand.vmem [shape: bf16[2,8,64], index: 4, kind: output, shape index: {}]  }
   0x1 LB: > { %s4938_s16 = sadd.s32 4294967295, %s5524_s15   ;;  %p4942_p0 = scmp.ge.s32.totalorder %s5524_s15, 1  ;;  %s5524_s15 = sphi %s5562_s15, %s14_s15  }
   0x2   : > { %p162_p1 = scmp.lt.s32.totalorder %s5524_s15, 3 }
   0x4   : > { %p163_p2 = pnand %p4942_p0, %p162_p1 }
   0x6   : > { %166 = sbr.rel (%p163_p2) target bundleno = 1139 (0x473), region = 36 }
   0xb   : > { %p187_p3 = scmp.lt.s32.totalorder %s4938_s16, 1  ;;  %vm310_vm0 = vsmask.f32 3328  ;;  %vm311_vm1 = vsmask.f32 7440  ;;  %s5526_s21 = smov 4  }
   0xc   : > { %vm5587_vm2 = vmor %vm310_vm0, %vm311_vm1  ;;  %vm922_vm3 = vcmask 1042432   ;;  %vm923_vm4 = vcmask 1046532   ;;  %vm229_vm5 = vcmask 27648   ;;  %s5527_s22 = smov 8   ;;  %vm793_vm7 = vcmask 60448   ;;  %s5528_s23 = smov 12  }
   0xd   : > { %s7815_s16 = smov (!%p187_p3, %s4938_s16), 1  ;;  %vm5762_vm6 = vmor %vm922_vm3, %vm923_vm4  ;;  %vm1133_vm8 = vcmask 93248   ;;  %s5529_s24 = smov 16   ;;  %vm1327_vm9 = vcmask 126048   ;;  %vm1888_vm10 = vcmask 158848   ;;  %vm2225_vm11 = vcmask 191648  }
   0xe   : > { %s5494_s17 = smul.u32 216, %s7815_s16  ;;  %s5530_s25 = smov 20   ;;  %vm2419_vm12 = vcmask 224448   ;;  %vm3531_vm13 = vcmask 1041408   ;;  %vm2980_vm14 = vcmask 257248   ;;  %vm3317_vm15 = vcmask 290048  }
   0xf   : > { %s5531_s26 = smov 24   ;;  %s5532_s27 = smov 28   ;;  %vm3482_vm0 = vcmask 293888   ;;  %vm4609_vm1 = vcmask 1041409   ;;  %vm4615_vm3 = vcmask 1043459   ;;  %vm4618_vm4 = vcmask 1044484  }
  0x10   : > { %s5576_s20 = scalar_lea.vmem %s7684_s0, %s5494_s17  ;;  %s5533_s28 = smov 32  }
  0x11   : > { %v265_v0 = vld [vmem:[%s5576_s20 + $0xc] sm:$0xf]  ;;  %v266_v1 = vld [vmem:[%s5576_s20 + $0x10] sm:$0xf]  ;;  %v262_v2 = vld [vmem:[%s5576_s20] sm:$0xf] }
  0x12   : > { %v338_v3 = vshrl.u32 %v265_v0, 16  ;;  %v341_v4 = vshll.u32 %v265_v0, 16  ;;  %v347_v5 = vshll.u32 %v266_v1, 16  ;;  %v351_v6 = vshrl.u32 %v266_v1, 16  ;;  %v263_v7 = vld [vmem:[%s5576_s20 + $0x4] sm:$0xf] }
  0x13   : > { %v314_v8 = vshrl.u32 %v262_v2, 16  ;;  %v317_v9 = vshll.u32 %v262_v2, 16  ;;  %v323_v10 = vshll.u32 %v263_v7, 16  ;;  %v327_v11 = vshrl.u32 %v263_v7, 16  ;;  %v267_v12 = vld [vmem:[%s5576_s20 + $0x14] sm:$0x1] }
  0x14   : > { %v340_v13 = vrot.slane %v338_v3, 4  ;;  %v343_v14 = vrot.slane %v341_v4, 5  ;;  %v349_v15 = vrot.slane %v347_v5, 5  ;;  %v353_v16 = vrot.slane %v351_v6, 4  ;;  %v264_v17 = vld [vmem:[%s5576_s20 + $0x8] sm:$0x1] }
  0x15   : > { %v316_v18 = vrot.slane %v314_v8, 4  ;;  %v319_v19 = vrot.slane %v317_v9, 5  ;;  %v329_v20 = vrot.slane %v327_v11, 4  ;;  %v272_v21 = vld [vmem:[%s5576_s20 + $0x28] sm:$0xf]  ;;  %v357_v24 = vshll.u32 %v267_v12, 16 }
  0x16   : > { %v344_v22 = vor.u32 %v343_v14, %v340_v13  ;;  %v354_v23 = vor.u32 %v353_v16, %v349_v15  ;;  %v325_v27 = vrot.slane %v323_v10, 5  ;;  %v395_v28 = vshll.u32 %v272_v21, 16  ;;  %v271_v30 = vld [vmem:[%s5576_s20 + $0x24] sm:$0xf]  ;;  %v268_v35 = vld [vmem:[%s5576_s20 + $0x18] sm:$0xf] }
  0x17   : > { %v320_v26 = vor.u32 %v319_v19, %v316_v18  ;;  %v399_v29 = vshrl.u32 %v272_v21, 16  ;;  %v333_v32 = vshll.u32 %v264_v17, 16  ;;  %v359_v38 = vrot.slane %v357_v24, 5  ;;  %v269_v40 = vld [vmem:[%s5576_s20 + $0x1c] sm:$0xf]  ;;  %s5534_s19 = smov 48  }
  0x18   : > { %v345_v31 = vrot.slane %v344_v22, 4  ;;  %v330_v34 = vor.u32 %v329_v20, %v325_v27  ;;  %v355_v37 = vrot.slane %v354_v23, 4  ;;  %v386_v39 = vshrl.u32 %v271_v30, 16  ;;  %v273_v42 = vld [vmem:[%s5576_s20 + $0x2c] sm:$0x1] }
  0x19   : > { %v321_v33 = vrot.slane %v320_v26, 4  ;;  %v5600_v43 = vrot.slane %v395_v28, 5  ;;  %v401_v44 = vrot.slane %v399_v29, 4  ;;  %v389_v45 = vshll.u32 %v271_v30, 16  ;;  %v277_v50 = vld [vmem:[%s5576_s20 + $0x3c] sm:$0xf] }
  0x1a   : > { %v350_v36 = vsel %vm5587_vm2, %v345_v31, %v349_v15  ;;  %v335_v46 = vrot.slane %v333_v32, 5  ;;  %v388_v47 = vrot.slane %v386_v39, 4  ;;  %v362_v48 = vshrl.u32 %v268_v35, 16  ;;  %v275_v58 = vld [vmem:[%s5576_s20 + $0x34] sm:$0xf] }
  0x1b   : > { %701 = vrot.lane.b32.xlu1 %v350_v36, %s5526_s21  ;;  %v326_v41 = vsel %vm5587_vm2, %v321_v33, %v325_v27  ;;  %v365_v49 = vshll.u32 %v268_v35, 16  ;;  %v331_v51 = vrot.slane %v330_v34, 4  ;;  %v391_v52 = vrot.slane %v389_v45, 5  ;;  %v270_v6 = vld [vmem:[%s5576_s20 + $0x20] sm:$0x1] }
  0x1c   : > { %697 = vrot.lane.b32.xlu0 %v326_v41, %s5526_s21  ;;  %v371_v53 = vshll.u32 %v269_v40, 16  ;;  %v375_v54 = vshrl.u32 %v269_v40, 16  ;;  %v405_v55 = vshll.u32 %v273_v42, 16  ;;  %v364_v56 = vrot.slane %v362_v48, 4  ;;  %v278_v15 = vld [vmem:[%s5576_s20 + $0x40] sm:$0xf] }
  0x1d   : > { %v367_v57 = vrot.slane %v365_v49, 5  ;;  %v402_v59 = vor.u32 %v401_v44, %v5600_v43  ;;  %v434_v61 = vshrl.u32 %v277_v50, 16  ;;  %v437_v62 = vshll.u32 %v277_v50, 16  ;;  %v276_v16 = vld [vmem:[%s5576_s20 + $0x38] sm:$0x1] }
  0x1e   : > { %v377_v60 = vrot.slane %v375_v54, 4  ;;  %v360_v63 = vsel %vm5587_vm2, %v355_v37, %v359_v38  ;;  %v392_v0 = vor.u32 %v391_v52, %v388_v47  ;;  %v373_v2 = vrot.slane %v371_v53, 5  ;;  %v281_v20 = vld [vmem:[%s5576_s20 + $0x4c] sm:$0xf]  ;;  %v274_v21 = vld [vmem:[%s5576_s20 + $0x30] sm:$0xf] }
  0x1f   : > { %v368_v1 = vor.u32 %v367_v57, %v364_v56  ;;  %v336_v3 = vsel %vm5587_vm2, %v331_v51, %v335_v46  ;;  %v419_v4 = vshll.u32 %v275_v58, 16  ;;  %v423_v5 = vshrl.u32 %v275_v58, 16  ;;  %v280_v24 = vld [vmem:[%s5576_s20 + $0x48] sm:$0xf]  ;;  %v286_v47 = vld [vmem:[%s5576_s20 + $0x60] sm:$0xf] }
  0x20   : > { %v407_v7 = vrot.slane %v405_v55, 5  ;;  %v403_v9 = vrot.slane %v402_v59, 4  ;;  %v436_v10 = vrot.slane %v434_v61, 4  ;;  %v439_v11 = vrot.slane %v437_v62, 5  ;;  %v282_v49 = vld [vmem:[%s5576_s20 + $0x50] sm:$0x1] }
  0x21   : > { %v369_v8 = vrot.slane %v368_v1, 4  ;;  %v378_v12 = vor.u32 %v377_v60, %v373_v2  ;;  %v393_v13 = vrot.slane %v392_v0, 4  ;;  %v381_v17 = vshll.u32 %v270_v6, 16  ;;  %v284_v53 = vld [vmem:[%s5576_s20 + $0x58] sm:$0xf] }
  0x22   : > { %v5618_v18 = vrot.slane %v419_v4, 5  ;;  %v425_v19 = vrot.slane %v423_v5, 4  ;;  %v408_v26 = vsel %vm5587_vm2, %v403_v9, %v407_v7  ;;  %v440_v27 = vor.u32 %v439_v11, %v436_v10  ;;  %v279_v58 = vld [vmem:[%s5576_s20 + $0x44] sm:$0x1]  ;;  %v290_v11 = vld [vmem:[%s5576_s20 + $0x70] sm:$0xf] }
  0x23   : > { %703 = vrot.lane.b32.xlu1 %v360_v63, %s5526_s21  ;;  %v374_v14 = vsel %vm5587_vm2, %v369_v8, %v373_v2  ;;  %v379_v22 = vrot.slane %v378_v12, 4  ;;  %v383_v23 = vrot.slane %v381_v17, 5  ;;  %v443_v28 = vshll.u32 %v278_v15, 16  ;;  %v283_v2 = vld [vmem:[%s5576_s20 + $0x54] sm:$0xf] }
  0x24   : > { %699 = vrot.lane.b32.xlu0 %v336_v3, %s5526_s21  ;;  %705 = vrot.lane.b32.xlu2 %v374_v14, %s5526_s21  ;;  %v429_v29 = vshll.u32 %v276_v16, 16  ;;  %v398_v30 = vsel %vm5587_vm2, %v393_v13, %v5600_v43  ;;  %v467_v31 = vshll.u32 %v281_v20, 16  ;;  %v471_v32 = vshrl.u32 %v281_v20, 16  ;;  %v287_v6 = vld [vmem:[%s5576_s20 + $0x64] sm:$0xf] }
  0x25   : > { %v410_v33 = vshrl.u32 %v274_v21, 16  ;;  %v426_v34 = vor.u32 %v425_v19, %v5618_v18  ;;  %v458_v35 = vshrl.u32 %v280_v24, 16  ;;  %v461_v36 = vshll.u32 %v280_v24, 16  ;;  %v289_v20 = vld [vmem:[%s5576_s20 + $0x6c] sm:$0xf] }
  0x26   : > { %v413_v37 = vshll.u32 %v274_v21, 16  ;;  %v447_v38 = vshrl.u32 %v278_v15, 16  ;;  %v384_v39 = vsel %vm5587_vm2, %v379_v22, %v383_v23  ;;  %v445_v41 = vrot.slane %v443_v28, 5  ;;  %v285_v15 = vld [vmem:[%s5576_s20 + $0x5c] sm:$0x1] }
  0x27   : > { %v412_v40 = vrot.slane %v410_v33, 4  ;;  %v441_v43 = vrot.slane %v440_v27, 4  ;;  %v431_v44 = vrot.slane %v429_v29, 5  ;;  %v5633_v45 = vrot.slane %v467_v31, 5 }
  0x28   : > { %v415_v42 = vrot.slane %v413_v37, 5  ;;  %v473_v46 = vrot.slane %v471_v32, 4  ;;  %v427_v48 = vrot.slane %v426_v34, 4  ;;  %v460_v50 = vrot.slane %v458_v35, 4 }
  0x29   : > { %v463_v51 = vrot.slane %v461_v36, 5  ;;  %v449_v54 = vrot.slane %v447_v38, 4  ;;  %v506_v56 = vshrl.u32 %v286_v47, 16  ;;  %v509_v57 = vshll.u32 %v286_v47, 16  ;;  %v293_v47 = vld [vmem:[%s5576_s20 + $0x7c] sm:$0xf] }
  0x2a   : > { %v416_v52 = vor.u32 %v415_v42, %v412_v40  ;;  %v446_v59 = vsel %vm5587_vm2, %v441_v43, %v445_v41  ;;  %v474_v60 = vor.u32 %v473_v46, %v5633_v45  ;;  %v477_v61 = vshll.u32 %v282_v49, 16  ;;  %v295_v42 = vld [vmem:[%s5576_s20 + $0x84] sm:$0xf]  ;;  %v288_v49 = vld [vmem:[%s5576_s20 + $0x68] sm:$0x1] }
  0x2b   : > { %711 = vrot.lane.b32.xlu1 %v408_v26, %s5526_s21  ;;  %v432_v62 = vsel %vm5587_vm2, %v427_v48, %v431_v44  ;;  %v464_v63 = vor.u32 %v463_v51, %v460_v50  ;;  %v491_v0 = vshll.u32 %v284_v53, 16  ;;  %v495_v1 = vshrl.u32 %v284_v53, 16 }
  0x2c   : > { %709 = vrot.lane.b32.xlu0 %v398_v30, %s5526_s21  ;;  %707 = vrot.lane.b32.xlu2 %v384_v39, %s5526_s21  ;;  %v417_v55 = vrot.slane %v416_v52, 4  ;;  %v450_v4 = vor.u32 %v449_v54, %v445_v41  ;;  %v453_v5 = vshll.u32 %v279_v58, 16  ;;  %v508_v7 = vrot.slane %v506_v56, 4  ;;  %v291_v41 = vld [vmem:[%s5576_s20 + $0x74] sm:$0x1] }
  0x2d   : > { %v511_v8 = vrot.slane %v509_v57, 5  ;;  %v475_v9 = vrot.slane %v474_v60, 4  ;;  %v479_v10 = vrot.slane %v477_v61, 5  ;;  %v482_v12 = vshrl.u32 %v283_v2, 16  ;;  %v292_v54 = vld [vmem:[%s5576_s20 + $0x78] sm:$0xf] }
  0x2e   : > { %v422_v3 = vsel %vm5587_vm2, %v417_v55, %v5618_v18  ;;  %v485_v13 = vshll.u32 %v283_v2, 16  ;;  %v465_v14 = vrot.slane %v464_v63, 4  ;;  %v5655_v16 = vrot.slane %v491_v0, 5 }
  0x2f   : > { %v497_v17 = vrot.slane %v495_v1, 4  ;;  %v451_v18 = vrot.slane %v450_v4, 4  ;;  %v455_v19 = vrot.slane %v453_v5, 5  ;;  %v484_v21 = vrot.slane %v482_v12, 4  ;;  %v296_v4 = vld [vmem:[%s5576_s20 + $0x88] sm:$0xf] }
  0x30   : > { %v487_v22 = vrot.slane %v485_v13, 5  ;;  %v512_v23 = vor.u32 %v511_v8, %v508_v7  ;;  %v515_v24 = vshll.u32 %v287_v6, 16  ;;  %v539_v26 = vshll.u32 %v290_v11, 16 }
  0x31   : > { %v543_v27 = vshrl.u32 %v290_v11, 16  ;;  %v480_v28 = vsel %vm5587_vm2, %v475_v9, %v479_v10  ;;  %v501_v29 = vshll.u32 %v285_v15, 16  ;;  %v470_v30 = vsel %vm5587_vm2, %v465_v14, %v5633_v45  ;;  %v299_v9 = vld [vmem:[%s5576_s20 + $0x94] sm:$0xf]  ;;  %v294_v11 = vld [vmem:[%s5576_s20 + $0x80] sm:$0x1] }
  0x32   : > { %v498_v31 = vor.u32 %v497_v17, %v5655_v16  ;;  %v530_v32 = vshrl.u32 %v289_v20, 16  ;;  %v533_v33 = vshll.u32 %v289_v20, 16  ;;  %v519_v34 = vshrl.u32 %v287_v6, 16  ;;  %v298_v14 = vld [vmem:[%s5576_s20 + $0x90] sm:$0xf] }
  0x33   : > { %717 = vrot.lane.b32.xlu1 %v446_v59, %s5526_s21  ;;  %v456_v35 = vsel %vm5587_vm2, %v451_v18, %v455_v19  ;;  %v488_v36 = vor.u32 %v487_v22, %v484_v21  ;;  %v513_v37 = vrot.slane %v512_v23, 4  ;;  %v517_v38 = vrot.slane %v515_v24, 5 }
  0x34   : > { %715 = vrot.lane.b32.xlu0 %v432_v62, %s5526_s21  ;;  %713 = vrot.lane.b32.xlu2 %v422_v3, %s5526_s21  ;;  %v5667_v39 = vrot.slane %v539_v26, 5  ;;  %v545_v40 = vrot.slane %v543_v27, 4  ;;  %v499_v43 = vrot.slane %v498_v31, 4  ;;  %v503_v44 = vrot.slane %v501_v29, 5 }
  0x35   : > { %v532_v45 = vrot.slane %v530_v32, 4  ;;  %v535_v46 = vrot.slane %v533_v33, 5  ;;  %v489_v48 = vrot.slane %v488_v36, 4  ;;  %v521_v50 = vrot.slane %v519_v34, 4 }
  0x36   : > { %v518_v51 = vsel %vm5587_vm2, %v513_v37, %v517_v38  ;;  %v546_v52 = vor.u32 %v545_v40, %v5667_v39  ;;  %v549_v53 = vshll.u32 %v291_v41, 16  ;;  %v578_v55 = vshrl.u32 %v295_v42, 16  ;;  %v300_v37 = vld [vmem:[%s5576_s20 + $0x98] sm:$0x1]  ;;  %v304_v40 = vld [vmem:[%s5576_s20 + $0xa8] sm:$0xf] }
  0x37   : > { %v581_v56 = vshll.u32 %v295_v42, 16  ;;  %v563_v57 = vshll.u32 %v293_v47, 16  ;;  %v567_v58 = vshrl.u32 %v293_v47, 16  ;;  %v504_v59 = vsel %vm5587_vm2, %v499_v43, %v503_v44  ;;  %v302_v42 = vld [vmem:[%s5576_s20 + $0xa0] sm:$0xf] }
  0x38   : > { %v536_v60 = vor.u32 %v535_v46, %v532_v45  ;;  %v525_v61 = vshll.u32 %v288_v49, 16  ;;  %v494_v62 = vsel %vm5587_vm2, %v489_v48, %v5655_v16  ;;  %v522_v63 = vor.u32 %v521_v50, %v517_v38  ;;  %v297_v43 = vld [vmem:[%s5576_s20 + $0x8c] sm:$0x1]  ;;  %v301_v47 = vld [vmem:[%s5576_s20 + $0x9c] sm:$0xf] }
  0x39   : > { %v554_v0 = vshrl.u32 %v292_v54, 16  ;;  %v557_v1 = vshll.u32 %v292_v54, 16  ;;  %v547_v2 = vrot.slane %v546_v52, 4  ;;  %v551_v3 = vrot.slane %v549_v53, 5 }
  0x3a   : > { %v580_v5 = vrot.slane %v578_v55, 4  ;;  %v583_v6 = vrot.slane %v581_v56, 5  ;;  %v5687_v7 = vrot.slane %v563_v57, 5  ;;  %v569_v8 = vrot.slane %v567_v58, 4 }
  0x3b   : > { %723 = vrot.lane.b32.xlu1 %v480_v28, %s5526_s21  ;;  %v537_v10 = vrot.slane %v536_v60, 4  ;;  %v523_v12 = vrot.slane %v522_v63, 4  ;;  %v527_v13 = vrot.slane %v525_v61, 5  ;;  %v556_v15 = vrot.slane %v554_v0, 4 }
  0x3c   : > { %721 = vrot.lane.b32.xlu0 %v470_v30, %s5526_s21  ;;  %719 = vrot.lane.b32.xlu2 %v456_v35, %s5526_s21  ;;  %v559_v16 = vrot.slane %v557_v1, 5  ;;  %v587_v17 = vshll.u32 %v296_v4, 16  ;;  %v611_v18 = vshll.u32 %v299_v9, 16  ;;  %v615_v19 = vshrl.u32 %v299_v9, 16  ;;  %v303_v1 = vld [vmem:[%s5576_s20 + $0xa4] sm:$0x1] }
  0x3d   : > { %v552_v20 = vsel %vm5587_vm2, %v547_v2, %v551_v3  ;;  %v584_v21 = vor.u32 %v583_v6, %v580_v5  ;;  %v570_v22 = vor.u32 %v569_v8, %v5687_v7  ;;  %v573_v23 = vshll.u32 %v294_v11, 16  ;;  %v308_v5 = vld [vmem:[%s5576_s20 + $0xb8] sm:$0xf]  ;;  %v307_v8 = vld [vmem:[%s5576_s20 + $0xb4] sm:$0xf] }
  0x3e   : > { %v542_v24 = vsel %vm5587_vm2, %v537_v10, %v5667_v39  ;;  %v602_v26 = vshrl.u32 %v298_v14, 16  ;;  %v605_v27 = vshll.u32 %v298_v14, 16  ;;  %v591_v28 = vshrl.u32 %v296_v4, 16 }
  0x3f   : > { %v528_v29 = vsel %vm5587_vm2, %v523_v12, %v527_v13  ;;  %v560_v30 = vor.u32 %v559_v16, %v556_v15  ;;  %v5702_v31 = vrot.slane %v611_v18, 5  ;;  %v617_v32 = vrot.slane %v615_v19, 4 }
  0x40   : > { %v585_v33 = vrot.slane %v584_v21, 4  ;;  %v589_v34 = vrot.slane %v587_v17, 5  ;;  %v571_v35 = vrot.slane %v570_v22, 4  ;;  %v575_v36 = vrot.slane %v573_v23, 5 }
  0x41   : > { %v604_v38 = vrot.slane %v602_v26, 4  ;;  %v607_v39 = vrot.slane %v605_v27, 5  ;;  %v561_v41 = vrot.slane %v560_v30, 4  ;;  %v593_v44 = vrot.slane %v591_v28, 4 }
  0x42   : > { %v618_v45 = vor.u32 %v617_v32, %v5702_v31  ;;  %v621_v46 = vshll.u32 %v300_v37, 16  ;;  %v590_v48 = vsel %vm5587_vm2, %v585_v33, %v589_v34  ;;  %v576_v49 = vsel %vm5587_vm2, %v571_v35, %v575_v36  ;;  %v306_v36 = vld [vmem:[%s5576_s20 + $0xb0] sm:$0x1] }
  0x43   : > { %729 = vrot.lane.b32.xlu1 %v518_v51, %s5526_s21  ;;  %v650_v50 = vshrl.u32 %v304_v40, 16  ;;  %v653_v51 = vshll.u32 %v304_v40, 16  ;;  %v608_v52 = vor.u32 %v607_v39, %v604_v38  ;;  %v635_v53 = vshll.u32 %v302_v42, 16 }
  0x44   : > { %727 = vrot.lane.b32.xlu0 %v504_v59, %s5526_s21  ;;  %725 = vrot.lane.b32.xlu2 %v494_v62, %s5526_s21  ;;  %v639_v54 = vshrl.u32 %v302_v42, 16  ;;  %v597_v55 = vshll.u32 %v297_v43, 16  ;;  %v566_v56 = vsel %vm5587_vm2, %v561_v41, %v5687_v7  ;;  %v594_v57 = vor.u32 %v593_v44, %v589_v34  ;;  %v305_v62 = vld [vmem:[%s5576_s20 + $0xac] sm:$0xf] }
  0x45   : > { %v626_v58 = vshrl.u32 %v301_v47, 16  ;;  %v629_v59 = vshll.u32 %v301_v47, 16  ;;  %v619_v60 = vrot.slane %v618_v45, 4  ;;  %v623_v61 = vrot.slane %v621_v46, 5 }
  0x46   : > { %v652_v63 = vrot.slane %v650_v50, 4  ;;  %v655_v0 = vrot.slane %v653_v51, 5  ;;  %v609_v2 = vrot.slane %v608_v52, 4  ;;  %v637_v3 = vrot.slane %v635_v53, 5  ;;  %v829_v51 = vld [vmem:[%s5576_s20 + $0xc] sm:$0xe] }
  0x47   : > { %v641_v4 = vrot.slane %v639_v54, 4  ;;  %v595_v6 = vrot.slane %v594_v57, 4  ;;  %v599_v7 = vrot.slane %v597_v55, 5  ;;  %v628_v9 = vrot.slane %v626_v58, 4  ;;  %v830_v53 = vld [vmem:[%s5576_s20 + $0x10] sm:$0xf] }
  0x48   : > { %v631_v10 = vrot.slane %v629_v59, 5  ;;  %v624_v11 = vsel %vm5587_vm2, %v619_v60, %v623_v61  ;;  %v659_v12 = vshll.u32 %v305_v62, 16  ;;  %v656_v13 = vor.u32 %v655_v0, %v652_v63  ;;  %v828_v54 = vld [vmem:[%s5576_s20 + $0x8] sm:$0x1]  ;;  %v826_v61 = vld [vmem:[%s5576_s20] sm:$0xe] }
  0x49   : > { %v645_v14 = vshll.u32 %v303_v1, 16  ;;  %v683_v15 = vshll.u32 %v308_v5, 16  ;;  %v687_v16 = vshrl.u32 %v308_v5, 16  ;;  %v614_v17 = vsel %vm5587_vm2, %v609_v2, %v5702_v31  ;;  %v309_v31 = vld [vmem:[%s5576_s20 + $0xbc] sm:$0x1] }
  0x4a   : > { %v642_v18 = vor.u32 %v641_v4, %v637_v3  ;;  %v674_v19 = vshrl.u32 %v307_v8, 16  ;;  %v663_v21 = vshrl.u32 %v305_v62, 16  ;;  %v600_v22 = vsel %vm5587_vm2, %v595_v6, %v599_v7  ;;  %v833_v63 = vld [vmem:[%s5576_s20 + $0x1c] sm:$0xf]  ;;  %v201_v0 = vld [vmem:[%s5576_s20 + $0x18] sm:$0xf] }
  0x4b   : > { %735 = vrot.lane.b32.xlu1 %v552_v20, %s5526_s21  ;;  %v677_v20 = vshll.u32 %v307_v8, 16  ;;  %v632_v23 = vor.u32 %v631_v10, %v628_v9  ;;  %v661_v26 = vrot.slane %v659_v12, 5  ;;  %v685_v27 = vrot.slane %v683_v15, 5  ;;  %234 = vst.msk [vmem:[#allocation2 + $0x10] sm:$0xf] %vm229_vm5, %v201_v0 }
  0x4c   : > { %733 = vrot.lane.b32.xlu0 %v542_v24, %s5526_s21  ;;  %731 = vrot.lane.b32.xlu2 %v528_v29, %s5526_s21  ;;  %v657_v24 = vrot.slane %v656_v13, 4  ;;  %v689_v28 = vrot.slane %v687_v16, 4  ;;  %v643_v29 = vrot.slane %v642_v18, 4  ;;  %v647_v30 = vrot.slane %v645_v14, 5  ;;  %v199_v2 = vld [vmem:[%s5576_s20 + $0xc] sm:$0xf] }
  0x4d   : > { %v676_v32 = vrot.slane %v674_v19, 4  ;;  %v679_v33 = vrot.slane %v677_v20, 5  ;;  %v633_v34 = vrot.slane %v632_v23, 4  ;;  %v665_v35 = vrot.slane %v663_v21, 4  ;;  %232 = vst.msk [vmem:[#allocation2 + $0x8] sm:$0xf] %vm229_vm5, %v199_v2 }
  0x4e   : > { %v662_v37 = vsel %vm5587_vm2, %v657_v24, %v661_v26  ;;  %v690_v38 = vor.u32 %v689_v28, %v685_v27  ;;  %v693_v39 = vshll.u32 %v309_v31, 16  ;;  %v648_v40 = vsel %vm5587_vm2, %v643_v29, %v647_v30  ;;  %v834_v6 = vld [vmem:[%s5576_s20 + $0x20] sm:$0x1]  ;;  %v832_v9 = vld [vmem:[%s5576_s20 + $0x18] sm:$0xe] }
  0x4f   : > { %v680_v41 = vor.u32 %v679_v33, %v676_v32  ;;  %v638_v42 = vsel %vm5587_vm2, %v633_v34, %v637_v3  ;;  %v666_v43 = vor.u32 %v665_v35, %v661_v26  ;;  %v669_v44 = vshll.u32 %v306_v36, 16  ;;  %v197_v3 = vld [vmem:[%s5576_s20] sm:$0xf]  ;;  %v831_v12 = vld [vmem:[%s5576_s20 + $0x14] sm:$0x1] }
  0x50   : > { %v691_v45 = vrot.slane %v690_v38, 4  ;;  %v695_v46 = vrot.slane %v693_v39, 5  ;;  %v4946_v58 = vrot.slane %v829_v51, 9  ;;  %v934_v59 = vrot.slane %v830_v53, 5  ;;  %230 = vst.msk [vmem:[#allocation2] sm:$0xf] %vm229_vm5, %v197_v3 }
  0x51   : > { %v681_v47 = vrot.slane %v680_v41, 4  ;;  %v671_v50 = vrot.slane %v669_v44, 5  ;;  %v930_v60 = vrot.slane %v828_v54, 5  ;;  %v4945_v4 = vrot.slane %v826_v61, 9  ;;  %v836_v15 = vld [vmem:[%s5576_s20 + $0x28] sm:$0xf] }
  0x52   : > { %v696_v52 = vsel %vm5587_vm2, %v691_v45, %v695_v46  ;;  %v935_v5 = vsel %vm5762_vm6, %v4946_v58, %v934_v59  ;;  %v941_v7 = vrot.slane %v833_v63, 5  ;;  %v4947_v14 = vrot.slane %v832_v9, 9  ;;  %v202_v16 = vld [vmem:[%s5576_s20 + $0x1c] sm:$0xf]  ;;  %v198_v18 = vld [vmem:[%s5576_s20 + $0x4] sm:$0xf] }
  0x53   : > { %741 = vrot.lane.b32.xlu1 %v590_v48, %s5526_s21  ;;  %v827_v48 = vld [vmem:[%s5576_s20 + $0x4] sm:$0xf]  ;;  %235 = vst.msk [vmem:[#allocation2 + $0x14] sm:$0xf] %vm229_vm5, %v202_v16  ;;  %v936_v19 = vrot.slane %v934_v59, 4  ;;  %v937_v20 = vrot.slane %v831_v12, 5 }
  0x54   : > { %739 = vrot.lane.b32.xlu0 %v576_v49, %s5526_s21  ;;  %737 = vrot.lane.b32.xlu2 %v566_v56, %s5526_s21  ;;  %v667_v49 = vrot.slane %v666_v43, 4  ;;  %v927_v55 = vrot.slane %v827_v48, 5  ;;  %v686_v56 = vsel %vm5587_vm2, %v681_v47, %v685_v27  ;;  %v943_v13 = vrot.slane %v941_v7, 4  ;;  %231 = vst.msk [vmem:[#allocation2 + $0x4] sm:$0xf] %vm229_vm5, %v198_v18 }
  0x55   : > { %v839_v23 = vld [vmem:[%s5576_s20 + $0x34] sm:$0xf]  ;;  %v948_v24 = vrot.slane %v836_v15, 5  ;;  %v942_v26 = vsel %vm5762_vm6, %v4947_v14, %v941_v7  ;;  %v837_v27 = vld [vmem:[%s5576_s20 + $0x2c] sm:$0x1]  ;;  %v938_v28 = vsel %vm5762_vm6, %v936_v19, %v937_v20 }
  0x56   : > { %v672_v57 = vsel %vm5587_vm2, %v667_v49, %v671_v50  ;;  %v929_v62 = vrot.slane %v927_v55, 4  ;;  %v928_v10 = vsel %vm5762_vm6, %v4945_v4, %v927_v55  ;;  %v955_v30 = vrot.slane %v839_v23, 5  ;;  %v835_v31 = vld [vmem:[%s5576_s20 + $0x24] sm:$0xe]  ;;  %v842_v34 = vld [vmem:[%s5576_s20 + $0x40] sm:$0xf] }
  0x57   : > { %v950_v32 = vrot.slane %v948_v24, 4  ;;  %v951_v33 = vrot.slane %v837_v27, 5  ;;  %v205_v35 = vld [vmem:[%s5576_s20 + $0x30] sm:$0xf]  ;;  %v204_v36 = vld [vmem:[%s5576_s20 + $0x28] sm:$0xf] }
  0x58   : > { %v931_v8 = vsel %vm5762_vm6, %v929_v62, %v930_v60  ;;  %238 = vst.msk [vmem:[#allocation2 + $0x20] sm:$0xf] %vm229_vm5, %v205_v35  ;;  %v4948_v38 = vrot.slane %v835_v31, 9  ;;  %v962_v41 = vrot.slane %v842_v34, 5  ;;  %v843_v43 = vld [vmem:[%s5576_s20 + $0x44] sm:$0x1] }
  0x59   : > { %237 = vst.msk [vmem:[#allocation2 + $0x1c] sm:$0xf] %vm229_vm5, %v204_v36  ;;  %v841_v44 = vld [vmem:[%s5576_s20 + $0x3c] sm:$0xe]  ;;  %v840_v46 = vld [vmem:[%s5576_s20 + $0x38] sm:$0x1] }
  0x5a   : > { %v949_v45 = vsel %vm5762_vm6, %v4948_v38, %v948_v24  ;;  %v964_v47 = vrot.slane %v962_v41, 4  ;;  %v965_v48 = vrot.slane %v843_v43, 5  ;;  %v4950_v49 = vrot.slane %v841_v44, 9  ;;  %v208_v50 = vld [vmem:[%s5576_s20 + $0x40] sm:$0xf] }
  0x5b   : > { %747 = vrot.lane.b32.xlu1 %v624_v11, %s5526_s21  ;;  %v944_v11 = vrot.slane %v834_v6, 5  ;;  %241 = vst.msk [vmem:[#allocation2 + $0x2c] sm:$0xf] %vm229_vm5, %v208_v50  ;;  %v207_v51 = vld [vmem:[%s5576_s20 + $0x3c] sm:$0xf]  ;;  %v957_v54 = vrot.slane %v955_v30, 4 }
  0x5c   : > { %745 = vrot.lane.b32.xlu0 %v614_v17, %s5526_s21  ;;  %743 = vrot.lane.b32.xlu2 %v600_v22, %s5526_s21  ;;  %v200_v17 = vld [vmem:[%s5576_s20 + $0x10] sm:$0xf]  ;;  %v845_v53 = vld [vmem:[%s5576_s20 + $0x4c] sm:$0xf]  ;;  %v958_v55 = vrot.slane %v840_v46, 5  ;;  %v963_v58 = vsel %vm5762_vm6, %v4950_v49, %v962_v41 }
  0x5d   : > { %233 = vst.msk [vmem:[#allocation2 + $0xc] sm:$0xf] %vm229_vm5, %v200_v17  ;;  %v945_v21 = vsel %vm5762_vm6, %v943_v13, %v944_v11  ;;  %v838_v22 = vld [vmem:[%s5576_s20 + $0x30] sm:$0xe]  ;;  %v847_v59 = vld [vmem:[%s5576_s20 + $0x54] sm:$0xe] }
  0x5e   : > { %v4949_v29 = vrot.slane %v838_v22, 9  ;;  %240 = vst.msk [vmem:[#allocation2 + $0x28] sm:$0xf] %vm229_vm5, %v207_v51  ;;  %v848_v60 = vld [vmem:[%s5576_s20 + $0x58] sm:$0xf]  ;;  %v969_v61 = vrot.slane %v845_v53, 5  ;;  %v959_v63 = vsel %vm5762_vm6, %v957_v54, %v958_v55 }
  0x5f   : > { %v846_v62 = vld [vmem:[%s5576_s20 + $0x50] sm:$0x1]  ;;  %v844_v0 = vld [vmem:[%s5576_s20 + $0x48] sm:$0xe]  ;;  %v4952_v2 = vrot.slane %v847_v59, 9  ;;  %v976_v3 = vrot.slane %v848_v60, 5 }
  0x60   : > { %v211_v4 = vld [vmem:[%s5576_s20 + $0x54] sm:$0xf]  ;;  %v971_v6 = vrot.slane %v969_v61, 4  ;;  %v972_v7 = vrot.slane %v846_v62, 5  ;;  %v210_v11 = vld [vmem:[%s5576_s20 + $0x4c] sm:$0xf] }
  0x61   : > { %244 = vst.msk [vmem:[#allocation2 + $0x38] sm:$0xf] %vm229_vm5, %v211_v4  ;;  %v209_v13 = vld [vmem:[%s5576_s20 + $0x48] sm:$0xf]  ;;  %v977_v14 = vsel %vm5762_vm6, %v4952_v2, %v976_v3  ;;  %v850_v18 = vld [vmem:[%s5576_s20 + $0x60] sm:$0xe] }
  0x62   : > { %v973_v16 = vsel %vm5762_vm6, %v971_v6, %v972_v7  ;;  %v852_v17 = vld [vmem:[%s5576_s20 + $0x68] sm:$0x1]  ;;  %243 = vst.msk [vmem:[#allocation2 + $0x34] sm:$0xf] %vm229_vm5, %v210_v11  ;;  %v849_v20 = vld [vmem:[%s5576_s20 + $0x5c] sm:$0x1] }
  0x63   : > { %753 = vrot.lane.b32.xlu1 %v662_v37, %s5526_s21  ;;  %v203_v37 = vld [vmem:[%s5576_s20 + $0x24] sm:$0xf]  ;;  %242 = vst.msk [vmem:[#allocation2 + $0x30] sm:$0xf] %vm229_vm5, %v209_v13  ;;  %v986_v22 = vrot.slane %v852_v17, 5 }
  0x64   : > { %751 = vrot.lane.b32.xlu0 %v648_v40, %s5526_s21  ;;  %749 = vrot.lane.b32.xlu2 %v638_v42, %s5526_s21  ;;  %236 = vst.msk [vmem:[#allocation2 + $0x18] sm:$0xf] %vm229_vm5, %v203_v37  ;;  %v956_v40 = vsel %vm5762_vm6, %v4949_v29, %v955_v30  ;;  %v952_v42 = vsel %vm5762_vm6, %v950_v32, %v951_v33  ;;  %v214_v23 = vld [vmem:[%s5576_s20 + $0x64] sm:$0xf]  ;;  %v854_v27 = vld [vmem:[%s5576_s20 + $0x70] sm:$0xf] }
  0x65   : > { %247 = vst.msk [vmem:[#allocation2 + $0x44] sm:$0xf] %vm229_vm5, %v214_v23  ;;  %v978_v29 = vrot.slane %v976_v3, 4  ;;  %v979_v30 = vrot.slane %v849_v20, 5  ;;  %v213_v31 = vld [vmem:[%s5576_s20 + $0x60] sm:$0xf] }
  0x66   : > { %v212_v33 = vld [vmem:[%s5576_s20 + $0x58] sm:$0xf]  ;;  %v857_v37 = vld [vmem:[%s5576_s20 + $0x7c] sm:$0xf]  ;;  %v990_v38 = vrot.slane %v854_v27, 5 }
  0x67   : > { %v856_v35 = vld [vmem:[%s5576_s20 + $0x78] sm:$0xe]  ;;  %246 = vst.msk [vmem:[#allocation2 + $0x40] sm:$0xf] %vm229_vm5, %v213_v31  ;;  %v853_v41 = vld [vmem:[%s5576_s20 + $0x6c] sm:$0xe] }
  0x68   : > { %245 = vst.msk [vmem:[#allocation2 + $0x3c] sm:$0xf] %vm229_vm5, %v212_v33  ;;  %v997_v43 = vrot.slane %v857_v37, 5  ;;  %v217_v44 = vld [vmem:[%s5576_s20 + $0x78] sm:$0xf]  ;;  %v992_v46 = vrot.slane %v990_v38, 4 }
  0x69   : > { %250 = vst.msk [vmem:[#allocation2 + $0x50] sm:$0xf] %vm229_vm5, %v217_v44  ;;  %v4954_v50 = vrot.slane %v853_v41, 9  ;;  %v216_v51 = vld [vmem:[%s5576_s20 + $0x70] sm:$0xf] }
  0x6a   : > { %v215_v53 = vld [vmem:[%s5576_s20 + $0x6c] sm:$0xf]  ;;  %249 = vst.msk [vmem:[#allocation2 + $0x4c] sm:$0xf] %vm229_vm5, %v216_v51  ;;  %v858_v60 = vld [vmem:[%s5576_s20 + $0x80] sm:$0x1] }
  0x6b   : > { %759 = vrot.lane.b32.xlu1 %v696_v52, %s5526_s21  ;;  %v206_v52 = vld [vmem:[%s5576_s20 + $0x34] sm:$0xf]  ;;  %v991_v59 = vsel %vm5762_vm6, %v4954_v50, %v990_v38  ;;  %248 = vst.msk [vmem:[#allocation2 + $0x48] sm:$0xf] %vm229_vm5, %v215_v53  ;;  %v1000_v6 = vrot.slane %v858_v60, 5 }
  0x6c   : > { %757 = vrot.lane.b32.xlu0 %v686_v56, %s5526_s21  ;;  %755 = vrot.lane.b32.xlu2 %v672_v57, %s5526_s21  ;;  %239 = vst.msk [vmem:[#allocation2 + $0x24] sm:$0xf] %vm229_vm5, %v206_v52  ;;  %v966_v57 = vsel %vm5762_vm6, %v964_v47, %v965_v48  ;;  %v860_v48 = vld [vmem:[%s5576_s20 + $0x88] sm:$0xf]  ;;  %v863_v3 = vld [vmem:[%s5576_s20 + $0x94] sm:$0xf] }
  0x6d   : > { %v1004_v55 = vrot.slane %v860_v48, 5  ;;  %v219_v7 = vld [vmem:[%s5576_s20 + $0x84] sm:$0xf]  ;;  %v865_v11 = vld [vmem:[%s5576_s20 + $0x9c] sm:$0xe]  ;;  %s5535_s21 = smov 40  }
  0x6e   : > { %v866_v13 = vld [vmem:[%s5576_s20 + $0xa0] sm:$0xf]  ;;  %252 = vst.msk [vmem:[#allocation2 + $0x58] sm:$0xf] %vm229_vm5, %v219_v7  ;;  %v862_v17 = vld [vmem:[%s5576_s20 + $0x90] sm:$0xe] }
  0x6f   : > { %v223_v20 = vld [vmem:[%s5576_s20 + $0x9c] sm:$0xf]  ;;  %v4957_v27 = vrot.slane %v862_v17, 9  ;;  %v867_v37 = vld [vmem:[%s5576_s20 + $0xa4] sm:$0x1] }
  0x70   : > { %256 = vst.msk [vmem:[#allocation2 + $0x68] sm:$0xf] %vm229_vm5, %v223_v20  ;;  %v873_v53 = vld [vmem:[%s5576_s20 + $0xbc] sm:$0x1] }
  0x71   : > { %v4964_v7 = vld [vmem:[%s5576_s20 + $0x1c] sm:$0xf] }
  0x72   : > { %v4969_v20 = vld [vmem:[%s5576_s20 + $0x3c] sm:$0xf] }
  0x73   : > { %1041 = vrot.lane.b32.xlu1 %v935_v5, %s5527_s22 }
  0x74   : > { %1039 = vrot.lane.b32.xlu0 %v931_v8, %s5527_s22  ;;  %1037 = vrot.lane.b32.xlu2 %v928_v10, %s5527_s22  ;;  %v851_v8 = vld [vmem:[%s5576_s20 + $0x64] sm:$0xf]  ;;  %v4951_v10 = vrot.slane %v844_v0, 9 }
  0x75   : > { %v983_v15 = vrot.slane %v851_v8, 5 }
  0x76   : > { %v970_v19 = vsel %vm5762_vm6, %v4951_v10, %v969_v61  ;;  %v1006_v61 = vrot.slane %v1004_v55, 4 }
  0x7b   : > { %1047 = vrot.lane.b32.xlu1 %v945_v21, %s5527_s22  ;;  %v985_v21 = vrot.slane %v983_v15, 4 }
  0x7c   : > { %1045 = vrot.lane.b32.xlu0 %v942_v26, %s5527_s22  ;;  %1043 = vrot.lane.b32.xlu2 %v938_v28, %s5527_s22  ;;  %v4953_v26 = vrot.slane %v850_v18, 9  ;;  %v4958_v18 = vrot.slane %v865_v11, 9 }
  0x7d   : > { %v987_v34 = vsel %vm5762_vm6, %v985_v21, %v986_v22 }
  0x7e   : > { %v706_v39 = vpop.permute.xlu2 %705  ;;  %v984_v36 = vsel %vm5762_vm6, %v4953_v26, %v983_v15  ;;  %v864_v15 = vld [vmem:[%s5576_s20 + $0x98] sm:$0x1] }
  0x7f   : > { %798 = vst.msk [vmem:[#allocation2 + $0x10] sm:$0xf] %vm793_vm7, %v706_v39  ;;  %v855_v39 = vld [vmem:[%s5576_s20 + $0x74] sm:$0x1]  ;;  %v1014_v23 = vrot.slane %v864_v15, 5 }
  0x80   : > { %v993_v47 = vrot.slane %v855_v39, 5  ;;  %v4965_v15 = vld [vmem:[%s5576_s20 + $0x24] sm:$0xf] }
  0x83   : > { %1053 = vrot.lane.b32.xlu1 %v956_v40, %s5527_s22  ;;  %v980_v40 = vsel %vm5762_vm6, %v978_v29, %v979_v30  ;;  %v221_v30 = vld [vmem:[%s5576_s20 + $0x90] sm:$0xf] }
  0x84   : > { %1051 = vrot.lane.b32.xlu0 %v952_v42, %s5527_s22  ;;  %1049 = vrot.lane.b32.xlu2 %v949_v45, %s5527_s22  ;;  %v4955_v42 = vrot.slane %v856_v35, 9  ;;  %v868_v35 = vld [vmem:[%s5576_s20 + $0xa8] sm:$0xe]  ;;  %254 = vst.msk [vmem:[#allocation2 + $0x60] sm:$0xf] %vm229_vm5, %v221_v30 }
  0x86   : > { %v708_v56 = vpop.permute.xlu2 %707  ;;  %v998_v54 = vsel %vm5762_vm6, %v4955_v42, %v997_v43  ;;  %v4959_v42 = vrot.slane %v868_v35, 9 }
  0x87   : > { %799 = vst.msk [vmem:[#allocation2 + $0x14] sm:$0xf] %vm793_vm7, %v708_v56  ;;  %v994_v56 = vsel %vm5762_vm6, %v992_v46, %v993_v47  ;;  %v1021_v46 = vrot.slane %v867_v37, 5  ;;  %v225_v47 = vld [vmem:[%s5576_s20 + $0xa8] sm:$0xf] }
  0x88   : > { %258 = vst.msk [vmem:[#allocation2 + $0x70] sm:$0xf] %vm229_vm5, %v225_v47 }
  0x8b   : > { %1059 = vrot.lane.b32.xlu1 %v966_v57, %s5527_s22  ;;  %v861_v57 = vld [vmem:[%s5576_s20 + $0x8c] sm:$0x1] }
  0x8c   : > { %1057 = vrot.lane.b32.xlu0 %v963_v58, %s5527_s22  ;;  %1055 = vrot.lane.b32.xlu2 %v959_v63, %s5527_s22  ;;  %v859_v58 = vld [vmem:[%s5576_s20 + $0x84] sm:$0xe]  ;;  %v1007_v62 = vrot.slane %v861_v57, 5  ;;  %v220_v63 = vld [vmem:[%s5576_s20 + $0x88] sm:$0xf] }
  0x8d   : > { %v702_v5 = vpop.permute.xlu1 %701  ;;  %v4956_v2 = vrot.slane %v859_v58, 9  ;;  %253 = vst.msk [vmem:[#allocation2 + $0x5c] sm:$0xf] %vm229_vm5, %v220_v63  ;;  %v1035_v58 = vrot.slane %v873_v53, 5  ;;  %v227_v63 = vld [vmem:[%s5576_s20 + $0xb4] sm:$0xf] }
  0x8e   : > { %796 = vst.msk [vmem:[#allocation2 + $0x8] sm:$0xf] %vm793_vm7, %v702_v5  ;;  %v698_v9 = vpop.permute.xlu0 %697  ;;  %v714_v12 = vpop.permute.xlu2 %713  ;;  %v999_v5 = vrot.slane %v997_v43, 4  ;;  %v1008_v10 = vsel %vm5762_vm6, %v1006_v61, %v1007_v62  ;;  %v872_v43 = vld [vmem:[%s5576_s20 + $0xb8] sm:$0xf] }
  0x8f   : > { %794 = vst.msk [vmem:[#allocation2] sm:$0xf] %vm793_vm7, %v698_v9  ;;  %v218_v9 = vld [vmem:[%s5576_s20 + $0x7c] sm:$0xf]  ;;  %v228_v61 = vld [vmem:[%s5576_s20 + $0xb8] sm:$0xf] }
  0x90   : > { %802 = vst.msk [vmem:[#allocation2 + $0x20] sm:$0xf] %vm793_vm7, %v714_v12  ;;  %v1005_v12 = vsel %vm5762_vm6, %v4956_v2, %v1004_v55  ;;  %v871_v55 = vld [vmem:[%s5576_s20 + $0xb4] sm:$0xe]  ;;  %v4994_v53 = vld [vmem:[%s5576_s20 + $0x10] sm:$0xf] }
  0x91   : > { %251 = vst.msk [vmem:[#allocation2 + $0x54] sm:$0xf] %vm229_vm5, %v218_v9  ;;  %v4960_v60 = vrot.slane %v871_v55, 9  ;;  %v4962_v9 = vld [vmem:[%s5576_s20 + $0x10] sm:$0xf] }
  0x92   : > { %261 = vst.msk [vmem:[#allocation2 + $0x7c] sm:$0xf] %vm229_vm5, %v228_v61  ;;  %v4987_v61 = vld [vmem:[%s5576_s20 + $0xa8] sm:$0xf] }
  0x93   : > { %1065 = vrot.lane.b32.xlu1 %v977_v14, %s5527_s22  ;;  %v1011_v14 = vrot.slane %v863_v3, 5  ;;  %260 = vst.msk [vmem:[#allocation2 + $0x78] sm:$0xf] %vm229_vm5, %v227_v63 }
  0x94   : > { %1063 = vrot.lane.b32.xlu0 %v973_v16, %s5527_s22  ;;  %1061 = vrot.lane.b32.xlu2 %v970_v19, %s5527_s22  ;;  %v1001_v16 = vsel %vm5762_vm6, %v999_v5, %v1000_v6  ;;  %v1018_v19 = vrot.slane %v866_v13, 5  ;;  %v4967_v13 = vld [vmem:[%s5576_s20 + $0x30] sm:$0xf] }
  0x95   : > { %v704_v24 = vpop.permute.xlu1 %703  ;;  %v1013_v22 = vrot.slane %v1011_v14, 4 }
  0x96   : > { %797 = vst.msk [vmem:[#allocation2 + $0xc] sm:$0xf] %vm793_vm7, %v704_v24  ;;  %v700_v28 = vpop.permute.xlu0 %699  ;;  %v720_v32 = vpop.permute.xlu2 %719  ;;  %v869_v24 = vld [vmem:[%s5576_s20 + $0xac] sm:$0xf]  ;;  %v1019_v31 = vsel %vm5762_vm6, %v4958_v18, %v1018_v19 }
  0x97   : > { %795 = vst.msk [vmem:[#allocation2 + $0x4] sm:$0xf] %vm793_vm7, %v700_v28  ;;  %v222_v28 = vld [vmem:[%s5576_s20 + $0x94] sm:$0xf]  ;;  %v1015_v33 = vsel %vm5762_vm6, %v1013_v22, %v1014_v23 }
  0x98   : > { %805 = vst.msk [vmem:[#allocation2 + $0x2c] sm:$0xf] %vm793_vm7, %v720_v32  ;;  %v1025_v32 = vrot.slane %v869_v24, 5 }
  0x99   : > { %255 = vst.msk [vmem:[#allocation2 + $0x64] sm:$0xf] %vm229_vm5, %v222_v28  ;;  %v4971_v28 = vld [vmem:[%s5576_s20 + $0x48] sm:$0xf] }
  0x9a   : > { %v1027_v38 = vrot.slane %v1025_v32, 4  ;;  %v1026_v51 = vsel %vm5762_vm6, %v4959_v42, %v1025_v32  ;;  %v4976_v32 = vld [vmem:[%s5576_s20 + $0x64] sm:$0xf] }
  0x9b   : > { %1071 = vrot.lane.b32.xlu1 %v987_v34, %s5527_s22  ;;  %v870_v34 = vld [vmem:[%s5576_s20 + $0xb0] sm:$0x1] }
  0x9c   : > { %1069 = vrot.lane.b32.xlu0 %v984_v36, %s5527_s22  ;;  %1067 = vrot.lane.b32.xlu2 %v980_v40, %s5527_s22  ;;  %v1012_v36 = vsel %vm5762_vm6, %v4957_v27, %v1011_v14  ;;  %v1028_v39 = vrot.slane %v870_v34, 5  ;;  %v226_v40 = vld [vmem:[%s5576_s20 + $0xac] sm:$0xf]  ;;  %v4966_v14 = vld [vmem:[%s5576_s20 + $0x28] sm:$0xf] }
  0x9d   : > { %v712_v45 = vpop.permute.xlu1 %711  ;;  %259 = vst.msk [vmem:[#allocation2 + $0x74] sm:$0xf] %vm229_vm5, %v226_v40  ;;  %v4972_v27 = vld [vmem:[%s5576_s20 + $0x4c] sm:$0xf]  ;;  %v4974_v34 = vld [vmem:[%s5576_s20 + $0x58] sm:$0xf] }
  0x9e   : > { %801 = vst.msk [vmem:[#allocation2 + $0x1c] sm:$0xf] %vm793_vm7, %v712_v45  ;;  %v710_v49 = vpop.permute.xlu0 %709  ;;  %v726_v52 = vpop.permute.xlu2 %725  ;;  %v1020_v45 = vrot.slane %v1018_v19, 4  ;;  %v1029_v50 = vsel %vm5762_vm6, %v1027_v38, %v1028_v39  ;;  %v4970_v19 = vld [vmem:[%s5576_s20 + $0x40] sm:$0xf] }
  0x9f   : > { %800 = vst.msk [vmem:[#allocation2 + $0x18] sm:$0xf] %vm793_vm7, %v710_v49  ;;  %v224_v49 = vld [vmem:[%s5576_s20 + $0xa0] sm:$0xf]  ;;  %v4979_v38 = vld [vmem:[%s5576_s20 + $0x78] sm:$0xf] }
  0xa0   : > { %808 = vst.msk [vmem:[#allocation2 + $0x38] sm:$0xf] %vm793_vm7, %v726_v52  ;;  %v1032_v52 = vrot.slane %v872_v43, 5  ;;  %v4978_v39 = vld [vmem:[%s5576_s20 + $0x70] sm:$0xf] }
  0xa1   : > { %257 = vst.msk [vmem:[#allocation2 + $0x6c] sm:$0xf] %vm229_vm5, %v224_v49  ;;  %v4977_v40 = vld [vmem:[%s5576_s20 + $0x6c] sm:$0xf]  ;;  %vm4621_vm5 = vcmask 1045509  }
  0xa2   : > { %v1034_v57 = vrot.slane %v1032_v52, 4  ;;  %v1033_v3 = vsel %vm5762_vm6, %v4960_v60, %v1032_v52  ;;  %v4983_v52 = vld [vmem:[%s5576_s20 + $0x90] sm:$0xf]  ;;  %v4988_v60 = vld [vmem:[%s5576_s20 + $0xac] sm:$0xf] }
  0xa3   : > { %1077 = vrot.lane.b32.xlu1 %v998_v54, %s5527_s22  ;;  %v1022_v54 = vsel %vm5762_vm6, %v1020_v45, %v1021_v46  ;;  %v4981_v45 = vld [vmem:[%s5576_s20 + $0x84] sm:$0xf]  ;;  %v4980_v46 = vld [vmem:[%s5576_s20 + $0x7c] sm:$0xf] }
  0xa4   : > { %1075 = vrot.lane.b32.xlu0 %v994_v56, %s5527_s22  ;;  %1073 = vrot.lane.b32.xlu2 %v991_v59, %s5527_s22  ;;  %v1036_v2 = vsel %vm5762_vm6, %v1034_v57, %v1035_v58  ;;  %v1418_v58 = vshll.u32 %v4994_v53, 16 }
  0xa5   : > { %v718_v0 = vpop.permute.xlu1 %717 }
  0xa6   : > { %804 = vst.msk [vmem:[#allocation2 + $0x28] sm:$0xf] %vm793_vm7, %v718_v0  ;;  %v716_v4 = vpop.permute.xlu0 %715  ;;  %v732_v8 = vpop.permute.xlu2 %731  ;;  %v4961_v0 = vld [vmem:[%s5576_s20 + $0xc] sm:$0xf] }
  0xa7   : > { %803 = vst.msk [vmem:[#allocation2 + $0x24] sm:$0xf] %vm793_vm7, %v716_v4 }
  0xa8   : > { %811 = vst.msk [vmem:[#allocation2 + $0x44] sm:$0xf] %vm793_vm7, %v732_v8  ;;  %v4963_v8 = vld [vmem:[%s5576_s20 + $0x18] sm:$0xf] }
  0xab   : > { %1083 = vrot.lane.b32.xlu1 %v1008_v10, %s5527_s22 }
  0xac   : > { %1081 = vrot.lane.b32.xlu0 %v1005_v12, %s5527_s22  ;;  %1079 = vrot.lane.b32.xlu2 %v1001_v16, %s5527_s22 }
  0xad   : > { %v724_v21 = vpop.permute.xlu1 %723 }
  0xae   : > { %807 = vst.msk [vmem:[#allocation2 + $0x34] sm:$0xf] %vm793_vm7, %v724_v21  ;;  %v722_v26 = vpop.permute.xlu0 %721  ;;  %v738_v29 = vpop.permute.xlu2 %737  ;;  %v4968_v21 = vld [vmem:[%s5576_s20 + $0x34] sm:$0xf] }
  0xaf   : > { %806 = vst.msk [vmem:[#allocation2 + $0x30] sm:$0xf] %vm793_vm7, %v722_v26  ;;  %v4973_v26 = vld [vmem:[%s5576_s20 + $0x54] sm:$0xf] }
  0xb0   : > { %814 = vst.msk [vmem:[#allocation2 + $0x50] sm:$0xf] %vm793_vm7, %v738_v29 }
  0xb3   : > { %1089 = vrot.lane.b32.xlu1 %v1019_v31, %s5527_s22 }
  0xb4   : > { %1087 = vrot.lane.b32.xlu0 %v1015_v33, %s5527_s22  ;;  %1085 = vrot.lane.b32.xlu2 %v1012_v36, %s5527_s22  ;;  %v4975_v33 = vld [vmem:[%s5576_s20 + $0x60] sm:$0xf] }
  0xb5   : > { %v730_v41 = vpop.permute.xlu1 %729 }
  0xb6   : > { %810 = vst.msk [vmem:[#allocation2 + $0x40] sm:$0xf] %vm793_vm7, %v730_v41  ;;  %v728_v44 = vpop.permute.xlu0 %727  ;;  %v744_v48 = vpop.permute.xlu2 %743 }
  0xb7   : > { %809 = vst.msk [vmem:[#allocation2 + $0x3c] sm:$0xf] %vm793_vm7, %v728_v44  ;;  %v4982_v44 = vld [vmem:[%s5576_s20 + $0x88] sm:$0xf] }
  0xb8   : > { %817 = vst.msk [vmem:[#allocation2 + $0x5c] sm:$0xf] %vm793_vm7, %v744_v48 }
  0xbb   : > { %1095 = vrot.lane.b32.xlu1 %v1029_v50, %s5527_s22  ;;  %v4985_v50 = vld [vmem:[%s5576_s20 + $0x9c] sm:$0xf] }
  0xbc   : > { %1093 = vrot.lane.b32.xlu0 %v1026_v51, %s5527_s22  ;;  %1091 = vrot.lane.b32.xlu2 %v1022_v54, %s5527_s22  ;;  %v4984_v51 = vld [vmem:[%s5576_s20 + $0x94] sm:$0xf] }
  0xbd   : > { %v736_v56 = vpop.permute.xlu1 %735 }
  0xbe   : > { %813 = vst.msk [vmem:[#allocation2 + $0x4c] sm:$0xf] %vm793_vm7, %v736_v56  ;;  %v734_v59 = vpop.permute.xlu0 %733  ;;  %v750_v62 = vpop.permute.xlu2 %749  ;;  %v4993_v56 = vld [vmem:[%s5576_s20 + $0xc] sm:$0xf] }
  0xbf   : > { %812 = vst.msk [vmem:[#allocation2 + $0x48] sm:$0xf] %vm793_vm7, %v734_v59  ;;  %v1422_v59 = vshrl.u32 %v4994_v53, 16  ;;  %v1412_v63 = vshll.u32 %v4993_v56, 16  ;;  %v4992_v53 = vld [vmem:[%s5576_s20 + $0xc4] sm:$0xf] }
  0xc0   : > { %820 = vst.msk [vmem:[#allocation2 + $0x68] sm:$0xf] %vm793_vm7, %v750_v62  ;;  %v1409_v62 = vshrl.u32 %v4993_v56, 16 }
  0xc3   : > { %1231 = vrot.lane.b32.xlu1 %v4961_v0, %s5528_s23  ;;  %v4986_v0 = vld [vmem:[%s5576_s20 + $0xa0] sm:$0xf] }
  0xc4   : > { %1099 = vrot.lane.b32.xlu0 %v1036_v2, %s5527_s22  ;;  %1097 = vrot.lane.b32.xlu2 %v1033_v3, %s5527_s22  ;;  %v6074_v2 = vrot.slane %v1418_v58, 5  ;;  %v1424_v3 = vrot.slane %v1422_v59, 4 }
  0xc5   : > { %v742_v4 = vpop.permute.xlu1 %741 }
  0xc6   : > { %816 = vst.msk [vmem:[#allocation2 + $0x58] sm:$0xf] %vm793_vm7, %v742_v4  ;;  %v740_v5 = vpop.permute.xlu0 %739  ;;  %v756_v6 = vpop.permute.xlu2 %755  ;;  %v4995_v4 = vld [vmem:[%s5576_s20 + $0x14] sm:$0x1] }
  0xc7   : > { %815 = vst.msk [vmem:[#allocation2 + $0x54] sm:$0xf] %vm793_vm7, %v740_v5 }
  0xc8   : > { %823 = vst.msk [vmem:[#allocation2 + $0x74] sm:$0xf] %vm793_vm7, %v756_v6  ;;  %v1411_v6 = vrot.slane %v1409_v62, 4  ;;  %v5008_v62 = vld [vmem:[%s5576_s20 + $0x48] sm:$0xf] }
  0xcb   : > { %1237 = vrot.lane.b32.xlu1 %v4964_v7, %s5528_s23  ;;  %v1414_v7 = vrot.slane %v1412_v63, 5 }
  0xcc   : > { %1235 = vrot.lane.b32.xlu0 %v4963_v8, %s5528_s23  ;;  %1233 = vrot.lane.b32.xlu2 %v4962_v9, %s5528_s23  ;;  %v4999_v8 = vld [vmem:[%s5576_s20 + $0x24] sm:$0xf] }
  0xcd   : > { %v748_v10 = vpop.permute.xlu1 %747 }
  0xce   : > { %819 = vst.msk [vmem:[#allocation2 + $0x64] sm:$0xf] %vm793_vm7, %v748_v10  ;;  %v746_v11 = vpop.permute.xlu0 %745  ;;  %v1038_v12 = vpop.permute.xlu2 %1037  ;;  %v4997_v10 = vld [vmem:[%s5576_s20 + $0x1c] sm:$0xf] }
  0xcf   : > { %818 = vst.msk [vmem:[#allocation2 + $0x60] sm:$0xf] %vm793_vm7, %v746_v11  ;;  %v1425_v11 = vor.u32 %v1424_v3, %v6074_v2  ;;  %v5006_v3 = vld [vmem:[%s5576_s20 + $0x40] sm:$0xf] }
  0xd0   : > { %1134 = vst.msk [vmem:[#allocation2] sm:$0xf] %vm1133_vm8, %v1038_v12  ;;  %v1428_v12 = vshll.u32 %v4995_v4, 16 }
  0xd3   : > { %1243 = vrot.lane.b32.xlu1 %v4967_v13, %s5528_s23 }
  0xd4   : > { %1241 = vrot.lane.b32.xlu0 %v4966_v14, %s5528_s23  ;;  %1239 = vrot.lane.b32.xlu2 %v4965_v15, %s5528_s23  ;;  %v4996_v14 = vld [vmem:[%s5576_s20 + $0x18] sm:$0xf]  ;;  %v4991_v15 = vld [vmem:[%s5576_s20 + $0xc0] sm:$0xf] }
  0xd5   : > { %v754_v16 = vpop.permute.xlu1 %753 }
  0xd6   : > { %822 = vst.msk [vmem:[#allocation2 + $0x70] sm:$0xf] %vm793_vm7, %v754_v16  ;;  %v752_v17 = vpop.permute.xlu0 %751  ;;  %v1044_v18 = vpop.permute.xlu2 %1043  ;;  %v1457_v16 = vshrl.u32 %v4999_v8, 16 }
  0xd7   : > { %821 = vst.msk [vmem:[#allocation2 + $0x6c] sm:$0xf] %vm793_vm7, %v752_v17  ;;  %v1460_v17 = vshll.u32 %v4999_v8, 16 }
  0xd8   : > { %1137 = vst.msk [vmem:[#allocation2 + $0xc] sm:$0xf] %vm1133_vm8, %v1044_v18  ;;  %v4990_v18 = vld [vmem:[%s5576_s20 + $0xb8] sm:$0xf] }
  0xdb   : > { %1249 = vrot.lane.b32.xlu1 %v4970_v19, %s5528_s23  ;;  %v1415_v19 = vor.u32 %v1414_v7, %v1411_v6  ;;  %v5005_v7 = vld [vmem:[%s5576_s20 + $0x3c] sm:$0xf] }
  0xdc   : > { %1247 = vrot.lane.b32.xlu0 %v4969_v20, %s5528_s23  ;;  %1245 = vrot.lane.b32.xlu2 %v4968_v21, %s5528_s23  ;;  %v1442_v20 = vshll.u32 %v4997_v10, 16  ;;  %v1446_v21 = vshrl.u32 %v4997_v10, 16 }
  0xdd   : > { %v760_v22 = vpop.permute.xlu1 %759 }
  0xde   : > { %825 = vst.msk [vmem:[#allocation2 + $0x7c] sm:$0xf] %vm793_vm7, %v760_v22  ;;  %v758_v23 = vpop.permute.xlu0 %757  ;;  %v1050_v24 = vpop.permute.xlu2 %1049  ;;  %v4989_v22 = vld [vmem:[%s5576_s20 + $0xb4] sm:$0xf] }
  0xdf   : > { %824 = vst.msk [vmem:[#allocation2 + $0x78] sm:$0xf] %vm793_vm7, %v758_v23  ;;  %v1433_v23 = vshrl.u32 %v4996_v14, 16  ;;  %vm4627_vm7 = vcmask 1047559  }
  0xe0   : > { %1140 = vst.msk [vmem:[#allocation2 + $0x18] sm:$0xf] %vm1133_vm8, %v1050_v24  ;;  %v1436_v24 = vshll.u32 %v4996_v14, 16 }
  0xe3   : > { %1255 = vrot.lane.b32.xlu1 %v4973_v26, %s5528_s23  ;;  %v1426_v26 = vrot.slane %v1425_v11, 4 }
  0xe4   : > { %1253 = vrot.lane.b32.xlu0 %v4972_v27, %s5528_s23  ;;  %1251 = vrot.lane.b32.xlu2 %v4971_v28, %s5528_s23  ;;  %v1430_v27 = vrot.slane %v1428_v12, 5  ;;  %v1459_v28 = vrot.slane %v1457_v16, 4  ;;  %v1529_v12 = vshrl.u32 %v5008_v62, 16  ;;  %v1514_v16 = vshll.u32 %v5006_v3, 16 }
  0xe5   : > { %v1042_v29 = vpop.permute.xlu1 %1041 }
  0xe6   : > { %1136 = vst.msk [vmem:[#allocation2 + $0x8] sm:$0xf] %vm1133_vm8, %v1042_v29  ;;  %v1040_v30 = vpop.permute.xlu0 %1039  ;;  %v1056_v31 = vpop.permute.xlu2 %1055  ;;  %v1462_v29 = vrot.slane %v1460_v17, 5  ;;  %v1518_v17 = vshrl.u32 %v5006_v3, 16 }
  0xe7   : > { %1135 = vst.msk [vmem:[#allocation2 + $0x4] sm:$0xf] %vm1133_vm8, %v1040_v30  ;;  %v5003_v30 = vld [vmem:[%s5576_s20 + $0x34] sm:$0xf] }
  0xe8   : > { %1143 = vst.msk [vmem:[#allocation2 + $0x24] sm:$0xf] %vm1133_vm8, %v1056_v31  ;;  %v5002_v31 = vld [vmem:[%s5576_s20 + $0x30] sm:$0xf] }
  0xeb   : > { %1261 = vrot.lane.b32.xlu1 %v4976_v32, %s5528_s23 }
  0xec   : > { %1259 = vrot.lane.b32.xlu0 %v4975_v33, %s5528_s23  ;;  %1257 = vrot.lane.b32.xlu2 %v4974_v34, %s5528_s23  ;;  %v1416_v33 = vrot.slane %v1415_v19, 4  ;;  %v5000_v34 = vld [vmem:[%s5576_s20 + $0x28] sm:$0xf]  ;;  %v5012_v19 = vld [vmem:[%s5576_s20 + $0x58] sm:$0xf] }
  0xed   : > { %v1048_v35 = vpop.permute.xlu1 %1047 }
  0xee   : > { %1139 = vst.msk [vmem:[#allocation2 + $0x14] sm:$0xf] %vm1133_vm8, %v1048_v35  ;;  %v1046_v36 = vpop.permute.xlu0 %1045  ;;  %v1062_v37 = vpop.permute.xlu2 %1061  ;;  %v6095_v35 = vrot.slane %v1442_v20, 5  ;;  %v1505_v20 = vshrl.u32 %v5005_v7, 16 }
  0xef   : > { %1138 = vst.msk [vmem:[#allocation2 + $0x10] sm:$0xf] %vm1133_vm8, %v1046_v36  ;;  %v1448_v36 = vrot.slane %v1446_v21, 4  ;;  %v1508_v21 = vshll.u32 %v5005_v7, 16  ;;  %v5015_v7 = vld [vmem:[%s5576_s20 + $0x64] sm:$0xf] }
  0xf0   : > { %1146 = vst.msk [vmem:[#allocation2 + $0x30] sm:$0xf] %vm1133_vm8, %v1062_v37 }
  0xf3   : > { %1267 = vrot.lane.b32.xlu1 %v4979_v38, %s5528_s23  ;;  %v4998_v38 = vld [vmem:[%s5576_s20 + $0x20] sm:$0x1] }
  0xf4   : > { %1265 = vrot.lane.b32.xlu0 %v4978_v39, %s5528_s23  ;;  %1263 = vrot.lane.b32.xlu2 %v4977_v40, %s5528_s23  ;;  %v1435_v39 = vrot.slane %v1433_v23, 4  ;;  %v1438_v40 = vrot.slane %v1436_v24, 5 }
  0xf5   : > { %v1054_v41 = vpop.permute.xlu1 %1053 }
  0xf6   : > { %1142 = vst.msk [vmem:[#allocation2 + $0x20] sm:$0xf] %vm1133_vm8, %v1054_v41  ;;  %v1052_v42 = vpop.permute.xlu0 %1051  ;;  %v1068_v43 = vpop.permute.xlu2 %1067 }
  0xf7   : > { %1141 = vst.msk [vmem:[#allocation2 + $0x1c] sm:$0xf] %vm1133_vm8, %v1052_v42  ;;  %v1490_v42 = vshll.u32 %v5003_v30, 16 }
  0xf8   : > { %1149 = vst.msk [vmem:[#allocation2 + $0x3c] sm:$0xf] %vm1133_vm8, %v1068_v43  ;;  %v1494_v43 = vshrl.u32 %v5003_v30, 16  ;;  %v1531_v30 = vrot.slane %v1529_v12, 4 }
  0xfa   : > { %v1496_v56 = vrot.slane %v1494_v43, 4 }
  0xfb   : > { %1273 = vrot.lane.b32.xlu1 %v4982_v44, %s5528_s23  ;;  %v1481_v44 = vshrl.u32 %v5002_v31, 16 }
  0xfc   : > { %1271 = vrot.lane.b32.xlu0 %v4981_v45, %s5528_s23  ;;  %1269 = vrot.lane.b32.xlu2 %v4980_v46, %s5528_s23  ;;  %v1484_v45 = vshll.u32 %v5002_v31, 16  ;;  %v1431_v46 = vsel %vm5587_vm2, %v1426_v26, %v1430_v27 }
  0xfd   : > { %v1060_v47 = vpop.permute.xlu1 %1059 }
  0xfe   : > { %1145 = vst.msk [vmem:[#allocation2 + $0x2c] sm:$0xf] %vm1133_vm8, %v1060_v47  ;;  %v1058_v48 = vpop.permute.xlu0 %1057  ;;  %v1074_v49 = vpop.permute.xlu2 %1073  ;;  %v1463_v47 = vor.u32 %v1462_v29, %v1459_v28  ;;  %v1486_v58 = vrot.slane %v1484_v45, 5  ;;  %v5009_v29 = vld [vmem:[%s5576_s20 + $0x4c] sm:$0xf] }
  0xff   : > { %1144 = vst.msk [vmem:[#allocation2 + $0x28] sm:$0xf] %vm1133_vm8, %v1058_v48  ;;  %v1466_v48 = vshll.u32 %v5000_v34, 16 }
 0x100   : > { %1152 = vst.msk [vmem:[#allocation2 + $0x48] sm:$0xf] %vm1133_vm8, %v1074_v49  ;;  %v1421_v49 = vsel %vm5587_vm2, %v1416_v33, %v6074_v2  ;;  %v1464_v59 = vrot.slane %v1463_v47, 4  ;;  %v6134_v33 = vrot.slane %v1514_v16, 5 }
 0x103   : > { %1279 = vrot.lane.b32.xlu1 %v4985_v50, %s5528_s23  ;;  %v1449_v50 = vor.u32 %v1448_v36, %v6095_v35  ;;  %v1562_v36 = vshll.u32 %v5012_v19, 16 }
 0x104   : > { %1277 = vrot.lane.b32.xlu0 %v4984_v51, %s5528_s23  ;;  %1275 = vrot.lane.b32.xlu2 %v4983_v52, %s5528_s23  ;;  %v1452_v51 = vshll.u32 %v4998_v38, 16  ;;  %v1470_v52 = vshrl.u32 %v5000_v34, 16  ;;  %v1520_v34 = vrot.slane %v1518_v17, 4  ;;  %v5011_v38 = vld [vmem:[%s5576_s20 + $0x54] sm:$0xf]  ;;  %v1586_v17 = vshll.u32 %v5015_v7, 16 }
 0x105   : > { %v1066_v54 = vpop.permute.xlu1 %1065 }
 0x106   : > { %1148 = vst.msk [vmem:[#allocation2 + $0x38] sm:$0xf] %vm1133_vm8, %v1066_v54  ;;  %v1064_v55 = vpop.permute.xlu0 %1063  ;;  %v1080_v57 = vpop.permute.xlu2 %1079  ;;  %v1439_v54 = vor.u32 %v1438_v40, %v1435_v39  ;;  %v1454_v2 = vrot.slane %v1452_v51, 5  ;;  %v1472_v6 = vrot.slane %v1470_v52, 4  ;;  %v1507_v39 = vrot.slane %v1505_v20, 4 }
 0x107   : > { %1147 = vst.msk [vmem:[#allocation2 + $0x34] sm:$0xf] %vm1133_vm8, %v1064_v55  ;;  %v6109_v55 = vrot.slane %v1490_v42, 5  ;;  %v1510_v40 = vrot.slane %v1508_v21, 5  ;;  %v1553_v51 = vshrl.u32 %v5011_v38, 16  ;;  %v6147_v52 = vrot.slane %v1562_v36, 5 }
 0x108   : > { %1155 = vst.msk [vmem:[#allocation2 + $0x54] sm:$0xf] %vm1133_vm8, %v1080_v57  ;;  %v1483_v57 = vrot.slane %v1481_v44, 4 }
 0x109   : > { %v1497_v8 = vor.u32 %v1496_v56, %v6109_v55  ;;  %v1511_v56 = vor.u32 %v1510_v40, %v1507_v39 }
 0x10a   : > { %v1487_v10 = vor.u32 %v1486_v58, %v1483_v57  ;;  %v1542_v57 = vshrl.u32 %v5009_v29, 16 }
 0x10b   : > { %1285 = vrot.lane.b32.xlu1 %v4988_v60, %s5528_s23  ;;  %v1468_v60 = vrot.slane %v1466_v48, 5  ;;  %v1498_v26 = vrot.slane %v1497_v8, 4 }
 0x10c   : > { %1283 = vrot.lane.b32.xlu0 %v4987_v61, %s5528_s23  ;;  %1281 = vrot.lane.b32.xlu2 %v4986_v0, %s5528_s23  ;;  %v5004_v61 = vld [vmem:[%s5576_s20 + $0x38] sm:$0x1]  ;;  %v1450_v0 = vrot.slane %v1449_v50, 4  ;;  %v1488_v28 = vrot.slane %v1487_v10, 4 }
 0x10d   : > { %v1072_v5 = vpop.permute.xlu1 %1071  ;;  %v1469_v14 = vsel %vm5587_vm2, %v1464_v59, %v1468_v60  ;;  %v1473_v23 = vor.u32 %v1472_v6, %v1468_v60  ;;  %v5017_v60 = vld [vmem:[%s5576_s20 + $0x6c] sm:$0xf]  ;;  %v1512_v6 = vrot.slane %v1511_v56, 4 }
 0x10e   : > { %1151 = vst.msk [vmem:[#allocation2 + $0x44] sm:$0xf] %vm1133_vm8, %v1072_v5  ;;  %v1070_v9 = vpop.permute.xlu0 %1069  ;;  %v1086_v13 = vpop.permute.xlu2 %1085  ;;  %v1440_v5 = vrot.slane %v1439_v54, 4  ;;  %v1493_v45 = vsel %vm5587_vm2, %v1488_v28, %v6109_v55  ;;  %v1556_v54 = vshll.u32 %v5011_v38, 16  ;;  %v5013_v55 = vld [vmem:[%s5576_s20 + $0x5c] sm:$0x1] }
 0x10f   : > { %1150 = vst.msk [vmem:[#allocation2 + $0x40] sm:$0xf] %vm1133_vm8, %v1070_v9  ;;  %v1500_v9 = vshll.u32 %v5004_v61, 16  ;;  %v1474_v42 = vrot.slane %v1473_v23, 4  ;;  %v1604_v10 = vshll.u32 %v5017_v60, 16 }
 0x110   : > { %1158 = vst.msk [vmem:[#allocation2 + $0x60] sm:$0xf] %vm1133_vm8, %v1086_v13  ;;  %v5001_v13 = vld [vmem:[%s5576_s20 + $0x2c] sm:$0x1]  ;;  %v5016_v38 = vld [vmem:[%s5576_s20 + $0x68] sm:$0x1] }
 0x111   : > { %v1476_v24 = vshll.u32 %v5001_v13, 16  ;;  %v1502_v27 = vrot.slane %v1500_v9, 5  ;;  %v1601_v9 = vshrl.u32 %v5017_v60, 16  ;;  %v5010_v13 = vld [vmem:[%s5576_s20 + $0x50] sm:$0x1] }
 0x113   : > { %1291 = vrot.lane.b32.xlu1 %v4991_v15, %s5528_s23  ;;  %v1532_v15 = vshll.u32 %v5008_v62, 16  ;;  %v1478_v43 = vrot.slane %v1476_v24, 5  ;;  %v1503_v44 = vsel %vm5587_vm2, %v1498_v26, %v1502_v27  ;;  %v1548_v24 = vshll.u32 %v5010_v13, 16 }
 0x114   : > { %1289 = vrot.lane.b32.xlu0 %v4990_v18, %s5528_s23  ;;  %1287 = vrot.lane.b32.xlu2 %v4989_v22, %s5528_s23  ;;  %v1455_v18 = vsel %vm5587_vm2, %v1450_v0, %v1454_v2  ;;  %v1445_v22 = vsel %vm5587_vm2, %v1440_v5, %v6095_v35  ;;  %v1566_v35 = vshrl.u32 %v5012_v19, 16  ;;  %v1555_v0 = vrot.slane %v1553_v51, 4 }
 0x115   : > { %v1078_v32 = vpop.permute.xlu1 %1077  ;;  %v1534_v31 = vrot.slane %v1532_v15, 5  ;;  %v1479_v58 = vsel %vm5587_vm2, %v1474_v42, %v1478_v43  ;;  %v1558_v5 = vrot.slane %v1556_v54, 5  ;;  %v1603_v28 = vrot.slane %v1601_v9, 4  ;;  %v5023_v9 = vld [vmem:[%s5576_s20 + $0x84] sm:$0xf] }
 0x116   : > { %1154 = vst.msk [vmem:[#allocation2 + $0x50] sm:$0xf] %vm1133_vm8, %v1078_v32  ;;  %v1076_v37 = vpop.permute.xlu0 %1075  ;;  %v1092_v41 = vpop.permute.xlu2 %1091  ;;  %v5007_v32 = vld [vmem:[%s5576_s20 + $0x44] sm:$0x1] }
 0x117   : > { %1153 = vst.msk [vmem:[#allocation2 + $0x4c] sm:$0xf] %vm1133_vm8, %v1076_v37  ;;  %v1535_v48 = vor.u32 %v1534_v31, %v1531_v30  ;;  %v1524_v50 = vshll.u32 %v5007_v32, 16  ;;  %v1559_v21 = vor.u32 %v1558_v5, %v1555_v0  ;;  %v6172_v30 = vrot.slane %v1586_v17, 5  ;;  %v5021_v32 = vld [vmem:[%s5576_s20 + $0x7c] sm:$0xf] }
 0x118   : > { %1161 = vst.msk [vmem:[#allocation2 + $0x6c] sm:$0xf] %vm1133_vm8, %v1092_v41  ;;  %v5024_v5 = vld [vmem:[%s5576_s20 + $0x88] sm:$0xf] }
 0x119   : > { %v1536_v61 = vrot.slane %v1535_v48, 4 }
 0x11b   : > { %1794 = vrot.lane.b32.xlu1 %v1431_v46, %s5529_s24  ;;  %v1538_v46 = vshll.u32 %v5009_v29, 16  ;;  %v1606_v29 = vrot.slane %v1604_v10, 5 }
 0x11c   : > { %1792 = vrot.lane.b32.xlu0 %v1421_v49, %s5529_s24  ;;  %1293 = vrot.lane.b32.xlu2 %v4992_v53, %s5528_s23  ;;  %v1521_v49 = vor.u32 %v1520_v34, %v6134_v33  ;;  %v1568_v53 = vrot.slane %v1566_v35, 4  ;;  %v5020_v34 = vld [vmem:[%s5576_s20 + $0x78] sm:$0xf]  ;;  %v5018_v35 = vld [vmem:[%s5576_s20 + $0x70] sm:$0xf] }
 0x11d   : > { %v1084_v63 = vpop.permute.xlu1 %1083  ;;  %v1540_v59 = vrot.slane %v1538_v46, 5  ;;  %v1638_v46 = vshrl.u32 %v5021_v32, 16  ;;  %v1628_v48 = vshll.u32 %v5020_v34, 16  ;;  %v1614_v56 = vshrl.u32 %v5018_v35, 16 }
 0x11e   : > { %1157 = vst.msk [vmem:[#allocation2 + $0x5c] sm:$0xf] %vm1133_vm8, %v1084_v63  ;;  %v1082_v4 = vpop.permute.xlu0 %1081  ;;  %v1098_v11 = vpop.permute.xlu2 %1097  ;;  %v1522_v62 = vrot.slane %v1521_v49, 4  ;;  %v1526_v63 = vrot.slane %v1524_v50, 5  ;;  %v1569_v3 = vor.u32 %v1568_v53, %v6147_v52  ;;  %v1607_v49 = vor.u32 %v1606_v29, %v1603_v28 }
 0x11f   : > { %1156 = vst.msk [vmem:[#allocation2 + $0x58] sm:$0xf] %vm1133_vm8, %v1082_v4  ;;  %v1572_v4 = vshll.u32 %v5013_v55, 16  ;;  %v1541_v15 = vsel %vm5587_vm2, %v1536_v61, %v1540_v59  ;;  %v1610_v50 = vshll.u32 %v5018_v35, 16  ;;  %v1596_v53 = vshll.u32 %v5016_v38, 16 }
 0x120   : > { %1164 = vst.msk [vmem:[#allocation2 + $0x78] sm:$0xf] %vm1133_vm8, %v1098_v11  ;;  %v1544_v11 = vrot.slane %v1542_v57, 4  ;;  %v1527_v16 = vsel %vm5587_vm2, %v1522_v62, %v1526_v63  ;;  %v1570_v19 = vrot.slane %v1569_v3, 4  ;;  %v1630_v61 = vrot.slane %v1628_v48, 5 }
 0x121   : > { %v1574_v20 = vrot.slane %v1572_v4, 5  ;;  %v1608_v62 = vrot.slane %v1607_v49, 4  ;;  %v1612_v63 = vrot.slane %v1610_v50, 5  ;;  %v1598_v0 = vrot.slane %v1596_v53, 5  ;;  %v5026_v4 = vld [vmem:[%s5576_s20 + $0x90] sm:$0xf] }
 0x122   : > { %v1545_v23 = vor.u32 %v1544_v11, %v1540_v59  ;;  %v1640_v59 = vrot.slane %v1638_v46, 4  ;;  %v1673_v17 = vshrl.u32 %v5026_v4, 16 }
 0x123   : > { %1800 = vrot.lane.b32.xlu1 %v1469_v14, %s5529_s24  ;;  %v5014_v14 = vld [vmem:[%s5576_s20 + $0x60] sm:$0xf] }
 0x124   : > { %1798 = vrot.lane.b32.xlu0 %v1455_v18, %s5529_s24  ;;  %1796 = vrot.lane.b32.xlu2 %v1445_v22, %s5529_s24  ;;  %v1590_v18 = vshrl.u32 %v5015_v7, 16  ;;  %v1517_v22 = vsel %vm5587_vm2, %v1512_v6, %v6134_v33  ;;  %v1577_v26 = vshrl.u32 %v5014_v14, 16  ;;  %v1580_v27 = vshll.u32 %v5014_v14, 16  ;;  %v5019_v14 = vld [vmem:[%s5576_s20 + $0x74] sm:$0x1] }
 0x125   : > { %v1090_v37 = vpop.permute.xlu1 %1089  ;;  %v1575_v33 = vsel %vm5587_vm2, %v1570_v19, %v1574_v20  ;;  %v1546_v40 = vrot.slane %v1545_v23, 4  ;;  %v1658_v19 = vshll.u32 %v5024_v5, 16  ;;  %v1662_v20 = vshrl.u32 %v5024_v5, 16 }
 0x126   : > { %1160 = vst.msk [vmem:[#allocation2 + $0x68] sm:$0xf] %vm1133_vm8, %v1090_v37  ;;  %v1088_v41 = vpop.permute.xlu0 %1087  ;;  %v1234_v47 = vpop.permute.xlu2 %1233  ;;  %v1592_v31 = vrot.slane %v1590_v18, 4  ;;  %v1560_v37 = vrot.slane %v1559_v21, 4  ;;  %v1579_v42 = vrot.slane %v1577_v26, 4  ;;  %v1582_v43 = vrot.slane %v1580_v27, 5 }
 0x127   : > { %1159 = vst.msk [vmem:[#allocation2 + $0x64] sm:$0xf] %vm1133_vm8, %v1088_v41  ;;  %v1550_v41 = vrot.slane %v1548_v24, 5  ;;  %v1676_v18 = vshll.u32 %v5026_v4, 16  ;;  %v1649_v21 = vshrl.u32 %v5023_v9, 16  ;;  %v1620_v26 = vshll.u32 %v5019_v14, 16 }
 0x128   : > { %1329 = vst.msk [vmem:[#allocation2 + $0x4] sm:$0xf] %vm1327_vm9, %v1234_v47  ;;  %v1625_v47 = vshrl.u32 %v5020_v34, 16  ;;  %v1593_v51 = vor.u32 %v1592_v31, %v6172_v30  ;;  %v1565_v54 = vsel %vm5587_vm2, %v1560_v37, %v6147_v52  ;;  %v1675_v31 = vrot.slane %v1673_v17, 4  ;;  %v5030_v34 = vld [vmem:[%s5576_s20 + $0xa0] sm:$0xf] }
 0x129   : > { %v1551_v57 = vsel %vm5587_vm2, %v1546_v40, %v1550_v41  ;;  %v5027_v37 = vld [vmem:[%s5576_s20 + $0x94] sm:$0xf]  ;;  %v6217_v35 = vrot.slane %v1658_v19, 5  ;;  %v1651_v38 = vrot.slane %v1649_v21, 4  ;;  %v5025_v41 = vld [vmem:[%s5576_s20 + $0x8c] sm:$0x1] }
 0x12a   : > { %v1627_v60 = vrot.slane %v1625_v47, 4  ;;  %v1594_v52 = vrot.slane %v1593_v51, 4  ;;  %v1710_v46 = vshrl.u32 %v5030_v34, 16  ;;  %v1682_v51 = vshll.u32 %v5027_v37, 16  ;;  %v5028_v14 = vld [vmem:[%s5576_s20 + $0x98] sm:$0x1] }
 0x12b   : > { %1806 = vrot.lane.b32.xlu1 %v1503_v44, %s5529_s24 }
 0x12c   : > { %1804 = vrot.lane.b32.xlu0 %v1493_v45, %s5529_s24  ;;  %1802 = vrot.lane.b32.xlu2 %v1479_v58, %s5529_s24  ;;  %v1634_v45 = vshll.u32 %v5021_v32, 16  ;;  %v1583_v58 = vor.u32 %v1582_v43, %v1579_v42  ;;  %v1678_v32 = vrot.slane %v1676_v18, 5  ;;  %v1622_v43 = vrot.slane %v1620_v26, 5 }
 0x12d   : > { %v1096_v2 = vpop.permute.xlu1 %1095 }
 0x12e   : > { %1163 = vst.msk [vmem:[#allocation2 + $0x74] sm:$0xf] %vm1133_vm8, %v1096_v2  ;;  %v1094_v8 = vpop.permute.xlu0 %1093  ;;  %v1240_v12 = vpop.permute.xlu2 %1239  ;;  %v6191_v55 = vrot.slane %v1634_v45, 5  ;;  %v5022_v2 = vld [vmem:[%s5576_s20 + $0x80] sm:$0x1]  ;;  %v1584_v7 = vrot.slane %v1583_v58, 4  ;;  %v1679_v50 = vor.u32 %v1678_v32, %v1675_v31 }
 0x12f   : > { %1162 = vst.msk [vmem:[#allocation2 + $0x70] sm:$0xf] %vm1133_vm8, %v1094_v8  ;;  %v1616_v8 = vrot.slane %v1614_v56, 4  ;;  %v1644_v11 = vshll.u32 %v5022_v2, 16  ;;  %v1706_v45 = vshll.u32 %v5030_v34, 16  ;;  %v1668_v56 = vshll.u32 %v5025_v41, 16 }
 0x130   : > { %1332 = vst.msk [vmem:[#allocation2 + $0x10] sm:$0xf] %vm1327_vm9, %v1240_v12  ;;  %v1641_v10 = vor.u32 %v1640_v59, %v6191_v55  ;;  %v1631_v12 = vor.u32 %v1630_v61, %v1627_v60  ;;  %v1589_v23 = vsel %vm5587_vm2, %v1584_v7, %v6172_v30  ;;  %v1664_v30 = vrot.slane %v1662_v20, 4  ;;  %v5031_v60 = vld [vmem:[%s5576_s20 + $0xa4] sm:$0x1] }
 0x131   : > { %v1617_v24 = vor.u32 %v1616_v8, %v1612_v63  ;;  %v1646_v28 = vrot.slane %v1644_v11, 5  ;;  %v1686_v58 = vshrl.u32 %v5027_v37, 16  ;;  %v6233_v61 = vrot.slane %v1706_v45, 5  ;;  %v5036_v32 = vld [vmem:[%s5576_s20 + $0xb8] sm:$0xf] }
 0x132   : > { %v1642_v27 = vrot.slane %v1641_v10, 4  ;;  %v1632_v29 = vrot.slane %v1631_v12, 4  ;;  %v1670_v4 = vrot.slane %v1668_v56, 5  ;;  %v1716_v8 = vshll.u32 %v5031_v60, 16 }
 0x133   : > { %1812 = vrot.lane.b32.xlu1 %v1541_v15, %s5529_s24  ;;  %v1613_v15 = vsel %vm5587_vm2, %v1608_v62, %v1612_v63  ;;  %v1618_v42 = vrot.slane %v1617_v24, 4  ;;  %v1712_v62 = vrot.slane %v1710_v46, 4  ;;  %v1688_v10 = vrot.slane %v1686_v58, 4 }
 0x134   : > { %1810 = vrot.lane.b32.xlu0 %v1527_v16, %s5529_s24  ;;  %1808 = vrot.lane.b32.xlu2 %v1517_v22, %s5529_s24  ;;  %v1599_v16 = vsel %vm5587_vm2, %v1594_v52, %v1598_v0  ;;  %v1652_v22 = vshll.u32 %v5023_v9, 16  ;;  %v1647_v49 = vsel %vm5587_vm2, %v1642_v27, %v1646_v28  ;;  %v1637_v53 = vsel %vm5587_vm2, %v1632_v29, %v6191_v55  ;;  %v5033_v9 = vld [vmem:[%s5576_s20 + $0xac] sm:$0xf] }
 0x135   : > { %v1232_v36 = vpop.permute.xlu1 %1231  ;;  %v1623_v59 = vsel %vm5587_vm2, %v1618_v42, %v1622_v43  ;;  %v1680_v55 = vrot.slane %v1679_v50, 4  ;;  %v1684_v0 = vrot.slane %v1682_v51, 5  ;;  %v1713_v11 = vor.u32 %v1712_v62, %v6233_v61 }
 0x136   : > { %1328 = vst.msk [vmem:[#allocation2] sm:$0xf] %vm1327_vm9, %v1232_v36  ;;  %v1100_v39 = vpop.permute.xlu0 %1099  ;;  %v1246_v44 = vpop.permute.xlu2 %1245  ;;  %v5029_v36 = vld [vmem:[%s5576_s20 + $0x9c] sm:$0xf]  ;;  %v1730_v21 = vshll.u32 %v5033_v9, 16  ;;  %v1692_v24 = vshll.u32 %v5028_v14, 16 }
 0x137   : > { %1165 = vst.msk [vmem:[#allocation2 + $0x7c] sm:$0xf] %vm1133_vm8, %v1100_v39  ;;  %v1654_v39 = vrot.slane %v1652_v22, 5  ;;  %v1697_v47 = vshrl.u32 %v5029_v36, 16  ;;  %v1700_v48 = vshll.u32 %v5029_v36, 16  ;;  %v1734_v22 = vshrl.u32 %v5033_v9, 16 }
 0x138   : > { %1335 = vst.msk [vmem:[#allocation2 + $0x1c] sm:$0xf] %vm1327_vm9, %v1246_v44  ;;  %v1714_v28 = vrot.slane %v1713_v11, 4  ;;  %v1718_v29 = vrot.slane %v1716_v8, 5  ;;  %v1694_v42 = vrot.slane %v1692_v24, 5  ;;  %v1758_v58 = vshrl.u32 %v5036_v32, 16 }
 0x139   : > { %v1699_v63 = vrot.slane %v1697_v47, 4  ;;  %v1702_v52 = vrot.slane %v1700_v48, 5  ;;  %v5042_v24 = vld [vmem:[%s5576_s20 + $0x10] sm:$0xf]  ;;  %vm4631_vm8 = vcmask 60416  }
 0x13a   : > { %v1719_v45 = vsel %vm5587_vm2, %v1714_v28, %v1718_v29  ;;  %v1760_v8 = vrot.slane %v1758_v58, 4 }
 0x13b   : > { %1818 = vrot.lane.b32.xlu1 %v1575_v33, %s5529_s24  ;;  %v1703_v12 = vor.u32 %v1702_v52, %v1699_v63 }
 0x13c   : > { %1816 = vrot.lane.b32.xlu0 %v1565_v54, %s5529_s24  ;;  %1814 = vrot.lane.b32.xlu2 %v1551_v57, %s5529_s24  ;;  %v1665_v54 = vor.u32 %v1664_v30, %v6217_v35  ;;  %v1655_v57 = vor.u32 %v1654_v39, %v1651_v38  ;;  %v1736_v30 = vrot.slane %v1734_v22, 4  ;;  %v5039_v38 = vld [vmem:[%s5576_s20 + $0xc4] sm:$0xf]  ;;  %v5038_v39 = vld [vmem:[%s5576_s20 + $0xc0] sm:$0xf] }
 0x13d   : > { %v1238_v3 = vpop.permute.xlu1 %1237  ;;  %v1704_v31 = vrot.slane %v1703_v12, 4  ;;  %v1778_v50 = vshll.u32 %v5039_v38, 16  ;;  %v1782_v51 = vshrl.u32 %v5039_v38, 16  ;;  %v1769_v56 = vshrl.u32 %v5038_v39, 16 }
 0x13e   : > { %1331 = vst.msk [vmem:[#allocation2 + $0xc] sm:$0xf] %vm1327_vm9, %v1238_v3  ;;  %v1236_v6 = vpop.permute.xlu0 %1235  ;;  %v1252_v13 = vpop.permute.xlu2 %1251  ;;  %v1666_v3 = vrot.slane %v1665_v54, 4  ;;  %v1656_v5 = vrot.slane %v1655_v57, 4  ;;  %v1772_v57 = vshll.u32 %v5038_v39, 16 }
 0x13f   : > { %1330 = vst.msk [vmem:[#allocation2 + $0x8] sm:$0xf] %vm1327_vm9, %v1236_v6  ;;  %v5035_v6 = vld [vmem:[%s5576_s20 + $0xb4] sm:$0xf]  ;;  %v1709_v46 = vsel %vm5587_vm2, %v1704_v31, %v6233_v61  ;;  %v1780_v63 = vrot.slane %v1778_v50, 5  ;;  %v1784_v52 = vrot.slane %v1782_v51, 4 }
 0x140   : > { %1338 = vst.msk [vmem:[#allocation2 + $0x28] sm:$0xf] %vm1327_vm9, %v1252_v13  ;;  %v1745_v17 = vshrl.u32 %v5035_v6, 16  ;;  %v1748_v18 = vshll.u32 %v5035_v6, 16  ;;  %v1671_v19 = vsel %vm5587_vm2, %v1666_v3, %v1670_v4  ;;  %v1661_v20 = vsel %vm5587_vm2, %v1656_v5, %v6217_v35  ;;  %v5040_v3 = vld [vmem:[%s5576_s20 + $0xc8] sm:$0x1] }
 0x141   : > { %v1732_v35 = vrot.slane %v1730_v21, 5  ;;  %v1771_v4 = vrot.slane %v1769_v56, 4  ;;  %v1774_v5 = vrot.slane %v1772_v57, 5  ;;  %v1785_v12 = vor.u32 %v1784_v52, %v1780_v63  ;;  %v5047_v50 = vld [vmem:[%s5576_s20 + $0x24] sm:$0xe] }
 0x142   : > { %v1747_v34 = vrot.slane %v1745_v17, 4  ;;  %v1750_v36 = vrot.slane %v1748_v18, 5  ;;  %v5091_v58 = vrot.slane %v5047_v50, 9 }
 0x143   : > { %1824 = vrot.lane.b32.xlu1 %v1613_v15, %s5529_s24  ;;  %v5032_v15 = vld [vmem:[%s5576_s20 + $0xa8] sm:$0xf] }
 0x144   : > { %1822 = vrot.lane.b32.xlu0 %v1599_v16, %s5529_s24  ;;  %1820 = vrot.lane.b32.xlu2 %v1589_v23, %s5529_s24  ;;  %v1685_v16 = vsel %vm5587_vm2, %v1680_v55, %v1684_v0  ;;  %v1689_v23 = vor.u32 %v1688_v10, %v1684_v0  ;;  %v1721_v26 = vshrl.u32 %v5032_v15, 16  ;;  %v1724_v27 = vshll.u32 %v5032_v15, 16  ;;  %v5037_v10 = vld [vmem:[%s5576_s20 + $0xbc] sm:$0x1] }
 0x145   : > { %v1244_v33 = vpop.permute.xlu1 %1243  ;;  %v1751_v48 = vor.u32 %v1750_v36, %v1747_v34  ;;  %v1775_v15 = vor.u32 %v1774_v5, %v1771_v4  ;;  %v1764_v18 = vshll.u32 %v5037_v10, 16  ;;  %v5045_v34 = vld [vmem:[%s5576_s20 + $0x1c] sm:$0xf]  ;;  %v2019_v36 = vrot.slane %v5042_v24, 5  ;;  %v5052_v4 = vld [vmem:[%s5576_s20 + $0x38] sm:$0x1] }
 0x146   : > { %1334 = vst.msk [vmem:[#allocation2 + $0x18] sm:$0xf] %vm1327_vm9, %v1244_v33  ;;  %v1242_v40 = vpop.permute.xlu0 %1241  ;;  %v1258_v44 = vpop.permute.xlu2 %1257  ;;  %v5034_v33 = vld [vmem:[%s5576_s20 + $0xb0] sm:$0x1]  ;;  %v1690_v41 = vrot.slane %v1689_v23, 4  ;;  %v1723_v43 = vrot.slane %v1721_v26, 4 }
 0x147   : > { %1333 = vst.msk [vmem:[#allocation2 + $0x14] sm:$0xf] %vm1327_vm9, %v1242_v40  ;;  %v1740_v54 = vshll.u32 %v5034_v33, 16  ;;  %v1752_v61 = vrot.slane %v1751_v48, 4  ;;  %v1776_v22 = vrot.slane %v1775_v15, 4  ;;  %v2026_v38 = vrot.slane %v5045_v34, 5 }
 0x148   : > { %1341 = vst.msk [vmem:[#allocation2 + $0x34] sm:$0xf] %vm1327_vm9, %v1258_v44  ;;  %v1726_v44 = vrot.slane %v1724_v27, 5  ;;  %v1766_v27 = vrot.slane %v1764_v18, 5  ;;  %v5043_v33 = vld [vmem:[%s5576_s20 + $0x14] sm:$0x1] }
 0x149   : > { %v1781_v31 = vsel %vm5587_vm2, %v1776_v22, %v1780_v63  ;;  %v5055_v22 = vld [vmem:[%s5576_s20 + $0x44] sm:$0x1] }
 0x14a   : > { %v1727_v60 = vor.u32 %v1726_v44, %v1723_v43 }
 0x14b   : > { %1830 = vrot.lane.b32.xlu1 %v1647_v49, %s5529_s24  ;;  %v1754_v49 = vshll.u32 %v5036_v32, 16  ;;  %v5044_v32 = vld [vmem:[%s5576_s20 + $0x18] sm:$0xe] }
 0x14c   : > { %1828 = vrot.lane.b32.xlu0 %v1637_v53, %s5529_s24  ;;  %1826 = vrot.lane.b32.xlu2 %v1623_v59, %s5529_s24  ;;  %v1737_v53 = vor.u32 %v1736_v30, %v1732_v35  ;;  %v1695_v59 = vsel %vm5587_vm2, %v1690_v41, %v1694_v42  ;;  %v5090_v30 = vrot.slane %v5044_v32, 9  ;;  %v2022_v41 = vrot.slane %v5043_v33, 5  ;;  %v5048_v42 = vld [vmem:[%s5576_s20 + $0x28] sm:$0xf] }
 0x14d   : > { %v1250_v2 = vpop.permute.xlu1 %1249  ;;  %v1756_v62 = vrot.slane %v1754_v49, 5  ;;  %v5049_v49 = vld [vmem:[%s5576_s20 + $0x2c] sm:$0x1]  ;;  %v2050_v32 = vrot.slane %v5055_v22, 5 }
 0x14e   : > { %1337 = vst.msk [vmem:[#allocation2 + $0x24] sm:$0xf] %vm1327_vm9, %v1250_v2  ;;  %v1248_v7 = vpop.permute.xlu0 %1247  ;;  %v1264_v13 = vpop.permute.xlu2 %1263  ;;  %v1738_v0 = vrot.slane %v1737_v53, 4  ;;  %v1742_v2 = vrot.slane %v1740_v54, 5  ;;  %v5046_v53 = vld [vmem:[%s5576_s20 + $0x20] sm:$0x1] }
 0x14f   : > { %1336 = vst.msk [vmem:[#allocation2 + $0x20] sm:$0xf] %vm1327_vm9, %v1248_v7  ;;  %v1728_v7 = vrot.slane %v1727_v60, 4  ;;  %v1757_v11 = vsel %vm5587_vm2, %v1752_v61, %v1756_v62  ;;  %v1761_v17 = vor.u32 %v1760_v8, %v1756_v62  ;;  %v2036_v56 = vrot.slane %v5049_v49, 5  ;;  %v5051_v60 = vld [vmem:[%s5576_s20 + $0x34] sm:$0xf] }
 0x150   : > { %1344 = vst.msk [vmem:[#allocation2 + $0x40] sm:$0xf] %vm1327_vm9, %v1264_v13  ;;  %v1788_v13 = vshll.u32 %v5040_v3, 16  ;;  %v1743_v14 = vsel %vm5587_vm2, %v1738_v0, %v1742_v2  ;;  %v2028_v61 = vrot.slane %v2026_v38, 4  ;;  %v2029_v62 = vrot.slane %v5046_v53, 5 }
 0x151   : > { %v1762_v26 = vrot.slane %v1761_v17, 4  ;;  %v5053_v0 = vld [vmem:[%s5576_s20 + $0x3c] sm:$0xe]  ;;  %v5054_v2 = vld [vmem:[%s5576_s20 + $0x40] sm:$0xf]  ;;  %v2040_v3 = vrot.slane %v5051_v60, 5 }
 0x152   : > { %v2030_v5 = vsel %vm5762_vm6, %v2028_v61, %v2029_v62  ;;  %v2047_v8 = vrot.slane %v5054_v2, 5 }
 0x153   : > { %1836 = vrot.lane.b32.xlu1 %v1685_v16, %s5529_s24  ;;  %v1733_v16 = vsel %vm5587_vm2, %v1728_v7, %v1732_v35  ;;  %v5041_v35 = vld [vmem:[%s5576_s20 + $0xc] sm:$0xe]  ;;  %v5093_v7 = vrot.slane %v5053_v0, 9  ;;  %v2042_v10 = vrot.slane %v2040_v3, 4 }
 0x154   : > { %1834 = vrot.lane.b32.xlu0 %v1671_v19, %s5529_s24  ;;  %1832 = vrot.lane.b32.xlu2 %v1661_v20, %s5529_s24  ;;  %v1786_v19 = vrot.slane %v1785_v12, 4  ;;  %v1790_v20 = vrot.slane %v1788_v13, 5  ;;  %v5089_v44 = vrot.slane %v5041_v35, 9  ;;  %v5057_v12 = vld [vmem:[%s5576_s20 + $0x4c] sm:$0xf] }
 0x155   : > { %v1256_v37 = vpop.permute.xlu1 %1255  ;;  %v2054_v17 = vrot.slane %v5057_v12, 5  ;;  %v5063_v35 = vld [vmem:[%s5576_s20 + $0x64] sm:$0xf] }
 0x156   : > { %1340 = vst.msk [vmem:[#allocation2 + $0x30] sm:$0xf] %vm1327_vm9, %v1256_v37  ;;  %v1254_v40 = vpop.permute.xlu0 %1253  ;;  %v1270_v47 = vpop.permute.xlu2 %1269  ;;  %v1791_v29 = vsel %vm5587_vm2, %v1786_v19, %v1790_v20  ;;  %v1767_v37 = vsel %vm5587_vm2, %v1762_v26, %v1766_v27  ;;  %v2020_v51 = vsel %vm5762_vm6, %v5089_v44, %v2019_v36  ;;  %v5058_v19 = vld [vmem:[%s5576_s20 + $0x50] sm:$0x1]  ;;  %v5056_v20 = vld [vmem:[%s5576_s20 + $0x48] sm:$0xe] }
 0x157   : > { %1339 = vst.msk [vmem:[#allocation2 + $0x2c] sm:$0xf] %vm1327_vm9, %v1254_v40  ;;  %v2021_v40 = vrot.slane %v2019_v36, 4  ;;  %v2057_v24 = vrot.slane %v5058_v19, 5  ;;  %v5094_v27 = vrot.slane %v5056_v20, 9 }
 0x158   : > { %1347 = vst.msk [vmem:[#allocation2 + $0x4c] sm:$0xf] %vm1327_vm9, %v1270_v47  ;;  %v2033_v47 = vrot.slane %v5048_v42, 5  ;;  %v2068_v42 = vrot.slane %v5063_v35, 5 }
 0x159   : > { %v2023_v48 = vsel %vm5762_vm6, %v2021_v40, %v2022_v41  ;;  %v2055_v33 = vsel %vm5762_vm6, %v5094_v27, %v2054_v17  ;;  %v5059_v40 = vld [vmem:[%s5576_s20 + $0x54] sm:$0xe]  ;;  %v5073_v27 = vld [vmem:[%s5576_s20 + $0x8c] sm:$0x1] }
 0x15a   : > { %v2035_v54 = vrot.slane %v2033_v47, 4 }
 0x15b   : > { %1842 = vrot.lane.b32.xlu1 %v1719_v45, %s5529_s24 }
 0x15c   : > { %1840 = vrot.lane.b32.xlu0 %v1709_v46, %s5529_s24  ;;  %1838 = vrot.lane.b32.xlu2 %v1695_v59, %s5529_s24  ;;  %v2027_v46 = vsel %vm5762_vm6, %v5090_v30, %v2026_v38  ;;  %v2037_v52 = vsel %vm5762_vm6, %v2035_v54, %v2036_v56  ;;  %v5061_v38 = vld [vmem:[%s5576_s20 + $0x5c] sm:$0x1]  ;;  %v5067_v54 = vld [vmem:[%s5576_s20 + $0x74] sm:$0x1] }
 0x15d   : > { %v1262_v55 = vpop.permute.xlu1 %1261  ;;  %v5065_v56 = vld [vmem:[%s5576_s20 + $0x6c] sm:$0xe]  ;;  %v2078_v60 = vrot.slane %v5067_v54, 5 }
 0x15e   : > { %1343 = vst.msk [vmem:[#allocation2 + $0x3c] sm:$0xf] %vm1327_vm9, %v1262_v55  ;;  %v1260_v6 = vpop.permute.xlu0 %1259  ;;  %v1276_v9 = vpop.permute.xlu2 %1275  ;;  %v2034_v55 = vsel %vm5762_vm6, %v5091_v58, %v2033_v47  ;;  %v5064_v58 = vld [vmem:[%s5576_s20 + $0x68] sm:$0x1]  ;;  %v5097_v62 = vrot.slane %v5065_v56, 9 }
 0x15f   : > { %1342 = vst.msk [vmem:[#allocation2 + $0x38] sm:$0xf] %vm1327_vm9, %v1260_v6  ;;  %v5050_v6 = vld [vmem:[%s5576_s20 + $0x30] sm:$0xe]  ;;  %v2071_v0 = vrot.slane %v5064_v58, 5 }
 0x160   : > { %1350 = vst.msk [vmem:[#allocation2 + $0x58] sm:$0xf] %vm1327_vm9, %v1276_v9 }
 0x163   : > { %1848 = vrot.lane.b32.xlu1 %v1757_v11, %s5529_s24  ;;  %v2043_v11 = vrot.slane %v5052_v4, 5 }
 0x164   : > { %1846 = vrot.lane.b32.xlu0 %v1743_v14, %s5529_s24  ;;  %1844 = vrot.lane.b32.xlu2 %v1733_v16, %s5529_s24  ;;  %v5092_v14 = vrot.slane %v5050_v6, 9  ;;  %v2048_v16 = vsel %vm5762_vm6, %v5093_v7, %v2047_v8  ;;  %v5072_v6 = vld [vmem:[%s5576_s20 + $0x88] sm:$0xf] }
 0x165   : > { %v1268_v21 = vpop.permute.xlu1 %1267  ;;  %v2044_v18 = vsel %vm5762_vm6, %v2042_v10, %v2043_v11  ;;  %v5068_v10 = vld [vmem:[%s5576_s20 + $0x78] sm:$0xe]  ;;  %v2089_v12 = vrot.slane %v5072_v6, 5 }
 0x166   : > { %1346 = vst.msk [vmem:[#allocation2 + $0x48] sm:$0xf] %vm1327_vm9, %v1268_v21  ;;  %v1266_v23 = vpop.permute.xlu0 %1265  ;;  %v1282_v28 = vpop.permute.xlu2 %1281  ;;  %v2041_v21 = vsel %vm5762_vm6, %v5092_v14, %v2040_v3 }
 0x167   : > { %1345 = vst.msk [vmem:[#allocation2 + $0x44] sm:$0xf] %vm1327_vm9, %v1266_v23  ;;  %v2056_v23 = vrot.slane %v2054_v17, 4 }
 0x168   : > { %1353 = vst.msk [vmem:[#allocation2 + $0x64] sm:$0xf] %vm1327_vm9, %v1282_v28 }
 0x169   : > { %v2058_v36 = vsel %vm5762_vm6, %v2056_v23, %v2057_v24  ;;  %v5076_v23 = vld [vmem:[%s5576_s20 + $0x98] sm:$0x1]  ;;  %v5074_v24 = vld [vmem:[%s5576_s20 + $0x90] sm:$0xe] }
 0x16b   : > { %1854 = vrot.lane.b32.xlu1 %v1791_v29, %s5529_s24  ;;  %v5060_v29 = vld [vmem:[%s5576_s20 + $0x58] sm:$0xf] }
 0x16c   : > { %1852 = vrot.lane.b32.xlu0 %v1781_v31, %s5529_s24  ;;  %1850 = vrot.lane.b32.xlu2 %v1767_v37, %s5529_s24  ;;  %v2049_v31 = vrot.slane %v2047_v8, 4  ;;  %v5062_v37 = vld [vmem:[%s5576_s20 + $0x60] sm:$0xe]  ;;  %v2061_v30 = vrot.slane %v5060_v29, 5  ;;  %v5070_v8 = vld [vmem:[%s5576_s20 + $0x80] sm:$0x1] }
 0x16d   : > { %v1274_v39 = vpop.permute.xlu1 %1273  ;;  %v5096_v41 = vrot.slane %v5062_v37, 9  ;;  %v2099_v29 = vrot.slane %v5076_v23, 5  ;;  %v2092_v37 = vrot.slane %v5073_v27, 5 }
 0x16e   : > { %1349 = vst.msk [vmem:[#allocation2 + $0x54] sm:$0xf] %vm1327_vm9, %v1274_v39  ;;  %v1272_v43 = vpop.permute.xlu0 %1271  ;;  %v1288_v45 = vpop.permute.xlu2 %1287  ;;  %v2051_v39 = vsel %vm5762_vm6, %v2049_v31, %v2050_v32  ;;  %v2063_v44 = vrot.slane %v2061_v30, 4  ;;  %v5100_v32 = vrot.slane %v5074_v24, 9 }
 0x16f   : > { %1348 = vst.msk [vmem:[#allocation2 + $0x50] sm:$0xf] %vm1327_vm9, %v1272_v43  ;;  %v2069_v50 = vsel %vm5762_vm6, %v5096_v41, %v2068_v42 }
 0x170   : > { %1356 = vst.msk [vmem:[#allocation2 + $0x70] sm:$0xf] %vm1327_vm9, %v1288_v45  ;;  %v2064_v45 = vrot.slane %v5061_v38, 5 }
 0x172   : > { %v2065_v53 = vsel %vm5762_vm6, %v2063_v44, %v2064_v45  ;;  %v5077_v44 = vld [vmem:[%s5576_s20 + $0x9c] sm:$0xe] }
 0x173   : > { %2133 = vrot.lane.b32.xlu1 %v2027_v46, %s5530_s25  ;;  %v5066_v46 = vld [vmem:[%s5576_s20 + $0x70] sm:$0xf] }
 0x174   : > { %2131 = vrot.lane.b32.xlu0 %v2023_v48, %s5530_s25  ;;  %2129 = vrot.lane.b32.xlu2 %v2020_v51, %s5530_s25  ;;  %v5095_v48 = vrot.slane %v5059_v40, 9  ;;  %v2075_v51 = vrot.slane %v5066_v46, 5  ;;  %v5081_v40 = vld [vmem:[%s5576_s20 + $0xac] sm:$0xf] }
 0x175   : > { %v1280_v57 = vpop.permute.xlu1 %1279  ;;  %v2110_v46 = vrot.slane %v5081_v40, 5 }
 0x176   : > { %1352 = vst.msk [vmem:[#allocation2 + $0x60] sm:$0xf] %vm1327_vm9, %v1280_v57  ;;  %v1278_v59 = vpop.permute.xlu0 %1277  ;;  %v1294_v63 = vpop.permute.xlu2 %1293  ;;  %v2062_v57 = vsel %vm5762_vm6, %v5095_v48, %v2061_v30  ;;  %v2076_v4 = vsel %vm5762_vm6, %v5097_v62, %v2075_v51  ;;  %v5082_v62 = vld [vmem:[%s5576_s20 + $0xb0] sm:$0x1] }
 0x177   : > { %1351 = vst.msk [vmem:[#allocation2 + $0x5c] sm:$0xf] %vm1327_vm9, %v1278_v59  ;;  %v2077_v59 = vrot.slane %v2075_v51, 4 }
 0x178   : > { %1359 = vst.msk [vmem:[#allocation2 + $0x7c] sm:$0xf] %vm1327_vm9, %v1294_v63 }
 0x179   : > { %v2079_v3 = vsel %vm5762_vm6, %v2077_v59, %v2078_v60  ;;  %v5085_v59 = vld [vmem:[%s5576_s20 + $0xbc] sm:$0x1]  ;;  %v5083_v60 = vld [vmem:[%s5576_s20 + $0xb4] sm:$0xe] }
 0x17b   : > { %2139 = vrot.lane.b32.xlu1 %v2037_v52, %s5530_s25  ;;  %v5069_v52 = vld [vmem:[%s5576_s20 + $0x7c] sm:$0xf] }
 0x17c   : > { %2137 = vrot.lane.b32.xlu0 %v2034_v55, %s5530_s25  ;;  %2135 = vrot.lane.b32.xlu2 %v2030_v5, %s5530_s25  ;;  %v2070_v55 = vrot.slane %v2068_v42, 4  ;;  %v5071_v5 = vld [vmem:[%s5576_s20 + $0x84] sm:$0xe]  ;;  %v2082_v7 = vrot.slane %v5069_v52, 5  ;;  %v5079_v42 = vld [vmem:[%s5576_s20 + $0xa4] sm:$0x1] }
 0x17d   : > { %v1286_v9 = vpop.permute.xlu1 %1285  ;;  %v5099_v11 = vrot.slane %v5071_v5, 9  ;;  %v2120_v52 = vrot.slane %v5085_v59, 5  ;;  %v2113_v5 = vrot.slane %v5082_v62, 5 }
 0x17e   : > { %1355 = vst.msk [vmem:[#allocation2 + $0x6c] sm:$0xf] %vm1327_vm9, %v1286_v9  ;;  %v1284_v13 = vpop.permute.xlu0 %1283  ;;  %v1797_v15 = vpop.permute.xlu2 %1796  ;;  %v2072_v9 = vsel %vm5762_vm6, %v2070_v55, %v2071_v0  ;;  %v2084_v14 = vrot.slane %v2082_v7, 4  ;;  %v5103_v0 = vrot.slane %v5083_v60, 9  ;;  %v5211_v60 = vld [vmem:[%s5576_s20 + $0x80] sm:$0x1] }
 0x17f   : > { %1354 = vst.msk [vmem:[#allocation2 + $0x68] sm:$0xf] %vm1327_vm9, %v1284_v13  ;;  %v2090_v20 = vsel %vm5762_vm6, %v5099_v11, %v2089_v12 }
 0x180   : > { %1891 = vst.msk [vmem:[#allocation2 + $0x8] sm:$0xf] %vm1888_vm10, %v1797_v15  ;;  %v2085_v15 = vrot.slane %v5070_v8, 5 }
 0x182   : > { %v2086_v22 = vsel %vm5762_vm6, %v2084_v14, %v2085_v15 }
 0x183   : > { %2145 = vrot.lane.b32.xlu1 %v2048_v16, %s5530_s25  ;;  %v5075_v16 = vld [vmem:[%s5576_s20 + $0x94] sm:$0xf] }
 0x184   : > { %2143 = vrot.lane.b32.xlu0 %v2044_v18, %s5530_s25  ;;  %2141 = vrot.lane.b32.xlu2 %v2041_v21, %s5530_s25  ;;  %v5098_v18 = vrot.slane %v5068_v10, 9  ;;  %v2096_v21 = vrot.slane %v5075_v16, 5  ;;  %v5088_v10 = vld [vmem:[%s5576_s20 + $0xc8] sm:$0x1]  ;;  %v5162_v16 = vld [vmem:[%s5576_s20 + $0x7c] sm:$0xf] }
 0x185   : > { %v1292_v26 = vpop.permute.xlu1 %1291  ;;  %v2127_v15 = vrot.slane %v5088_v10, 5  ;;  %v2706_v23 = vshrl.u32 %v5162_v16, 16 }
 0x186   : > { %1358 = vst.msk [vmem:[#allocation2 + $0x78] sm:$0xf] %vm1327_vm9, %v1292_v26  ;;  %v1290_v28 = vpop.permute.xlu0 %1289  ;;  %v1803_v34 = vpop.permute.xlu2 %1802  ;;  %v2083_v26 = vsel %vm5762_vm6, %v5098_v18, %v2082_v7  ;;  %v2097_v38 = vsel %vm5762_vm6, %v5100_v32, %v2096_v21 }
 0x187   : > { %1357 = vst.msk [vmem:[#allocation2 + $0x74] sm:$0xf] %vm1327_vm9, %v1290_v28  ;;  %v2098_v28 = vrot.slane %v2096_v21, 4  ;;  %v5105_v21 = vld [vmem:[%s5576_s20 + $0x18] sm:$0xf]  ;;  %vm4667_vm9 = vcmask 126016  }
 0x188   : > { %1894 = vst.msk [vmem:[#allocation2 + $0x14] sm:$0xf] %vm1888_vm10, %v1803_v34 }
 0x189   : > { %v2100_v30 = vsel %vm5762_vm6, %v2098_v28, %v2099_v29 }
 0x18b   : > { %2151 = vrot.lane.b32.xlu1 %v2058_v36, %s5530_s25  ;;  %v5078_v36 = vld [vmem:[%s5576_s20 + $0xa0] sm:$0xf] }
 0x18c   : > { %2149 = vrot.lane.b32.xlu0 %v2055_v33, %s5530_s25  ;;  %2147 = vrot.lane.b32.xlu2 %v2051_v39, %s5530_s25  ;;  %v2091_v33 = vrot.slane %v2089_v12, 4  ;;  %v5080_v39 = vld [vmem:[%s5576_s20 + $0xa8] sm:$0xe]  ;;  %v2103_v41 = vrot.slane %v5078_v36, 5  ;;  %v5086_v12 = vld [vmem:[%s5576_s20 + $0xc0] sm:$0xe] }
 0x18d   : > { %v1795_v43 = vpop.permute.xlu1 %1794  ;;  %v5102_v45 = vrot.slane %v5080_v39, 9  ;;  %v5104_v18 = vrot.slane %v5086_v12, 9  ;;  %v5163_v36 = vld [vmem:[%s5576_s20 + $0x80] sm:$0x1]  ;;  %v5121_v39 = vld [vmem:[%s5576_s20 + $0x78] sm:$0xf] }
 0x18e   : > { %1890 = vst.msk [vmem:[#allocation2 + $0x4] sm:$0xf] %vm1888_vm10, %v1795_v43  ;;  %v1793_v47 = vpop.permute.xlu0 %1792  ;;  %v1809_v49 = vpop.permute.xlu2 %1808  ;;  %v2093_v43 = vsel %vm5762_vm6, %v2091_v33, %v2092_v37  ;;  %v2105_v48 = vrot.slane %v2103_v41, 4  ;;  %v2712_v40 = vshll.u32 %v5163_v36, 16  ;;  %v5139_v12 = vld [vmem:[%s5576_s20 + $0x20] sm:$0x1] }
 0x18f   : > { %1889 = vst.msk [vmem:[#allocation2] sm:$0xf] %vm1888_vm10, %v1793_v47  ;;  %v2111_v56 = vsel %vm5762_vm6, %v5102_v45, %v2110_v46 }
 0x190   : > { %1897 = vst.msk [vmem:[#allocation2 + $0x20] sm:$0xf] %vm1888_vm10, %v1809_v49  ;;  %v2106_v49 = vrot.slane %v5079_v42, 5  ;;  %v2714_v45 = vrot.slane %v2712_v40, 5 }
 0x192   : > { %v2107_v58 = vsel %vm5762_vm6, %v2105_v48, %v2106_v49 }
 0x193   : > { %2157 = vrot.lane.b32.xlu1 %v2069_v50, %s5530_s25  ;;  %v5084_v50 = vld [vmem:[%s5576_s20 + $0xb8] sm:$0xf] }
 0x194   : > { %2155 = vrot.lane.b32.xlu0 %v2065_v53, %s5530_s25  ;;  %2153 = vrot.lane.b32.xlu2 %v2062_v57, %s5530_s25  ;;  %v5101_v53 = vrot.slane %v5077_v44, 9  ;;  %v2117_v57 = vrot.slane %v5084_v50, 5  ;;  %v5138_v50 = vld [vmem:[%s5576_s20 + $0x1c] sm:$0xf] }
 0x195   : > { %v1801_v61 = vpop.permute.xlu1 %1800  ;;  %v2514_v62 = vshrl.u32 %v5138_v50, 16 }
 0x196   : > { %1893 = vst.msk [vmem:[#allocation2 + $0x10] sm:$0xf] %vm1888_vm10, %v1801_v61  ;;  %v1799_v63 = vpop.permute.xlu0 %1798  ;;  %v1815_v2 = vpop.permute.xlu2 %1814  ;;  %v2104_v61 = vsel %vm5762_vm6, %v5101_v53, %v2103_v41  ;;  %v2118_v8 = vsel %vm5762_vm6, %v5103_v0, %v2117_v57  ;;  %v5106_v41 = vld [vmem:[%s5576_s20 + $0x1c] sm:$0xf] }
 0x197   : > { %1892 = vst.msk [vmem:[#allocation2 + $0xc] sm:$0xf] %vm1888_vm10, %v1799_v63  ;;  %v2119_v63 = vrot.slane %v2117_v57, 4  ;;  %v2516_v10 = vrot.slane %v2514_v62, 4  ;;  %v5185_v62 = vld [vmem:[%s5576_s20 + $0x18] sm:$0xe] }
 0x198   : > { %1900 = vst.msk [vmem:[#allocation2 + $0x2c] sm:$0xf] %vm1888_vm10, %v1815_v2 }
 0x199   : > { %v2121_v7 = vsel %vm5762_vm6, %v2119_v63, %v2120_v52  ;;  %v5209_v63 = vld [vmem:[%s5576_s20 + $0x78] sm:$0xe] }
 0x19b   : > { %2163 = vrot.lane.b32.xlu1 %v2079_v3, %s5530_s25  ;;  %v5087_v3 = vld [vmem:[%s5576_s20 + $0xc4] sm:$0xf] }
 0x19c   : > { %2161 = vrot.lane.b32.xlu0 %v2076_v4, %s5530_s25  ;;  %2159 = vrot.lane.b32.xlu2 %v2072_v9, %s5530_s25  ;;  %v2112_v4 = vrot.slane %v2110_v46, 4  ;;  %v2124_v9 = vrot.slane %v5087_v3, 5  ;;  %v5210_v46 = vld [vmem:[%s5576_s20 + $0x7c] sm:$0xf]  ;;  %v3170_v3 = vrot.slane %v5211_v60, 5 }
 0x19d   : > { %v1807_v13 = vpop.permute.xlu1 %1806  ;;  %v5187_v60 = vld [vmem:[%s5576_s20 + $0x20] sm:$0x1] }
 0x19e   : > { %1896 = vst.msk [vmem:[#allocation2 + $0x1c] sm:$0xf] %vm1888_vm10, %v1807_v13  ;;  %v1805_v17 = vpop.permute.xlu0 %1804  ;;  %v1821_v19 = vpop.permute.xlu2 %1820  ;;  %v2114_v11 = vsel %vm5762_vm6, %v2112_v4, %v2113_v5  ;;  %v2126_v14 = vrot.slane %v2124_v9, 4 }
 0x19f   : > { %1895 = vst.msk [vmem:[#allocation2 + $0x18] sm:$0xf] %vm1888_vm10, %v1805_v17 }
 0x1a0   : > { %1903 = vst.msk [vmem:[#allocation2 + $0x38] sm:$0xf] %vm1888_vm10, %v1821_v19  ;;  %v2128_v24 = vsel %vm5762_vm6, %v2126_v14, %v2127_v15 }
 0x1a3   : > { %2169 = vrot.lane.b32.xlu1 %v2090_v20, %s5530_s25  ;;  %v5161_v20 = vld [vmem:[%s5576_s20 + $0x78] sm:$0xf] }
 0x1a4   : > { %2167 = vrot.lane.b32.xlu0 %v2086_v22, %s5530_s25  ;;  %2165 = vrot.lane.b32.xlu2 %v2083_v26, %s5530_s25  ;;  %v2702_v22 = vshll.u32 %v5162_v16, 16  ;;  %v2125_v26 = vsel %vm5762_vm6, %v5104_v18, %v2124_v9  ;;  %v2693_v27 = vshrl.u32 %v5161_v20, 16  ;;  %v2696_v28 = vshll.u32 %v5161_v20, 16 }
 0x1a5   : > { %v1813_v31 = vpop.permute.xlu1 %1812 }
 0x1a6   : > { %1899 = vst.msk [vmem:[#allocation2 + $0x28] sm:$0xf] %vm1888_vm10, %v1813_v31  ;;  %v1811_v34 = vpop.permute.xlu0 %1810  ;;  %v1827_v35 = vpop.permute.xlu2 %1826  ;;  %v2704_v29 = vrot.slane %v2702_v22, 5  ;;  %v2708_v31 = vrot.slane %v2706_v23, 4  ;;  %v2695_v33 = vrot.slane %v2693_v27, 4  ;;  %v2698_v37 = vrot.slane %v2696_v28, 5 }
 0x1a7   : > { %1898 = vst.msk [vmem:[#allocation2 + $0x24] sm:$0xf] %vm1888_vm10, %v1811_v34  ;;  %v5130_v23 = vld [vmem:[%s5576_s20 + $0xac] sm:$0xf] }
 0x1a8   : > { %1906 = vst.msk [vmem:[#allocation2 + $0x44] sm:$0xf] %vm1888_vm10, %v1827_v35  ;;  %v2699_v42 = vor.u32 %v2698_v37, %v2695_v33  ;;  %v5175_v37 = vld [vmem:[%s5576_s20 + $0xb0] sm:$0x1] }
 0x1a9   : > { %v2808_v40 = vshll.u32 %v5175_v37, 16 }
 0x1aa   : > { %v2700_v49 = vrot.slane %v2699_v42, 4  ;;  %v5186_v42 = vld [vmem:[%s5576_s20 + $0x1c] sm:$0xf] }
 0x1ab   : > { %2175 = vrot.lane.b32.xlu1 %v2100_v30, %s5530_s25  ;;  %v5122_v30 = vld [vmem:[%s5576_s20 + $0x7c] sm:$0xf] }
 0x1ac   : > { %2173 = vrot.lane.b32.xlu0 %v2097_v38, %s5530_s25  ;;  %2171 = vrot.lane.b32.xlu2 %v2093_v43, %s5530_s25  ;;  %v2709_v38 = vor.u32 %v2708_v31, %v2704_v29  ;;  %v2705_v52 = vsel %vm5587_vm2, %v2700_v49, %v2704_v29  ;;  %v5113_v49 = vld [vmem:[%s5576_s20 + $0x48] sm:$0xf] }
 0x1ad   : > { %v1819_v47 = vpop.permute.xlu1 %1818 }
 0x1ae   : > { %1902 = vst.msk [vmem:[#allocation2 + $0x34] sm:$0xf] %vm1888_vm10, %v1819_v47  ;;  %v1817_v51 = vpop.permute.xlu0 %1816  ;;  %v1833_v54 = vpop.permute.xlu2 %1832  ;;  %v2710_v43 = vrot.slane %v2709_v38, 4  ;;  %v5173_v47 = vld [vmem:[%s5576_s20 + $0xa8] sm:$0xf] }
 0x1af   : > { %1901 = vst.msk [vmem:[#allocation2 + $0x30] sm:$0xf] %vm1888_vm10, %v1817_v51  ;;  %v5129_v51 = vld [vmem:[%s5576_s20 + $0xa8] sm:$0xf]  ;;  %v2789_v57 = vshrl.u32 %v5173_v47, 16 }
 0x1b0   : > { %1909 = vst.msk [vmem:[#allocation2 + $0x50] sm:$0xf] %vm1888_vm10, %v1833_v54  ;;  %v5137_v54 = vld [vmem:[%s5576_s20 + $0x18] sm:$0xf]  ;;  %v2715_v59 = vsel %vm5587_vm2, %v2710_v43, %v2714_v45  ;;  %v5150_v43 = vld [vmem:[%s5576_s20 + $0x4c] sm:$0xf] }
 0x1b1   : > { %v2504_v0 = vshll.u32 %v5137_v54, 16  ;;  %v2791_v4 = vrot.slane %v2789_v57, 4  ;;  %v3111_v57 = vrot.slane %v5186_v42, 5 }
 0x1b3   : > { %2181 = vrot.lane.b32.xlu1 %v2111_v56, %s5530_s25  ;;  %v3167_v56 = vrot.slane %v5210_v46, 5  ;;  %v2506_v14 = vrot.slane %v2504_v0, 5  ;;  %v2810_v46 = vrot.slane %v2808_v40, 5 }
 0x1b4   : > { %2179 = vrot.lane.b32.xlu0 %v2107_v58, %s5530_s25  ;;  %2177 = vrot.lane.b32.xlu2 %v2104_v61, %s5530_s25  ;;  %v2792_v58 = vshll.u32 %v5173_v47, 16  ;;  %v2510_v61 = vshll.u32 %v5138_v50, 16  ;;  %v5149_v47 = vld [vmem:[%s5576_s20 + $0x48] sm:$0xf] }
 0x1b5   : > { %v1825_v55 = vpop.permute.xlu1 %1824 }
 0x1b6   : > { %1905 = vst.msk [vmem:[#allocation2 + $0x40] sm:$0xf] %vm1888_vm10, %v1825_v55  ;;  %v1823_v2 = vpop.permute.xlu0 %1822  ;;  %v1839_v6 = vpop.permute.xlu2 %1838  ;;  %v2501_v55 = vshrl.u32 %v5137_v54, 16  ;;  %v2794_v5 = vrot.slane %v2792_v58, 5  ;;  %v2512_v9 = vrot.slane %v2510_v61, 5  ;;  %v2610_v54 = vshrl.u32 %v5150_v43, 16 }
 0x1b7   : > { %1904 = vst.msk [vmem:[#allocation2 + $0x3c] sm:$0xf] %vm1888_vm10, %v1823_v2  ;;  %v3169_v2 = vrot.slane %v3167_v56, 4  ;;  %v2597_v58 = vshrl.u32 %v5149_v47, 16 }
 0x1b8   : > { %1912 = vst.msk [vmem:[#allocation2 + $0x5c] sm:$0xf] %vm1888_vm10, %v1839_v6  ;;  %v2517_v20 = vor.u32 %v2516_v10, %v2512_v9  ;;  %v2612_v0 = vrot.slane %v2610_v54, 4 }
 0x1b9   : > { %v3171_v16 = vsel %vm5762_vm6, %v3169_v2, %v3170_v3  ;;  %v3113_v3 = vrot.slane %v3111_v57, 4 }
 0x1ba   : > { %v2518_v29 = vrot.slane %v2517_v20, 4 }
 0x1bb   : > { %2187 = vrot.lane.b32.xlu1 %v2121_v7, %s5530_s25  ;;  %v5241_v7 = vrot.slane %v5209_v63, 9 }
 0x1bc   : > { %2185 = vrot.lane.b32.xlu0 %v2118_v8, %s5530_s25  ;;  %2183 = vrot.lane.b32.xlu2 %v2114_v11, %s5530_s25  ;;  %v5174_v8 = vld [vmem:[%s5576_s20 + $0xac] sm:$0xf] }
 0x1bd   : > { %v1831_v13 = vpop.permute.xlu1 %1830  ;;  %v2798_v18 = vshll.u32 %v5174_v8, 16  ;;  %v2802_v22 = vshrl.u32 %v5174_v8, 16 }
 0x1be   : > { %1908 = vst.msk [vmem:[#allocation2 + $0x4c] sm:$0xf] %vm1888_vm10, %v1831_v13  ;;  %v1829_v17 = vpop.permute.xlu0 %1828  ;;  %v1845_v19 = vpop.permute.xlu2 %1844  ;;  %v2503_v13 = vrot.slane %v2501_v55, 4 }
 0x1bf   : > { %1907 = vst.msk [vmem:[#allocation2 + $0x48] sm:$0xf] %vm1888_vm10, %v1829_v17  ;;  %v2795_v17 = vor.u32 %v2794_v5, %v2791_v4  ;;  %v2800_v27 = vrot.slane %v2798_v18, 5  ;;  %v2804_v36 = vrot.slane %v2802_v22, 4  ;;  %v3114_v4 = vrot.slane %v5187_v60, 5 }
 0x1c0   : > { %1915 = vst.msk [vmem:[#allocation2 + $0x68] sm:$0xf] %vm1888_vm10, %v1845_v19  ;;  %v3168_v19 = vsel %vm5762_vm6, %v5241_v7, %v3167_v56  ;;  %v5222_v56 = vld [vmem:[%s5576_s20 + $0xac] sm:$0xf]  ;;  %v5151_v5 = vld [vmem:[%s5576_s20 + $0x50] sm:$0x1] }
 0x1c1   : > { %v5198_v22 = vld [vmem:[%s5576_s20 + $0x4c] sm:$0xf] }
 0x1c3   : > { %2323 = vrot.lane.b32.xlu1 %v5105_v21, %s5531_s26  ;;  %v2520_v21 = vshll.u32 %v5139_v12, 16 }
 0x1c4   : > { %2191 = vrot.lane.b32.xlu0 %v2128_v24, %s5530_s25  ;;  %2189 = vrot.lane.b32.xlu2 %v2125_v26, %s5530_s25  ;;  %v2507_v24 = vor.u32 %v2506_v14, %v2503_v13  ;;  %v2796_v26 = vrot.slane %v2795_v17, 4  ;;  %v2616_v13 = vshll.u32 %v5151_v5, 16  ;;  %v3115_v14 = vsel %vm5762_vm6, %v3113_v3, %v3114_v4  ;;  %v5223_v17 = vld [vmem:[%s5576_s20 + $0xb0] sm:$0x1]  ;;  %v5213_v4 = vld [vmem:[%s5576_s20 + $0x88] sm:$0xf] }
 0x1c5   : > { %v1837_v32 = vpop.permute.xlu1 %1836  ;;  %v2522_v31 = vrot.slane %v2520_v21, 5  ;;  %v5176_v5 = vld [vmem:[%s5576_s20 + $0xb4] sm:$0xf] }
 0x1c6   : > { %1911 = vst.msk [vmem:[#allocation2 + $0x58] sm:$0xf] %vm1888_vm10, %v1837_v32  ;;  %v1835_v34 = vpop.permute.xlu0 %1834  ;;  %v1851_v35 = vpop.permute.xlu2 %1850 }
 0x1c7   : > { %1910 = vst.msk [vmem:[#allocation2 + $0x54] sm:$0xf] %vm1888_vm10, %v1835_v34  ;;  %v2508_v34 = vrot.slane %v2507_v24, 4 }
 0x1c8   : > { %1918 = vst.msk [vmem:[#allocation2 + $0x74] sm:$0xf] %vm1888_vm10, %v1851_v35  ;;  %v2801_v35 = vsel %vm5587_vm2, %v2796_v26, %v2800_v27 }
 0x1c9   : > { %v2513_v38 = vsel %vm5587_vm2, %v2508_v34, %v2512_v9  ;;  %v5233_v9 = vrot.slane %v5185_v62, 9 }
 0x1cb   : > { %2357 = vrot.lane.b32.xlu1 %v5122_v30, %s5531_s26  ;;  %v2523_v30 = vsel %vm5587_vm2, %v2518_v29, %v2522_v31 }
 0x1cc   : > { %2355 = vrot.lane.b32.xlu0 %v5121_v39, %s5531_s26  ;;  %2325 = vrot.lane.b32.xlu2 %v5106_v41, %s5531_s26  ;;  %v2805_v39 = vor.u32 %v2804_v36, %v2800_v27  ;;  %v3198_v27 = vrot.slane %v5223_v17, 5 }
 0x1cd   : > { %v1843_v44 = vpop.permute.xlu1 %1842 }
 0x1ce   : > { %1914 = vst.msk [vmem:[#allocation2 + $0x64] sm:$0xf] %vm1888_vm10, %v1843_v44  ;;  %v1841_v48 = vpop.permute.xlu0 %1840  ;;  %v2130_v53 = vpop.permute.xlu2 %2129  ;;  %v2806_v45 = vrot.slane %v2805_v39, 4  ;;  %v5197_v39 = vld [vmem:[%s5576_s20 + $0x48] sm:$0xe] }
 0x1cf   : > { %1913 = vst.msk [vmem:[#allocation2 + $0x60] sm:$0xf] %vm1888_vm10, %v1841_v48  ;;  %v5114_v48 = vld [vmem:[%s5576_s20 + $0x4c] sm:$0xf] }
 0x1d0   : > { %2226 = vst.msk [vmem:[#allocation2] sm:$0xf] %vm2225_vm11, %v2130_v53  ;;  %v2606_v53 = vshll.u32 %v5150_v43, 16  ;;  %v2811_v61 = vsel %vm5587_vm2, %v2806_v45, %v2810_v46  ;;  %v5166_v45 = vld [vmem:[%s5576_s20 + $0x8c] sm:$0x1] }
 0x1d1   : > { %v2736_v54 = vshll.u32 %v5166_v45, 16 }
 0x1d2   : > { %v2608_v55 = vrot.slane %v2606_v53, 5 }
 0x1d3   : > { %2371 = vrot.lane.b32.xlu1 %v5129_v51, %s5531_s26  ;;  %v5221_v51 = vld [vmem:[%s5576_s20 + $0xa8] sm:$0xe]  ;;  %v2738_v60 = vrot.slane %v2736_v54, 5 }
 0x1d4   : > { %2918 = vrot.lane.b32.xlu0 %v2715_v59, %s5532_s27  ;;  %2916 = vrot.lane.b32.xlu2 %v2705_v52, %s5532_s27  ;;  %v2600_v59 = vshll.u32 %v5149_v47, 16  ;;  %v5245_v63 = vrot.slane %v5221_v51, 9  ;;  %v3195_v52 = vrot.slane %v5222_v56, 5  ;;  %v2613_v12 = vor.u32 %v2612_v0, %v2608_v55  ;;  %v5123_v51 = vld [vmem:[%s5576_s20 + $0x84] sm:$0xf] }
 0x1d5   : > { %v1849_v6 = vpop.permute.xlu1 %1848 }
 0x1d6   : > { %1917 = vst.msk [vmem:[#allocation2 + $0x70] sm:$0xf] %vm1888_vm10, %v1849_v6  ;;  %v1847_v11 = vpop.permute.xlu0 %1846  ;;  %v2136_v15 = vpop.permute.xlu2 %2135  ;;  %v2599_v6 = vrot.slane %v2597_v58, 4  ;;  %v2602_v7 = vrot.slane %v2600_v59, 5  ;;  %v2614_v18 = vrot.slane %v2613_v12, 4  ;;  %v3197_v26 = vrot.slane %v3195_v52, 4 }
 0x1d7   : > { %1916 = vst.msk [vmem:[#allocation2 + $0x6c] sm:$0xf] %vm1888_vm10, %v1847_v11  ;;  %v3196_v11 = vsel %vm5762_vm6, %v5245_v63, %v3195_v52  ;;  %v2813_v12 = vshrl.u32 %v5176_v5, 16 }
 0x1d8   : > { %2229 = vst.msk [vmem:[#allocation2 + $0xc] sm:$0xf] %vm2225_vm11, %v2136_v15  ;;  %v2603_v15 = vor.u32 %v2602_v7, %v2599_v6  ;;  %v5141_v7 = vld [vmem:[%s5576_s20 + $0x28] sm:$0xf] }
 0x1d9   : > { %v2538_v17 = vshrl.u32 %v5141_v7, 16 }
 0x1da   : > { %v2604_v21 = vrot.slane %v2603_v15, 4  ;;  %v5214_v15 = vld [vmem:[%s5576_s20 + $0x8c] sm:$0x1] }
 0x1db   : > { %3255 = vrot.lane.b32.xlu1 %v3171_v16, %s5533_s28  ;;  %v3112_v16 = vsel %vm5762_vm6, %v5233_v9, %v3111_v57 }
 0x1dc   : > { %3253 = vrot.lane.b32.xlu0 %v3168_v19, %s5533_s28  ;;  %2373 = vrot.lane.b32.xlu2 %v5130_v23, %s5531_s26  ;;  %v2618_v19 = vrot.slane %v2616_v13, 5  ;;  %v5165_v23 = vld [vmem:[%s5576_s20 + $0x88] sm:$0xf]  ;;  %v2609_v36 = vsel %vm5587_vm2, %v2604_v21, %v2608_v55  ;;  %v2816_v13 = vshll.u32 %v5176_v5, 16  ;;  %v5152_v5 = vld [vmem:[%s5576_s20 + $0x54] sm:$0xf] }
 0x1dd   : > { %v1855_v28 = vpop.permute.xlu1 %1854  ;;  %v2730_v34 = vshrl.u32 %v5165_v23, 16 }
 0x1de   : > { %1920 = vst.msk [vmem:[#allocation2 + $0x7c] sm:$0xf] %vm1888_vm10, %v1855_v28  ;;  %v1853_v32 = vpop.permute.xlu0 %1852  ;;  %v2142_v33 = vpop.permute.xlu2 %2141  ;;  %v5164_v28 = vld [vmem:[%s5576_s20 + $0x84] sm:$0xf]  ;;  %v2619_v31 = vsel %vm5587_vm2, %v2614_v18, %v2618_v19 }
 0x1df   : > { %1919 = vst.msk [vmem:[#allocation2 + $0x78] sm:$0xf] %vm1888_vm10, %v1853_v32  ;;  %v2726_v32 = vshll.u32 %v5165_v23, 16  ;;  %v2717_v37 = vshrl.u32 %v5164_v28, 16  ;;  %v5212_v18 = vld [vmem:[%s5576_s20 + $0x84] sm:$0xe] }
 0x1e0   : > { %2232 = vst.msk [vmem:[#allocation2 + $0x18] sm:$0xf] %vm2225_vm11, %v2142_v33  ;;  %v3139_v33 = vrot.slane %v5198_v22, 5  ;;  %v5107_v19 = vld [vmem:[%s5576_s20 + $0x24] sm:$0xf]  ;;  %v3177_v23 = vrot.slane %v5214_v15, 5 }
 0x1e1   : > { %v2728_v40 = vrot.slane %v2726_v32, 5  ;;  %v2719_v46 = vrot.slane %v2717_v37, 4  ;;  %v2540_v32 = vrot.slane %v2538_v17, 4  ;;  %v2621_v15 = vshrl.u32 %v5152_v5, 16 }
 0x1e2   : > { %v3141_v43 = vrot.slane %v3139_v33, 4  ;;  %vm4703_vm10 = vcmask 191616  }
 0x1e3   : > { %2932 = vrot.lane.b32.xlu1 %v2801_v35, %s5532_s27  ;;  %v2720_v35 = vshll.u32 %v5164_v28, 16  ;;  %v5242_v28 = vrot.slane %v5212_v18, 9 }
 0x1e4   : > { %2886 = vrot.lane.b32.xlu0 %v2523_v30, %s5532_s27  ;;  %2884 = vrot.lane.b32.xlu2 %v2513_v38, %s5532_s27  ;;  %v5199_v30 = vld [vmem:[%s5576_s20 + $0x50] sm:$0x1]  ;;  %v3199_v38 = vsel %vm5762_vm6, %v3197_v26, %v3198_v27  ;;  %v2818_v26 = vrot.slane %v2816_v13, 5  ;;  %v5190_v13 = vld [vmem:[%s5576_s20 + $0x2c] sm:$0x1] }
 0x1e5   : > { %v2134_v41 = vpop.permute.xlu1 %2133  ;;  %v2722_v47 = vrot.slane %v2720_v35, 5 }
 0x1e6   : > { %2228 = vst.msk [vmem:[#allocation2 + $0x8] sm:$0xf] %vm2225_vm11, %v2134_v41  ;;  %v2132_v44 = vpop.permute.xlu0 %2131  ;;  %v2148_v50 = vpop.permute.xlu2 %2147  ;;  %v2732_v41 = vrot.slane %v2730_v34, 4 }
 0x1e7   : > { %2227 = vst.msk [vmem:[#allocation2 + $0x4] sm:$0xf] %vm2225_vm11, %v2132_v44  ;;  %v3142_v44 = vrot.slane %v5199_v30, 5  ;;  %v2723_v57 = vor.u32 %v2722_v47, %v2719_v46 }
 0x1e8   : > { %2235 = vst.msk [vmem:[#allocation2 + $0x24] sm:$0xf] %vm2225_vm11, %v2148_v50  ;;  %v2733_v53 = vor.u32 %v2732_v41, %v2728_v40 }
 0x1e9   : > { %v3143_v56 = vsel %vm5762_vm6, %v3141_v43, %v3142_v44  ;;  %v2724_v62 = vrot.slane %v2723_v57, 4  ;;  %v5132_v44 = vld [vmem:[%s5576_s20 + $0xb8] sm:$0xf]  ;;  %v5178_v57 = vld [vmem:[%s5576_s20 + $0xbc] sm:$0x1] }
 0x1ea   : > { %v2734_v59 = vrot.slane %v2733_v53, 4 }
 0x1eb   : > { %2341 = vrot.lane.b32.xlu1 %v5114_v48, %s5531_s26  ;;  %v2729_v0 = vsel %vm5587_vm2, %v2724_v62, %v2728_v40  ;;  %v2832_v62 = vshll.u32 %v5178_v57, 16 }
 0x1ec   : > { %2339 = vrot.lane.b32.xlu0 %v5113_v49, %s5531_s26  ;;  %2934 = vrot.lane.b32.xlu2 %v2811_v61, %s5532_s27  ;;  %v5237_v49 = vrot.slane %v5197_v39, 9  ;;  %v2739_v55 = vsel %vm5587_vm2, %v2734_v59, %v2738_v60 }
 0x1ed   : > { %v2140_v2 = vpop.permute.xlu1 %2139 }
 0x1ee   : > { %2231 = vst.msk [vmem:[#allocation2 + $0x14] sm:$0xf] %vm2225_vm11, %v2140_v2  ;;  %v2138_v8 = vpop.permute.xlu0 %2137  ;;  %v2154_v10 = vpop.permute.xlu2 %2153  ;;  %v3140_v58 = vsel %vm5762_vm6, %v5237_v49, %v3139_v33  ;;  %v5124_v2 = vld [vmem:[%s5576_s20 + $0x88] sm:$0xf] }
 0x1ef   : > { %2230 = vst.msk [vmem:[#allocation2 + $0x10] sm:$0xf] %vm2225_vm11, %v2138_v8  ;;  %v5131_v8 = vld [vmem:[%s5576_s20 + $0xb4] sm:$0xf] }
 0x1f0   : > { %2238 = vst.msk [vmem:[#allocation2 + $0x30] sm:$0xf] %vm2225_vm11, %v2154_v10  ;;  %v5140_v10 = vld [vmem:[%s5576_s20 + $0x24] sm:$0xf] }
 0x1f1   : > { %v2528_v21 = vshll.u32 %v5140_v10, 16 }
 0x1f3   : > { %3269 = vrot.lane.b32.xlu1 %v3196_v11, %s5533_s28  ;;  %v3174_v11 = vrot.slane %v5213_v4, 5  ;;  %v2530_v37 = vrot.slane %v2528_v21, 5  ;;  %v2834_v4 = vrot.slane %v2832_v62, 5  ;;  %v5202_v62 = vld [vmem:[%s5576_s20 + $0x5c] sm:$0x1] }
 0x1f4   : > { %3223 = vrot.lane.b32.xlu0 %v3115_v14, %s5533_s28  ;;  %3221 = vrot.lane.b32.xlu2 %v3112_v16, %s5533_s28  ;;  %v5108_v14 = vld [vmem:[%s5576_s20 + $0x28] sm:$0xf]  ;;  %v2534_v16 = vshll.u32 %v5141_v7, 16  ;;  %v5224_v7 = vld [vmem:[%s5576_s20 + $0xb4] sm:$0xe] }
 0x1f5   : > { %v2146_v20 = vpop.permute.xlu1 %2145  ;;  %v3176_v22 = vrot.slane %v3174_v11, 4  ;;  %v3175_v40 = vsel %vm5762_vm6, %v5242_v28, %v3174_v11 }
 0x1f6   : > { %2234 = vst.msk [vmem:[#allocation2 + $0x20] sm:$0xf] %vm2225_vm11, %v2146_v20  ;;  %v2144_v24 = vpop.permute.xlu0 %2143  ;;  %v2160_v29 = vpop.permute.xlu2 %2159  ;;  %v2525_v20 = vshrl.u32 %v5140_v10, 16 }
 0x1f7   : > { %2233 = vst.msk [vmem:[#allocation2 + $0x1c] sm:$0xf] %vm2225_vm11, %v2144_v24  ;;  %v2815_v24 = vrot.slane %v2813_v12, 4  ;;  %v3178_v30 = vsel %vm5762_vm6, %v3176_v22, %v3177_v23  ;;  %v3386_v12 = vld [vmem:[%s7685_s1 + $0x10] sm:$0x3]  ;;  %v3121_v23 = vrot.slane %v5190_v13, 5 }
 0x1f8   : > { %2241 = vst.msk [vmem:[#allocation2 + $0x3c] sm:$0xf] %vm2225_vm11, %v2160_v29  ;;  %v5177_v29 = vld [vmem:[%s5576_s20 + $0xb8] sm:$0xf]  ;;  %v2527_v33 = vrot.slane %v2525_v20, 4  ;;  %v3476_v17 = vunpack.c.l.b16 %v3386_v12 }
 0x1f9   : > { %v2822_v39 = vshll.u32 %v5177_v29, 16  ;;  %v2826_v43 = vshrl.u32 %v5177_v29, 16  ;;  %v5188_v20 = vld [vmem:[%s5576_s20 + $0x24] sm:$0xe]  ;;  %v5154_v29 = vld [vmem:[%s5576_s20 + $0x5c] sm:$0x1] }
 0x1fa   : > { %v2531_v45 = vor.u32 %v2530_v37, %v2527_v33  ;;  %v3479_v21 = vpack.c.b16 %v3476_v17, %v3476_v17  ;;  %v5234_v33 = vrot.slane %v5188_v20, 9 }
 0x1fb   : > { %2902 = vrot.lane.b32.xlu1 %v2619_v31, %s5532_s27  ;;  %v2536_v31 = vrot.slane %v2534_v16, 5  ;;  %v2824_v47 = vrot.slane %v2822_v39, 5  ;;  %v2828_v54 = vrot.slane %v2826_v43, 4  ;;  %v2624_v16 = vshll.u32 %v5152_v5, 16  ;;  %v5226_v43 = vld [vmem:[%s5576_s20 + $0xbc] sm:$0x1] }
 0x1fc   : > { %2900 = vrot.lane.b32.xlu0 %v2609_v36, %s5532_s27  ;;  %3271 = vrot.lane.b32.xlu2 %v3199_v38, %s5533_s28  ;;  %v5142_v36 = vld [vmem:[%s5576_s20 + $0x2c] sm:$0x1]  ;;  %v2819_v38 = vor.u32 %v2818_v26, %v2815_v24  ;;  %v2532_v53 = vrot.slane %v2531_v45, 4  ;;  %v2640_v39 = vshll.u32 %v5154_v29, 16  ;;  %v5126_v29 = vld [vmem:[%s5576_s20 + $0x94] sm:$0xf] }
 0x1fd   : > { %v2152_v42 = vpop.permute.xlu1 %2151  ;;  %v2541_v41 = vor.u32 %v2540_v32, %v2536_v31  ;;  %v2626_v32 = vrot.slane %v2624_v16, 5 }
 0x1fe   : > { %2237 = vst.msk [vmem:[#allocation2 + $0x2c] sm:$0xf] %vm2225_vm11, %v2152_v42  ;;  %v2150_v48 = vpop.permute.xlu0 %2149  ;;  %v2166_v50 = vpop.permute.xlu2 %2165  ;;  %v2544_v42 = vshll.u32 %v5142_v36, 16  ;;  %v2820_v46 = vrot.slane %v2819_v38, 4  ;;  %v2537_v60 = vsel %vm5587_vm2, %v2532_v53, %v2536_v31  ;;  %v2623_v31 = vrot.slane %v2621_v15, 4 }
 0x1ff   : > { %2236 = vst.msk [vmem:[#allocation2 + $0x28] sm:$0xf] %vm2225_vm11, %v2150_v48  ;;  %v2542_v49 = vrot.slane %v2541_v41, 4 }
 0x200   : > { %2244 = vst.msk [vmem:[#allocation2 + $0x48] sm:$0xf] %vm2225_vm11, %v2166_v50  ;;  %v2546_v50 = vrot.slane %v2544_v42, 5  ;;  %v2627_v41 = vor.u32 %v2626_v32, %v2623_v31  ;;  %v5216_v31 = vld [vmem:[%s5576_s20 + $0x94] sm:$0xf] }
 0x202   : > { %v2547_v59 = vsel %vm5587_vm2, %v2542_v49, %v2546_v50  ;;  %v5201_v49 = vld [vmem:[%s5576_s20 + $0x58] sm:$0xf]  ;;  %v5168_v50 = vld [vmem:[%s5576_s20 + $0x94] sm:$0xf] }
 0x203   : > { %2359 = vrot.lane.b32.xlu1 %v5123_v51, %s5531_s26 }
 0x204   : > { %3239 = vrot.lane.b32.xlu0 %v3143_v56, %s5533_s28  ;;  %3237 = vrot.lane.b32.xlu2 %v3140_v58, %s5533_s28  ;;  %v2825_v58 = vsel %vm5587_vm2, %v2820_v46, %v2824_v47  ;;  %v2642_v46 = vrot.slane %v2640_v39, 5  ;;  %v5110_v39 = vld [vmem:[%s5576_s20 + $0x34] sm:$0xf] }
 0x205   : > { %v2158_v61 = vpop.permute.xlu1 %2157 }
 0x206   : > { %2240 = vst.msk [vmem:[#allocation2 + $0x38] sm:$0xf] %vm2225_vm11, %v2158_v61  ;;  %v2156_v63 = vpop.permute.xlu0 %2155  ;;  %v2172_v52 = vpop.permute.xlu2 %2171  ;;  %v2829_v61 = vor.u32 %v2828_v54, %v2824_v47  ;;  %v3205_v54 = vrot.slane %v5226_v43, 5  ;;  %v5215_v43 = vld [vmem:[%s5576_s20 + $0x90] sm:$0xe] }
 0x207   : > { %2239 = vst.msk [vmem:[#allocation2 + $0x34] sm:$0xf] %vm2225_vm11, %v2156_v63 }
 0x208   : > { %2247 = vst.msk [vmem:[#allocation2 + $0x54] sm:$0xf] %vm2225_vm11, %v2172_v52  ;;  %v5189_v52 = vld [vmem:[%s5576_s20 + $0x28] sm:$0xf] }
 0x20b   : > { %2922 = vrot.lane.b32.xlu1 %v2739_v55, %s5532_s27  ;;  %v5153_v55 = vld [vmem:[%s5576_s20 + $0x58] sm:$0xf] }
 0x20c   : > { %2920 = vrot.lane.b32.xlu0 %v2729_v0, %s5532_s27  ;;  %2361 = vrot.lane.b32.xlu2 %v5124_v2, %s5531_s26  ;;  %v5116_v2 = vld [vmem:[%s5576_s20 + $0x58] sm:$0xf]  ;;  %v2630_v10 = vshll.u32 %v5153_v55, 16  ;;  %v2634_v11 = vshrl.u32 %v5153_v55, 16 }
 0x20d   : > { %v2164_v3 = vpop.permute.xlu1 %2163 }
 0x20e   : > { %2243 = vst.msk [vmem:[#allocation2 + $0x44] sm:$0xf] %vm2225_vm11, %v2164_v3  ;;  %v2162_v6 = vpop.permute.xlu0 %2161  ;;  %v2178_v9 = vpop.permute.xlu2 %2177  ;;  %v2830_v3 = vrot.slane %v2829_v61, 4  ;;  %v6663_v24 = vrot.slane %v2630_v10, 5  ;;  %v2636_v26 = vrot.slane %v2634_v11, 4 }
 0x20f   : > { %2242 = vst.msk [vmem:[#allocation2 + $0x40] sm:$0xf] %vm2225_vm11, %v2162_v6  ;;  %v5115_v6 = vld [vmem:[%s5576_s20 + $0x54] sm:$0xf] }
 0x210   : > { %2250 = vst.msk [vmem:[#allocation2 + $0x60] sm:$0xf] %vm2225_vm11, %v2178_v9  ;;  %v2835_v18 = vsel %vm5587_vm2, %v2830_v3, %v2834_v4  ;;  %v2637_v38 = vor.u32 %v2636_v26, %v6663_v24  ;;  %v3149_v3 = vrot.slane %v5202_v62, 5 }
 0x212   : > { %v2638_v45 = vrot.slane %v2637_v38, 4  ;;  %v5143_v38 = vld [vmem:[%s5576_s20 + $0x30] sm:$0xf] }
 0x213   : > { %2375 = vrot.lane.b32.xlu1 %v5131_v8, %s5531_s26  ;;  %v5225_v8 = vld [vmem:[%s5576_s20 + $0xb8] sm:$0xf] }
 0x214   : > { %2329 = vrot.lane.b32.xlu0 %v5108_v14, %s5531_s26  ;;  %2327 = vrot.lane.b32.xlu2 %v5107_v19, %s5531_s26  ;;  %v3118_v14 = vrot.slane %v5189_v52, 5  ;;  %v5246_v19 = vrot.slane %v5224_v7, 9  ;;  %v3202_v22 = vrot.slane %v5225_v8, 5  ;;  %v5169_v8 = vld [vmem:[%s5576_s20 + $0x98] sm:$0x1] }
 0x215   : > { %v2170_v27 = vpop.permute.xlu1 %2169  ;;  %v2760_v16 = vshll.u32 %v5169_v8, 16  ;;  %v5134_v8 = vld [vmem:[%s5576_s20 + $0xc4] sm:$0xf] }
 0x216   : > { %2246 = vst.msk [vmem:[#allocation2 + $0x50] sm:$0xf] %vm2225_vm11, %v2170_v27  ;;  %v2168_v34 = vpop.permute.xlu0 %2167  ;;  %v2184_v35 = vpop.permute.xlu2 %2183  ;;  %v3120_v28 = vrot.slane %v3118_v14, 4  ;;  %v3119_v42 = vsel %vm5762_vm6, %v5234_v33, %v3118_v14  ;;  %v3204_v53 = vrot.slane %v3202_v22, 4  ;;  %v5125_v14 = vld [vmem:[%s5576_s20 + $0x90] sm:$0xf] }
 0x217   : > { %2245 = vst.msk [vmem:[#allocation2 + $0x4c] sm:$0xf] %vm2225_vm11, %v2168_v34  ;;  %v3533_v34 = vsel %vm3531_vm13, %v3479_v21, 0  ;;  %v2762_v21 = vrot.slane %v2760_v16, 5  ;;  %v5133_v33 = vld [vmem:[%s5576_s20 + $0xc0] sm:$0xf] }
 0x218   : > { %2253 = vst.msk [vmem:[#allocation2 + $0x6c] sm:$0xf] %vm2225_vm11, %v2184_v35  ;;  %5486 = vmatpush.bf16.msra.mxu2 %v3533_v34  ;;  %3540 = vmatpush.bf16.msra.mxu0 %v3533_v34  ;;  %v5484_v35 = vld [vmem:[%s7685_s1 + $0x8] sm:$0xff]  ;;  %vm4811_vm13 = vcmask 388416  }
 0x219   : > { %5487 = vmatpush.bf16.msra.mxu3 %v3533_v34  ;;  %5485 = vmatpush.bf16.msra.mxu1 %v3533_v34  ;;  %v5179_v34 = vld [vmem:[%s5576_s20 + $0xc0] sm:$0xf] }
 0x21b   : > { %3259 = vrot.lane.b32.xlu1 %v3178_v30, %s5533_s28  ;;  %v3203_v30 = vsel %vm5762_vm6, %v5246_v19, %v3202_v22 }
 0x21c   : > { %3257 = vrot.lane.b32.xlu0 %v3175_v40, %s5533_s28  ;;  %2377 = vrot.lane.b32.xlu2 %v5132_v44, %s5531_s26  ;;  %v3122_v40 = vsel %vm5762_vm6, %v3120_v28, %v3121_v23  ;;  %v5483_v44 = vld [vmem:[%s7685_s1] sm:$0xff] }
 0x21d   : > { %v2176_v48 = vpop.permute.xlu1 %2175  ;;  %5489 = vmatpush.bf16.msra.mxu2 %v5484_v35  ;;  %3541 = vmatpush.bf16.msra.mxu0 %v5484_v35 }
 0x21e   : > { %2249 = vst.msk [vmem:[#allocation2 + $0x5c] sm:$0xf] %vm2225_vm11, %v2176_v48  ;;  %v2174_v51 = vpop.permute.xlu0 %2173  ;;  %v2190_v56 = vpop.permute.xlu2 %2189  ;;  %5490 = vmatpush.bf16.msra.mxu3 %v5484_v35  ;;  %5488 = vmatpush.bf16.msra.mxu1 %v5484_v35  ;;  %v2628_v48 = vrot.slane %v2627_v41, 4  ;;  %v3181_v35 = vrot.slane %v5216_v31, 5  ;;  %v2840_v41 = vshll.u32 %v5179_v34, 16 }
 0x21f   : > { %2248 = vst.msk [vmem:[#allocation2 + $0x58] sm:$0xf] %vm2225_vm11, %v2174_v51 }
 0x220   : > { %2256 = vst.msk [vmem:[#allocation2 + $0x78] sm:$0xf] %vm2225_vm11, %v2190_v56  ;;  %v5167_v56 = vld [vmem:[%s5576_s20 + $0x90] sm:$0xf]  ;;  %v2633_v61 = vsel %vm5587_vm2, %v2628_v48, %v6663_v24  ;;  %v2552_v48 = vshll.u32 %v5143_v38, 16 }
 0x221   : > { %5492 = vmatpush.bf16.msra.mxu2 %v5483_v44  ;;  %3542 = vmatpush.bf16.msra.mxu0 %v5483_v44  ;;  %v2741_v52 = vshrl.u32 %v5167_v56, 16  ;;  %v2744_v55 = vshll.u32 %v5167_v56, 16 }
 0x222   : > { %5493 = vmatpush.bf16.msra.mxu3 %v5483_v44  ;;  %5491 = vmatpush.bf16.msra.mxu1 %v5483_v44 }
 0x223   : > { %2936 = vrot.lane.b32.xlu1 %v2825_v58, %s5532_s27  ;;  %v2643_v58 = vsel %vm5587_vm2, %v2638_v45, %v2642_v46  ;;  %v2746_v10 = vrot.slane %v2744_v55, 5  ;;  %v5109_v46 = vld [vmem:[%s5576_s20 + $0x30] sm:$0xf] }
 0x224   : > { %2890 = vrot.lane.b32.xlu0 %v2547_v59, %s5532_s27  ;;  %2888 = vrot.lane.b32.xlu2 %v2537_v60, %s5532_s27  ;;  %v2750_v59 = vshll.u32 %v5168_v50, 16  ;;  %v2754_v60 = vshrl.u32 %v5168_v50, 16 }
 0x225   : > { %v2182_v63 = vpop.permute.xlu1 %2181 }
 0x226   : > { %2252 = vst.msk [vmem:[#allocation2 + $0x68] sm:$0xf] %vm2225_vm11, %v2182_v63  ;;  %v2180_v0 = vpop.permute.xlu0 %2179  ;;  %v2326_v9 = vpop.permute.xlu2 %2325  ;;  %v3146_v63 = vrot.slane %v5201_v49, 5  ;;  %v2752_v4 = vrot.slane %v2750_v59, 5  ;;  %v2756_v5 = vrot.slane %v2754_v60, 4  ;;  %v3183_v49 = vrot.slane %v3181_v35, 4 }
 0x227   : > { %2251 = vst.msk [vmem:[#allocation2 + $0x64] sm:$0xf] %vm2225_vm11, %v2180_v0  ;;  %v3206_v0 = vsel %vm5762_vm6, %v3204_v53, %v3205_v54  ;;  %v2842_v54 = vrot.slane %v2840_v41, 5 }
 0x228   : > { %2421 = vst.msk [vmem:[#allocation2 + $0x4] sm:$0xf] %vm2419_vm12, %v2326_v9  ;;  %v3148_v7 = vrot.slane %v3146_v63, 4  ;;  %v2743_v9 = vrot.slane %v2741_v52, 4  ;;  %v2757_v15 = vor.u32 %v2756_v5, %v2752_v4  ;;  %v2554_v52 = vrot.slane %v2552_v48, 5 }
 0x22a   : > { %v3150_v17 = vsel %vm5762_vm6, %v3148_v7, %v3149_v3  ;;  %v2758_v20 = vrot.slane %v2757_v15, 4 }
 0x22b   : > { %2345 = vrot.lane.b32.xlu1 %v5116_v2, %s5531_s26  ;;  %v5200_v2 = vld [vmem:[%s5576_s20 + $0x54] sm:$0xe] }
 0x22c   : > { %2343 = vrot.lane.b32.xlu0 %v5115_v6, %s5531_s26  ;;  %2938 = vrot.lane.b32.xlu2 %v2835_v18, %s5532_s27  ;;  %v5238_v12 = vrot.slane %v5200_v2, 9  ;;  %v2747_v18 = vor.u32 %v2746_v10, %v2743_v9 }
 0x22d   : > { %v2188_v27 = vpop.permute.xlu1 %2187 }
 0x22e   : > { %2255 = vst.msk [vmem:[#allocation2 + $0x74] sm:$0xf] %vm2225_vm11, %v2188_v27  ;;  %v2186_v36 = vpop.permute.xlu0 %2185  ;;  %v6669_v37 = vpop.permute.xlu2 %2916  ;;  %v3147_v19 = vsel %vm5762_vm6, %v5238_v12, %v3146_v63  ;;  %v2748_v23 = vrot.slane %v2747_v18, 4  ;;  %v2763_v27 = vsel %vm5587_vm2, %v2758_v20, %v2762_v21 }
 0x22f   : > { %2254 = vst.msk [vmem:[#allocation2 + $0x70] sm:$0xf] %vm2225_vm11, %v2186_v36 }
 0x230   : > { %v2753_v28 = vsel %vm5587_vm2, %v2748_v23, %v2752_v4 }
 0x233   : > { %3273 = vrot.lane.b32.xlu1 %v3203_v30, %s5533_s28 }
 0x234   : > { %3227 = vrot.lane.b32.xlu0 %v3122_v40, %s5533_s28  ;;  %3225 = vrot.lane.b32.xlu2 %v3119_v42, %s5533_s28  ;;  %v2837_v40 = vshrl.u32 %v5179_v34, 16  ;;  %v5217_v42 = vld [vmem:[%s5576_s20 + $0x98] sm:$0x1]  ;;  %v5155_v34 = vld [vmem:[%s5576_s20 + $0x60] sm:$0xf] }
 0x235   : > { %v2324_v47 = vpop.permute.xlu1 %2323  ;;  %v3184_v50 = vrot.slane %v5217_v42, 5  ;;  %v2645_v41 = vshrl.u32 %v5155_v34, 16  ;;  %v2648_v42 = vshll.u32 %v5155_v34, 16  ;;  %v5172_v34 = vld [vmem:[%s5576_s20 + $0xa4] sm:$0x1] }
 0x236   : > { %2420 = vst.msk [vmem:[#allocation2] sm:$0xf] %vm2419_vm12, %v2324_v47  ;;  %v2192_v51 = vpop.permute.xlu0 %2191  ;;  %v2374_v57 = vpop.permute.xlu2 %2373  ;;  %v2549_v47 = vshrl.u32 %v5143_v38, 16  ;;  %v2839_v53 = vrot.slane %v2837_v40, 4  ;;  %v5228_v40 = vld [vmem:[%s5576_s20 + $0xc4] sm:$0xf] }
 0x237   : > { %2257 = vst.msk [vmem:[#allocation2 + $0x7c] sm:$0xf] %vm2225_vm11, %v2192_v51  ;;  %v5243_v51 = vrot.slane %v5215_v43, 9  ;;  %v5193_v43 = vld [vmem:[%s5576_s20 + $0x38] sm:$0x1]  ;;  %vm4739_vm11 = vcmask 257216  }
 0x238   : > { %2445 = vst.msk [vmem:[#allocation2 + $0x64] sm:$0xf] %vm2419_vm12, %v2374_v57  ;;  %v5180_v57 = vld [vmem:[%s5576_s20 + $0xc4] sm:$0xf]  ;;  %v2551_v63 = vrot.slane %v2549_v47, 4  ;;  %v2843_v2 = vor.u32 %v2842_v54, %v2839_v53  ;;  %v3209_v47 = vrot.slane %v5228_v40, 5 }
 0x239   : > { %v2846_v3 = vshll.u32 %v5180_v57, 16  ;;  %v3182_v4 = vsel %vm5762_vm6, %v5243_v51, %v3181_v35  ;;  %v2850_v7 = vshrl.u32 %v5180_v57, 16  ;;  %v5227_v35 = vld [vmem:[%s5576_s20 + $0xc0] sm:$0xe]  ;;  %v3128_v54 = vrot.slane %v5193_v43, 5 }
 0x23a   : > { %v2555_v9 = vor.u32 %v2554_v52, %v2551_v63  ;;  %v2844_v10 = vrot.slane %v2843_v2, 4  ;;  %v2647_v57 = vrot.slane %v2645_v41, 4  ;;  %v2784_v41 = vshll.u32 %v5172_v34, 16 }
 0x23b   : > { %2906 = vrot.lane.b32.xlu1 %v2643_v58, %s5532_s27  ;;  %v5145_v58 = vld [vmem:[%s5576_s20 + $0x38] sm:$0x1] }
 0x23c   : > { %2904 = vrot.lane.b32.xlu0 %v2633_v61, %s5532_s27  ;;  %3275 = vrot.lane.b32.xlu2 %v3206_v0, %s5533_s28  ;;  %v3185_v0 = vsel %vm5762_vm6, %v3183_v49, %v3184_v50  ;;  %v2556_v16 = vrot.slane %v2555_v9, 4  ;;  %v5204_v9 = vld [vmem:[%s5576_s20 + $0x64] sm:$0xf] }
 0x23d   : > { %v2358_v6 = vpop.permute.xlu1 %2357 }
 0x23e   : > { %2437 = vst.msk [vmem:[#allocation2 + $0x44] sm:$0xf] %vm2419_vm12, %v2358_v6  ;;  %v2356_v11 = vpop.permute.xlu0 %2355  ;;  %v2885_v13 = vpop.permute.xlu2 %2884  ;;  %v2568_v6 = vshll.u32 %v5145_v58, 16  ;;  %v2650_v58 = vrot.slane %v2648_v42, 5 }
 0x23f   : > { %2436 = vst.msk [vmem:[#allocation2 + $0x40] sm:$0xf] %vm2419_vm12, %v2356_v11  ;;  %v2848_v11 = vrot.slane %v2846_v3, 5 }
 0x240   : > { %2997 = vst.msk [vmem:[#allocation2 + $0x40] sm:$0xf] %vm2980_vm14, %v6669_v37  ;;  %v5144_v37 = vld [vmem:[%s5576_s20 + $0x34] sm:$0xf]  ;;  %v2651_v2 = vor.u32 %v2650_v58, %v2647_v57  ;;  %v5182_v58 = vld [vmem:[%s5576_s20 + $0xcc] sm:$0xf] }
 0x241   : > { %2981 = vst.msk [vmem:[#allocation2] sm:$0xf] %vm2980_vm14, %v2885_v13  ;;  %v2558_v44 = vshll.u32 %v5144_v37, 16  ;;  %v2562_v45 = vshrl.u32 %v5144_v37, 16  ;;  %v2849_v20 = vsel %vm5587_vm2, %v2844_v10, %v2848_v11  ;;  %v5171_v10 = vld [vmem:[%s5576_s20 + $0xa0] sm:$0xf] }
 0x243   : > { %2363 = vrot.lane.b32.xlu1 %v5125_v14, %s5531_s26  ;;  %v2560_v59 = vrot.slane %v2558_v44, 5  ;;  %v2564_v60 = vrot.slane %v2562_v45, 4  ;;  %v2570_v14 = vrot.slane %v2568_v6, 5  ;;  %v5247_v45 = vrot.slane %v5227_v35, 9 }
 0x244   : > { %3243 = vrot.lane.b32.xlu0 %v3150_v17, %s5533_s28  ;;  %3241 = vrot.lane.b32.xlu2 %v3147_v19, %s5533_s28  ;;  %v2852_v17 = vrot.slane %v2850_v7, 4  ;;  %v5181_v19 = vld [vmem:[%s5576_s20 + $0xc8] sm:$0x1] }
 0x245   : > { %v2372_v22 = vpop.permute.xlu1 %2371  ;;  %v2565_v5 = vor.u32 %v2564_v60, %v2560_v59  ;;  %v3210_v63 = vsel %vm5762_vm6, %v5247_v45, %v3209_v47 }
 0x246   : > { %2444 = vst.msk [vmem:[#allocation2 + $0x60] sm:$0xf] %vm2419_vm12, %v2372_v22  ;;  %v2919_v24 = vpop.permute.xlu0 %2918  ;;  %v2935_v26 = vpop.permute.xlu2 %2934  ;;  %v2561_v22 = vsel %vm5587_vm2, %v2556_v16, %v2560_v59  ;;  %v2853_v23 = vor.u32 %v2852_v17, %v2848_v11  ;;  %v2774_v17 = vshll.u32 %v5171_v10, 16 }
 0x247   : > { %2998 = vst.msk [vmem:[#allocation2 + $0x44] sm:$0xf] %vm2980_vm14, %v2919_v24  ;;  %v2566_v13 = vrot.slane %v2565_v5, 4  ;;  %v2856_v24 = vshll.u32 %v5181_v19, 16 }
 0x248   : > { %3006 = vst.msk [vmem:[#allocation2 + $0x64] sm:$0xf] %vm2980_vm14, %v2935_v26  ;;  %v5192_v26 = vld [vmem:[%s5576_s20 + $0x34] sm:$0xf]  ;;  %v2854_v31 = vrot.slane %v2853_v23, 4 }
 0x249   : > { %v2571_v21 = vsel %vm5587_vm2, %v2566_v13, %v2570_v14  ;;  %v5170_v14 = vld [vmem:[%s5576_s20 + $0x9c] sm:$0xf]  ;;  %v5205_v23 = vld [vmem:[%s5576_s20 + $0x68] sm:$0x1] }
 0x24b   : > { %2926 = vrot.lane.b32.xlu1 %v2763_v27, %s5532_s27 }
 0x24c   : > { %2924 = vrot.lane.b32.xlu0 %v2753_v28, %s5532_s27  ;;  %2365 = vrot.lane.b32.xlu2 %v5126_v29, %s5531_s26  ;;  %v5156_v28 = vld [vmem:[%s5576_s20 + $0x64] sm:$0xf] }
 0x24d   : > { %v3256_v32 = vpop.permute.xlu1 %3255  ;;  %v2658_v38 = vshrl.u32 %v5156_v28, 16 }
 0x24e   : > { %3335 = vst.msk [vmem:[#allocation2 + $0x44] sm:$0xf] %vm3317_vm15, %v3256_v32  ;;  %v3254_v36 = vpop.permute.xlu0 %3253  ;;  %v3222_v30 = vpop.permute.xlu2 %3221  ;;  %v2858_v32 = vrot.slane %v2856_v24, 5 }
 0x24f   : > { %3334 = vst.msk [vmem:[#allocation2 + $0x40] sm:$0xf] %vm3317_vm15, %v3254_v36  ;;  %v5118_v36 = vld [vmem:[%s5576_s20 + $0x64] sm:$0xf]  ;;  %v2660_v50 = vrot.slane %v2658_v38, 4 }
 0x250   : > { %3318 = vst.msk [vmem:[#allocation2] sm:$0xf] %vm3317_vm15, %v3222_v30  ;;  %v2654_v30 = vshll.u32 %v5156_v28, 16  ;;  %v2859_v44 = vsel %vm5587_vm2, %v2854_v31, %v2858_v32  ;;  %v3156_v32 = vrot.slane %v5205_v23, 5 }
 0x252   : > { %v2656_v49 = vrot.slane %v2654_v30, 5 }
 0x253   : > { %2379 = vrot.lane.b32.xlu1 %v5133_v33, %s5531_s26  ;;  %v3125_v33 = vrot.slane %v5192_v26, 5  ;;  %v5203_v26 = vld [vmem:[%s5576_s20 + $0x60] sm:$0xe] }
 0x254   : > { %2333 = vrot.lane.b32.xlu0 %v5110_v39, %s5531_s26  ;;  %2331 = vrot.lane.b32.xlu2 %v5109_v46, %s5531_s26  ;;  %v5117_v39 = vld [vmem:[%s5576_s20 + $0x60] sm:$0xf]  ;;  %v5191_v46 = vld [vmem:[%s5576_s20 + $0x30] sm:$0xe]  ;;  %v2661_v52 = vor.u32 %v2660_v50, %v2656_v49  ;;  %v5239_v30 = vrot.slane %v5203_v26, 9 }
 0x255   : > { %v2933_v56 = vpop.permute.xlu1 %2932  ;;  %v3127_v48 = vrot.slane %v3125_v33, 4 }
 0x256   : > { %3005 = vst.msk [vmem:[#allocation2 + $0x60] sm:$0xf] %vm2980_vm14, %v2933_v56  ;;  %v2887_v61 = vpop.permute.xlu0 %2886  ;;  %v5475_v62 = vld [vmem:[#allocation2 + $0x40] sm:$0xff]  ;;  %v3272_v55 = vpop.permute.xlu2 %3271  ;;  %v5157_v56 = vld [vmem:[%s5576_s20 + $0x68] sm:$0x1]  ;;  %v2662_v5 = vrot.slane %v2661_v52, 4 }
 0x257   : > { %2982 = vst.msk [vmem:[#allocation2 + $0x4] sm:$0xf] %vm2980_vm14, %v2887_v61  ;;  %5329 = vmatmul.msk.bf16.vlgmr.msra.gmra.mxu2 %vm3482_vm0, %v5475_v62  ;;  %v5235_v61 = vrot.slane %v5191_v46, 9  ;;  %v2786_v46 = vrot.slane %v2784_v41, 5  ;;  %v5146_v52 = vld [vmem:[%s5576_s20 + $0x3c] sm:$0xf] }
 0x258   : > { %3343 = vst.msk [vmem:[#allocation2 + $0x64] sm:$0xf] %vm3317_vm15, %v3272_v55  ;;  %v2664_v55 = vshll.u32 %v5157_v56, 16  ;;  %v5219_v56 = vld [vmem:[%s5576_s20 + $0xa0] sm:$0xf] }
 0x259   : > { %v3126_v3 = vsel %vm5762_vm6, %v5235_v61, %v3125_v33  ;;  %v5147_v61 = vld [vmem:[%s5576_s20 + $0x40] sm:$0xf] }
 0x25a   : > { %v2666_v6 = vrot.slane %v2664_v55, 5  ;;  %v5112_v55 = vld [vmem:[%s5576_s20 + $0x40] sm:$0xf] }
 0x25b   : > { %3263 = vrot.lane.b32.xlu1 %v3185_v0, %s5533_s28  ;;  %v3129_v0 = vsel %vm5762_vm6, %v3127_v48, %v3128_v54  ;;  %v5128_v54 = vld [vmem:[%s5576_s20 + $0xa0] sm:$0xf] }
 0x25c   : > { %3261 = vrot.lane.b32.xlu0 %v3182_v4, %s5533_s28  ;;  %2381 = vrot.lane.b32.xlu2 %v5134_v8, %s5531_s26  ;;  %v5229_v4 = vld [vmem:[%s5576_s20 + $0xc8] sm:$0x1]  ;;  %v2652_v8 = vrot.slane %v2651_v2, 4  ;;  %v2667_v16 = vsel %vm5587_vm2, %v2662_v5, %v2666_v6  ;;  %v2864_v2 = vshll.u32 %v5182_v58, 16  ;;  %v2582_v5 = vshll.u32 %v5147_v61, 16 }
 0x25d   : > { %v2342_v12 = vpop.permute.xlu1 %2341  ;;  %v3212_v13 = vrot.slane %v5229_v4, 5  ;;  %v5218_v4 = vld [vmem:[%s5576_s20 + $0x9c] sm:$0xe]  ;;  %v2586_v6 = vshrl.u32 %v5147_v61, 16  ;;  %v5119_v61 = vld [vmem:[%s5576_s20 + $0x6c] sm:$0xf] }
 0x25e   : > { %2429 = vst.msk [vmem:[#allocation2 + $0x24] sm:$0xf] %vm2419_vm12, %v2342_v12  ;;  %v2340_v15 = vpop.permute.xlu0 %2339  ;;  %v3238_v18 = vpop.permute.xlu2 %3237  ;;  %v3211_v12 = vrot.slane %v3209_v47, 4  ;;  %v2657_v19 = vsel %vm5587_vm2, %v2652_v8, %v2656_v49  ;;  %v2573_v8 = vshrl.u32 %v5146_v52, 16 }
 0x25f   : > { %2428 = vst.msk [vmem:[#allocation2 + $0x20] sm:$0xf] %vm2419_vm12, %v2340_v15 }
 0x260   : > { %v3213_v24 = vsel %vm5762_vm6, %v3211_v12, %v3212_v13  ;;  %v5244_v12 = vrot.slane %v5218_v4, 9 }
 0x263   : > { %2940 = vrot.lane.b32.xlu1 %v2849_v20, %s5532_s27  ;;  %v3153_v20 = vrot.slane %v5204_v9, 5  ;;  %v2576_v9 = vshll.u32 %v5146_v52, 16  ;;  %v5230_v52 = vld [vmem:[%s5576_s20 + $0xcc] sm:$0xe] }
 0x264   : > { %2894 = vrot.lane.b32.xlu0 %v2571_v21, %s5532_s27  ;;  %2892 = vrot.lane.b32.xlu2 %v2561_v22, %s5532_s27  ;;  %v2765_v21 = vshrl.u32 %v5170_v14, 16  ;;  %v2768_v22 = vshll.u32 %v5170_v14, 16  ;;  %v2866_v14 = vrot.slane %v2864_v2, 5 }
 0x265   : > { %v3270_v27 = vpop.permute.xlu1 %3269  ;;  %v3155_v31 = vrot.slane %v3153_v20, 4  ;;  %v2578_v23 = vrot.slane %v2576_v9, 5 }
 0x266   : > { %3342 = vst.msk [vmem:[#allocation2 + $0x60] sm:$0xf] %vm3317_vm15, %v3270_v27  ;;  %v3224_v29 = vpop.permute.xlu0 %3223  ;;  %v2362_v37 = vpop.permute.xlu2 %2361  ;;  %v2776_v27 = vrot.slane %v2774_v17, 5  ;;  %v2770_v33 = vrot.slane %v2768_v22, 5  ;;  %v5148_v17 = vld [vmem:[%s5576_s20 + $0x44] sm:$0x1] }
 0x267   : > { %3319 = vst.msk [vmem:[#allocation2 + $0x4] sm:$0xf] %vm3317_vm15, %v3224_v29  ;;  %v3157_v42 = vsel %vm5762_vm6, %v3155_v31, %v3156_v32  ;;  %v2575_v22 = vrot.slane %v2573_v8, 4  ;;  %v2592_v32 = vshll.u32 %v5148_v17, 16 }
 0x268   : > { %2439 = vst.msk [vmem:[#allocation2 + $0x4c] sm:$0xf] %vm2419_vm12, %v2362_v37 }
 0x26b   : > { %2349 = vrot.lane.b32.xlu1 %v5118_v36, %s5531_s26  ;;  %v2767_v36 = vrot.slane %v2765_v21, 4 }
 0x26c   : > { %2347 = vrot.lane.b32.xlu0 %v5117_v39, %s5531_s26  ;;  %2942 = vrot.lane.b32.xlu2 %v2859_v44, %s5532_s27  ;;  %v5127_v39 = vld [vmem:[%s5576_s20 + $0x9c] sm:$0xf]  ;;  %v3154_v44 = vsel %vm5762_vm6, %v5239_v30, %v3153_v20 }
 0x26d   : > { %v2903_v51 = vpop.permute.xlu1 %2902  ;;  %v5479_v53 = vld [vmem:[#allocation2 + $0x60] sm:$0xff]  ;;  %v2771_v43 = vor.u32 %v2770_v33, %v2767_v36  ;;  %v5136_v36 = vld [vmem:[%s5576_s20 + $0xd0] sm:$0xf]  ;;  %v2579_v33 = vor.u32 %v2578_v23, %v2575_v22 }
 0x26e   : > { %2990 = vst.msk [vmem:[#allocation2 + $0x24] sm:$0xf] %vm2980_vm14, %v2903_v51  ;;  %v2901_v59 = vpop.permute.xlu0 %2900  ;;  %v5467_v60 = vld [vmem:[#allocation2] sm:$0xff]  ;;  %5333 = vmatmul.msk.bf16.vlgmr.msra.gmra.mxu3 %vm3482_vm0, %v5479_v53  ;;  %v2328_v62 = vpop.permute.xlu2 %2327 }
 0x26f   : > { %2989 = vst.msk [vmem:[#allocation2 + $0x20] sm:$0xf] %vm2980_vm14, %v2901_v59  ;;  %5321 = vmatmul.msk.bf16.vlgmr.msra.gmra.mxu0 %vm3482_vm0, %v5467_v60  ;;  %v2772_v48 = vrot.slane %v2771_v43, 4  ;;  %v5135_v60 = vld [vmem:[%s5576_s20 + $0xcc] sm:$0xf]  ;;  %v2580_v41 = vrot.slane %v2579_v33, 4 }
 0x270   : > { %3326 = vst.msk [vmem:[#allocation2 + $0x20] sm:$0xf] %vm3317_vm15, %v3238_v18  ;;  %v2778_v18 = vshrl.u32 %v5171_v10, 16 }
 0x271   : > { %2422 = vst.msk [vmem:[#allocation2 + $0x8] sm:$0xf] %vm2419_vm12, %v2328_v62  ;;  %v2777_v53 = vsel %vm5587_vm2, %v2772_v48, %v2776_v27  ;;  %v3188_v62 = vrot.slane %v5219_v56, 5 }
 0x272   : > { %v2780_v28 = vrot.slane %v2778_v18, 4  ;;  %v2584_v18 = vrot.slane %v2582_v5, 5 }
 0x273   : > { %3277 = vrot.lane.b32.xlu1 %v3210_v63, %s5533_s28  ;;  %v3190_v10 = vrot.slane %v3188_v62, 4 }
 0x274   : > { %3231 = vrot.lane.b32.xlu0 %v3129_v0, %s5533_s28  ;;  %3229 = vrot.lane.b32.xlu2 %v3126_v3, %s5533_s28  ;;  %v2781_v40 = vor.u32 %v2780_v28, %v2776_v27  ;;  %v2861_v0 = vshrl.u32 %v5182_v58, 16  ;;  %v5220_v3 = vld [vmem:[%s5576_s20 + $0xa4] sm:$0x1]  ;;  %v5120_v58 = vld [vmem:[%s5576_s20 + $0x70] sm:$0xf] }
 0x275   : > { %v2360_v7 = vpop.permute.xlu1 %2359 }
 0x276   : > { %2438 = vst.msk [vmem:[#allocation2 + $0x48] sm:$0xf] %vm2419_vm12, %v2360_v7  ;;  %v3240_v11 = vpop.permute.xlu0 %3239  ;;  %v2378_v15 = vpop.permute.xlu2 %2377  ;;  %v2782_v45 = vrot.slane %v2781_v40, 4  ;;  %v5111_v7 = vld [vmem:[%s5576_s20 + $0x3c] sm:$0xf]  ;;  %v2863_v13 = vrot.slane %v2861_v0, 4 }
 0x277   : > { %3327 = vst.msk [vmem:[#allocation2 + $0x24] sm:$0xf] %vm3317_vm15, %v3240_v11  ;;  %v3191_v11 = vrot.slane %v5220_v3, 5  ;;  %v5196_v3 = vld [vmem:[%s5576_s20 + $0x44] sm:$0x1] }
 0x278   : > { %2447 = vst.msk [vmem:[#allocation2 + $0x6c] sm:$0xf] %vm2419_vm12, %v2378_v15  ;;  %v2787_v51 = vsel %vm5587_vm2, %v2782_v45, %v2786_v46  ;;  %v2867_v27 = vor.u32 %v2866_v14, %v2863_v13  ;;  %v3135_v13 = vrot.slane %v5196_v3, 5 }
 0x279   : > { %v3192_v26 = vsel %vm5762_vm6, %v3190_v10, %v3191_v11 }
 0x27b   : > { %2910 = vrot.lane.b32.xlu1 %v2667_v16, %s5532_s27  ;;  %v5183_v16 = vld [vmem:[%s5576_s20 + $0xd0] sm:$0xf] }
 0x27c   : > { %2908 = vrot.lane.b32.xlu0 %v2657_v19, %s5532_s27  ;;  %3279 = vrot.lane.b32.xlu2 %v3213_v24, %s5533_s28  ;;  %v2588_v19 = vrot.slane %v2586_v6, 4  ;;  %v2870_v28 = vshll.u32 %v5183_v16, 16  ;;  %v2874_v34 = vshrl.u32 %v5183_v16, 16  ;;  %v5194_v6 = vld [vmem:[%s5576_s20 + $0x3c] sm:$0xe] }
 0x27d   : > { %v2923_v29 = vpop.permute.xlu1 %2922  ;;  %v5160_v16 = vld [vmem:[%s5576_s20 + $0x74] sm:$0x1] }
 0x27e   : > { %3000 = vst.msk [vmem:[#allocation2 + $0x4c] sm:$0xf] %vm2980_vm14, %v2923_v29  ;;  %v2921_v37 = vpop.permute.xlu0 %2920  ;;  %v5471_v35 = vld [vmem:[#allocation2 + $0x20] sm:$0xff]  ;;  %v2889_v38 = vpop.permute.xlu2 %2888  ;;  %v3189_v29 = vsel %vm5762_vm6, %v5244_v12, %v3188_v62  ;;  %v2589_v31 = vor.u32 %v2588_v19, %v2584_v18 }
 0x27f   : > { %2999 = vst.msk [vmem:[#allocation2 + $0x48] sm:$0xf] %vm2980_vm14, %v2921_v37  ;;  %5325 = vmatmul.msk.bf16.vlgmr.msra.gmra.mxu1 %vm3482_vm0, %v5471_v35  ;;  %v2868_v37 = vrot.slane %v2867_v27, 4  ;;  %v2872_v35 = vrot.slane %v2870_v28, 5 }
 0x280   : > { %2983 = vst.msk [vmem:[#allocation2 + $0x8] sm:$0xf] %vm2980_vm14, %v2889_v38  ;;  %v2590_v38 = vrot.slane %v2589_v31, 4 }
 0x281   : > { %v2873_v45 = vsel %vm5587_vm2, %v2868_v37, %v2872_v35  ;;  %v5207_v37 = vld [vmem:[%s5576_s20 + $0x70] sm:$0xf] }
 0x283   : > { %2367 = vrot.lane.b32.xlu1 %v5127_v39, %s5531_s26  ;;  %v2594_v39 = vrot.slane %v2592_v32, 5 }
 0x284   : > { %3247 = vrot.lane.b32.xlu0 %v3157_v42, %s5533_s28  ;;  %3245 = vrot.lane.b32.xlu2 %v3154_v44, %s5533_s28  ;;  %v2876_v42 = vrot.slane %v2874_v34, 4  ;;  %v5184_v44 = vld [vmem:[%s5576_s20 + $0xd4] sm:$0x1] }
 0x285   : > { %v2376_v47 = vpop.permute.xlu1 %2375  ;;  %v2595_v46 = vsel %vm5587_vm2, %v2590_v38, %v2594_v39 }
 0x286   : > { %2446 = vst.msk [vmem:[#allocation2 + $0x68] sm:$0xf] %vm2419_vm12, %v2376_v47  ;;  %v2330_v49 = vpop.permute.xlu0 %2329  ;;  %v2939_v50 = vpop.permute.xlu2 %2938  ;;  %v2585_v47 = vsel %vm5587_vm2, %v2580_v41, %v2584_v18  ;;  %v2877_v48 = vor.u32 %v2876_v42, %v2872_v35  ;;  %v3160_v41 = vrot.slane %v5207_v37, 5  ;;  %v5208_v42 = vld [vmem:[%s5576_s20 + $0x74] sm:$0x1] }
 0x287   : > { %2423 = vst.msk [vmem:[#allocation2 + $0xc] sm:$0xf] %vm2419_vm12, %v2330_v49  ;;  %v2880_v49 = vshll.u32 %v5184_v44, 16  ;;  %v5206_v44 = vld [vmem:[%s5576_s20 + $0x6c] sm:$0xe] }
 0x288   : > { %3008 = vst.msk [vmem:[#allocation2 + $0x6c] sm:$0xf] %vm2980_vm14, %v2939_v50  ;;  %v6998_v37 = vld [vmem:[%s7687_s3] ss:$0 sm:$0xff] }
 0x289   : > { %v2882_v56 = vrot.slane %v2880_v49, 5  ;;  %v5240_v49 = vrot.slane %v5206_v44, 9 }
 0x28b   : > { %2930 = vrot.lane.b32.xlu1 %v2787_v51, %s5532_s27  ;;  %v5195_v51 = vld [vmem:[%s5576_s20 + $0x40] sm:$0xf] }
 0x28c   : > { %2928 = vrot.lane.b32.xlu0 %v2777_v53, %s5532_s27  ;;  %2369 = vrot.lane.b32.xlu2 %v5128_v54, %s5531_s26  ;;  %v2878_v54 = vrot.slane %v2877_v48, 4  ;;  %v3132_v62 = vrot.slane %v5195_v51, 5 }
 0x28d   : > { %v3260_v57 = vpop.permute.xlu1 %3259 }
 0x28e   : > { %3337 = vst.msk [vmem:[#allocation2 + $0x4c] sm:$0xf] %vm3317_vm15, %v3260_v57  ;;  %v3258_v59 = vpop.permute.xlu0 %3257  ;;  %v3226_v63 = vpop.permute.xlu2 %3225  ;;  %v5158_v57 = vld [vmem:[%s5576_s20 + $0x6c] sm:$0xf]  ;;  %v2883_v4 = vsel %vm5587_vm2, %v2878_v54, %v2882_v56  ;;  %v3134_v9 = vrot.slane %v3132_v62, 4 }
 0x28f   : > { %3336 = vst.msk [vmem:[#allocation2 + $0x48] sm:$0xf] %vm3317_vm15, %v3258_v59  ;;  %v2669_v0 = vshrl.u32 %v5158_v57, 16  ;;  %v2672_v2 = vshll.u32 %v5158_v57, 16 }
 0x290   : > { %3320 = vst.msk [vmem:[#allocation2 + $0x8] sm:$0xf] %vm3317_vm15, %v3226_v63 }
 0x291   : > { %v2671_v14 = vrot.slane %v2669_v0, 4 }
 0x293   : > { %2383 = vrot.lane.b32.xlu1 %v5135_v60, %s5531_s26  ;;  %v5159_v60 = vld [vmem:[%s5576_s20 + $0x70] sm:$0xf] }
 0x294   : > { %2337 = vrot.lane.b32.xlu0 %v5112_v55, %s5531_s26  ;;  %2335 = vrot.lane.b32.xlu2 %v5111_v7, %s5531_s26  ;;  %v2682_v63 = vshrl.u32 %v5159_v60, 16  ;;  %v5231_v55 = vld [vmem:[%s5576_s20 + $0xd0] sm:$0xf]  ;;  %v2678_v5 = vshll.u32 %v5159_v60, 16  ;;  %v5248_v7 = vrot.slane %v5230_v52, 9 }
 0x295   : > { %v2937_v15 = vpop.permute.xlu1 %2936  ;;  %v3216_v8 = vrot.slane %v5231_v55, 5 }
 0x296   : > { %3007 = vst.msk [vmem:[#allocation2 + $0x68] sm:$0xf] %vm2980_vm14, %v2937_v15  ;;  %v2891_v20 = vpop.permute.xlu0 %2890  ;;  %v5476_v21 = vld [vmem:[#allocation2 + $0x48] sm:$0xff]  ;;  %v3276_v24 = vpop.permute.xlu2 %3275  ;;  %v2684_v10 = vrot.slane %v2682_v63, 4  ;;  %v2674_v15 = vrot.slane %v2672_v2, 5  ;;  %v2680_v19 = vrot.slane %v2678_v5, 5 }
 0x297   : > { %2984 = vst.msk [vmem:[#allocation2 + $0xc] sm:$0xf] %vm2980_vm14, %v2891_v20  ;;  %5330 = vmatmul.msk.bf16.gmra.mxu2 %vm3482_vm0, %v5476_v21  ;;  %v5236_v20 = vrot.slane %v5194_v6, 9  ;;  %v3217_v22 = vsel %vm5762_vm6, %v5248_v7, %v3216_v8  ;;  %v3218_v35 = vrot.slane %v3216_v8, 4 }
 0x298   : > { %3345 = vst.msk [vmem:[#allocation2 + $0x6c] sm:$0xf] %vm3317_vm15, %v3276_v24  ;;  %v2685_v23 = vor.u32 %v2684_v10, %v2680_v19  ;;  %v2688_v24 = vshll.u32 %v5160_v16, 16  ;;  %v2675_v27 = vor.u32 %v2674_v15, %v2671_v14 }
 0x299   : > { %v3133_v28 = vsel %vm5762_vm6, %v5236_v20, %v3132_v62 }
 0x29a   : > { %v2686_v31 = vrot.slane %v2685_v23, 4  ;;  %v2690_v32 = vrot.slane %v2688_v24, 5 }
 0x29b   : > { %3267 = vrot.lane.b32.xlu1 %v3192_v26, %s5533_s28  ;;  %v3136_v26 = vsel %vm5762_vm6, %v3134_v9, %v3135_v13 }
 0x29c   : > { %3265 = vrot.lane.b32.xlu0 %v3189_v29, %s5533_s28  ;;  %2385 = vrot.lane.b32.xlu2 %v5136_v36, %s5531_s26  ;;  %v5232_v29 = vld [vmem:[%s5576_s20 + $0xd4] sm:$0x1]  ;;  %v2676_v36 = vrot.slane %v2675_v27, 4  ;;  %v2691_v39 = vsel %vm5587_vm2, %v2686_v31, %v2690_v32  ;;  %v6990_v32 = vld [vmem:[%s7686_s2] ss:$0 sm:$0xff]  ;;  %s4944_s20 = sshll.u32 %s7815_s16, 2 }
 0x29d   : > { %v2346_v30 = vpop.permute.xlu1 %2345  ;;  %s5536_s16 = smov 56  }
 0x29e   : > { %2431 = vst.msk [vmem:[#allocation2 + $0x2c] sm:$0xf] %vm2419_vm12, %v2346_v30  ;;  %v2344_v40 = vpop.permute.xlu0 %2343  ;;  %v3242_v43 = vpop.permute.xlu2 %3241  ;;  %v3219_v30 = vrot.slane %v5232_v29, 5 }
 0x29f   : > { %2430 = vst.msk [vmem:[#allocation2 + $0x28] sm:$0xf] %vm2419_vm12, %v2344_v40  ;;  %v2681_v40 = vsel %vm5587_vm2, %v2676_v36, %v2680_v19  ;;  %vm4612_vm2 = vcmask 1042434  }
 0x2a3   : > { %2944 = vrot.lane.b32.xlu1 %v2873_v45, %s5532_s27 }
 0x2a4   : > { %2898 = vrot.lane.b32.xlu0 %v2595_v46, %s5532_s27  ;;  %2896 = vrot.lane.b32.xlu2 %v2585_v47, %s5532_s27  ;;  %v3162_v46 = vrot.slane %v3160_v41, 4  ;;  %v3163_v47 = vrot.slane %v5208_v42, 5 }
 0x2a5   : > { %v3274_v50 = vpop.permute.xlu1 %3273 }
 0x2a6   : > { %3344 = vst.msk [vmem:[#allocation2 + $0x68] sm:$0xf] %vm3317_vm15, %v3274_v50  ;;  %v3228_v53 = vpop.permute.xlu0 %3227  ;;  %v2366_v59 = vpop.permute.xlu2 %2365  ;;  %v3164_v51 = vsel %vm5762_vm6, %v3162_v46, %v3163_v47 }
 0x2a7   : > { %3321 = vst.msk [vmem:[#allocation2 + $0xc] sm:$0xf] %vm3317_vm15, %v3228_v53  ;;  %v3161_v53 = vsel %vm5762_vm6, %v5240_v49, %v3160_v41 }
 0x2a8   : > { %2441 = vst.msk [vmem:[#allocation2 + $0x54] sm:$0xf] %vm2419_vm12, %v2366_v59 }
 0x2ab   : > { %2353 = vrot.lane.b32.xlu1 %v5120_v58, %s5531_s26 }
 0x2ac   : > { %2351 = vrot.lane.b32.xlu0 %v5119_v61, %s5531_s26  ;;  %2946 = vrot.lane.b32.xlu2 %v2883_v4, %s5532_s27 }
 0x2ad   : > { %v2907_v11 = vpop.permute.xlu1 %2906  ;;  %v5480_v12 = vld [vmem:[#allocation2 + $0x68] sm:$0xff] }
 0x2ae   : > { %2992 = vst.msk [vmem:[#allocation2 + $0x2c] sm:$0xf] %vm2980_vm14, %v2907_v11  ;;  %v2905_v17 = vpop.permute.xlu0 %2904  ;;  %v5468_v18 = vld [vmem:[#allocation2 + $0x8] sm:$0xff]  ;;  %5334 = vmatmul.msk.bf16.gmra.mxu3 %vm3482_vm0, %v5480_v12  ;;  %v2332_v21 = vpop.permute.xlu2 %2331 }
 0x2af   : > { %2991 = vst.msk [vmem:[#allocation2 + $0x28] sm:$0xf] %vm2980_vm14, %v2905_v17  ;;  %5322 = vmatmul.msk.bf16.gmra.mxu0 %vm3482_vm0, %v5468_v18 }
 0x2b0   : > { %3328 = vst.msk [vmem:[#allocation2 + $0x28] sm:$0xf] %vm3317_vm15, %v3242_v43  ;;  %v3220_v43 = vsel %vm5762_vm6, %v3218_v35, %v3219_v30  ;;  %vm4624_vm6 = vcmask 1046534  }
 0x2b1   : > { %2424 = vst.msk [vmem:[#allocation2 + $0x10] sm:$0xf] %vm2419_vm12, %v2332_v21 }
 0x2b3   : > { %3281 = vrot.lane.b32.xlu1 %v3217_v22, %s5533_s28 }
 0x2b4   : > { %3235 = vrot.lane.b32.xlu0 %v3136_v26, %s5533_s28  ;;  %3233 = vrot.lane.b32.xlu2 %v3133_v28, %s5533_s28 }
 0x2b5   : > { %v2364_v34 = vpop.permute.xlu1 %2363 }
 0x2b6   : > { %2440 = vst.msk [vmem:[#allocation2 + $0x50] sm:$0xf] %vm2419_vm12, %v2364_v34  ;;  %v3244_v33 = vpop.permute.xlu0 %3243  ;;  %v2382_v38 = vpop.permute.xlu2 %2381 }
 0x2b7   : > { %3329 = vst.msk [vmem:[#allocation2 + $0x2c] sm:$0xf] %vm3317_vm15, %v3244_v33 }
 0x2b8   : > { %2449 = vst.msk [vmem:[#allocation2 + $0x74] sm:$0xf] %vm2419_vm12, %v2382_v38 }
 0x2bb   : > { %2914 = vrot.lane.b32.xlu1 %v2691_v39, %s5532_s27 }
 0x2bc   : > { %2912 = vrot.lane.b32.xlu0 %v2681_v40, %s5532_s27  ;;  %3283 = vrot.lane.b32.xlu2 %v3220_v43, %s5533_s28 }
 0x2bd   : > { %v2927_v45 = vpop.permute.xlu1 %2926 }
 0x2be   : > { %3002 = vst.msk [vmem:[#allocation2 + $0x54] sm:$0xf] %vm2980_vm14, %v2927_v45  ;;  %v2925_v48 = vpop.permute.xlu0 %2924  ;;  %v5472_v25 = vld [vmem:[#allocation2 + $0x28] sm:$0xff]  ;;  %v2893_v50 = vpop.permute.xlu2 %2892 }
 0x2bf   : > { %3001 = vst.msk [vmem:[#allocation2 + $0x50] sm:$0xf] %vm2980_vm14, %v2925_v48  ;;  %5326 = vmatmul.msk.bf16.gmra.mxu1 %vm3482_vm0, %v5472_v25 }
 0x2c0   : > { %2985 = vst.msk [vmem:[#allocation2 + $0x10] sm:$0xf] %vm2980_vm14, %v2893_v50 }
 0x2c4   : > { %3251 = vrot.lane.b32.xlu0 %v3164_v51, %s5533_s28  ;;  %3249 = vrot.lane.b32.xlu2 %v3161_v53, %s5533_s28 }
 0x2c5   : > { %v2380_v54 = vpop.permute.xlu1 %2379 }
 0x2c6   : > { %2448 = vst.msk [vmem:[#allocation2 + $0x70] sm:$0xf] %vm2419_vm12, %v2380_v54  ;;  %v2334_v56 = vpop.permute.xlu0 %2333  ;;  %v2943_v57 = vpop.permute.xlu2 %2942 }
 0x2c7   : > { %2425 = vst.msk [vmem:[#allocation2 + $0x14] sm:$0xf] %vm2419_vm12, %v2334_v56 }
 0x2c8   : > { %3010 = vst.msk [vmem:[#allocation2 + $0x74] sm:$0xf] %vm2980_vm14, %v2943_v57 }
 0x2cd   : > { %v3264_v58 = vpop.permute.xlu1 %3263 }
 0x2ce   : > { %3339 = vst.msk [vmem:[#allocation2 + $0x54] sm:$0xf] %vm3317_vm15, %v3264_v58  ;;  %v3262_v59 = vpop.permute.xlu0 %3261  ;;  %v3230_v1 = vpop.permute.xlu2 %3229 }
 0x2cf   : > { %3338 = vst.msk [vmem:[#allocation2 + $0x50] sm:$0xf] %vm3317_vm15, %v3262_v59 }
 0x2d0   : > { %3322 = vst.msk [vmem:[#allocation2 + $0x10] sm:$0xf] %vm3317_vm15, %v3230_v1 }
 0x2d5   : > { %v2941_v60 = vpop.permute.xlu1 %2940 }
 0x2d6   : > { %3009 = vst.msk [vmem:[#allocation2 + $0x70] sm:$0xf] %vm2980_vm14, %v2941_v60  ;;  %v2895_v61 = vpop.permute.xlu0 %2894  ;;  %v5477_v62 = vld [vmem:[#allocation2 + $0x50] sm:$0xff]  ;;  %v3280_v63 = vpop.permute.xlu2 %3279 }
 0x2d7   : > { %2986 = vst.msk [vmem:[#allocation2 + $0x14] sm:$0xf] %vm2980_vm14, %v2895_v61  ;;  %5331 = vmatmul.msk.bf16.gmra.mxu2 %vm3482_vm0, %v5477_v62 }
 0x2d8   : > { %3347 = vst.msk [vmem:[#allocation2 + $0x74] sm:$0xf] %vm3317_vm15, %v3280_v63 }
 0x2da   : > { %v3584_v31 = vpop.f32.mrf.mxu2 }
 0x2db   : > { %v3644_v33 = vmul.f32 %v6990_v32, %v3584_v31 }
 0x2dd   : > { %v2350_v52 = vpop.permute.xlu1 %2349  ;;  %v3680_v38 = vadd.f32 %v6998_v37, %v3644_v33 }
 0x2de   : > { %2433 = vst.msk [vmem:[#allocation2 + $0x34] sm:$0xf] %vm2419_vm12, %v2350_v52  ;;  %v2348_v55 = vpop.permute.xlu0 %2347  ;;  %v3246_v0 = vpop.permute.xlu2 %3245 }
 0x2df   : > { %2432 = vst.msk [vmem:[#allocation2 + $0x30] sm:$0xf] %vm2419_vm12, %v2348_v55  ;;  %v3712_v46 = vmax.f32 %v3680_v38, 0.0 }
 0x2e1   : > { %v3808_v50 = vrot.slane %v3712_v46, 2  ;;  %v3809_v53 = vrot.slane %v3712_v46, 4  ;;  %v3810_v58 = vrot.slane %v3712_v46, 6  ;;  %v5401_v1 = vrot.slane %v3712_v46, 9 }
 0x2e2   : > { %v3586_v30 = vpop.f32.mrf.mxu2 }
 0x2e3   : > { %v3645_v42 = vmul.f32 %v6990_v32, %v3586_v30  ;;  %v5402_v60 = vrot.slane %v3808_v50, 9  ;;  %v5403_v52 = vrot.slane %v3809_v53, 9 }
 0x2e5   : > { %v3278_v2 = vpop.permute.xlu1 %3277  ;;  %v3681_v48 = vadd.f32 %v6998_v37, %v3645_v42 }
 0x2e6   : > { %3346 = vst.msk [vmem:[#allocation2 + $0x70] sm:$0xf] %vm3317_vm15, %v3278_v2  ;;  %v3232_v3 = vpop.permute.xlu0 %3231  ;;  %v2370_v4 = vpop.permute.xlu2 %2369 }
 0x2e7   : > { %3323 = vst.msk [vmem:[#allocation2 + $0x14] sm:$0xf] %vm3317_vm15, %v3232_v3  ;;  %v3713_v54 = vmax.f32 %v3681_v48, 0.0 }
 0x2e8   : > { %2443 = vst.msk [vmem:[#allocation2 + $0x5c] sm:$0xf] %vm2419_vm12, %v2370_v4 }
 0x2e9   : > { %v3811_v55 = vrot.slane %v3713_v54, 2  ;;  %v3813_v3 = vrot.slane %v3713_v54, 6 }
 0x2ec   : > { %v3544_v35 = vpop.f32.mrf.mxu0 }
 0x2ed   : > { %v2911_v5 = vpop.permute.xlu1 %2910  ;;  %v5481_v6 = vld [vmem:[#allocation2 + $0x70] sm:$0xff]  ;;  %v3628_v47 = vmul.f32 %v6990_v32, %v3544_v35 }
 0x2ee   : > { %2994 = vst.msk [vmem:[#allocation2 + $0x34] sm:$0xf] %vm2980_vm14, %v2911_v5  ;;  %v2909_v7 = vpop.permute.xlu0 %2908  ;;  %v5469_v8 = vld [vmem:[#allocation2 + $0x10] sm:$0xff]  ;;  %5335 = vmatmul.msk.bf16.gmra.mxu3 %vm3482_vm0, %v5481_v6  ;;  %v2336_v9 = vpop.permute.xlu2 %2335  ;;  %v5404_v5 = vrot.slane %v3810_v58, 9  ;;  %v5405_v6 = vrot.slane %v3713_v54, 9 }
 0x2ef   : > { %2993 = vst.msk [vmem:[#allocation2 + $0x30] sm:$0xf] %vm2980_vm14, %v2909_v7  ;;  %5323 = vmatmul.msk.bf16.gmra.mxu0 %vm3482_vm0, %v5469_v8  ;;  %v3664_v51 = vadd.f32 %v6998_v37, %v3628_v47 }
 0x2f0   : > { %3330 = vst.msk [vmem:[#allocation2 + $0x30] sm:$0xf] %vm3317_vm15, %v3246_v0  ;;  %v3812_v0 = vrot.slane %v3713_v54, 4 }
 0x2f1   : > { %2426 = vst.msk [vmem:[#allocation2 + $0x18] sm:$0xf] %vm2419_vm12, %v2336_v9  ;;  %v3604_v45 = vpop.f32.mrf.mxu3  ;;  %v3696_v61 = vmax.f32 %v3664_v51, 0.0  ;;  %v7016_v9 = vmax.f32 %v3712_v46, %v5401_v1 }
 0x2f2   : > { %v3652_v25 = vmul.f32 %v6990_v32, %v3604_v45 }
 0x2f4   : > { %v3546_v49 = vpop.f32.mrf.mxu0  ;;  %v3688_v59 = vadd.f32 %v6998_v37, %v3652_v25 }
 0x2f5   : > { %v2368_v10 = vpop.permute.xlu1 %2367  ;;  %v3629_v57 = vmul.f32 %v6990_v32, %v3546_v49 }
 0x2f6   : > { %2442 = vst.msk [vmem:[#allocation2 + $0x58] sm:$0xf] %vm2419_vm12, %v2368_v10  ;;  %v3248_v11 = vpop.permute.xlu0 %3247  ;;  %v2386_v12 = vpop.permute.xlu2 %2385  ;;  %v3720_v7 = vmax.f32 %v3688_v59, 0.0  ;;  %v7018_v10 = vmax.f32 %v3808_v50, %v5402_v60 }
 0x2f7   : > { %3331 = vst.msk [vmem:[#allocation2 + $0x34] sm:$0xf] %vm3317_vm15, %v3248_v11  ;;  %v3665_v4 = vadd.f32 %v6998_v37, %v3629_v57  ;;  %v3760_v11 = vrot.slane %v3696_v61, 2 }
 0x2f8   : > { %2451 = vst.msk [vmem:[#allocation2 + $0x7c] sm:$0xf] %vm2419_vm12, %v2386_v12  ;;  %v5433_v42 = vrot.slane %v3720_v7, 9 }
 0x2f9   : > { %v3606_v62 = vpop.f32.mrf.mxu3 }
 0x2fa   : > { %v3653_v8 = vmul.f32 %v6990_v32, %v3606_v62  ;;  %v7056_v1 = vmax.f32 %v3720_v7, %v5433_v42 }
 0x2fc   : > { %v3564_v2 = vpop.f32.mrf.mxu1 }
 0x2fd   : > { %v2931_v13 = vpop.permute.xlu1 %2930  ;;  %v3636_v35 = vmul.f32 %v6990_v32, %v3564_v2 }
 0x2fe   : > { %3004 = vst.msk [vmem:[#allocation2 + $0x5c] sm:$0xf] %vm2980_vm14, %v2931_v13  ;;  %v2929_v14 = vpop.permute.xlu0 %2928  ;;  %v5473_v15 = vld [vmem:[#allocation2 + $0x30] sm:$0xff]  ;;  %v2897_v16 = vpop.permute.xlu2 %2896  ;;  %v7021_v13 = vmax.f32 %v3809_v53, %v5403_v52 }
 0x2ff   : > { %3003 = vst.msk [vmem:[#allocation2 + $0x58] sm:$0xf] %vm2980_vm14, %v2929_v14  ;;  %5327 = vmatmul.msk.bf16.gmra.mxu1 %vm3482_vm0, %v5473_v15  ;;  %v5406_v14 = vrot.slane %v3811_v55, 9  ;;  %v5407_v15 = vrot.slane %v3812_v0, 9  ;;  %v3672_v53 = vadd.f32 %v6998_v37, %v3636_v35 }
 0x300   : > { %2987 = vst.msk [vmem:[#allocation2 + $0x18] sm:$0xf] %vm2980_vm14, %v2897_v16  ;;  %v3761_v16 = vrot.slane %v3696_v61, 4 }
 0x302   : > { %v5339_v33 = vrot.slane %v3761_v16, 9 }
 0x304   : > { %v3566_v46 = vpop.f32.mrf.mxu1  ;;  %v7047_v50 = vmax.f32 %v3761_v16, %v5339_v33 }
 0x305   : > { %v2384_v17 = vpop.permute.xlu1 %2383  ;;  %v3637_v59 = vmul.f32 %v6990_v32, %v3566_v46 }
 0x306   : > { %2450 = vst.msk [vmem:[#allocation2 + $0x78] sm:$0xf] %vm2419_vm12, %v2384_v17  ;;  %v2338_v18 = vpop.permute.xlu0 %2337  ;;  %v2947_v19 = vpop.permute.xlu2 %2946 }
 0x307   : > { %2427 = vst.msk [vmem:[#allocation2 + $0x1c] sm:$0xf] %vm2419_vm12, %v2338_v18  ;;  %v5408_v18 = vrot.slane %v3813_v3, 9 }
 0x308   : > { %3012 = vst.msk [vmem:[#allocation2 + $0x7c] sm:$0xf] %vm2980_vm14, %v2947_v19  ;;  %v3762_v19 = vrot.slane %v3696_v61, 6 }
 0x309   : > { %v7037_v30 = vmax.f32 %v3813_v3, %v5408_v18 }
 0x30a   : > { %v5340_v38 = vrot.slane %v3762_v19, 9 }
 0x30d   : > { %v3268_v20 = vpop.permute.xlu1 %3267 }
 0x30e   : > { %3341 = vst.msk [vmem:[#allocation2 + $0x5c] sm:$0xf] %vm3317_vm15, %v3268_v20  ;;  %v3266_v21 = vpop.permute.xlu0 %3265  ;;  %v3234_v22 = vpop.permute.xlu2 %3233  ;;  %v5337_v20 = vrot.slane %v3696_v61, 9 }
 0x30f   : > { %3340 = vst.msk [vmem:[#allocation2 + $0x58] sm:$0xf] %vm3317_vm15, %v3266_v21  ;;  %v7023_v21 = vmax.f32 %v3665_v4, 0.0  ;;  %v3704_v4 = vmax.f32 %v3672_v53, 0.0 }
 0x310   : > { %3324 = vst.msk [vmem:[#allocation2 + $0x18] sm:$0xf] %vm3317_vm15, %v3234_v22  ;;  %v7025_v22 = vmax.f32 %v3810_v58, %v5404_v5 }
 0x311   : > { %v3765_v51 = vrot.slane %v7023_v21, 6  ;;  %v5341_v57 = vrot.slane %v7023_v21, 9 }
 0x313   : > { %v5344_v2 = vrot.slane %v3765_v51, 9 }
 0x315   : > { %v2945_v23 = vpop.permute.xlu1 %2944 }
 0x316   : > { %3011 = vst.msk [vmem:[#allocation2 + $0x78] sm:$0xf] %vm2980_vm14, %v2945_v23  ;;  %v2899_v24 = vpop.permute.xlu0 %2898  ;;  %v5478_v26 = vld [vmem:[#allocation2 + $0x58] sm:$0xff]  ;;  %v3284_v27 = vpop.permute.xlu2 %3283  ;;  %v7027_v23 = vmax.f32 %v3713_v54, %v5405_v6 }
 0x317   : > { %2988 = vst.msk [vmem:[#allocation2 + $0x1c] sm:$0xf] %vm2980_vm14, %v2899_v24  ;;  %5332 = vmatmul.msk.bf16.gmra.mxu2 %vm3482_vm0, %v5478_v26  ;;  %v3832_v24 = vrot.slane %v3720_v7, 2  ;;  %v3689_v26 = vadd.f32 %v6998_v37, %v3653_v8 }
 0x318   : > { %3349 = vst.msk [vmem:[#allocation2 + $0x7c] sm:$0xf] %vm3317_vm15, %v3284_v27  ;;  %v5338_v27 = vrot.slane %v3760_v11, 9 }
 0x319   : > { %v3721_v45 = vmax.f32 %v3689_v26, 0.0  ;;  %v3784_v26 = vrot.slane %v3704_v4, 2 }
 0x31a   : > { %v3589_v63 = vpop.f32.mrf.mxu2  ;;  %v7043_v47 = vmax.f32 %v3760_v11, %v5338_v27  ;;  %v3673_v11 = vadd.f32 %v6998_v37, %v3637_v59  ;;  %v3785_v27 = vrot.slane %v3704_v4, 4 }
 0x31b   : > { %v3646_v12 = vmul.f32 %v6990_v32, %v3589_v63  ;;  %v3835_v62 = vrot.slane %v3721_v45, 2  ;;  %v3837_v3 = vrot.slane %v3721_v45, 6  ;;  %v5370_v53 = vrot.slane %v3784_v26, 9 }
 0x31c   : > { %v7082_v33 = vmax.f32 %v3673_v11, 0.0 }
 0x31d   : > { %v2354_v28 = vpop.permute.xlu1 %2353  ;;  %v3682_v31 = vadd.f32 %v6998_v37, %v3646_v12  ;;  %v5438_v16 = vrot.slane %v3835_v62, 9  ;;  %v7104_v11 = vmax.f32 %v3784_v26, %v5370_v53 }
 0x31e   : > { %2435 = vst.msk [vmem:[#allocation2 + $0x3c] sm:$0xf] %vm2419_vm12, %v2354_v28  ;;  %v2352_v29 = vpop.permute.xlu0 %2351  ;;  %v3250_v41 = vpop.permute.xlu2 %3249  ;;  %v3833_v28 = vrot.slane %v3720_v7, 4 }
 0x31f   : > { %2434 = vst.msk [vmem:[#allocation2 + $0x38] sm:$0xf] %vm2419_vm12, %v2352_v29  ;;  %v3834_v29 = vrot.slane %v3720_v7, 6  ;;  %v7045_v49 = vmax.f32 %v3682_v31, 0.0  ;;  %v7067_v7 = vmax.f32 %v7023_v21, %v5341_v57  ;;  %v3786_v31 = vrot.slane %v3704_v4, 6 }
 0x320   : > { %v5435_v48 = vrot.slane %v3833_v28, 9  ;;  %vm4775_vm12 = vcmask 322816  }
 0x321   : > { %v5436_v25 = vrot.slane %v3834_v29, 9  ;;  %v3815_v12 = vrot.slane %v7045_v49, 4 }
 0x322   : > { %v7060_v63 = vmax.f32 %v3833_v28, %v5435_v48 }
 0x323   : > { %v7062_v52 = vmax.f32 %v3834_v29, %v5436_v25  ;;  %v7080_v29 = vmax.f32 %v3765_v51, %v5344_v2  ;;  %v5411_v35 = vrot.slane %v3815_v12, 9  ;;  %v3788_v2 = vrot.slane %v7082_v33, 4 }
 0x325   : > { %v3282_v34 = vpop.permute.xlu1 %3281  ;;  %v4410_v59 = vmax.f32 %v3815_v12, %v5411_v35  ;;  %v3789_v12 = vrot.slane %v7082_v33, 6 }
 0x326   : > { %3348 = vst.msk [vmem:[#allocation2 + $0x78] sm:$0xf] %vm3317_vm15, %v3282_v34  ;;  %v3236_v36 = vpop.permute.xlu0 %3235  ;;  %v7032_v34 = vmax.f32 %v3811_v55, %v5406_v14  ;;  %v3836_v55 = vrot.slane %v3721_v45, 4 }
 0x327   : > { %3325 = vst.msk [vmem:[#allocation2 + $0x1c] sm:$0xf] %vm3317_vm15, %v3236_v36  ;;  %v7034_v36 = vmax.f32 %v3812_v0, %v5407_v15  ;;  %v3816_v0 = vrot.slane %v7045_v49, 6  ;;  %v5437_v15 = vrot.slane %v3721_v45, 9 }
 0x328   : > { %v5439_v18 = vrot.slane %v3836_v55, 9 }
 0x32c   : > { %v3549_v6 = vpop.f32.mrf.mxu0 }
 0x32d   : > { %v5482_v39 = vld [vmem:[#allocation2 + $0x78] sm:$0xff]  ;;  %v2915_v40 = vpop.permute.xlu1 %2914 }
 0x32e   : > { %v2913_v43 = vpop.permute.xlu0 %2912  ;;  %v5470_v44 = vld [vmem:[#allocation2 + $0x18] sm:$0xff]  ;;  %2996 = vst.msk [vmem:[#allocation2 + $0x3c] sm:$0xf] %vm2980_vm14, %v2915_v40  ;;  %5336 = vmatmul.msk.bf16.gmra.mxu3 %vm3482_vm0, %v5482_v39  ;;  %v7039_v39 = vmax.f32 %v3696_v61, %v5337_v20  ;;  %v3763_v40 = vrot.slane %v7023_v21, 2  ;;  %v5412_v20 = vrot.slane %v3816_v0, 9 }
 0x32f   : > { %2995 = vst.msk [vmem:[#allocation2 + $0x38] sm:$0xf] %vm2980_vm14, %v2913_v43  ;;  %5324 = vmatmul.msk.bf16.gmra.mxu0 %vm3482_vm0, %v5470_v44  ;;  %v5434_v43 = vrot.slane %v3832_v24, 9  ;;  %v3764_v44 = vrot.slane %v7023_v21, 4  ;;  %v5440_v21 = vrot.slane %v3837_v3, 9  ;;  %vm4847_vm14 = vcmask 454016  }
 0x330   : > { %3332 = vst.msk [vmem:[#allocation2 + $0x38] sm:$0xf] %vm3317_vm15, %v3250_v41  ;;  %v3591_v41 = vpop.f32.mrf.mxu2  ;;  %v5342_v58 = vrot.slane %v3763_v40, 9  ;;  %v4411_v48 = vmax.f32 %v3816_v0, %v5412_v20 }
 0x331   : > { %v3647_v54 = vmul.f32 %v6990_v32, %v3591_v41  ;;  %v7058_v60 = vmax.f32 %v3832_v24, %v5434_v43  ;;  %v5343_v61 = vrot.slane %v3764_v44, 9  ;;  %v3630_v24 = vmul.f32 %v6990_v32, %v3549_v6  ;;  %v3609_v43 = vpop.f32.mrf.mxu3 }
 0x332   : > { %v7069_v8 = vmax.f32 %v3763_v40, %v5342_v58  ;;  %v7086_v40 = vmax.f32 %v3835_v62, %v5438_v16  ;;  %v5369_v41 = vrot.slane %v3704_v4, 9  ;;  %v7092_v51 = vmax.f32 %v3837_v3, %v5440_v21 }
 0x333   : > { %v3683_v5 = vadd.f32 %v6998_v37, %v3647_v54  ;;  %v7073_v14 = vmax.f32 %v3764_v44, %v5343_v61  ;;  %v7089_v44 = vmax.f32 %v3836_v55, %v5439_v18  ;;  %v3666_v25 = vadd.f32 %v6998_v37, %v3630_v24 }
 0x334   : > { %v5371_v54 = vrot.slane %v3785_v27, 9  ;;  %v3787_v58 = vrot.slane %v7082_v33, 2  ;;  %v3654_v61 = vmul.f32 %v6990_v32, %v3609_v43  ;;  %v5375_v21 = vrot.slane %v3788_v2, 9 }
 0x335   : > { %v7078_v28 = vmax.f32 %v3683_v5, 0.0  ;;  %v4499_v5 = vmax.f32 %v7025_v22, %v4411_v48  ;;  %v3698_v6 = vmax.f32 %v3666_v25, 0.0 }
 0x336   : > { %v3252_v56 = vpop.permute.xlu0 %3251  ;;  %v7108_v16 = vmax.f32 %v3785_v27, %v5371_v54  ;;  %v3690_v18 = vadd.f32 %v6998_v37, %v3654_v61 }
 0x337   : > { %3333 = vst.msk [vmem:[#allocation2 + $0x3c] sm:$0xf] %vm3317_vm15, %v3252_v56  ;;  %v7052_v56 = vmax.f32 %v3762_v19, %v5340_v38  ;;  %v3814_v19 = vrot.slane %v7045_v49, 2  ;;  %v7084_v38 = vmax.f32 %v3721_v45, %v5437_v15  ;;  %v3818_v57 = vrot.slane %v7078_v28, 4 }
 0x338   : > { %v5372_v45 = vrot.slane %v3786_v31, 9  ;;  %v3817_v55 = vrot.slane %v7078_v28, 2  ;;  %v5413_v0 = vrot.slane %v7078_v28, 9  ;;  %v5373_v15 = vrot.slane %v7082_v33, 9 }
 0x339   : > { %v5410_v46 = vrot.slane %v3814_v19, 9  ;;  %v3766_v35 = vrot.slane %v3698_v6, 2  ;;  %v7122_v48 = vmax.f32 %v3690_v18, 0.0  ;;  %vm4883_vm15 = vcmask 519616  }
 0x33a   : > { %v7112_v20 = vmax.f32 %v3786_v31, %v5372_v45  ;;  %v5414_v24 = vrot.slane %v3817_v55, 9  ;;  %v4412_v22 = vmax.f32 %v7078_v28, %v5413_v0  ;;  %v7117_v27 = vmax.f32 %v7082_v33, %v5373_v15 }
 0x33b   : > { %v4409_v3 = vmax.f32 %v3814_v19, %v5410_v46  ;;  %v3767_v46 = vrot.slane %v3698_v6, 4  ;;  %v3819_v31 = vrot.slane %v7078_v28, 6  ;;  %v3768_v45 = vrot.slane %v3698_v6, 6 }
 0x33c   : > { %v4413_v54 = vmax.f32 %v3817_v55, %v5414_v24  ;;  %v3569_v61 = vpop.f32.mrf.mxu1  ;;  %v5346_v33 = vrot.slane %v3766_v35, 9  ;;  %v3840_v55 = vrot.slane %v7122_v48, 6 }
 0x33d   : > { %v4497_v26 = vmax.f32 %v7018_v10, %v4409_v3  ;;  %v4500_v10 = vmax.f32 %v7027_v23, %v4412_v22  ;;  %v5416_v15 = vrot.slane %v3819_v31, 9 }
 0x33e   : > { %v5474_v17 = vld [vmem:[#allocation2 + $0x38] sm:$0xff]  ;;  %v4345_v24 = vmax.f32 %v3766_v35, %v5346_v33  ;;  %v3839_v35 = vrot.slane %v7122_v48, 4 }
 0x33f   : > { %5328 = vmatmul.msk.bf16.gmra.mxu1 %vm3482_vm0, %v5474_v17  ;;  %v5409_v17 = vrot.slane %v7045_v49, 9  ;;  %v4564_v18 = vpack.c.bf16 %v4500_v10, %v4500_v10  ;;  %v3611_v10 = vpop.f32.mrf.mxu3 }
 0x341   : > { %v4408_v42 = vmax.f32 %v7045_v49, %v5409_v17  ;;  %v7097_v49 = vmax.f32 %v3704_v4, %v5369_v41  ;;  %v5415_v4 = vrot.slane %v3818_v57, 9  ;;  %v4498_v17 = vmax.f32 %v7021_v13, %v4410_v59  ;;  %v3551_v59 = vpop.f32.mrf.mxu0 }
 0x342   : > { %v4563_v41 = vpack.c.bf16 %v4499_v5, %v4499_v5  ;;  %v5347_v5 = vrot.slane %v3767_v46, 9  ;;  %v3631_v23 = vmul.f32 %v6990_v32, %v3551_v59 }
 0x343   : > { %v4496_v62 = vmax.f32 %v7016_v9, %v4408_v42  ;;  %v5374_v9 = vrot.slane %v3787_v58, 9  ;;  %v5376_v42 = vrot.slane %v3789_v12, 9  ;;  %v4414_v43 = vmax.f32 %v3818_v57, %v5415_v4 }
 0x344   : > { %v4562_v25 = vpack.c.bf16 %v4498_v17, %v4498_v17  ;;  %v7127_v0 = vunpack.c.l.b16 %v4563_v41  ;;  %v4561_v57 = vpack.c.bf16 %v4497_v26, %v4497_v26  ;;  %v4501_v17 = vmax.f32 %v7032_v34, %v4413_v54 }
 0x345   : > { %v4560_v19 = vpack.c.bf16 %v4496_v62, %v4496_v62  ;;  %v7119_v13 = vmax.f32 %v3787_v58, %v5374_v9  ;;  %v5345_v62 = vrot.slane %v3698_v6, 9  ;;  %v7129_v58 = vmax.f32 %v3788_v2, %v5375_v21 }
 0x346   : > { %v7131_v3 = vmax.f32 %v3789_v12, %v5376_v42  ;;  %v4502_v28 = vmax.f32 %v7034_v36, %v4414_v43  ;;  %v7136_v4 = vunpack.c.l.b16 %v4562_v25  ;;  %v7141_v22 = vunpack.c.l.b16 %v4561_v57 }
 0x347   : > { %v7124_v53 = vunpack.c.l.b16 %v4560_v19  ;;  %v5348_v19 = vrot.slane %v3768_v45, 9  ;;  %v4344_v2 = vmax.f32 %v3698_v6, %v5345_v62  ;;  %v4346_v36 = vmax.f32 %v3767_v46, %v5347_v5  ;;  %v3571_v5 = vpop.f32.mrf.mxu1 }
 0x348   : > { %7718 = vst [vmem:[#allocation4_spill] sm:$0xff] %v7141_v22  ;;  %v5441_v21 = vrot.slane %v7122_v48, 9  ;;  %v3638_v26 = vmul.f32 %v6990_v32, %v3569_v61  ;;  %v4566_v41 = vpack.c.bf16 %v4502_v28, %v4502_v28  ;;  %v4415_v42 = vmax.f32 %v3819_v31, %v5416_v15 }
 0x349   : > { %7717 = vst [vmem:[#allocation3_spill] sm:$0xff] %v7124_v53  ;;  %v5444_v43 = vrot.slane %v3840_v55, 9  ;;  %v3667_v25 = vadd.f32 %v6998_v37, %v3631_v23  ;;  %v7147_v54 = vunpack.c.l.b16 %v4564_v18  ;;  %v4347_v6 = vmax.f32 %v3768_v45, %v5348_v19 }
 0x34a   : > { %v4565_v59 = vpack.c.bf16 %v4501_v17, %v4501_v17  ;;  %v4464_v46 = vmax.f32 %v7039_v39, %v4344_v2  ;;  %v4465_v62 = vmax.f32 %v7043_v47, %v4345_v24  ;;  %v3838_v61 = vrot.slane %v7122_v48, 2 }
 0x34b   : > { %7719 = vst [vmem:[#allocation5_spill] sm:$0xff] %v7147_v54  ;;  %v4466_v33 = vmax.f32 %v7047_v50, %v4346_v36  ;;  %v4440_v57 = vmax.f32 %v7122_v48, %v5441_v21  ;;  %v3674_v28 = vadd.f32 %v6998_v37, %v3638_v26  ;;  %v7157_v45 = vunpack.c.l.b16 %v4566_v41 }
 0x34c   : > { %v7160_v15 = vmax.f32 %v7037_v30, %v4415_v42  ;;  %v4443_v23 = vmax.f32 %v3840_v55, %v5444_v43  ;;  %v3699_v39 = vmax.f32 %v3667_v25, 0.0  ;;  %v3655_v47 = vmul.f32 %v6990_v32, %v3611_v10 }
 0x34d   : > { %7720 = vst [vmem:[#allocation6_spill] sm:$0xff] %v7157_v45  ;;  %v4467_v17 = vmax.f32 %v7052_v56, %v4347_v6  ;;  %v5443_v18 = vrot.slane %v3839_v35, 9  ;;  %v7165_v50 = vunpack.c.l.b16 %v4565_v59  ;;  %v4528_v48 = vpack.c.bf16 %v4464_v46, %v4464_v46 }
 0x34e   : > { %v4529_v2 = vpack.c.bf16 %v4465_v62, %v4465_v62  ;;  %v5442_v24 = vrot.slane %v3838_v61, 9  ;;  %v3639_v36 = vmul.f32 %v6990_v32, %v3571_v5  ;;  %v4530_v21 = vpack.c.bf16 %v4466_v33, %v4466_v33 }
 0x34f   : > { %7721 = vst [vmem:[#allocation7_spill] sm:$0xff] %v7165_v50  ;;  %v4512_v30 = vmax.f32 %v7056_v1, %v4440_v57  ;;  %v3706_v26 = vmax.f32 %v3674_v28, 0.0  ;;  %v3769_v41 = vrot.slane %v3699_v39, 2  ;;  %v3770_v42 = vrot.slane %v3699_v39, 4 }
 0x350   : > { %v3691_v56 = vadd.f32 %v6998_v37, %v3655_v47  ;;  %v4515_v43 = vmax.f32 %v7062_v52, %v4443_v23  ;;  %v4531_v25 = vpack.c.bf16 %v4467_v17, %v4467_v17  ;;  %v4442_v6 = vmax.f32 %v3839_v35, %v5443_v18 }
 0x351   : > { %v3771_v10 = vrot.slane %v3699_v39, 6  ;;  %v7173_v46 = vunpack.c.l.b16 %v4528_v48  ;;  %v7175_v62 = vunpack.c.l.b16 %v4529_v2  ;;  %v4441_v33 = vmax.f32 %v3838_v61, %v5442_v24 }
 0x352   : > { %v3675_v1 = vadd.f32 %v6998_v37, %v3639_v36  ;;  %v7178_v57 = vunpack.c.l.b16 %v4530_v21  ;;  %v4576_v28 = vpack.c.bf16 %v4512_v30, %v4512_v30  ;;  %v5349_v5 = vrot.slane %v3699_v39, 9 }
 0x353   : > { %v3790_v9 = vrot.slane %v3706_v26, 2  ;;  %v5350_v47 = vrot.slane %v3769_v41, 9  ;;  %v5351_v55 = vrot.slane %v3770_v42, 9  ;;  %v3723_v52 = vmax.f32 %v3691_v56, 0.0 }
 0x354   : > { %v4579_v23 = vpack.c.bf16 %v4515_v43, %v4515_v43  ;;  %v5352_v35 = vrot.slane %v3771_v10, 9  ;;  %v3791_v17 = vrot.slane %v3706_v26, 4  ;;  %v3792_v18 = vrot.slane %v3706_v26, 6 }
 0x355   : > { %v7181_v48 = vmax.f32 %v7060_v63, %v4442_v6  ;;  %v7183_v2 = vunpack.c.l.b16 %v4531_v25  ;;  %v5377_v61 = vrot.slane %v3706_v26, 9  ;;  %v3707_v24 = vmax.f32 %v3675_v1, 0.0 }
 0x356   : > { %v7186_v36 = vmax.f32 %v7058_v60, %v4441_v33  ;;  %v7188_v21 = vunpack.c.l.b16 %v4576_v28  ;;  %v4348_v30 = vmax.f32 %v3699_v39, %v5349_v5  ;;  %v5378_v59 = vrot.slane %v3790_v9, 9 }
 0x357   : > { %v4349_v43 = vmax.f32 %v3769_v41, %v5350_v47  ;;  %v4350_v19 = vmax.f32 %v3770_v42, %v5351_v55  ;;  %v3841_v31 = vrot.slane %v3723_v52, 2  ;;  %v7192_v34 = vunpack.c.l.b16 %v4579_v23 }
 0x358   : > { %7722 = vst [vmem:[#allocation8_spill] sm:$0xff] %v7188_v21  ;;  %v4351_v63 = vmax.f32 %v3771_v10, %v5352_v35  ;;  %v5379_v25 = vrot.slane %v3791_v17, 9  ;;  %v5380_v6 = vrot.slane %v3792_v18, 9  ;;  %v4578_v1 = vpack.c.bf16 %v7181_v48, %v7181_v48 }
 0x359   : > { %v3842_v60 = vrot.slane %v3723_v52, 4  ;;  %v3843_v33 = vrot.slane %v3723_v52, 6  ;;  %v4376_v28 = vmax.f32 %v3706_v26, %v5377_v61  ;;  %v3793_v12 = vrot.slane %v3707_v24, 2 }
 0x35a   : > { %v4468_v39 = vmax.f32 %v7067_v7, %v4348_v30  ;;  %v5445_v5 = vrot.slane %v3723_v52, 9  ;;  %v4377_v21 = vmax.f32 %v3790_v9, %v5378_v59  ;;  %v3794_v56 = vrot.slane %v3707_v24, 4  ;;  %v3594_v41 = vpop.f32.mrf.mxu2 }
 0x35b   : > { %v4469_v55 = vmax.f32 %v7069_v8, %v4349_v43  ;;  %v4470_v42 = vmax.f32 %v7073_v14, %v4350_v19  ;;  %v5446_v10 = vrot.slane %v3841_v31, 9  ;;  %v3795_v47 = vrot.slane %v3707_v24, 6 }
 0x35c   : > { %v4471_v23 = vmax.f32 %v7080_v29, %v4351_v63  ;;  %v4378_v35 = vmax.f32 %v3791_v17, %v5379_v25  ;;  %v4379_v48 = vmax.f32 %v3792_v18, %v5380_v6  ;;  %v5381_v53 = vrot.slane %v3707_v24, 9 }
 0x35d   : > { %v5447_v50 = vrot.slane %v3842_v60, 9  ;;  %v5448_v26 = vrot.slane %v3843_v33, 9  ;;  %v4480_v61 = vmax.f32 %v7097_v49, %v4376_v28  ;;  %v5382_v7 = vrot.slane %v3793_v12, 9 }
 0x35e   : > { %v4532_v30 = vpack.c.bf16 %v4468_v39, %v4468_v39  ;;  %v4444_v9 = vmax.f32 %v3723_v52, %v5445_v5  ;;  %v4481_v59 = vmax.f32 %v7104_v11, %v4377_v21  ;;  %v5383_v45 = vrot.slane %v3794_v56, 9 }
 0x35f   : > { %v4533_v8 = vpack.c.bf16 %v4469_v55, %v4469_v55  ;;  %v4534_v43 = vpack.c.bf16 %v4470_v42, %v4470_v42  ;;  %v4445_v14 = vmax.f32 %v3841_v31, %v5446_v10  ;;  %v5384_v19 = vrot.slane %v3795_v47, 9 }
 0x360   : > { %v4535_v54 = vpack.c.bf16 %v4471_v23, %v4471_v23  ;;  %v4482_v29 = vmax.f32 %v7108_v16, %v4378_v35  ;;  %v4483_v17 = vmax.f32 %v7112_v20, %v4379_v48  ;;  %v4380_v18 = vmax.f32 %v3707_v24, %v5381_v53 }
 0x361   : > { %v4446_v63 = vmax.f32 %v3842_v60, %v5447_v50  ;;  %v4447_v25 = vmax.f32 %v3843_v33, %v5448_v26  ;;  %v4544_v6 = vpack.c.bf16 %v4480_v61, %v4480_v61  ;;  %v4381_v49 = vmax.f32 %v3793_v12, %v5382_v7 }
 0x362   : > { %v7204_v28 = vunpack.c.l.b16 %v4532_v30  ;;  %v4545_v52 = vpack.c.bf16 %v4481_v59, %v4481_v59  ;;  %v4382_v39 = vmax.f32 %v3794_v56, %v5383_v45  ;;  %v4516_v11 = vmax.f32 %v7084_v38, %v4444_v9  ;;  %v3596_v24 = vpop.f32.mrf.mxu2 }
 0x363   : > { %v7207_v21 = vunpack.c.l.b16 %v4533_v8  ;;  %v7209_v31 = vunpack.c.l.b16 %v4534_v43  ;;  %v4383_v5 = vmax.f32 %v3795_v47, %v5384_v19  ;;  %v3648_v16 = vmul.f32 %v6990_v32, %v3594_v41 }
 0x364   : > { %7723 = vst [vmem:[#allocation9_spill] sm:$0xff] %v7204_v28  ;;  %v7212_v20 = vunpack.c.l.b16 %v4535_v54  ;;  %v4546_v53 = vpack.c.bf16 %v4482_v29, %v4482_v29  ;;  %v4547_v50 = vpack.c.bf16 %v4483_v17, %v4483_v17  ;;  %v4484_v12 = vmax.f32 %v7117_v27, %v4380_v18 }
 0x365   : > { %7724 = vst [vmem:[#allocation10_spill] sm:$0xff] %v7207_v21  ;;  %v7215_v60 = vunpack.c.l.b16 %v4544_v6  ;;  %v4485_v45 = vmax.f32 %v7119_v13, %v4381_v49  ;;  %v7218_v38 = vunpack.c.l.b16 %v4578_v1  ;;  %v4577_v56 = vpack.c.bf16 %v7186_v36, %v7186_v36 }
 0x366   : > { %7725 = vst [vmem:[#allocation11_spill] sm:$0xff] %v7209_v31  ;;  %v7222_v33 = vunpack.c.l.b16 %v4545_v52  ;;  %v4486_v41 = vmax.f32 %v7129_v58, %v4382_v39  ;;  %v4580_v42 = vpack.c.bf16 %v4516_v11, %v4516_v11  ;;  %v4487_v10 = vmax.f32 %v7131_v3, %v4383_v5 }
 0x367   : > { %7726 = vst [vmem:[#allocation12_spill] sm:$0xff] %v7212_v20  ;;  %v3684_v27 = vadd.f32 %v6998_v37, %v3648_v16  ;;  %v3649_v47 = vmul.f32 %v6990_v32, %v3596_v24  ;;  %v4518_v13 = vmax.f32 %v7089_v44, %v4446_v63  ;;  %v7230_v1 = vunpack.c.l.b16 %v4546_v53 }
 0x368   : > { %7727 = vst [vmem:[#allocation13_spill] sm:$0xff] %v7215_v60  ;;  %v7232_v23 = vunpack.c.l.b16 %v4547_v50  ;;  %v4548_v36 = vpack.c.bf16 %v4484_v12, %v4484_v12  ;;  %v4517_v48 = vmax.f32 %v7086_v40, %v4445_v14  ;;  %v4549_v26 = vpack.c.bf16 %v4485_v45, %v4485_v45 }
 0x369   : > { %7728 = vst [vmem:[#allocation14_spill] sm:$0xff] %v7222_v33  ;;  %v7237_v3 = vunpack.c.l.b16 %v4577_v56  ;;  %v4550_v30 = vpack.c.bf16 %v4486_v41, %v4486_v41  ;;  %v7241_v9 = vunpack.c.l.b16 %v4580_v42  ;;  %v4551_v59 = vpack.c.bf16 %v4487_v10, %v4487_v10 }
 0x36a   : > { %v3716_v8 = vmax.f32 %v3684_v27, 0.0  ;;  %v3685_v43 = vadd.f32 %v6998_v37, %v3649_v47  ;;  %v4582_v19 = vpack.c.bf16 %v4518_v13, %v4518_v13  ;;  %v7246_v29 = vunpack.c.l.b16 %v4548_v36 }
 0x36b   : > { %7729 = vst [vmem:[#allocation15_spill] sm:$0xff] %v7237_v3  ;;  %v4581_v17 = vpack.c.bf16 %v4517_v48, %v4517_v48  ;;  %v7248_v18 = vunpack.c.l.b16 %v4549_v26  ;;  %v4519_v49 = vmax.f32 %v7092_v51, %v4447_v25  ;;  %v7733_v52 = vpack.c.bf16 %v7160_v15, %v7160_v15 }
 0x36c   : > { %v3554_v55 = vpop.f32.mrf.mxu0  ;;  %7730 = vst [vmem:[#allocation16_spill] sm:$0xff] %v7241_v9  ;;  %v7257_v11 = vunpack.c.l.b16 %v4550_v30  ;;  %v7262_v53 = vunpack.c.l.b16 %v4551_v59  ;;  %v3820_v50 = vrot.slane %v3716_v8, 2  ;;  %v3717_v12 = vmax.f32 %v3685_v43, 0.0 }
 0x36d   : > { %v3632_v44 = vmul.f32 %v6990_v32, %v3554_v55  ;;  %7731 = vst [vmem:[#allocation17_spill] sm:$0xff] %v7246_v29  ;;  %v7255_v39 = vunpack.c.l.b16 %v7733_v52  ;;  %v7264_v24 = vunpack.c.l.b16 %v4582_v19  ;;  %v3821_v25 = vrot.slane %v3716_v8, 4 }
 0x36e   : > { %7732 = vst [vmem:[#allocation18_spill] sm:$0xff] %v7248_v18  ;;  %v7268_v45 = vunpack.c.l.b16 %v4581_v17  ;;  %v3822_v41 = vrot.slane %v3716_v8, 6  ;;  %v4583_v42 = vpack.c.bf16 %v4519_v49, %v4519_v49  ;;  %v5417_v47 = vrot.slane %v3716_v8, 9 }
 0x36f   : > { %7734 = vst [vmem:[#allocation19_spill] sm:$0xff] %v7255_v39  ;;  %v3668_v5 = vadd.f32 %v6998_v37, %v3632_v44  ;;  %v5418_v30 = vrot.slane %v3820_v50, 9  ;;  %v3823_v44 = vrot.slane %v3717_v12, 2  ;;  %v5419_v43 = vrot.slane %v3821_v25, 9 }
 0x370   : > { %7735 = vst [vmem:[#allocation20_spill] sm:$0xff] %v7257_v11  ;;  %v3824_v19 = vrot.slane %v3717_v12, 4  ;;  %v3825_v17 = vrot.slane %v3717_v12, 6  ;;  %v5420_v49 = vrot.slane %v3822_v41, 9  ;;  %v7279_v58 = vunpack.c.l.b16 %v4583_v42 }
 0x371   : > { %v3614_v35 = vpop.f32.mrf.mxu3  ;;  %7736 = vst [vmem:[#allocation21_spill] sm:$0xff] %v7262_v53  ;;  %v3700_v13 = vmax.f32 %v3668_v5, 0.0  ;;  %v5421_v10 = vrot.slane %v3717_v12, 9  ;;  %v7283_v55 = vmax.f32 %v3820_v50, %v5418_v30  ;;  %v5422_v59 = vrot.slane %v3823_v44, 9 }
 0x372   : > { %v3656_v16 = vmul.f32 %v6990_v32, %v3614_v35  ;;  %7737 = vst [vmem:[#allocation22_spill] sm:$0xff] %v7264_v24  ;;  %v7285_v51 = vmax.f32 %v3821_v25, %v5419_v43  ;;  %v5424_v7 = vrot.slane %v3825_v17, 9 }
 0x373   : > { %7738 = vst [vmem:[#allocation23_spill] sm:$0xff] %v7268_v45  ;;  %v3772_v26 = vrot.slane %v3700_v13, 2  ;;  %v3773_v6 = vrot.slane %v3700_v13, 4  ;;  %v3774_v27 = vrot.slane %v3700_v13, 6  ;;  %v5353_v5 = vrot.slane %v3700_v13, 9 }
 0x374   : > { %v3556_v63 = vpop.f32.mrf.mxu0  ;;  %v3692_v36 = vadd.f32 %v6998_v37, %v3656_v16  ;;  %7739 = vst [vmem:[#allocation24_spill] sm:$0xff] %v7279_v58  ;;  %v7281_v16 = vmax.f32 %v3716_v8, %v5417_v47  ;;  %v7291_v47 = vmax.f32 %v3717_v12, %v5421_v10  ;;  %v7293_v54 = vmax.f32 %v3823_v44, %v5422_v59 }
 0x375   : > { %v3633_v15 = vmul.f32 %v6990_v32, %v3556_v63  ;;  %v5355_v40 = vrot.slane %v3773_v6, 9  ;;  %v5356_v25 = vrot.slane %v3774_v27, 9  ;;  %v7300_v60 = vmax.f32 %v3700_v13, %v5353_v5 }
 0x376   : > { %v3724_v56 = vmax.f32 %v3692_v36, 0.0  ;;  %v5354_v36 = vrot.slane %v3772_v26, 9 }
 0x377   : > { %v3669_v63 = vadd.f32 %v6998_v37, %v3633_v15  ;;  %v5423_v15 = vrot.slane %v3824_v19, 9  ;;  %v7304_v45 = vmax.f32 %v3773_v6, %v5355_v40 }
 0x378   : > { %v3845_v50 = vrot.slane %v3724_v56, 4  ;;  %v3846_v30 = vrot.slane %v3724_v56, 6  ;;  %v7302_v58 = vmax.f32 %v3772_v26, %v5354_v36  ;;  %v5449_v44 = vrot.slane %v3724_v56, 9 }
 0x379   : > { %v3616_v35 = vpop.f32.mrf.mxu3  ;;  %v3701_v61 = vmax.f32 %v3669_v63, 0.0  ;;  %v7296_v14 = vmax.f32 %v3824_v19, %v5423_v15  ;;  %v3844_v63 = vrot.slane %v3724_v56, 2 }
 0x37a   : > { %v3657_v52 = vmul.f32 %v6990_v32, %v3616_v35  ;;  %v7287_v35 = vmax.f32 %v3822_v41, %v5420_v49  ;;  %v7298_v41 = vmax.f32 %v3825_v17, %v5424_v7  ;;  %v5451_v59 = vrot.slane %v3845_v50, 9 }
 0x37b   : > { %v3775_v49 = vrot.slane %v3701_v61, 2  ;;  %v3776_v12 = vrot.slane %v3701_v61, 4  ;;  %v3777_v10 = vrot.slane %v3701_v61, 6  ;;  %v5452_v39 = vrot.slane %v3846_v30, 9 }
 0x37c   : > { %v3574_v48 = vpop.f32.mrf.mxu1  ;;  %v3693_v42 = vadd.f32 %v6998_v37, %v3657_v52  ;;  %v5450_v15 = vrot.slane %v3844_v63, 9  ;;  %v5357_v13 = vrot.slane %v3701_v61, 9  ;;  %v7311_v24 = vmax.f32 %v3724_v56, %v5449_v44 }
 0x37d   : > { %v3640_v43 = vmul.f32 %v6990_v32, %v3574_v48  ;;  %v7306_v48 = vmax.f32 %v3774_v27, %v5356_v25  ;;  %v5358_v5 = vrot.slane %v3775_v49, 9  ;;  %v5360_v26 = vrot.slane %v3777_v10, 9 }
 0x37e   : > { %v3725_v8 = vmax.f32 %v3693_v42, 0.0  ;;  %v5359_v42 = vrot.slane %v3776_v12, 9  ;;  %v7314_v6 = vmax.f32 %v3846_v30, %v5452_v39  ;;  %v7316_v27 = vmax.f32 %v3845_v50, %v5451_v59 }
 0x37f   : > { %v3676_v7 = vadd.f32 %v6998_v37, %v3640_v43  ;;  %v7321_v21 = vmax.f32 %v3701_v61, %v5357_v13  ;;  %v7325_v3 = vmax.f32 %v3844_v63, %v5450_v15 }
 0x380   : > { %v3847_v36 = vrot.slane %v3725_v8, 2  ;;  %v3848_v20 = vrot.slane %v3725_v8, 4  ;;  %v3849_v25 = vrot.slane %v3725_v8, 6  ;;  %v5453_v43 = vrot.slane %v3725_v8, 9 }
 0x381   : > { %v7327_v56 = vmax.f32 %v3776_v12, %v5359_v42 }
 0x382   : > { %v5454_v39 = vrot.slane %v3847_v36, 9  ;;  %v5455_v50 = vrot.slane %v3848_v20, 9  ;;  %v5456_v11 = vrot.slane %v3849_v25, 9  ;;  %v7331_v31 = vmax.f32 %v3725_v8, %v5453_v43 }
 0x384   : > { %v3576_v52 = vpop.f32.mrf.mxu1  ;;  %7740 = vst [vmem:[#allocation25_spill] sm:$0xff] %v7331_v31  ;;  %v7342_v29 = vmax.f32 %v3848_v20, %v5455_v50  ;;  %v7344_v33 = vmax.f32 %v3847_v36, %v5454_v39 }
 0x385   : > { %v3641_v19 = vmul.f32 %v6990_v32, %v3576_v52  ;;  %v7318_v52 = vmax.f32 %v3676_v7, 0.0 }
 0x386   : > { %7741 = vst [vmem:[#allocation26_spill] sm:$0xff] %v7344_v33  ;;  %v7380_v33 = vld [vmem:[%s7687_s3] ss:$0 sm:$0xff] }
 0x387   : > { %v3677_v18 = vadd.f32 %v6998_v37, %v3641_v19  ;;  %v3796_v61 = vrot.slane %v7318_v52, 2  ;;  %v5385_v42 = vrot.slane %v7318_v52, 9 }
 0x39a   : > { %v3599_v17 = vpop.f32.mrf.mxu2 }
 0x39b   : > { %v3650_v53 = vmul.f32 %v6990_v32, %v3599_v17  ;;  %v7323_v17 = vmax.f32 %v3775_v49, %v5358_v5  ;;  %v7334_v49 = vmax.f32 %v3677_v18, 0.0  ;;  %v3798_v5 = vrot.slane %v7318_v52, 6 }
 0x39d   : > { %v3686_v40 = vadd.f32 %v6998_v37, %v3650_v53  ;;  %v7329_v53 = vmax.f32 %v3777_v10, %v5360_v26  ;;  %v3797_v10 = vrot.slane %v7318_v52, 4  ;;  %v3799_v28 = vrot.slane %v7334_v49, 2 }
 0x39e   : > { %v3800_v31 = vrot.slane %v7334_v49, 4 }
 0x39f   : > { %v3718_v9 = vmax.f32 %v3686_v40, 0.0 }
 0x3a1   : > { %v3826_v30 = vrot.slane %v3718_v9, 2  ;;  %v3827_v44 = vrot.slane %v3718_v9, 4  ;;  %v3828_v59 = vrot.slane %v3718_v9, 6  ;;  %v5425_v7 = vrot.slane %v3718_v9, 9 }
 0x3a2   : > { %v3601_v19 = vpop.f32.mrf.mxu2 }
 0x3a3   : > { %v5426_v63 = vrot.slane %v3826_v30, 9  ;;  %v5427_v15 = vrot.slane %v3827_v44, 9  ;;  %v5428_v12 = vrot.slane %v3828_v59, 9  ;;  %v4424_v13 = vmax.f32 %v3718_v9, %v5425_v7 }
 0x3a4   : > { %v3651_v26 = vmul.f32 %v6990_v32, %v3601_v19  ;;  %v7346_v9 = vmax.f32 %v3849_v25, %v5456_v11  ;;  %v5386_v7 = vrot.slane %v3796_v61, 9 }
 0x3a5   : > { %v4425_v40 = vmax.f32 %v3826_v30, %v5426_v63  ;;  %v4426_v8 = vmax.f32 %v3827_v44, %v5427_v15  ;;  %v4427_v43 = vmax.f32 %v3828_v59, %v5428_v12  ;;  %v4504_v22 = vmax.f32 %v7281_v16, %v4424_v13 }
 0x3a6   : > { %v3687_v18 = vadd.f32 %v6998_v37, %v3651_v26  ;;  %7742 = vst [vmem:[#allocation27_spill] sm:$0xff] %v7346_v9  ;;  %v5387_v30 = vrot.slane %v3797_v10, 9  ;;  %v5388_v44 = vrot.slane %v3798_v5, 9  ;;  %v3801_v59 = vrot.slane %v7334_v49, 6 }
 0x3a7   : > { %v4507_v32 = vmax.f32 %v7287_v35, %v4427_v43  ;;  %v7353_v37 = vmax.f32 %v7318_v52, %v5385_v42  ;;  %v4568_v20 = vpack.c.bf16 %v4504_v22, %v4504_v22  ;;  %v4506_v36 = vmax.f32 %v7285_v51, %v4426_v8 }
 0x3a8   : > { %v3719_v16 = vmax.f32 %v3687_v18, 0.0  ;;  %v4505_v11 = vmax.f32 %v7283_v55, %v4425_v40  ;;  %v7357_v63 = vmax.f32 %v3796_v61, %v5386_v7  ;;  %v5389_v35 = vrot.slane %v7334_v49, 9  ;;  %v7365_v55 = vld [vmem:[%s7686_s2] ss:$0 sm:$0xff] }
 0x3a9   : > { %v4571_v19 = vpack.c.bf16 %v4507_v32, %v4507_v32  ;;  %v5390_v15 = vrot.slane %v3799_v28, 9  ;;  %v5391_v12 = vrot.slane %v3800_v31, 9  ;;  %v5392_v13 = vrot.slane %v3801_v59, 9 }
 0x3aa   : > { %v3829_v25 = vrot.slane %v3719_v16, 2  ;;  %v3830_v39 = vrot.slane %v3719_v16, 4  ;;  %v5429_v50 = vrot.slane %v3719_v16, 9  ;;  %v7360_v22 = vunpack.c.l.b16 %v4568_v20 }
 0x3ab   : > { %v4570_v61 = vpack.c.bf16 %v4506_v36, %v4506_v36  ;;  %v4569_v40 = vpack.c.bf16 %v4505_v11, %v4505_v11  ;;  %v3831_v8 = vrot.slane %v3719_v16, 6  ;;  %v7368_v32 = vunpack.c.l.b16 %v4571_v19 }
 0x3ac   : > { %v5430_v26 = vrot.slane %v3829_v25, 9  ;;  %v5431_v43 = vrot.slane %v3830_v39, 9  ;;  %v4428_v52 = vmax.f32 %v3719_v16, %v5429_v50  ;;  %v3559_v42 = vpop.f32.mrf.mxu0  ;;  %7743 = vst [vmem:[#allocation28_spill] sm:$0xff] %v7360_v22  ;;  %v7370_v9 = vmax.f32 %v3797_v10, %v5387_v30 }
 0x3ad   : > { %v3634_v51 = vmul.f32 %v7365_v55, %v3559_v42  ;;  %v7372_v50 = vmax.f32 %v3798_v5, %v5388_v44  ;;  %v7375_v20 = vmax.f32 %v7334_v49, %v5389_v35  ;;  %v7383_v11 = vmax.f32 %v3799_v28, %v5390_v15 }
 0x3ae   : > { %v4429_v18 = vmax.f32 %v3829_v25, %v5430_v26  ;;  %v4430_v7 = vmax.f32 %v3830_v39, %v5431_v43  ;;  %v4508_v16 = vmax.f32 %v7291_v47, %v4428_v52  ;;  %v7388_v5 = vmax.f32 %v3800_v31, %v5391_v12 }
 0x3af   : > { %v3670_v36 = vadd.f32 %v7380_v33, %v3634_v51  ;;  %v7390_v30 = vmax.f32 %v3801_v59, %v5392_v13  ;;  %v5432_v39 = vrot.slane %v3831_v8, 9  ;;  %v7394_v26 = vunpack.c.l.b16 %v4570_v61 }
 0x3b0   : > { %v4510_v25 = vmax.f32 %v7296_v14, %v4430_v7  ;;  %v4509_v10 = vmax.f32 %v7293_v54, %v4429_v18  ;;  %v7396_v28 = vunpack.c.l.b16 %v4569_v40  ;;  %v4572_v59 = vpack.c.bf16 %v4508_v16, %v4508_v16 }
 0x3b1   : > { %v3702_v44 = vmax.f32 %v3670_v36, 0.0  ;;  %v3619_v19 = vpop.f32.mrf.mxu3  ;;  %v4431_v7 = vmax.f32 %v3831_v8, %v5432_v39 }
 0x3b2   : > { %v3658_v31 = vmul.f32 %v7365_v55, %v3619_v19  ;;  %v4574_v12 = vpack.c.bf16 %v4510_v25, %v4510_v25  ;;  %v4573_v13 = vpack.c.bf16 %v4509_v10, %v4509_v10  ;;  %v7405_v25 = vunpack.c.l.b16 %v4572_v59 }
 0x3b3   : > { %v3778_v47 = vrot.slane %v3702_v44, 2  ;;  %v3779_v15 = vrot.slane %v3702_v44, 4  ;;  %v3780_v14 = vrot.slane %v3702_v44, 6  ;;  %v5361_v43 = vrot.slane %v3702_v44, 9 }
 0x3b4   : > { %v3561_v54 = vpop.f32.mrf.mxu0  ;;  %v3694_v61 = vadd.f32 %v7380_v33, %v3658_v31  ;;  %v7407_v10 = vunpack.c.l.b16 %v4574_v12 }
 0x3b5   : > { %v5362_v52 = vrot.slane %v3778_v47, 9  ;;  %v5363_v42 = vrot.slane %v3779_v15, 9  ;;  %v5364_v51 = vrot.slane %v3780_v14, 9  ;;  %v4360_v18 = vmax.f32 %v3702_v44, %v5361_v43 }
 0x3b6   : > { %v3635_v40 = vmul.f32 %v7365_v55, %v3561_v54  ;;  %v7403_v16 = vmax.f32 %v3694_v61, 0.0  ;;  %v7409_v44 = vunpack.c.l.b16 %v4573_v13 }
 0x3b7   : > { %v4361_v49 = vmax.f32 %v3778_v47, %v5362_v52  ;;  %v4362_v35 = vmax.f32 %v3779_v15, %v5363_v42  ;;  %v4363_v22 = vmax.f32 %v3780_v14, %v5364_v51  ;;  %v4472_v19 = vmax.f32 %v7300_v60, %v4360_v18 }
 0x3b8   : > { %7744 = vst [vmem:[#allocation29_spill] sm:$0xff] %v7409_v44  ;;  %v7707_v15 = vrot.slane %v7403_v16, 2  ;;  %v7708_v60 = vrot.slane %v7403_v16, 4  ;;  %v5457_v14 = vrot.slane %v7403_v16, 9  ;;  %v3671_v31 = vadd.f32 %v7380_v33, %v3635_v40 }
 0x3b9   : > { %v4473_v8 = vmax.f32 %v7302_v58, %v4361_v49  ;;  %v4474_v39 = vmax.f32 %v7304_v45, %v4362_v35  ;;  %v4475_v43 = vmax.f32 %v7306_v48, %v4363_v22  ;;  %v4536_v47 = vpack.c.bf16 %v4472_v19, %v4472_v19  ;;  %v3621_v52 = vpop.f32.mrf.mxu3 }
 0x3ba   : > { %v3852_v13 = vrot.slane %v7403_v16, 6  ;;  %v7425_v42 = vrot.slane %v7707_v15, 9  ;;  %v4456_v51 = vmax.f32 %v7403_v16, %v5457_v14  ;;  %v7429_v18 = vmax.f32 %v7298_v41, %v4431_v7 }
 0x3bb   : > { %v4537_v54 = vpack.c.bf16 %v4473_v8, %v4473_v8  ;;  %v4538_v59 = vpack.c.bf16 %v4474_v39, %v4474_v39  ;;  %v4601_v12 = vunpack.c.l.b16 %v4536_v47  ;;  %v4539_v35 = vpack.c.bf16 %v4475_v43, %v4475_v43 }
 0x3bc   : > { %v3579_v58 = vpop.f32.mrf.mxu1  ;;  %v7433_v61 = vrot.slane %v7708_v60, 9  ;;  %v3703_v40 = vmax.f32 %v3671_v31, 0.0  ;;  %v3659_v19 = vmul.f32 %v7365_v55, %v3621_v52  ;;  %v5460_v49 = vrot.slane %v3852_v13, 9 }
 0x3bd   : > { %v3642_v8 = vmul.f32 %v7365_v55, %v3579_v58  ;;  %v4608_v39 = vrot.slane %v4601_v12, 7  ;;  %v7437_v43 = vunpack.c.l.b16 %v4537_v54  ;;  %v7439_v47 = vunpack.c.l.b16 %v4538_v59 }
 0x3be   : > { %v3781_v22 = vrot.slane %v3703_v40, 2  ;;  %v3782_v14 = vrot.slane %v3703_v40, 4  ;;  %v3783_v48 = vrot.slane %v3703_v40, 6  ;;  %v5365_v41 = vrot.slane %v3703_v40, 9 }
 0x3bf   : > { %v7441_v7 = vunpack.c.l.b16 %v4539_v35  ;;  %v7444_v45 = vmax.f32 %v7311_v24, %v4456_v51  ;;  %v3695_v31 = vadd.f32 %v7380_v33, %v3659_v19  ;;  %v3678_v52 = vadd.f32 %v7380_v33, %v3642_v8 }
 0x3c0   : > { %v5366_v58 = vrot.slane %v3781_v22, 9  ;;  %v5367_v12 = vrot.slane %v3782_v14, 9  ;;  %v5368_v54 = vrot.slane %v3783_v48, 9  ;;  %v4364_v36 = vmax.f32 %v3703_v40, %v5365_v41 }
 0x3c1   : > { %7745 = vst [vmem:[#allocation30_spill] sm:$0xff] %v7444_v45  ;;  %v7450_v59 = vsel %vm4609_vm1, %v4608_v39, %v7173_v46  ;;  %v7453_v60 = vmax.f32 %v3695_v31, 0.0  ;;  %v4459_v35 = vmax.f32 %v3852_v13, %v5460_v49  ;;  %v3710_v41 = vmax.f32 %v3678_v52, 0.0 }
 0x3c2   : > { %7746 = vst [vmem:[#allocation31_spill] sm:$0xff] %v7450_v59  ;;  %v4365_v44 = vmax.f32 %v3781_v22, %v5366_v58  ;;  %v4366_v24 = vmax.f32 %v3782_v14, %v5367_v12  ;;  %v4367_v51 = vmax.f32 %v3783_v48, %v5368_v54  ;;  %v4476_v19 = vmax.f32 %v7321_v21, %v4364_v36 }
 0x3c3   : > { %v7710_v8 = vrot.slane %v7453_v60, 2  ;;  %v7711_v45 = vrot.slane %v7453_v60, 4  ;;  %v7712_v40 = vrot.slane %v7453_v60, 6  ;;  %v4721_v48 = vrot.slane %v7441_v7, 7 }
 0x3c4   : > { %v4477_v46 = vmax.f32 %v7323_v17, %v4365_v44  ;;  %v4478_v39 = vmax.f32 %v7327_v56, %v4366_v24  ;;  %v4479_v31 = vmax.f32 %v7329_v53, %v4367_v51  ;;  %v4540_v15 = vpack.c.bf16 %v4476_v19, %v4476_v19  ;;  %v3581_v58 = vpop.f32.mrf.mxu1 }
 0x3c5   : > { %v5461_v21 = vrot.slane %v7453_v60, 9  ;;  %v4523_v36 = vmax.f32 %v7314_v6, %v4459_v35  ;;  %v7468_v52 = vrot.slane %v7710_v8, 9  ;;  %v3802_v17 = vrot.slane %v3710_v41, 2 }
 0x3c6   : > { %v4541_v22 = vpack.c.bf16 %v4477_v46, %v4477_v46  ;;  %v4542_v49 = vpack.c.bf16 %v4478_v39, %v4478_v39  ;;  %v4543_v14 = vpack.c.bf16 %v4479_v31, %v4479_v31  ;;  %v3803_v56 = vrot.slane %v3710_v41, 4 }
 0x3c7   : > { %v3804_v44 = vrot.slane %v3710_v41, 6  ;;  %v5393_v53 = vrot.slane %v3710_v41, 9  ;;  %v7470_v12 = vunpack.c.l.b16 %v4540_v15  ;;  %v7476_v7 = vrot.slane %v7711_v45, 9 }
 0x3c8   : > { %v7472_v54 = vunpack.c.l.b16 %v4541_v22  ;;  %v7480_v6 = vrot.slane %v7712_v40, 9  ;;  %v5394_v35 = vrot.slane %v3802_v17, 9  ;;  %v5395_v24 = vrot.slane %v3803_v56, 9 }
 0x3c9   : > { %v5396_v51 = vrot.slane %v3804_v44, 9  ;;  %v4392_v19 = vmax.f32 %v3710_v41, %v5393_v53  ;;  %v7482_v46 = vunpack.c.l.b16 %v4542_v49  ;;  %v7484_v39 = vunpack.c.l.b16 %v4543_v14 }
 0x3ca   : > { %v7487_v15 = vmax.f32 %v7453_v60, %v5461_v21  ;;  %v3643_v31 = vmul.f32 %v7365_v55, %v3581_v58  ;;  %v4393_v22 = vmax.f32 %v3802_v17, %v5394_v35  ;;  %v4394_v8 = vmax.f32 %v3803_v56, %v5395_v24 }
 0x3cb   : > { %v4395_v45 = vmax.f32 %v3804_v44, %v5396_v51  ;;  %v4488_v40 = vmax.f32 %v7353_v37, %v4392_v19  ;;  %v4757_v13 = vrot.slane %v7470_v12, 7  ;;  %v4793_v59 = vrot.slane %v7472_v54, 7 }
 0x3cc   : > { %v3679_v41 = vadd.f32 %v7380_v33, %v3643_v31  ;;  %v4587_v49 = vpack.c.bf16 %v4523_v36, %v4523_v36  ;;  %v4489_v14 = vmax.f32 %v7357_v63, %v4393_v22  ;;  %v4490_v21 = vmax.f32 %v7370_v9, %v4394_v8 }
 0x3cd   : > { %v4491_v55 = vmax.f32 %v7372_v50, %v4395_v45  ;;  %v4552_v53 = vpack.c.bf16 %v4488_v40, %v4488_v40  ;;  %v4829_v17 = vrot.slane %v7482_v46, 7  ;;  %v4722_v44 = vsel %vm4609_vm1, %v4721_v48, %v7183_v2 }
 0x3ce   : > { %v3711_v37 = vmax.f32 %v3679_v41, 0.0  ;;  %v4553_v58 = vpack.c.bf16 %v4489_v14, %v4489_v14  ;;  %v4554_v33 = vpack.c.bf16 %v4490_v21, %v4490_v21  ;;  %v4720_v51 = vunpack.c.l.b16 %v4587_v49 }
 0x3cf   : > { %v4555_v36 = vpack.c.bf16 %v4491_v55, %v4491_v55  ;;  %v7501_v35 = vunpack.c.l.b16 %v4552_v53  ;;  %v7747_v21 = vrot.slane %v7232_v23, 6 }
 0x3d0   : > { %v3805_v63 = vrot.slane %v3711_v37, 2  ;;  %v3806_v24 = vrot.slane %v3711_v37, 4  ;;  %v3807_v9 = vrot.slane %v3711_v37, 6  ;;  %v5397_v8 = vrot.slane %v3711_v37, 9 }
 0x3d1   : > { %v7503_v50 = vunpack.c.l.b16 %v4553_v58  ;;  %v4680_v45 = vunpack.c.l.b16 %v4554_v33  ;;  %v4716_v40 = vunpack.c.l.b16 %v4555_v36  ;;  %v4614_v2 = vrot.slane %v7501_v35, 5 }
 0x3d2   : > { %v5398_v19 = vrot.slane %v3805_v63, 9  ;;  %v5399_v31 = vrot.slane %v3806_v24, 9  ;;  %v5400_v22 = vrot.slane %v3807_v9, 9  ;;  %v4396_v41 = vmax.f32 %v3711_v37, %v5397_v8 }
 0x3d3   : > { %v4653_v48 = vrot.slane %v7503_v50, 5  ;;  %v4725_v14 = vrot.slane %v4716_v40, 5  ;;  %v4724_v55 = vsel %vm4612_vm2, %v7747_v21, %v4722_v44  ;;  %v4689_v36 = vrot.slane %v4680_v45, 5 }
 0x3d4   : > { %v4397_v53 = vmax.f32 %v3805_v63, %v5398_v19  ;;  %v4398_v58 = vmax.f32 %v3806_v24, %v5399_v31  ;;  %v4399_v33 = vmax.f32 %v3807_v9, %v5400_v22  ;;  %v4492_v49 = vmax.f32 %v7375_v20, %v4396_v41 }
 0x3d5   : > { %v4726_v56 = vsel %vm4615_vm3, %v4725_v14, %v4724_v55  ;;  %v7748_v37 = vrot.slane %v7403_v16, 4  ;;  %v7749_v50 = vrot.slane %v7439_v47, 7  ;;  %v7750_v20 = vrot.slane %v7127_v0, 4 }
 0x3d6   : > { %v4493_v23 = vmax.f32 %v7383_v11, %v4397_v53  ;;  %v4494_v44 = vmax.f32 %v7388_v5, %v4398_v58  ;;  %v4495_v63 = vmax.f32 %v7390_v30, %v4399_v33  ;;  %v4556_v24 = vpack.c.bf16 %v4492_v49, %v4492_v49 }
 0x3d7   : > { %v4458_v8 = vmax.f32 %v7748_v37, %v7433_v61  ;;  %v4686_v40 = vsel %vm4609_vm1, %v7749_v50, %v7178_v57  ;;  %v4728_v9 = vsel %vm4618_vm4, %v7750_v20, %v4726_v56  ;;  %v7751_v61 = vrot.slane %v7230_v1, 6 }
 0x3d8   : > { %v7752_v57 = vrot.slane %v7403_v16, 2  ;;  %v4557_v11 = vpack.c.bf16 %v4493_v23, %v4493_v23  ;;  %v4558_v31 = vpack.c.bf16 %v4494_v44, %v4494_v44  ;;  %v4559_v5 = vpack.c.bf16 %v4495_v63, %v4495_v63 }
 0x3d9   : > { %v4522_v45 = vmax.f32 %v7316_v27, %v4458_v8  ;;  %v4688_v19 = vsel %vm4612_vm2, %v7751_v61, %v4686_v40  ;;  %v4752_v22 = vunpack.c.l.b16 %v4556_v24  ;;  %v7753_v30 = vrot.slane %v7368_v32, 3  ;;  %v7759_v24 = vld [vmem:[#allocation25_spill] sm:$0xff] }
 0x3da   : > { %v4457_v47 = vmax.f32 %v7752_v57, %v7425_v42  ;;  %v4690_v56 = vsel %vm4615_vm3, %v4689_v36, %v4688_v19  ;;  %v4788_v14 = vunpack.c.l.b16 %v4557_v11  ;;  %v4824_v21 = vunpack.c.l.b16 %v4558_v31 }
 0x3db   : > { %v4730_v0 = vsel %vm4621_vm5, %v7753_v30, %v4728_v9  ;;  %v4586_v41 = vpack.c.bf16 %v4522_v45, %v4522_v45  ;;  %v4761_v1 = vrot.slane %v4752_v22, 5  ;;  %v4733_v55 = vrot.slane %v4720_v51, 1  ;;  %v7760_v9 = vld [vmem:[#allocation9_spill] sm:$0xff] }
 0x3dc   : > { %v4521_v27 = vmax.f32 %v7325_v3, %v4457_v47  ;;  %v7754_v16 = vrot.slane %v7192_v34, 2  ;;  %v7755_v58 = vrot.slane %v7136_v4, 4  ;;  %v4797_v49 = vrot.slane %v4788_v14, 5  ;;  %v7767_v30 = vld [vmem:[#allocation5_spill] sm:$0xff]  ;;  %v7770_v14 = vld [vmem:[#allocation11_spill] sm:$0xff] }
 0x3dd   : > { %v4684_v53 = vunpack.c.l.b16 %v4586_v41  ;;  %v4833_v37 = vrot.slane %v4824_v21, 5  ;;  %v4860_v8 = vunpack.c.l.b16 %v4559_v5  ;;  %v7756_v50 = vrot.slane %v7394_v26, 3 }
 0x3de   : > { %v4732_v42 = vsel %vm4624_vm6, %v7754_v16, %v4730_v0  ;;  %v4692_v32 = vsel %vm4618_vm4, %v7755_v58, %v4690_v56  ;;  %v4585_v33 = vpack.c.bf16 %v4521_v27, %v4521_v27  ;;  %v7757_v23 = vrot.slane %v7218_v38, 2  ;;  %v7761_v38 = vld [vmem:[#allocation14_spill] sm:$0xff] }
 0x3df   : > { %v4734_v36 = vsel %vm4627_vm7, %v4733_v55, %v4732_v42  ;;  %v4694_v51 = vsel %vm4621_vm5, %v7756_v50, %v4692_v32  ;;  %v4697_v40 = vrot.slane %v4684_v53, 1  ;;  %v7758_v4 = vrot.slane %v7437_v43, 7  ;;  %v7763_v43 = vld [vmem:[#allocation17_spill] sm:$0xff]  ;;  %v7773_v53 = vld [vmem:[#allocation20_spill] sm:$0xff]  ;;  %v7775_v32 = vld [vmem:[#allocation15_spill] sm:$0xff] }
 0x3e0   : > { %v4735_v3 = vpack.c.b16 %v4734_v36, %v4734_v36  ;;  %v4648_v34 = vunpack.c.l.b16 %v4585_v33  ;;  %v4696_v44 = vsel %vm4624_vm6, %v7757_v23, %v4694_v51  ;;  %v4524_v20 = vmax.f32 %v7759_v24, %v7487_v15 }
 0x3e1   : > { %v4650_v63 = vsel %vm4609_vm1, %v7758_v4, %v7175_v62  ;;  %v4758_v26 = vsel %vm4609_vm1, %v4757_v13, %v7760_v9  ;;  %v4698_v45 = vsel %vm4627_vm7, %v4697_v40, %v4696_v44  ;;  %v7762_v61 = vrot.slane %v7761_v38, 6  ;;  %v7765_v13 = vld [vmem:[#allocation4_spill] sm:$0xff]  ;;  %v7779_v40 = vld [vmem:[#allocation6_spill] sm:$0xff] }
 0x3e2   : > { %4736 = vrot.lane.b32.xlu0 %v4735_v3, %s5531_s26  ;;  %v4661_v57 = vrot.slane %v4648_v34, 1  ;;  %v7764_v47 = vrot.slane %v7763_v43, 6  ;;  %v4699_v11 = vpack.c.b16 %v4698_v45, %v4698_v45  ;;  %v4588_v31 = vpack.c.bf16 %v4524_v20, %v4524_v20  ;;  %v7784_v38 = vld [vmem:[#allocation26_spill] sm:$0xff] }
 0x3e3   : > { %v4652_v19 = vsel %vm4612_vm2, %v7762_v61, %v4650_v63  ;;  %v7766_v5 = vrot.slane %v7765_v13, 4  ;;  %v7768_v0 = vrot.slane %v7767_v30, 4  ;;  %v7769_v56 = vrot.slane %v7453_v60, 4 }
 0x3e4   : > { %v4760_v62 = vsel %vm4612_vm2, %v7764_v47, %v4758_v26  ;;  %v4654_v15 = vsel %vm4615_vm3, %v4653_v48, %v4652_v19  ;;  %v4830_v48 = vsel %vm4609_vm1, %v4829_v17, %v7770_v14  ;;  %4700 = vrot.lane.b32.xlu2 %v4699_v11, %s5529_s24  ;;  %v4756_v55 = vunpack.c.l.b16 %v4588_v31  ;;  %v7777_v17 = vld [vmem:[#allocation16_spill] sm:$0xff]  ;;  %v7785_v19 = vld [vmem:[#allocation18_spill] sm:$0xff]  ;;  %s195_s24 = scalar_lea.vmem %s7688_s4, %s4944_s20 }
 0x3e5   : > { %v4762_v12 = vsel %vm4615_vm3, %v4761_v1, %v4760_v62  ;;  %v4656_v22 = vsel %vm4618_vm4, %v7766_v5, %v4654_v15  ;;  %v4462_v27 = vmax.f32 %v7769_v56, %v7476_v7  ;;  %v7771_v1 = vrot.slane %v7396_v28, 3  ;;  %v7790_v15 = vld [vmem:[#allocation7_spill] sm:$0xff]  ;;  %v7792_v5 = vld [vmem:[#allocation12_spill] sm:$0xff] }
 0x3e6   : > { %v4764_v41 = vsel %vm4618_vm4, %v7768_v0, %v4762_v12  ;;  %v7772_v16 = vrot.slane %v7405_v25, 3  ;;  %v7774_v58 = vrot.slane %v7773_v53, 6  ;;  %v7776_v33 = vrot.slane %v7775_v32, 2 }
 0x3e7   : > { %v4658_v21 = vsel %vm4621_vm5, %v7771_v1, %v4656_v22  ;;  %v7778_v36 = vrot.slane %v7777_v17, 2  ;;  %v4526_v28 = vmax.f32 %v7342_v29, %v4462_v27  ;;  %v4769_v51 = vrot.slane %v4756_v55, 1  ;;  %v7783_v29 = vld [vmem:[#allocation10_spill] sm:$0xff]  ;;  %v7797_v27 = vld [vmem:[#allocation21_spill] sm:$0xff] }
 0x3e8   : > { %v4766_v42 = vsel %vm4621_vm5, %v7772_v16, %v4764_v41  ;;  %v4832_v7 = vsel %vm4612_vm2, %v7774_v58, %v4830_v48  ;;  %v4660_v46 = vsel %vm4624_vm6, %v7776_v33, %v4658_v21  ;;  %v7780_v34 = vrot.slane %v7779_v40, 4  ;;  %v7794_v41 = vld [vmem:[#allocation29_spill] sm:$0xff]  ;;  %v7799_v21 = vld [vmem:[#allocation23_spill] sm:$0xff]  ;;  %v7803_v33 = vld [vmem:[#allocation30_spill] sm:$0xff] }
 0x3e9   : > { %v4768_v3 = vsel %vm4624_vm6, %v7778_v36, %v4766_v42  ;;  %v4834_v50 = vsel %vm4615_vm3, %v4833_v37, %v4832_v7  ;;  %v4662_v25 = vsel %vm4627_vm7, %v4661_v57, %v4660_v46  ;;  %v7781_v44 = vrot.slane %v7453_v60, 2  ;;  %v7801_v58 = vld [vmem:[#allocation19_spill] sm:$0xff] }
 0x3ea   : > { %v4836_v23 = vsel %vm4618_vm4, %v7780_v34, %v4834_v50  ;;  %v4663_v63 = vpack.c.b16 %v4662_v25, %v4662_v25  ;;  %v4590_v24 = vpack.c.bf16 %v4526_v28, %v4526_v28  ;;  %v7782_v20 = vrot.slane %v7407_v10, 3  ;;  %v7787_v10 = vld [vmem:[#allocation22_spill] sm:$0xff]  ;;  %v7804_v28 = vld [vmem:[#allocation31_spill] sm:$0xff]  ;;  %v7805_v50 = vld [vmem:[#allocation13_spill] sm:$0xff] }
 0x3eb   : > { %v4461_v4 = vmax.f32 %v7781_v44, %v7468_v52  ;;  %v4794_v37 = vsel %vm4609_vm1, %v4793_v59, %v7783_v29  ;;  %v4869_v26 = vrot.slane %v4860_v8, 5  ;;  %v4770_v45 = vsel %vm4627_vm7, %v4769_v51, %v4768_v3  ;;  %v7809_v29 = vld [vmem:[#allocation8_spill] sm:$0xff] }
 0x3ec   : > { %v4838_v9 = vsel %vm4621_vm5, %v7782_v20, %v4836_v23  ;;  %v7786_v57 = vrot.slane %v7785_v19, 6  ;;  %4664 = vrot.lane.b32.xlu1 %v4663_v63, %s5527_s22  ;;  %v4828_v43 = vunpack.c.l.b16 %v4590_v24  ;;  %v7788_v47 = vrot.slane %v7787_v10, 2  ;;  %v7807_v24 = vld [vmem:[#allocation3_spill] sm:$0xff] }
 0x3ed   : > { %v4525_v61 = vmax.f32 %v7784_v38, %v4461_v4  ;;  %v7789_v59 = vrot.slane %v7453_v60, 6  ;;  %v7791_v31 = vrot.slane %v7790_v15, 4  ;;  %v4575_v13 = vpack.c.bf16 %v7429_v18, %v7429_v18  ;;  %v7796_v60 = vld [vmem:[#allocation27_spill] sm:$0xff] }
 0x3ee   : > { %v4796_v52 = vsel %vm4612_vm2, %v7786_v57, %v4794_v37  ;;  %v4840_v62 = vsel %vm4624_vm6, %v7788_v47, %v4838_v9  ;;  %v7793_v22 = vrot.slane %v7484_v39, 7  ;;  %v4841_v0 = vrot.slane %v4828_v43, 1 }
 0x3ef   : > { %v4798_v54 = vsel %vm4615_vm3, %v4797_v49, %v4796_v52  ;;  %v4463_v8 = vmax.f32 %v7789_v59, %v7480_v6  ;;  %v4589_v11 = vpack.c.bf16 %v4525_v61, %v4525_v61  ;;  %v7795_v49 = vrot.slane %v7794_v41, 3 }
 0x3f0   : > { %v4800_v12 = vsel %vm4618_vm4, %v7791_v31, %v4798_v54  ;;  %v4866_v30 = vsel %vm4609_vm1, %v7793_v22, %v7792_v5  ;;  %v7798_v14 = vrot.slane %v7797_v27, 6  ;;  %v7800_v55 = vrot.slane %v7799_v21, 2 }
 0x3f1   : > { %v4802_v56 = vsel %vm4621_vm5, %v7795_v49, %v4800_v12  ;;  %v4527_v6 = vmax.f32 %v7796_v60, %v4463_v8  ;;  %v4792_v1 = vunpack.c.l.b16 %v4589_v11  ;;  %v4862_v16 = vunpack.c.l.b16 %v4575_v13 }
 0x3f2   : > { %v4868_v48 = vsel %vm4612_vm2, %v7798_v14, %v4866_v30  ;;  %v4804_v18 = vsel %vm4624_vm6, %v7800_v55, %v4802_v56  ;;  %v4842_v42 = vsel %vm4627_vm7, %v4841_v0, %v4840_v62  ;;  %v7802_v7 = vrot.slane %v7801_v58, 4 }
 0x3f3   : > { %v4870_v39 = vsel %vm4615_vm3, %v4869_v26, %v4868_v48  ;;  %v4591_v53 = vpack.c.bf16 %v4527_v6, %v4527_v6  ;;  %v4584_v46 = vpack.c.bf16 %v7803_v33, %v7803_v33  ;;  %v4843_v17 = vpack.c.b16 %v4842_v42, %v4842_v42 }
 0x3f4   : > { %v4872_v32 = vsel %vm4618_vm4, %v7802_v7, %v4870_v39  ;;  %v4805_v36 = vrot.slane %v4792_v1, 1  ;;  %v4873_v3 = vrot.slane %v4862_v16, 3  ;;  %v7806_v25 = vrot.slane %v7805_v50, 6 }
 0x3f5   : > { %v4771_v40 = vpack.c.b16 %v4770_v45, %v4770_v45  ;;  %v4864_v34 = vunpack.c.l.b16 %v4591_v53  ;;  %v4607_v23 = vunpack.c.l.b16 %v4584_v46  ;;  %4844 = vrot.lane.b32.xlu0 %v4843_v17, %s5534_s19  ;;  %v7808_v20 = vrot.slane %v7807_v24, 4  ;;  %v7810_v45 = vld [vmem:[#allocation24_spill] sm:$0xff] }
 0x3f6   : > { %v4613_v51 = vsel %vm4612_vm2, %v7806_v25, %v7804_v28  ;;  %v4806_v4 = vsel %vm4627_vm7, %v4805_v36, %v4804_v18  ;;  %v4874_v63 = vsel %vm4621_vm5, %v4873_v3, %v4872_v32  ;;  %v4623_v37 = vrot.slane %v7809_v29, 2 }
 0x3f7   : > { %v4616_v44 = vsel %vm4615_vm3, %v4614_v2, %v4613_v51  ;;  %4772 = vrot.lane.b32.xlu1 %v4771_v40, %s5533_s28  ;;  %v4807_v26 = vpack.c.b16 %v4806_v4, %v4806_v4  ;;  %v7811_v38 = vrot.slane %v7810_v45, 2  ;;  %v7812_v2 = vld [vmem:[#allocation28_spill] sm:$0xff]  ;;  %v4877_v57 = vrot.slane %v4864_v34, 1 }
 0x3f8   : > { %v4619_v9 = vsel %vm4618_vm4, %v7808_v20, %v4616_v44  ;;  %v7813_v61 = vrot.slane %v7812_v2, 3  ;;  %v4626_v43 = vrot.slane %v4607_v23, 1 }
 0x3f9   : > { %v4876_v35 = vsel %vm4624_vm6, %v7811_v38, %v4874_v63  ;;  %4808 = vrot.lane.b32.xlu2 %v4807_v26, %s5535_s21 }
 0x3fa   : > { %v4622_v19 = vsel %vm4621_vm5, %v7813_v61, %v4619_v9  ;;  %v4878_v10 = vsel %vm4627_vm7, %v4877_v57, %v4876_v35 }
 0x3fb   : > { %v4625_v52 = vsel %vm4624_vm6, %v4623_v37, %v4622_v19  ;;  %v4879_v54 = vpack.c.b16 %v4878_v10, %v4878_v10 }
 0x3fc   : > { %v4628_v47 = vsel %vm4627_vm7, %v4626_v43, %v4625_v52 }
 0x3fd   : > { %v4629_v62 = vpack.c.b16 %v4628_v47, %v4628_v47 }
 0x3ff   : > { %4632 = vst.msk [vmem:[%s195_s24] sm:$0xf] %vm4631_vm8, %v4629_v62  ;;  %4880 = vrot.lane.b32.xlu1 %v4879_v54, %s5536_s16 }
 0x43e   : > { %v4701_v59 = vpop.permute.xlu2 %4700 }
 0x453   : > { %v4809_v31 = vpop.permute.xlu2 %4808 }
 0x454   : > { %v4737_v8 = vpop.permute.xlu0 %4736 }
 0x45e   : > { %v4665_v11 = vpop.permute.xlu1 %4664 }
 0x45f   : > { %4668 = vst.msk [vmem:[%s195_s24] sm:$0xf] %vm4667_vm9, %v4665_v11 }
 0x460   : > { %4704 = vst.msk [vmem:[%s195_s24] sm:$0xf] %vm4703_vm10, %v4701_v59 }
 0x461   : > { %4740 = vst.msk [vmem:[%s195_s24] sm:$0xf] %vm4739_vm11, %v4737_v8 }
 0x467   : > { %v4845_v12 = vpop.permute.xlu0 %4844 }
 0x469   : > { %v4773_v15 = vpop.permute.xlu1 %4772 }
 0x46a   : > { %4776 = vst.msk [vmem:[%s195_s24] sm:$0xf] %vm4775_vm12, %v4773_v15 }
 0x46b   : > { %4812 = vst.msk [vmem:[%s195_s24] sm:$0xf] %vm4811_vm13, %v4809_v31 }
 0x46c   : > { %4848 = vst.msk [vmem:[%s195_s24] sm:$0xf] %vm4847_vm14, %v4845_v12 }
 0x471   : > { %v4881_v13 = vpop.permute.xlu1 %4880 }
 0x472   : > { %4884 = vst.msk [vmem:[%s195_s24] sm:$0xf] %vm4883_vm15, %v4881_v13 }
 0x473 PF: > { %s14_s15 = sadd.s32 1, %s5524_s15  }
 0x474   : > { %p11_p4 = scmp.ge.s32.totalorder %s14_s15, 4  }
 0x476   :  { %13 = sbr.rel (!%p11_p4) target bundleno = 1 (0x1), region = 68 }

</bundles_post_ra>
